<compile_context>
chip_gen: v5e
topology: v5e:2x2
jax: 0.10.0
libtpu: 0.0.40
codegen_flags: <defaults>
</compile_context>

<pallas_src>
import jax
import jax.numpy as jnp
from jax import lax
from jax.experimental import pallas as pl
from jax.experimental.pallas import tpu as pltpu

NEG_SLOPE = 0.2


def _leaky(x):
    return jnp.where(x > 0, x, NEG_SLOPE * x)


def _pad_into(scratch_ref, interior, H, W, C):
    """Write `interior` (H, W, C) into scratch (H+2, W+2, C) with a zero ring.

    Only the 1-pixel ring is zeroed (cheap); the interior is fully overwritten
    every grid step, so no full-buffer memset is needed.
    """
    z_row = jnp.zeros((1, W + 2, C), jnp.float32)
    z_col = jnp.zeros((H + 2, 1, C), jnp.float32)
    scratch_ref[0:1, :, :] = z_row
    scratch_ref[H + 1:H + 2, :, :] = z_row
    scratch_ref[:, 0:1, :] = z_col
    scratch_ref[:, W + 1:W + 2, :] = z_col
    scratch_ref[1:H + 1, 1:W + 1, :] = interior
    return scratch_ref[...]


def _taps3x3(padded, H, W, C):
    """The 9 shifted 3x3-conv views of a zero-padded (H+2, W+2, C) array,
    each flattened to (H*W, C), in (dy, dx) row-major tap order."""
    return [padded[dy:dy + H, dx:dx + W, :].reshape(H * W, C)
            for dy in range(3) for dx in range(3)]


def residual_block_kernel(x_ref, w1_ref, b1_ref, w2_ref, b2_ref,
                          ws_ref, bs_ref, alpha_ref,
                          out_ref, xpad_ref, h1pad_ref):
    """One batch element per grid step (channels-last compute layout).

    x_ref    : (1, H, W, Cin)   unpadded input tile (VMEM)
    w1_ref   : (9, Cin, Cout)   conv1 weights, tap-major (dy*3+dx, ci, co)
    b1_ref   : (1, Cout)
    w2_ref   : (9, Cout, Cout)  conv2 weights, tap-major
    b2_ref   : (1, Cout)
    ws_ref   : (Cin, Cout)      1x1 skip-conv weights
    bs_ref   : (1, Cout)
    alpha_ref: (1, 1) in SMEM   rezero scalar
    out_ref  : (1, H*W, Cout)
    xpad_ref : VMEM scratch (H+2, W+2, Cin)
    h1pad_ref: VMEM scratch (H+2, W+2, Cout)
    """
    _, H, W, Cin = x_ref.shape
    Cout = out_ref.shape[-1]

    # ---- zero-pad x in VMEM (padding=1 for the 3x3 convs) ----
    xpad = _pad_into(xpad_ref, x_ref[0], H, W, Cin)

    # ---- conv1: all 9 taps in one batched matmul, then LeakyReLU(0.2) ----
    taps1 = _taps3x3(xpad, H, W, Cin)
    c1 = jnp.einsum("thc,tcd->thd", jnp.stack(taps1, axis=0), w1_ref[...],
                    preferred_element_type=jnp.float32)        # (9, H*W, Cout)
    h1 = _leaky(jnp.sum(c1, axis=0) + b1_ref[...])             # (H*W, Cout)

    # ---- skip path: 1x1 conv, reusing the already-built centre tap ----
    residual = jnp.dot(taps1[4], ws_ref[...],
                       preferred_element_type=jnp.float32) + bs_ref[...]

    # ---- conv2: same batched-tap matmul on zero-padded h1 (no activation) ----
    h1pad = _pad_into(h1pad_ref, h1.reshape(H, W, Cout), H, W, Cout)
    taps2 = _taps3x3(h1pad, H, W, Cout)
    c2 = jnp.einsum("thc,tcd->thd", jnp.stack(taps2, axis=0), w2_ref[...],
                    preferred_element_type=jnp.float32)        # (9, H*W, Cout)
    acc2 = jnp.sum(c2, axis=0) + b2_ref[...]

    # ---- rezero + final LeakyReLU(0.2) ----
    alpha = alpha_ref[0, 0]                                    # scalar from SMEM
    y = _leaky(alpha * acc2 + residual)
    out_ref[0] = y.astype(out_ref.dtype)


def residual_block_pallas(x_nchw, w1_oihw, b1, w2_oihw, b2, ws_oihw, bs, alpha):
    """Drop-in forward for the PyTorch module.

    x_nchw : (N, Cin, H, W);  conv weights in PyTorch OIHW layout.
    Returns (N, Cout, H, W).
    """
    N, Cin, H, W = x_nchw.shape
    Cout = w1_oihw.shape[0]

    # Wrapper-side layout glue (no padding of activations here).
    x = jnp.transpose(x_nchw, (0, 2, 3, 1))                          # NHWC
    w1t = jnp.transpose(w1_oihw, (2, 3, 1, 0)).reshape(9, Cin, Cout)  # tap-major
    w2t = jnp.transpose(w2_oihw, (2, 3, 1, 0)).reshape(9, Cout, Cout)
    wst = ws_oihw.reshape(Cout, Cin).T                                # (Cin, Cout)
    b1r = b1.reshape(1, Cout)
    b2r = b2.reshape(1, Cout)
    bsr = bs.reshape(1, Cout)
    alpha2 = jnp.asarray(alpha, jnp.float32).reshape(1, 1)

    out = pl.pallas_call(
        residual_block_kernel,
        out_shape=jax.ShapeDtypeStruct((N, H * W, Cout), x.dtype),
        grid_spec=pltpu.PrefetchScalarGridSpec(
            num_scalar_prefetch=0,
            grid=(N,),
            in_specs=[
                pl.BlockSpec((1, H, W, Cin), lambda n: (n, 0, 0, 0)),   # x
                pl.BlockSpec((9, Cin, Cout), lambda n: (0, 0, 0)),      # w1
                pl.BlockSpec((1, Cout), lambda n: (0, 0)),              # b1
                pl.BlockSpec((9, Cout, Cout), lambda n: (0, 0, 0)),     # w2
                pl.BlockSpec((1, Cout), lambda n: (0, 0)),              # b2
                pl.BlockSpec((Cin, Cout), lambda n: (0, 0)),            # ws
                pl.BlockSpec((1, Cout), lambda n: (0, 0)),              # bs
                pl.BlockSpec(memory_space=pltpu.MemorySpace.SMEM),      # alpha
            ],
            out_specs=pl.BlockSpec((1, H * W, Cout), lambda n: (n, 0, 0)),
            scratch_shapes=[
                pltpu.VMEM((H + 2, W + 2, Cin), jnp.float32),   # padded x
                pltpu.VMEM((H + 2, W + 2, Cout), jnp.float32),  # padded conv1 out
            ],
        ),
        compiler_params=pltpu.CompilerParams(
            dimension_semantics=("parallel",),
            vmem_limit_bytes=32 * 1024 * 1024,
        ),
    )(x, w1t, b1r, w2t, b2r, wst, bsr, alpha2)

    # (N, H*W, Cout) -> NCHW; pure layout glue, same HBM bytes.
    return jnp.transpose(out.reshape(N, H, W, Cout), (0, 3, 1, 2))


def residual_block_ref(x_nchw, w1, b1, w2, b2, ws, bs, alpha):
    """Pure-JAX NCHW reference matching the PyTorch forward."""
    dn = ("NCHW", "OIHW", "NCHW")
    h = lax.conv_general_dilated(x_nchw, w1, (1, 1), "SAME",
                                 dimension_numbers=dn) + b1.reshape(1, -1, 1, 1)
    h = _leaky(h)
    h = lax.conv_general_dilated(h, w2, (1, 1), "SAME",
                                 dimension_numbers=dn) + b2.reshape(1, -1, 1, 1)
    res = lax.conv_general_dilated(x_nchw, ws, (1, 1), "SAME",
                                   dimension_numbers=dn) + bs.reshape(1, -1, 1, 1)
    return _leaky(alpha.reshape(()) * h + res)


if __name__ == "__main__":
    key = jax.random.PRNGKey(0)
    N, Cin, H, W = 2, 4, 16, 16
    Cout = 8   # in_channels != out_channels -> 1x1 conv on the skip path

    ks = jax.random.split(key, 8)
    x = jax.random.normal(ks[0], (N, Cin, H, W), jnp.float32)

    # PyTorch-layout parameters (OIHW conv weights).
    w1 = jax.random.normal(ks[1], (Cout, Cin, 3, 3), jnp.float32) * 0.1
    b1 = jax.random.normal(ks[2], (Cout,), jnp.float32) * 0.1
    w2 = jax.random.normal(ks[3], (Cout, Cout, 3, 3), jnp.float32) * 0.1
    b2 = jax.random.normal(ks[4], (Cout,), jnp.float32) * 0.1
    ws = jax.random.normal(ks[5], (Cout, Cin, 1, 1), jnp.float32) * 0.1
    bs = jax.random.normal(ks[6], (Cout,), jnp.float32) * 0.1
    # rezero=True initializes alpha to 0 in the PyTorch module; use a nonzero
    # value so the conv path is exercised numerically.
    alpha = jnp.full((1,), 0.3, jnp.float32)

    out = residual_block_pallas(x, w1, b1, w2, b2, ws, bs, alpha)
    out = jax.block_until_ready(out)

    ref = residual_block_ref(x, w1, b1, w2, b2, ws, bs, alpha)
    assert out.shape == (N, Cout, H, W)
    err = float(jnp.max(jnp.abs(out - ref)))
    assert jnp.allclose(out, ref, atol=1e-4, rtol=1e-4), err

    print("KERNEL_OK")
</pallas_src>

<mosaic_0001>
module attributes {stable_mosaic.version = 11 : i64} {
  func.func @residual_block_kernel(%arg0: i32, %arg1: memref<1x16x16x4xf32, #tpu.memory_space<vmem>>, %arg2: memref<9x4x8xf32, #tpu.memory_space<vmem>>, %arg3: memref<1x8xf32, #tpu.memory_space<vmem>>, %arg4: memref<9x8x8xf32, #tpu.memory_space<vmem>>, %arg5: memref<1x8xf32, #tpu.memory_space<vmem>>, %arg6: memref<4x8xf32, #tpu.memory_space<vmem>>, %arg7: memref<1x8xf32, #tpu.memory_space<vmem>>, %arg8: memref<1x1xf32, #tpu.memory_space<smem>>, %arg9: memref<1x256x8xf32, #tpu.memory_space<vmem>>, %arg10: memref<18x18x4xf32, #tpu.memory_space<vmem>>, %arg11: memref<18x18x8xf32, #tpu.memory_space<vmem>>) attributes {dimension_semantics = [#tpu.dimension_semantics<parallel>], iteration_bounds = array<i64: 2>, scalar_prefetch = 0 : i64, scratch_operands = 2 : i64, tpu.core_type = #tpu.core_type<tc>, window_params = [{transform_indices = @transform_0, window_bounds = array<i64: 1, 16, 16, 4>}, {pipeline_mode = #tpu.pipeline_mode<synchronous>, transform_indices = @transform_1, window_bounds = array<i64: 9, 4, 8>}, {pipeline_mode = #tpu.pipeline_mode<synchronous>, transform_indices = @transform_2, window_bounds = array<i64: 1, 8>}, {pipeline_mode = #tpu.pipeline_mode<synchronous>, transform_indices = @transform_3, window_bounds = array<i64: 9, 8, 8>}, {pipeline_mode = #tpu.pipeline_mode<synchronous>, transform_indices = @transform_4, window_bounds = array<i64: 1, 8>}, {pipeline_mode = #tpu.pipeline_mode<synchronous>, transform_indices = @transform_5, window_bounds = array<i64: 4, 8>}, {pipeline_mode = #tpu.pipeline_mode<synchronous>, transform_indices = @transform_6, window_bounds = array<i64: 1, 8>}, {transform_indices = @transform_7, window_bounds = array<i64: 1, 1>}, {transform_indices = @transform_8, window_bounds = array<i64: 1, 256, 8>}]} {
    %c0 = arith.constant 0 : index
    %c0_0 = arith.constant 0 : index
    %c0_1 = arith.constant 0 : index
    %c0_2 = arith.constant 0 : index
    %0 = vector.load %arg1[%c0, %c0_0, %c0_1, %c0_2] : memref<1x16x16x4xf32, #tpu.memory_space<vmem>>, vector<1x16x16x4xf32>
    %1 = vector.shape_cast %0 : vector<1x16x16x4xf32> to vector<16x16x4xf32>
    %cst = arith.constant 0.000000e+00 : f32
    %2 = vector.broadcast %cst : f32 to vector<1x18x4xf32>
    %cst_3 = arith.constant 0.000000e+00 : f32
    %3 = vector.broadcast %cst_3 : f32 to vector<18x1x4xf32>
    %c0_4 = arith.constant 0 : index
    %c0_5 = arith.constant 0 : index
    %c0_6 = arith.constant 0 : index
    %4 = vector.load %arg10[%c0_4, %c0_5, %c0_6] : memref<18x18x4xf32, #tpu.memory_space<vmem>>, vector<1x18x4xf32>
    tpu.vector_store %arg10[%c0_4, %c0_5, %c0_6], %2 {strides = array<i32>} : memref<18x18x4xf32, #tpu.memory_space<vmem>>, vector<1x18x4xf32>,
    %c17 = arith.constant 17 : index
    %c0_7 = arith.constant 0 : index
    %c0_8 = arith.constant 0 : index
    %5 = vector.load %arg10[%c17, %c0_7, %c0_8] : memref<18x18x4xf32, #tpu.memory_space<vmem>>, vector<1x18x4xf32>
    tpu.vector_store %arg10[%c17, %c0_7, %c0_8], %2 {strides = array<i32>} : memref<18x18x4xf32, #tpu.memory_space<vmem>>, vector<1x18x4xf32>,
    %c0_9 = arith.constant 0 : index
    %c0_10 = arith.constant 0 : index
    %c0_11 = arith.constant 0 : index
    %6 = vector.load %arg10[%c0_9, %c0_10, %c0_11] : memref<18x18x4xf32, #tpu.memory_space<vmem>>, vector<18x1x4xf32>
    tpu.vector_store %arg10[%c0_9, %c0_10, %c0_11], %3 {strides = array<i32>} : memref<18x18x4xf32, #tpu.memory_space<vmem>>, vector<18x1x4xf32>,
    %c0_12 = arith.constant 0 : index
    %c17_13 = arith.constant 17 : index
    %c0_14 = arith.constant 0 : index
    %7 = vector.load %arg10[%c0_12, %c17_13, %c0_14] : memref<18x18x4xf32, #tpu.memory_space<vmem>>, vector<18x1x4xf32>
    tpu.vector_store %arg10[%c0_12, %c17_13, %c0_14], %3 {strides = array<i32>} : memref<18x18x4xf32, #tpu.memory_space<vmem>>, vector<18x1x4xf32>,
    %c1 = arith.constant 1 : index
    %c1_15 = arith.constant 1 : index
    %c0_16 = arith.constant 0 : index
    %8 = vector.load %arg10[%c1, %c1_15, %c0_16] : memref<18x18x4xf32, #tpu.memory_space<vmem>>, vector<16x16x4xf32>
    tpu.vector_store %arg10[%c1, %c1_15, %c0_16], %1 {strides = array<i32>} : memref<18x18x4xf32, #tpu.memory_space<vmem>>, vector<16x16x4xf32>,
    %c0_17 = arith.constant 0 : index
    %c0_18 = arith.constant 0 : index
    %c0_19 = arith.constant 0 : index
    %9 = vector.load %arg10[%c0_17, %c0_18, %c0_19] : memref<18x18x4xf32, #tpu.memory_space<vmem>>, vector<18x18x4xf32>
    %10 = vector.extract_strided_slice %9 {offsets = [0, 0, 0], sizes = [16, 16, 4], strides = [1, 1, 1]} : vector<18x18x4xf32> to vector<16x16x4xf32>
    %11 = vector.shape_cast %10 : vector<16x16x4xf32> to vector<256x4xf32>
    %12 = vector.extract_strided_slice %9 {offsets = [0, 1, 0], sizes = [16, 16, 4], strides = [1, 1, 1]} : vector<18x18x4xf32> to vector<16x16x4xf32>
    %13 = vector.shape_cast %12 : vector<16x16x4xf32> to vector<256x4xf32>
    %14 = vector.extract_strided_slice %9 {offsets = [0, 2, 0], sizes = [16, 16, 4], strides = [1, 1, 1]} : vector<18x18x4xf32> to vector<16x16x4xf32>
    %15 = vector.shape_cast %14 : vector<16x16x4xf32> to vector<256x4xf32>
    %16 = vector.extract_strided_slice %9 {offsets = [1, 0, 0], sizes = [16, 16, 4], strides = [1, 1, 1]} : vector<18x18x4xf32> to vector<16x16x4xf32>
    %17 = vector.shape_cast %16 : vector<16x16x4xf32> to vector<256x4xf32>
    %18 = vector.extract_strided_slice %9 {offsets = [1, 1, 0], sizes = [16, 16, 4], strides = [1, 1, 1]} : vector<18x18x4xf32> to vector<16x16x4xf32>
    %19 = vector.shape_cast %18 : vector<16x16x4xf32> to vector<256x4xf32>
    %20 = vector.extract_strided_slice %9 {offsets = [1, 2, 0], sizes = [16, 16, 4], strides = [1, 1, 1]} : vector<18x18x4xf32> to vector<16x16x4xf32>
    %21 = vector.shape_cast %20 : vector<16x16x4xf32> to vector<256x4xf32>
    %22 = vector.extract_strided_slice %9 {offsets = [2, 0, 0], sizes = [16, 16, 4], strides = [1, 1, 1]} : vector<18x18x4xf32> to vector<16x16x4xf32>
    %23 = vector.shape_cast %22 : vector<16x16x4xf32> to vector<256x4xf32>
    %24 = vector.extract_strided_slice %9 {offsets = [2, 1, 0], sizes = [16, 16, 4], strides = [1, 1, 1]} : vector<18x18x4xf32> to vector<16x16x4xf32>
    %25 = vector.shape_cast %24 : vector<16x16x4xf32> to vector<256x4xf32>
    %26 = vector.extract_strided_slice %9 {offsets = [2, 2, 0], sizes = [16, 16, 4], strides = [1, 1, 1]} : vector<18x18x4xf32> to vector<16x16x4xf32>
    %27 = vector.shape_cast %26 : vector<16x16x4xf32> to vector<256x4xf32>
    %28 = vector.shape_cast %11 : vector<256x4xf32> to vector<1x256x4xf32>
    %29 = vector.shape_cast %13 : vector<256x4xf32> to vector<1x256x4xf32>
    %30 = vector.shape_cast %15 : vector<256x4xf32> to vector<1x256x4xf32>
    %31 = vector.shape_cast %17 : vector<256x4xf32> to vector<1x256x4xf32>
    %32 = vector.shape_cast %19 : vector<256x4xf32> to vector<1x256x4xf32>
    %33 = vector.shape_cast %21 : vector<256x4xf32> to vector<1x256x4xf32>
    %34 = vector.shape_cast %23 : vector<256x4xf32> to vector<1x256x4xf32>
    %35 = vector.shape_cast %25 : vector<256x4xf32> to vector<1x256x4xf32>
    %36 = vector.shape_cast %27 : vector<256x4xf32> to vector<1x256x4xf32>
    %37 = tpu.concatenate %28, %29, %30, %31, %32, %33, %34, %35, %36 in 0 : vector<1x256x4xf32>, vector<1x256x4xf32>, vector<1x256x4xf32>, vector<1x256x4xf32>, vector<1x256x4xf32>, vector<1x256x4xf32>, vector<1x256x4xf32>, vector<1x256x4xf32>, vector<1x256x4xf32> -> vector<9x256x4xf32>
    %c0_20 = arith.constant 0 : index
    %c0_21 = arith.constant 0 : index
    %c0_22 = arith.constant 0 : index
    %38 = vector.load %arg2[%c0_20, %c0_21, %c0_22] : memref<9x4x8xf32, #tpu.memory_space<vmem>>, vector<9x4x8xf32>
    "tpu.trace_start"() <{level = 10 : i32, message = "thc,tcd->thd"}> : () -> ()
    %cst_23 = arith.constant dense<0.000000e+00> : vector<9x256x8xf32>
    %39 = tpu.matmul %37, %38, %cst_23 {dimension_numbers = #tpu.dot_dimension_numbers<[2], [1], [1], [2], [0, 0, 0, 1, 1, 2], [0], [0]>} : vector<9x256x4xf32>, vector<9x4x8xf32>, vector<9x256x8xf32> -> vector<9x256x8xf32>
    "tpu.trace_stop"() : () -> ()
    %cst_24 = arith.constant dense<0.000000e+00> : vector<256x8xf32>
    %40 = vector.multi_reduction <add>, %39, %cst_24 [0] : vector<9x256x8xf32> to vector<256x8xf32>
    %c0_25 = arith.constant 0 : index
    %c0_26 = arith.constant 0 : index
    %41 = vector.load %arg3[%c0_25, %c0_26] : memref<1x8xf32, #tpu.memory_space<vmem>>, vector<1x8xf32>
    %42 = vector.broadcast %41 : vector<1x8xf32> to vector<256x8xf32>
    %43 = arith.addf %40, %42 : vector<256x8xf32>
    %cst_27 = arith.constant 0.000000e+00 : f32
    %44 = vector.broadcast %cst_27 : f32 to vector<256x8xf32>
    %45 = arith.cmpf ogt, %43, %44 : vector<256x8xf32>
    %cst_28 = arith.constant 2.000000e-01 : f32
    %46 = vector.broadcast %cst_28 : f32 to vector<256x8xf32>
    %47 = arith.mulf %46, %43 : vector<256x8xf32>
    %48 = arith.select %45, %43, %47 : vector<256x8xi1>, vector<256x8xf32>
    %c0_29 = arith.constant 0 : index
    %c0_30 = arith.constant 0 : index
    %49 = vector.load %arg6[%c0_29, %c0_30] : memref<4x8xf32, #tpu.memory_space<vmem>>, vector<4x8xf32>
    %cst_31 = arith.constant dense<0.000000e+00> : vector<256x8xf32>
    %50 = tpu.matmul %19, %49, %cst_31 {dimension_numbers = #tpu.dot_dimension_numbers<[1], [0], [0], [1], [0, 0, 1, 1], [], []>} : vector<256x4xf32>, vector<4x8xf32>, vector<256x8xf32> -> vector<256x8xf32>
    %c0_32 = arith.constant 0 : index
    %c0_33 = arith.constant 0 : index
    %51 = vector.load %arg7[%c0_32, %c0_33] : memref<1x8xf32, #tpu.memory_space<vmem>>, vector<1x8xf32>
    %52 = vector.broadcast %51 : vector<1x8xf32> to vector<256x8xf32>
    %53 = arith.addf %50, %52 : vector<256x8xf32>
    %54 = vector.shape_cast %48 : vector<256x8xf32> to vector<16x16x8xf32>
    %cst_34 = arith.constant 0.000000e+00 : f32
    %55 = vector.broadcast %cst_34 : f32 to vector<1x18x8xf32>
    %cst_35 = arith.constant 0.000000e+00 : f32
    %56 = vector.broadcast %cst_35 : f32 to vector<18x1x8xf32>
    %c0_36 = arith.constant 0 : index
    %c0_37 = arith.constant 0 : index
    %c0_38 = arith.constant 0 : index
    %57 = vector.load %arg11[%c0_36, %c0_37, %c0_38] : memref<18x18x8xf32, #tpu.memory_space<vmem>>, vector<1x18x8xf32>
    tpu.vector_store %arg11[%c0_36, %c0_37, %c0_38], %55 {strides = array<i32>} : memref<18x18x8xf32, #tpu.memory_space<vmem>>, vector<1x18x8xf32>,
    %c17_39 = arith.constant 17 : index
    %c0_40 = arith.constant 0 : index
    %c0_41 = arith.constant 0 : index
    %58 = vector.load %arg11[%c17_39, %c0_40, %c0_41] : memref<18x18x8xf32, #tpu.memory_space<vmem>>, vector<1x18x8xf32>
    tpu.vector_store %arg11[%c17_39, %c0_40, %c0_41], %55 {strides = array<i32>} : memref<18x18x8xf32, #tpu.memory_space<vmem>>, vector<1x18x8xf32>,
    %c0_42 = arith.constant 0 : index
    %c0_43 = arith.constant 0 : index
    %c0_44 = arith.constant 0 : index
    %59 = vector.load %arg11[%c0_42, %c0_43, %c0_44] : memref<18x18x8xf32, #tpu.memory_space<vmem>>, vector<18x1x8xf32>
    tpu.vector_store %arg11[%c0_42, %c0_43, %c0_44], %56 {strides = array<i32>} : memref<18x18x8xf32, #tpu.memory_space<vmem>>, vector<18x1x8xf32>,
    %c0_45 = arith.constant 0 : index
    %c17_46 = arith.constant 17 : index
    %c0_47 = arith.constant 0 : index
    %60 = vector.load %arg11[%c0_45, %c17_46, %c0_47] : memref<18x18x8xf32, #tpu.memory_space<vmem>>, vector<18x1x8xf32>
    tpu.vector_store %arg11[%c0_45, %c17_46, %c0_47], %56 {strides = array<i32>} : memref<18x18x8xf32, #tpu.memory_space<vmem>>, vector<18x1x8xf32>,
    %c1_48 = arith.constant 1 : index
    %c1_49 = arith.constant 1 : index
    %c0_50 = arith.constant 0 : index
    %61 = vector.load %arg11[%c1_48, %c1_49, %c0_50] : memref<18x18x8xf32, #tpu.memory_space<vmem>>, vector<16x16x8xf32>
    tpu.vector_store %arg11[%c1_48, %c1_49, %c0_50], %54 {strides = array<i32>} : memref<18x18x8xf32, #tpu.memory_space<vmem>>, vector<16x16x8xf32>,
    %c0_51 = arith.constant 0 : index
    %c0_52 = arith.constant 0 : index
    %c0_53 = arith.constant 0 : index
    %62 = vector.load %arg11[%c0_51, %c0_52, %c0_53] : memref<18x18x8xf32, #tpu.memory_space<vmem>>, vector<18x18x8xf32>
    %63 = vector.extract_strided_slice %62 {offsets = [0, 0, 0], sizes = [16, 16, 8], strides = [1, 1, 1]} : vector<18x18x8xf32> to vector<16x16x8xf32>
    %64 = vector.shape_cast %63 : vector<16x16x8xf32> to vector<256x8xf32>
    %65 = vector.extract_strided_slice %62 {offsets = [0, 1, 0], sizes = [16, 16, 8], strides = [1, 1, 1]} : vector<18x18x8xf32> to vector<16x16x8xf32>
    %66 = vector.shape_cast %65 : vector<16x16x8xf32> to vector<256x8xf32>
    %67 = vector.extract_strided_slice %62 {offsets = [0, 2, 0], sizes = [16, 16, 8], strides = [1, 1, 1]} : vector<18x18x8xf32> to vector<16x16x8xf32>
    %68 = vector.shape_cast %67 : vector<16x16x8xf32> to vector<256x8xf32>
    %69 = vector.extract_strided_slice %62 {offsets = [1, 0, 0], sizes = [16, 16, 8], strides = [1, 1, 1]} : vector<18x18x8xf32> to vector<16x16x8xf32>
    %70 = vector.shape_cast %69 : vector<16x16x8xf32> to vector<256x8xf32>
    %71 = vector.extract_strided_slice %62 {offsets = [1, 1, 0], sizes = [16, 16, 8], strides = [1, 1, 1]} : vector<18x18x8xf32> to vector<16x16x8xf32>
    %72 = vector.shape_cast %71 : vector<16x16x8xf32> to vector<256x8xf32>
    %73 = vector.extract_strided_slice %62 {offsets = [1, 2, 0], sizes = [16, 16, 8], strides = [1, 1, 1]} : vector<18x18x8xf32> to vector<16x16x8xf32>
    %74 = vector.shape_cast %73 : vector<16x16x8xf32> to vector<256x8xf32>
    %75 = vector.extract_strided_slice %62 {offsets = [2, 0, 0], sizes = [16, 16, 8], strides = [1, 1, 1]} : vector<18x18x8xf32> to vector<16x16x8xf32>
    %76 = vector.shape_cast %75 : vector<16x16x8xf32> to vector<256x8xf32>
    %77 = vector.extract_strided_slice %62 {offsets = [2, 1, 0], sizes = [16, 16, 8], strides = [1, 1, 1]} : vector<18x18x8xf32> to vector<16x16x8xf32>
    %78 = vector.shape_cast %77 : vector<16x16x8xf32> to vector<256x8xf32>
    %79 = vector.extract_strided_slice %62 {offsets = [2, 2, 0], sizes = [16, 16, 8], strides = [1, 1, 1]} : vector<18x18x8xf32> to vector<16x16x8xf32>
    %80 = vector.shape_cast %79 : vector<16x16x8xf32> to vector<256x8xf32>
    %81 = vector.shape_cast %64 : vector<256x8xf32> to vector<1x256x8xf32>
    %82 = vector.shape_cast %66 : vector<256x8xf32> to vector<1x256x8xf32>
    %83 = vector.shape_cast %68 : vector<256x8xf32> to vector<1x256x8xf32>
    %84 = vector.shape_cast %70 : vector<256x8xf32> to vector<1x256x8xf32>
    %85 = vector.shape_cast %72 : vector<256x8xf32> to vector<1x256x8xf32>
    %86 = vector.shape_cast %74 : vector<256x8xf32> to vector<1x256x8xf32>
    %87 = vector.shape_cast %76 : vector<256x8xf32> to vector<1x256x8xf32>
    %88 = vector.shape_cast %78 : vector<256x8xf32> to vector<1x256x8xf32>
    %89 = vector.shape_cast %80 : vector<256x8xf32> to vector<1x256x8xf32>
    %90 = tpu.concatenate %81, %82, %83, %84, %85, %86, %87, %88, %89 in 0 : vector<1x256x8xf32>, vector<1x256x8xf32>, vector<1x256x8xf32>, vector<1x256x8xf32>, vector<1x256x8xf32>, vector<1x256x8xf32>, vector<1x256x8xf32>, vector<1x256x8xf32>, vector<1x256x8xf32> -> vector<9x256x8xf32>
    %c0_54 = arith.constant 0 : index
    %c0_55 = arith.constant 0 : index
    %c0_56 = arith.constant 0 : index
    %91 = vector.load %arg4[%c0_54, %c0_55, %c0_56] : memref<9x8x8xf32, #tpu.memory_space<vmem>>, vector<9x8x8xf32>
    "tpu.trace_start"() <{level = 10 : i32, message = "thc,tcd->thd"}> : () -> ()
    %cst_57 = arith.constant dense<0.000000e+00> : vector<9x256x8xf32>
    %92 = tpu.matmul %90, %91, %cst_57 {dimension_numbers = #tpu.dot_dimension_numbers<[2], [1], [1], [2], [0, 0, 0, 1, 1, 2], [0], [0]>} : vector<9x256x8xf32>, vector<9x8x8xf32>, vector<9x256x8xf32> -> vector<9x256x8xf32>
    "tpu.trace_stop"() : () -> ()
    %cst_58 = arith.constant dense<0.000000e+00> : vector<256x8xf32>
    %93 = vector.multi_reduction <add>, %92, %cst_58 [0] : vector<9x256x8xf32> to vector<256x8xf32>
    %c0_59 = arith.constant 0 : index
    %c0_60 = arith.constant 0 : index
    %94 = vector.load %arg5[%c0_59, %c0_60] : memref<1x8xf32, #tpu.memory_space<vmem>>, vector<1x8xf32>
    %95 = vector.broadcast %94 : vector<1x8xf32> to vector<256x8xf32>
    %96 = arith.addf %93, %95 : vector<256x8xf32>
    %c0_61 = arith.constant 0 : index
    %c0_62 = arith.constant 0 : index
    %97 = memref.load %arg8[%c0_61, %c0_62] : memref<1x1xf32, #tpu.memory_space<smem>>
    %98 = vector.broadcast %97 : f32 to vector<256x8xf32>
    %99 = arith.mulf %98, %96 : vector<256x8xf32>
    %100 = arith.addf %99, %53 : vector<256x8xf32>
    %cst_63 = arith.constant 0.000000e+00 : f32
    %101 = vector.broadcast %cst_63 : f32 to vector<256x8xf32>
    %102 = arith.cmpf ogt, %100, %101 : vector<256x8xf32>
    %cst_64 = arith.constant 2.000000e-01 : f32
    %103 = vector.broadcast %cst_64 : f32 to vector<256x8xf32>
    %104 = arith.mulf %103, %100 : vector<256x8xf32>
    %105 = arith.select %102, %100, %104 : vector<256x8xi1>, vector<256x8xf32>
    %c0_65 = arith.constant 0 : index
    %c0_66 = arith.constant 0 : index
    %c0_67 = arith.constant 0 : index
    %106 = vector.load %arg9[%c0_65, %c0_66, %c0_67] : memref<1x256x8xf32, #tpu.memory_space<vmem>>, vector<1x256x8xf32>
    %107 = vector.shape_cast %106 : vector<1x256x8xf32> to vector<256x8xf32>
    %108 = vector.shape_cast %105 : vector<256x8xf32> to vector<1x256x8xf32>
    tpu.vector_store %arg9[%c0_65, %c0_66, %c0_67], %108 {strides = array<i32>} : memref<1x256x8xf32, #tpu.memory_space<vmem>>, vector<1x256x8xf32>,
    return
  }
  func.func @transform_0(%arg0: i32) -> (i32, i32, i32, i32) {
    %c0_i32 = arith.constant 0 : i32
    %c0_i32_0 = arith.constant 0 : i32
    %c0_i32_1 = arith.constant 0 : i32
    %c0_i32_2 = arith.constant 0 : i32
    return %arg0, %c0_i32, %c0_i32_0, %c0_i32_1 : i32, i32, i32, i32
  }
  func.func @transform_1(%arg0: i32) -> (i32, i32, i32) {
    %c0_i32 = arith.constant 0 : i32
    %c0_i32_0 = arith.constant 0 : i32
    %c0_i32_1 = arith.constant 0 : i32
    %c0_i32_2 = arith.constant 0 : i32
    return %c0_i32, %c0_i32_0, %c0_i32_1 : i32, i32, i32
  }
  func.func @transform_2(%arg0: i32) -> (i32, i32) {
    %c0_i32 = arith.constant 0 : i32
    %c0_i32_0 = arith.constant 0 : i32
    %c0_i32_1 = arith.constant 0 : i32
    return %c0_i32, %c0_i32_0 : i32, i32
  }
  func.func @transform_3(%arg0: i32) -> (i32, i32, i32) {
    %c0_i32 = arith.constant 0 : i32
    %c0_i32_0 = arith.constant 0 : i32
    %c0_i32_1 = arith.constant 0 : i32
    %c0_i32_2 = arith.constant 0 : i32
    return %c0_i32, %c0_i32_0, %c0_i32_1 : i32, i32, i32
  }
  func.func @transform_4(%arg0: i32) -> (i32, i32) {
    %c0_i32 = arith.constant 0 : i32
    %c0_i32_0 = arith.constant 0 : i32
    %c0_i32_1 = arith.constant 0 : i32
    return %c0_i32, %c0_i32_0 : i32, i32
  }
  func.func @transform_5(%arg0: i32) -> (i32, i32) {
    %c0_i32 = arith.constant 0 : i32
    %c0_i32_0 = arith.constant 0 : i32
    %c0_i32_1 = arith.constant 0 : i32
    return %c0_i32, %c0_i32_0 : i32, i32
  }
  func.func @transform_6(%arg0: i32) -> (i32, i32) {
    %c0_i32 = arith.constant 0 : i32
    %c0_i32_0 = arith.constant 0 : i32
    %c0_i32_1 = arith.constant 0 : i32
    return %c0_i32, %c0_i32_0 : i32, i32
  }
  func.func @transform_7(%arg0: i32) -> (i32, i32) {
    %c0_i32 = arith.constant 0 : i32
    %c0_i32_0 = arith.constant 0 : i32
    %c0_i32_1 = arith.constant 0 : i32
    return %c0_i32, %c0_i32_0 : i32, i32
  }
  func.func @transform_8(%arg0: i32) -> (i32, i32, i32) {
    %c0_i32 = arith.constant 0 : i32
    %c0_i32_0 = arith.constant 0 : i32
    %c0_i32_1 = arith.constant 0 : i32
    return %arg0, %c0_i32, %c0_i32_0 : i32, i32, i32
  }
}

</mosaic_0001>

<bundles_post_ra>
// kernel: tpu_custom_call.1
= control target key start
LH: loop header
LB: loop body
LE: loop exit
PB: predicated region body
PF: predicated region fallthrough
CT: control target
= control target key end

     0   :  { %s5955_s29 = smov 0   ;;  %s10412_s0 = inlined_call_operand.vmem [shape: f32[2,16,16,4], index: 0, kind: input, shape index: {}]   ;;  %s10413_s1 = inlined_call_operand.vmem [shape: f32[9,4,8], index: 1, kind: input, shape index: {}]   ;;  %s10414_s2 = inlined_call_operand.vmem [shape: f32[1,8], index: 2, kind: input, shape index: {}]   ;;  %s10415_s3 = inlined_call_operand.vmem [shape: f32[9,8,8], index: 3, kind: input, shape index: {}]   ;;  %s10416_s4 = inlined_call_operand.vmem [shape: f32[1,8], index: 4, kind: input, shape index: {}]   ;;  %s10417_s5 = inlined_call_operand.vmem [shape: f32[4,8], index: 5, kind: input, shape index: {}]   ;;  %s10418_s6 = inlined_call_operand.vmem [shape: f32[1,8], index: 6, kind: input, shape index: {}]   ;;  %s10419_s7 = inlined_call_operand.<no memory space> [shape: f32[1,1], index: 7, kind: input, shape index: {}]   ;;  %s10420_s8 = inlined_call_operand.vmem [shape: f32[2,256,8], index: 8, kind: output, shape index: {}]  }
   0x1   :  { %13 = sst [smem:[#allocation4]] %s10419_s7 }
   0x2 LB: > { %s5213_s30 = sadd.s32 4294967295, %s5904_s29   ;;  %p5217_p0 = scmp.ge.s32.totalorder %s5904_s29, 1  ;;  %s5904_s29 = sphi %s5955_s29, %s19_s29  }
   0x3   : > { %p263_p1 = scmp.lt.s32.totalorder %s5904_s29, 3 }
   0x5   : > { %p264_p2 = pnand %p5217_p0, %p263_p1 }
   0x7   : > { %267 = sbr.rel (%p264_p2) target bundleno = 1549 (0x60d), region = 52 }
   0xc   : > { %v708_v0 = vld [vmem:[%s10413_s1] sm:$0xf]  ;;  %vm781_vm0 = vcmask 1043456   ;;  %vm339_vm1 = vcmask 31744   ;;  %vm348_vm2 = vcmask 24576   ;;  %v10421_v1 = vmov 0.0  }
   0xd   : > { %5222 = vmatpush.msk.msra.mxu0 %vm781_vm0, %v708_v0  ;;  %340 = vst.msk [vmem:[#allocation2] sm:$0xff] %vm339_vm1, %v10421_v1  ;;  %v709_v2 = vld [vmem:[%s10413_s1 + $0x4] sm:$0xf]  ;;  %5844 = vmatpush.msk.msra.mxu3 %vm781_vm0, %v708_v0  ;;  %vm520_vm3 = vcmask 1046528   ;;  %v710_v9 = vld [vmem:[%s10413_s1 + $0x8] sm:$0xf] }
   0xe   : > { %349 = vst.msk [vmem:[#allocation2] sm:$0x1] %vm348_vm2, %v10421_v1  ;;  %5255 = vmatpush.msk.msra.mxu1 %vm781_vm0, %v709_v2  ;;  %vm609_vm4 = vcmask 1045504   ;;  %5288 = vmatpush.msk.msra.mxu2 %vm781_vm0, %v710_v9  ;;  %p297_p3 = scmp.lt.s32.totalorder %s5213_s30, 1  ;;  %v712_v12 = vld [vmem:[%s10413_s1 + $0x10] sm:$0xf] }
   0xf   : > { %5845 = vmatpush.msk.msrb.mxu3 %vm781_vm0, %v709_v2  ;;  %341 = vst.msk [vmem:[#allocation2 + $0x8] sm:$0xff] %vm339_vm1, %v10421_v1  ;;  %5354 = vmatpush.msk.msrb.mxu0 %vm781_vm0, %v712_v12  ;;  %vm342_vm5 = vcmask 25600   ;;  %vm1978_vm6 = vcmask 64512   ;;  %vm2784_vm7 = vcmask 57344   ;;  %s4964_s13 = sld [smem:[#allocation4]] }
  0x10   : > { %345 = vst.msk [vmem:[#allocation2 + $0x198] sm:$0xff] %vm339_vm1, %v10421_v1  ;;  %s11263_s30 = smov (!%p297_p3, %s5213_s30), 1 }
  0x11   : > { %346 = vst.msk [vmem:[#allocation2 + $0x1a0] sm:$0xff] %vm339_vm1, %v10421_v1  ;;  %s5842_s16 = sshll.u32 %s11263_s30, 8 }
  0x12   : > { %350 = vst.msk [vmem:[#allocation2 + $0x18] sm:$0x1] %vm348_vm2, %v10421_v1  ;;  %s6074_s19 = scalar_lea.vmem %s10412_s0, %s5842_s16  ;;  %s9915_s21 = scalar_lea.vmem %s10420_s8, %s5842_s16 }
  0x13   : > { %351 = vst.msk [vmem:[#allocation2 + $0x30] sm:$0x1] %vm348_vm2, %v10421_v1  ;;  %v329_v13 = vld [vmem:[%s6074_s19 + $0xb0] sm:$0xff]  ;;  %v330_v14 = vld [vmem:[%s6074_s19 + $0xb8] sm:$0xff]  ;;  %v307_v15 = vld [vmem:[%s6074_s19] sm:$0xff] }
  0x14   : > { %352 = vst.msk [vmem:[#allocation2 + $0x48] sm:$0x1] %vm348_vm2, %v10421_v1  ;;  %v308_v16 = vld [vmem:[%s6074_s19 + $0x8] sm:$0xff]  ;;  %v331_v17 = vld [vmem:[%s6074_s19 + $0xc0] sm:$0xff]  ;;  %v309_v20 = vld [vmem:[%s6074_s19 + $0x10] sm:$0xff] }
  0x15   : > { %v418_v3 = vld [vmem:[#allocation2] sm:$0xff]  ;;  %353 = vst.msk [vmem:[#allocation2 + $0x60] sm:$0x1] %vm348_vm2, %v10421_v1  ;;  %v332_v18 = vld [vmem:[%s6074_s19 + $0xc8] sm:$0xff]  ;;  %v310_v21 = vld [vmem:[%s6074_s19 + $0x18] sm:$0xff] }
  0x16   : > { %v604_v4 = vrot.slane %v418_v3, 1  ;;  %5223 = vmatmul.msk.f32.vlgmr.msra.gmra.mxu0 %vm339_vm1, %v418_v3  ;;  %354 = vst.msk [vmem:[#allocation2 + $0x78] sm:$0x1] %vm348_vm2, %v10421_v1  ;;  %v5994_v5 = vld [vmem:[#allocation2 + $0x8] sm:$0xff]  ;;  %v610_v7 = vrot.slane %v418_v3, 2  ;;  %v333_v23 = vld [vmem:[%s6074_s19 + $0xd0] sm:$0xff] }
  0x17   : > { %355 = vst.msk [vmem:[#allocation2 + $0x90] sm:$0x1] %vm348_vm2, %v10421_v1  ;;  %v605_v6 = vrot.slane %v5994_v5, 1  ;;  %v611_v10 = vrot.slane %v5994_v5, 2  ;;  %v334_v26 = vld [vmem:[%s6074_s19 + $0xd8] sm:$0xff]  ;;  %v311_v27 = vld [vmem:[%s6074_s19 + $0x20] sm:$0xff] }
  0x18   : > { %356 = vst.msk [vmem:[#allocation2 + $0xa8] sm:$0x1] %vm348_vm2, %v10421_v1  ;;  %v312_v30 = vld [vmem:[%s6074_s19 + $0x28] sm:$0xff]  ;;  %v335_v38 = vld [vmem:[%s6074_s19 + $0xe0] sm:$0xff]  ;;  %v313_v48 = vld [vmem:[%s6074_s19 + $0x30] sm:$0xff] }
  0x19   : > { %357 = vst.msk [vmem:[#allocation2 + $0xc0] sm:$0x1] %vm348_vm2, %v10421_v1  ;;  %v606_v8 = vsel %vm520_vm3, %v604_v4, %v605_v6  ;;  %v612_v11 = vsel %vm609_vm4, %v610_v7, %v611_v10  ;;  %v336_v45 = vld [vmem:[%s6074_s19 + $0xe8] sm:$0xff]  ;;  %v314_v49 = vld [vmem:[%s6074_s19 + $0x38] sm:$0xff]  ;;  %v315_v2 = vld [vmem:[%s6074_s19 + $0x40] sm:$0xff] }
  0x1a   : > { %358 = vst.msk [vmem:[#allocation2 + $0xd8] sm:$0x1] %vm348_vm2, %v10421_v1  ;;  %5256 = vmatmul.msk.f32.vlgmr.msra.gmra.mxu1 %vm339_vm1, %v606_v8  ;;  %5289 = vmatmul.msk.f32.vlgmr.msra.gmra.mxu2 %vm339_vm1, %v612_v11  ;;  %v316_v3 = vld [vmem:[%s6074_s19 + $0x48] sm:$0xff] }
  0x1b   : > { %359 = vst.msk [vmem:[#allocation2 + $0xf0] sm:$0x1] %vm348_vm2, %v10421_v1 }
  0x1c   : > { %360 = vst.msk [vmem:[#allocation2 + $0x108] sm:$0x1] %vm348_vm2, %v10421_v1 }
  0x1d   : > { %361 = vst.msk [vmem:[#allocation2 + $0x120] sm:$0x1] %vm348_vm2, %v10421_v1 }
  0x1e   : > { %362 = vst.msk [vmem:[#allocation2 + $0x138] sm:$0x1] %vm348_vm2, %v10421_v1  ;;  %5224 = vmatmul.msk.f32.gmra.mxu0 %vm339_vm1, %v5994_v5 }
  0x1f   : > { %363 = vst.msk [vmem:[#allocation2 + $0x150] sm:$0x1] %vm348_vm2, %v10421_v1 }
  0x20   : > { %364 = vst.msk [vmem:[#allocation2 + $0x168] sm:$0x1] %vm348_vm2, %v10421_v1 }
  0x21   : > { %365 = vst.msk [vmem:[#allocation2 + $0x180] sm:$0x1] %vm348_vm2, %v10421_v1 }
  0x22   : > { %368 = vst.msk [vmem:[#allocation2 + $0x29] sm:$0x1] %vm348_vm2, %v10421_v1 }
  0x23   : > { %369 = vst.msk [vmem:[#allocation2 + $0x41] sm:$0x1] %vm348_vm2, %v10421_v1 }
  0x24   : > { %370 = vst.msk [vmem:[#allocation2 + $0x59] sm:$0x1] %vm348_vm2, %v10421_v1 }
  0x25   : > { %371 = vst.msk [vmem:[#allocation2 + $0x71] sm:$0x1] %vm348_vm2, %v10421_v1 }
  0x26   : > { %372 = vst.msk [vmem:[#allocation2 + $0x89] sm:$0x1] %vm348_vm2, %v10421_v1 }
  0x27   : > { %373 = vst.msk [vmem:[#allocation2 + $0xa1] sm:$0x1] %vm348_vm2, %v10421_v1 }
  0x28   : > { %374 = vst.msk [vmem:[#allocation2 + $0xb9] sm:$0x1] %vm348_vm2, %v10421_v1 }
  0x29   : > { %375 = vst.msk [vmem:[#allocation2 + $0xd1] sm:$0x1] %vm348_vm2, %v10421_v1 }
  0x2a   : > { %376 = vst.msk [vmem:[#allocation2 + $0xe9] sm:$0x1] %vm348_vm2, %v10421_v1 }
  0x2b   : > { %377 = vst.msk [vmem:[#allocation2 + $0x101] sm:$0x1] %vm348_vm2, %v10421_v1 }
  0x2c   : > { %378 = vst.msk [vmem:[#allocation2 + $0x119] sm:$0x1] %vm348_vm2, %v10421_v1 }
  0x2d   : > { %379 = vst.msk [vmem:[#allocation2 + $0x131] sm:$0x1] %vm348_vm2, %v10421_v1 }
  0x2e   : > { %380 = vst.msk [vmem:[#allocation2 + $0x149] sm:$0x1] %vm348_vm2, %v10421_v1 }
  0x2f   : > { %381 = vst.msk [vmem:[#allocation2 + $0x161] sm:$0x1] %vm348_vm2, %v10421_v1 }
  0x30   : > { %382 = vst.msk [vmem:[#allocation2 + $0x179] sm:$0x1] %vm348_vm2, %v10421_v1 }
  0x31   : > { %383 = vst.msk [vmem:[#allocation2 + $0x191] sm:$0x1] %vm348_vm2, %v10421_v1 }
  0x32   : > { %366 = vst.msk [vmem:[#allocation2 + $0x198] sm:$0x1] %vm348_vm2, %v10421_v1 }
  0x33   : > { %408 = vst.msk [vmem:[#allocation2 + $0x121] sm:$0xff] %vm339_vm1, %v329_v13 }
  0x34   : > { %343 = vst.msk [vmem:[#allocation2 + $0x10] sm:$0x3] %vm342_vm5, %v10421_v1 }
  0x35   : > { %367 = vst.msk [vmem:[#allocation2 + $0x11] sm:$0x1] %vm348_vm2, %v10421_v1 }
  0x36   : > { %347 = vst.msk [vmem:[#allocation2 + $0x1a8] sm:$0x3] %vm342_vm5, %v10421_v1  ;;  %vm2778_vm5 = vcmask 58368  }
  0x37   : > { %409 = vst.msk [vmem:[#allocation2 + $0x129] sm:$0xff] %vm339_vm1, %v330_v14 }
  0x38   : > { %384 = vst.msk [vmem:[#allocation2 + $0x1a9] sm:$0x1] %vm348_vm2, %v10421_v1 }
  0x39   : > { %386 = vst.msk [vmem:[#allocation2 + $0x19] sm:$0xff] %vm339_vm1, %v307_v15 }
  0x3a   : > { %v6101_v19 = vld [vmem:[#allocation2 + $0x120] sm:$0xff]  ;;  %387 = vst.msk [vmem:[#allocation2 + $0x21] sm:$0xff] %vm339_vm1, %v308_v16 }
  0x3b   : > { %5247 = vmatmul.msk.f32.vlgmr.msra.gmra.mxu3 %vm339_vm1, %v6101_v19  ;;  %410 = vst.msk [vmem:[#allocation2 + $0x139] sm:$0xff] %vm339_vm1, %v331_v17 }
  0x3c   : > { %v420_v22 = vld [vmem:[#allocation2 + $0x10] sm:$0x3]  ;;  %411 = vst.msk [vmem:[#allocation2 + $0x141] sm:$0xff] %vm339_vm1, %v332_v18  ;;  %5846 = vmatpush.msk.msra.mxu3 %vm781_vm0, %v710_v9 }
  0x3d   : > { %v607_v24 = vrot.slane %v420_v22, 1  ;;  %v613_v25 = vrot.slane %v420_v22, 2  ;;  %388 = vst.msk [vmem:[#allocation2 + $0x31] sm:$0xff] %vm339_vm1, %v309_v20  ;;  %v317_v20 = vld [vmem:[%s6074_s19 + $0x50] sm:$0xff] }
  0x3e   : > { %389 = vst.msk [vmem:[#allocation2 + $0x39] sm:$0xff] %vm339_vm1, %v310_v21  ;;  %v6125_v31 = vld [vmem:[#allocation2 + $0x128] sm:$0xff]  ;;  %v318_v21 = vld [vmem:[%s6074_s19 + $0x58] sm:$0xff] }
  0x3f   : > { %v608_v28 = vsel %vm520_vm3, %v605_v6, %v607_v24  ;;  %v614_v29 = vsel %vm609_vm4, %v611_v10, %v613_v25  ;;  %412 = vst.msk [vmem:[#allocation2 + $0x151] sm:$0xff] %vm339_vm1, %v333_v23 }
  0x40   : > { %5257 = vmatmul.msk.f32.gmra.mxu1 %vm339_vm1, %v608_v28  ;;  %v6127_v32 = vld [vmem:[#allocation2 + $0x18] sm:$0xff]  ;;  %5290 = vmatmul.msk.f32.gmra.mxu2 %vm339_vm1, %v614_v29  ;;  %413 = vst.msk [vmem:[#allocation2 + $0x159] sm:$0xff] %vm339_vm1, %v334_v26  ;;  %v576_v29 = vrot.slane %v6101_v19, 1 }
  0x41   : > { %5225 = vmatmul.msk.f32.gmra.mxu0 %vm339_vm1, %v6127_v32  ;;  %v6133_v33 = vld [vmem:[#allocation2 + $0x20] sm:$0xff]  ;;  %v521_v34 = vrot.slane %v6127_v32, 1  ;;  %v615_v35 = vrot.slane %v6127_v32, 2  ;;  %390 = vst.msk [vmem:[#allocation2 + $0x49] sm:$0xff] %vm339_vm1, %v311_v27  ;;  %v423_v41 = vld [vmem:[#allocation2 + $0x28] sm:$0x3] }
  0x42   : > { %v522_v36 = vrot.slane %v6133_v33, 1  ;;  %v616_v37 = vrot.slane %v6133_v33, 2  ;;  %391 = vst.msk [vmem:[#allocation2 + $0x51] sm:$0xff] %vm339_vm1, %v312_v30  ;;  %v6153_v42 = vld [vmem:[#allocation2 + $0x138] sm:$0xff]  ;;  %v524_v43 = vrot.slane %v423_v41, 1  ;;  %v618_v44 = vrot.slane %v423_v41, 2 }
  0x43   : > { %5248 = vmatmul.msk.f32.gmra.mxu3 %vm339_vm1, %v6125_v31  ;;  %414 = vst.msk [vmem:[#allocation2 + $0x169] sm:$0xff] %vm339_vm1, %v335_v38  ;;  %v6179_v52 = vld [vmem:[#allocation2 + $0x140] sm:$0xff]  ;;  %v577_v30 = vrot.slane %v6125_v31, 1  ;;  %v6296_v41 = vld [vmem:[#allocation2 + $0x130] sm:$0x3] }
  0x44   : > { %v6146_v39 = vsel %vm520_vm3, %v521_v34, %v522_v36  ;;  %v6149_v40 = vsel %vm609_vm4, %v615_v35, %v616_v37  ;;  %415 = vst.msk [vmem:[#allocation2 + $0x171] sm:$0xff] %vm339_vm1, %v336_v45  ;;  %v6164_v46 = vsel %vm520_vm3, %v522_v36, %v524_v43  ;;  %v6167_v47 = vsel %vm609_vm4, %v616_v37, %v618_v44  ;;  %v6171_v50 = vld [vmem:[#allocation2 + $0x30] sm:$0xff] }
  0x45   : > { %10597 = vst [vmem:[#allocation5_spill] sm:$0xff] %v6146_v39  ;;  %v6173_v51 = vld [vmem:[#allocation2 + $0x38] sm:$0xff]  ;;  %v526_v53 = vrot.slane %v6171_v50, 1  ;;  %v620_v55 = vrot.slane %v6171_v50, 2  ;;  %v426_v59 = vld [vmem:[#allocation2 + $0x40] sm:$0x3]  ;;  %v6290_v37 = vsel %vm520_vm3, %v576_v29, %v577_v30 }
  0x46   : > { %10598 = vst [vmem:[#allocation6_spill] sm:$0xff] %v6164_v46  ;;  %v527_v54 = vrot.slane %v6173_v51, 1  ;;  %v621_v56 = vrot.slane %v6173_v51, 2  ;;  %v6199_v60 = vld [vmem:[#allocation2 + $0x150] sm:$0xff]  ;;  %v529_v61 = vrot.slane %v426_v59, 1  ;;  %v623_v62 = vrot.slane %v426_v59, 2 }
  0x47   : > { %392 = vst.msk [vmem:[#allocation2 + $0x61] sm:$0xff] %vm339_vm1, %v313_v48  ;;  %v6223_v6 = vld [vmem:[#allocation2 + $0x158] sm:$0xff]  ;;  %v579_v44 = vrot.slane %v6296_v41, 1 }
  0x48   : > { %5258 = vmatmul.msk.f32.gmra.mxu1 %vm339_vm1, %v6146_v39  ;;  %5291 = vmatmul.msk.f32.gmra.mxu2 %vm339_vm1, %v6149_v40  ;;  %393 = vst.msk [vmem:[#allocation2 + $0x69] sm:$0xff] %vm339_vm1, %v314_v49  ;;  %v6192_v57 = vsel %vm520_vm3, %v526_v53, %v527_v54  ;;  %v6195_v58 = vsel %vm609_vm4, %v620_v55, %v621_v56  ;;  %v6215_v4 = vld [vmem:[#allocation2 + $0x48] sm:$0xff]  ;;  %v319_v49 = vld [vmem:[%s6074_s19 + $0x60] sm:$0xff] }
  0x49   : > { %5226 = vmatmul.msk.f32.gmra.mxu0 %vm339_vm1, %v6133_v33  ;;  %10599 = vst [vmem:[#allocation7_spill] sm:$0xff] %v6192_v57  ;;  %v6208_v63 = vsel %vm520_vm3, %v527_v54, %v529_v61  ;;  %v6211_v0 = vsel %vm609_vm4, %v621_v56, %v623_v62  ;;  %v6217_v5 = vld [vmem:[#allocation2 + $0x50] sm:$0xff]  ;;  %v531_v7 = vrot.slane %v6215_v4, 1  ;;  %v625_v9 = vrot.slane %v6215_v4, 2  ;;  %v429_v13 = vld [vmem:[#allocation2 + $0x58] sm:$0x3] }
  0x4a   : > { %10600 = vst [vmem:[#allocation8_spill] sm:$0xff] %v6195_v58  ;;  %v532_v8 = vrot.slane %v6217_v5, 1  ;;  %v626_v10 = vrot.slane %v6217_v5, 2  ;;  %v6243_v14 = vld [vmem:[#allocation2 + $0x168] sm:$0xff]  ;;  %v534_v15 = vrot.slane %v429_v13, 1  ;;  %v628_v16 = vrot.slane %v429_v13, 2 }
  0x4b   : > { %5249 = vmatmul.msk.f32.gmra.mxu3 %vm339_vm1, %v6153_v42  ;;  %10601 = vst [vmem:[#allocation9_spill] sm:$0xff] %v6208_v63  ;;  %v6267_v24 = vld [vmem:[#allocation2 + $0x170] sm:$0xff]  ;;  %v320_v53 = vld [vmem:[%s6074_s19 + $0x68] sm:$0xff]  ;;  %v6318_v56 = vsel %vm520_vm3, %v577_v30, %v579_v44 }
  0x4c   : > { %10602 = vst [vmem:[#allocation10_spill] sm:$0xff] %v6211_v0  ;;  %v6236_v11 = vsel %vm520_vm3, %v531_v7, %v532_v8  ;;  %v6239_v12 = vsel %vm609_vm4, %v625_v9, %v626_v10  ;;  %v6252_v17 = vsel %vm520_vm3, %v532_v8, %v534_v15  ;;  %v6255_v18 = vsel %vm609_vm4, %v626_v10, %v628_v16  ;;  %v6347_v16 = vld [vmem:[#allocation2 + $0x148] sm:$0x3] }
  0x4d   : > { %394 = vst.msk [vmem:[#allocation2 + $0x79] sm:$0xff] %vm339_vm1, %v315_v2  ;;  %v582_v7 = vrot.slane %v6179_v52, 1 }
  0x4e   : > { %395 = vst.msk [vmem:[#allocation2 + $0x81] sm:$0xff] %vm339_vm1, %v316_v3  ;;  %v6259_v22 = vld [vmem:[#allocation2 + $0x60] sm:$0xff]  ;;  %v581_v3 = vrot.slane %v6153_v42, 1 }
  0x4f   : > { %10603 = vst [vmem:[#allocation11_spill] sm:$0xff] %v6236_v11  ;;  %v6261_v23 = vld [vmem:[#allocation2 + $0x68] sm:$0xff]  ;;  %v536_v25 = vrot.slane %v6259_v22, 1  ;;  %v630_v27 = vrot.slane %v6259_v22, 2  ;;  %v432_v36 = vld [vmem:[#allocation2 + $0x70] sm:$0x3] }
  0x50   : > { %5259 = vmatmul.msk.f32.gmra.mxu1 %vm339_vm1, %v6164_v46  ;;  %5292 = vmatmul.msk.f32.gmra.mxu2 %vm339_vm1, %v6167_v47  ;;  %10604 = vst [vmem:[#allocation12_spill] sm:$0xff] %v6239_v12  ;;  %v537_v26 = vrot.slane %v6261_v23, 1  ;;  %v631_v28 = vrot.slane %v6261_v23, 2  ;;  %v539_v38 = vrot.slane %v432_v36, 1  ;;  %v633_v43 = vrot.slane %v432_v36, 2 }
  0x51   : > { %5227 = vmatmul.msk.f32.gmra.mxu0 %vm339_vm1, %v6171_v50  ;;  %10605 = vst [vmem:[#allocation13_spill] sm:$0xff] %v6252_v17  ;;  %v6341_v13 = vsel %vm520_vm3, %v581_v3, %v582_v7 }
  0x52   : > { %10606 = vst [vmem:[#allocation14_spill] sm:$0xff] %v6255_v18  ;;  %v6282_v34 = vsel %vm520_vm3, %v536_v25, %v537_v26  ;;  %v6285_v35 = vsel %vm609_vm4, %v630_v27, %v631_v28  ;;  %v6302_v45 = vsel %vm520_vm3, %v537_v26, %v539_v38  ;;  %v6305_v48 = vsel %vm609_vm4, %v631_v28, %v633_v43  ;;  %v321_v27 = vld [vmem:[%s6074_s19 + $0x70] sm:$0xff]  ;;  %v322_v28 = vld [vmem:[%s6074_s19 + $0x78] sm:$0xff] }
  0x53   : > { %5250 = vmatmul.msk.f32.gmra.mxu3 %vm339_vm1, %v6179_v52  ;;  %396 = vst.msk [vmem:[#allocation2 + $0x91] sm:$0xff] %vm339_vm1, %v317_v20 }
  0x54   : > { %397 = vst.msk [vmem:[#allocation2 + $0x99] sm:$0xff] %vm339_vm1, %v318_v21  ;;  %v6309_v54 = vld [vmem:[#allocation2 + $0x78] sm:$0xff]  ;;  %v584_v21 = vrot.slane %v6347_v16, 1 }
  0x55   : > { %10607 = vst [vmem:[#allocation15_spill] sm:$0xff] %v6282_v34  ;;  %v6311_v55 = vld [vmem:[#allocation2 + $0x80] sm:$0xff]  ;;  %v541_v59 = vrot.slane %v6309_v54, 1  ;;  %v635_v62 = vrot.slane %v6309_v54, 2  ;;  %v435_v10 = vld [vmem:[#allocation2 + $0x88] sm:$0x3] }
  0x56   : > { %10608 = vst [vmem:[#allocation16_spill] sm:$0xff] %v6285_v35  ;;  %v542_v61 = vrot.slane %v6311_v55, 1  ;;  %v636_v2 = vrot.slane %v6311_v55, 2  ;;  %v544_v15 = vrot.slane %v435_v10, 1  ;;  %v638_v20 = vrot.slane %v435_v10, 2 }
  0x57   : > { %10609 = vst [vmem:[#allocation17_spill] sm:$0xff] %v6290_v37  ;;  %v6369_v36 = vsel %vm520_vm3, %v582_v7, %v584_v21  ;;  %v6406_v10 = vld [vmem:[#allocation2 + $0x160] sm:$0x3] }
  0x58   : > { %5260 = vmatmul.msk.f32.gmra.mxu1 %vm339_vm1, %v6192_v57  ;;  %5293 = vmatmul.msk.f32.gmra.mxu2 %vm339_vm1, %v6195_v58  ;;  %10610 = vst [vmem:[#allocation18_spill] sm:$0xff] %v6302_v45  ;;  %v6333_v8 = vsel %vm520_vm3, %v541_v59, %v542_v61  ;;  %v6336_v9 = vsel %vm609_vm4, %v635_v62, %v636_v2  ;;  %v587_v59 = vrot.slane %v6223_v6, 1  ;;  %v589_v21 = vrot.slane %v6406_v10, 1 }
  0x59   : > { %5228 = vmatmul.msk.f32.gmra.mxu0 %vm339_vm1, %v6173_v51  ;;  %10611 = vst [vmem:[#allocation19_spill] sm:$0xff] %v6305_v48  ;;  %v6353_v25 = vsel %vm520_vm3, %v542_v61, %v544_v15  ;;  %v6356_v26 = vsel %vm609_vm4, %v636_v2, %v638_v20  ;;  %v711_v20 = vld [vmem:[%s10413_s1 + $0xc] sm:$0xf] }
  0x5a   : > { %398 = vst.msk [vmem:[#allocation2 + $0xa9] sm:$0xff] %vm339_vm1, %v319_v49  ;;  %v6360_v29 = vld [vmem:[#allocation2 + $0x90] sm:$0xff] }
  0x5b   : > { %5251 = vmatmul.msk.f32.gmra.mxu3 %vm339_vm1, %v6199_v60  ;;  %399 = vst.msk [vmem:[#allocation2 + $0xb1] sm:$0xff] %vm339_vm1, %v320_v53  ;;  %v6362_v30 = vld [vmem:[#allocation2 + $0x98] sm:$0xff]  ;;  %v546_v38 = vrot.slane %v6360_v29, 1  ;;  %v640_v44 = vrot.slane %v6360_v29, 2  ;;  %v586_v53 = vrot.slane %v6199_v60, 1 }
  0x5c   : > { %10612 = vst [vmem:[#allocation20_spill] sm:$0xff] %v6318_v56  ;;  %v547_v43 = vrot.slane %v6362_v30, 1  ;;  %v641_v49 = vrot.slane %v6362_v30, 2  ;;  %v438_v2 = vld [vmem:[#allocation2 + $0xa0] sm:$0x3] }
  0x5d   : > { %10613 = vst [vmem:[#allocation21_spill] sm:$0xff] %v6333_v8  ;;  %v6400_v3 = vsel %vm520_vm3, %v586_v53, %v587_v59  ;;  %v549_v7 = vrot.slane %v438_v2, 1  ;;  %v643_v15 = vrot.slane %v438_v2, 2 }
  0x5e   : > { %10614 = vst [vmem:[#allocation22_spill] sm:$0xff] %v6336_v9  ;;  %v6392_v61 = vsel %vm520_vm3, %v546_v38, %v547_v43  ;;  %v6395_v62 = vsel %vm609_vm4, %v640_v44, %v641_v49  ;;  %v323_v38 = vld [vmem:[%s6074_s19 + $0x80] sm:$0xff]  ;;  %v324_v44 = vld [vmem:[%s6074_s19 + $0x88] sm:$0xff] }
  0x5f   : > { %10615 = vst [vmem:[#allocation23_spill] sm:$0xff] %v6341_v13 }
  0x60   : > { %5261 = vmatmul.msk.f32.gmra.mxu1 %vm339_vm1, %v6208_v63  ;;  %5294 = vmatmul.msk.f32.gmra.mxu2 %vm339_vm1, %v6211_v0  ;;  %10616 = vst [vmem:[#allocation24_spill] sm:$0xff] %v6353_v25 }
  0x61   : > { %5229 = vmatmul.msk.f32.gmra.mxu0 %vm339_vm1, %v6215_v4  ;;  %10617 = vst [vmem:[#allocation25_spill] sm:$0xff] %v6356_v26  ;;  %v6423_v53 = vld [vmem:[#allocation2 + $0xa8] sm:$0xff] }
  0x62   : > { %400 = vst.msk [vmem:[#allocation2 + $0xc1] sm:$0xff] %vm339_vm1, %v321_v27  ;;  %v6416_v27 = vsel %vm520_vm3, %v547_v43, %v549_v7  ;;  %v6425_v2 = vld [vmem:[#allocation2 + $0xb0] sm:$0xff]  ;;  %v714_v43 = vld [vmem:[%s10413_s1 + $0x18] sm:$0xf] }
  0x63   : > { %5252 = vmatmul.msk.f32.gmra.mxu3 %vm339_vm1, %v6223_v6  ;;  %401 = vst.msk [vmem:[#allocation2 + $0xc9] sm:$0xff] %vm339_vm1, %v322_v28  ;;  %v6419_v28 = vsel %vm609_vm4, %v641_v49, %v643_v15  ;;  %v551_v49 = vrot.slane %v6423_v53, 1  ;;  %v552_v7 = vrot.slane %v6425_v2, 1  ;;  %v645_v15 = vrot.slane %v6423_v53, 2  ;;  %5420 = vmatpush.msk.msrb.mxu2 %vm781_vm0, %v714_v43 }
  0x64   : > { %10618 = vst [vmem:[#allocation26_spill] sm:$0xff] %v6369_v36 }
  0x65   : > { %2776 = vst.msk [vmem:[#allocation3] sm:$0xff] %vm1978_vm6, %v10421_v1 }
  0x66   : > { %2777 = vst.msk [vmem:[#allocation3 + $0x8] sm:$0xff] %vm1978_vm6, %v10421_v1 }
  0x67   : > { %2781 = vst.msk [vmem:[#allocation3 + $0x198] sm:$0xff] %vm1978_vm6, %v10421_v1 }
  0x68   : > { %5262 = vmatmul.msk.f32.gmra.mxu1 %vm339_vm1, %v6236_v11  ;;  %5295 = vmatmul.msk.f32.gmra.mxu2 %vm339_vm1, %v6239_v12  ;;  %2782 = vst.msk [vmem:[#allocation3 + $0x1a0] sm:$0xff] %vm1978_vm6, %v10421_v1  ;;  %v6455_v1 = vsel %vm520_vm3, %v551_v49, %v552_v7  ;;  %v6469_v49 = vld [vmem:[#allocation2 + $0x178] sm:$0x3] }
  0x69   : > { %5230 = vmatmul.msk.f32.gmra.mxu0 %vm339_vm1, %v6217_v5  ;;  %10619 = vst [vmem:[#allocation27_spill] sm:$0xff] %v6392_v61 }
  0x6a   : > { %10620 = vst [vmem:[#allocation28_spill] sm:$0xff] %v6395_v62 }
  0x6b   : > { %5253 = vmatmul.msk.f32.gmra.mxu3 %vm339_vm1, %v6243_v14  ;;  %10621 = vst [vmem:[#allocation29_spill] sm:$0xff] %v6400_v3 }
  0x6c   : > { %10622 = vst [vmem:[#allocation30_spill] sm:$0xff] %v6416_v27 }
  0x6d   : > { %10623 = vst [vmem:[#allocation31_spill] sm:$0xff] %v6419_v28 }
  0x6e   : > { %10624 = vst [vmem:[#allocation32_spill] sm:$0xff] %v6425_v2 }
  0x6f   : > { %402 = vst.msk [vmem:[#allocation2 + $0xd9] sm:$0xff] %vm339_vm1, %v323_v38  ;;  %v646_v38 = vrot.slane %v6425_v2, 2 }
  0x70   : > { %5263 = vmatmul.msk.f32.gmra.mxu1 %vm339_vm1, %v6252_v17  ;;  %5296 = vmatmul.msk.f32.gmra.mxu2 %vm339_vm1, %v6255_v18  ;;  %403 = vst.msk [vmem:[#allocation2 + $0xe1] sm:$0xff] %vm339_vm1, %v324_v44  ;;  %v592_v44 = vrot.slane %v6267_v24, 1 }
  0x71   : > { %5231 = vmatmul.msk.f32.gmra.mxu0 %vm339_vm1, %v6259_v22  ;;  %10626 = vst [vmem:[#allocation34_spill] sm:$0xff] %v6455_v1  ;;  %v6458_v43 = vsel %vm609_vm4, %v645_v15, %v646_v38  ;;  %v594_v15 = vrot.slane %v6469_v49, 1 }
  0x72   : > { %10627 = vst [vmem:[#allocation35_spill] sm:$0xff] %v6458_v43 }
  0x73   : > { %5254 = vmatmul.msk.f32.gmra.mxu3 %vm339_vm1, %v6267_v24 }
  0x78   : > { %5264 = vmatmul.msk.f32.gmra.mxu1 %vm339_vm1, %v6282_v34  ;;  %5297 = vmatmul.msk.f32.gmra.mxu2 %vm339_vm1, %v6285_v35 }
  0x79   : > { %5232 = vmatmul.msk.f32.gmra.mxu0 %vm339_vm1, %v6261_v23 }
  0x7b   : > { %5280 = vmatmul.msk.f32.vlgmr.msrb.gmra.mxu3 %vm339_vm1, %v6290_v37  ;;  %v325_v37 = vld [vmem:[%s6074_s19 + $0x90] sm:$0xff] }
  0x7c   : > { %5321 = vmatpush.msk.msrb.mxu3 %vm781_vm0, %v711_v20  ;;  %v6432_v20 = vsel %vm520_vm3, %v587_v59, %v589_v21  ;;  %v713_v59 = vld [vmem:[%s10413_s1 + $0x14] sm:$0xf]  ;;  %v591_v21 = vrot.slane %v6243_v14, 1  ;;  %404 = vst.msk [vmem:[#allocation2 + $0xf1] sm:$0xff] %vm339_vm1, %v325_v37 }
  0x7d   : > { %10625 = vst [vmem:[#allocation33_spill] sm:$0xff] %v6432_v20  ;;  %5387 = vmatpush.msk.msrb.mxu1 %vm781_vm0, %v713_v59 }
  0x80   : > { %5265 = vmatmul.msk.f32.gmra.mxu1 %vm339_vm1, %v6302_v45  ;;  %5298 = vmatmul.msk.f32.gmra.mxu2 %vm339_vm1, %v6305_v48 }
  0x81   : > { %5233 = vmatmul.msk.f32.gmra.mxu0 %vm339_vm1, %v6309_v54 }
  0x83   : > { %5281 = vmatmul.msk.f32.gmra.mxu3 %vm339_vm1, %v6318_v56 }
  0x88   : > { %5266 = vmatmul.msk.f32.gmra.mxu1 %vm339_vm1, %v6333_v8  ;;  %5299 = vmatmul.msk.f32.gmra.mxu2 %vm339_vm1, %v6336_v9 }
  0x89   : > { %5234 = vmatmul.msk.f32.gmra.mxu0 %vm339_vm1, %v6311_v55 }
  0x8b   : > { %5282 = vmatmul.msk.f32.gmra.mxu3 %vm339_vm1, %v6341_v13 }
  0x90   : > { %5267 = vmatmul.msk.f32.gmra.mxu1 %vm339_vm1, %v6353_v25  ;;  %5300 = vmatmul.msk.f32.gmra.mxu2 %vm339_vm1, %v6356_v26 }
  0x91   : > { %5235 = vmatmul.msk.f32.gmra.mxu0 %vm339_vm1, %v6360_v29 }
  0x93   : > { %5283 = vmatmul.msk.f32.gmra.mxu3 %vm339_vm1, %v6369_v36  ;;  %v6471_v13 = vpop.f32.mrf.mxu0 }
  0x94   : > { %10629 = vst [vmem:[#allocation37_spill] sm:$0xff] %v6471_v13 }
  0x98   : > { %5268 = vmatmul.msk.f32.gmra.mxu1 %vm339_vm1, %v6392_v61  ;;  %5301 = vmatmul.msk.f32.gmra.mxu2 %vm339_vm1, %v6395_v62 }
  0x99   : > { %5236 = vmatmul.msk.f32.gmra.mxu0 %vm339_vm1, %v6362_v30 }
  0x9b   : > { %5284 = vmatmul.msk.f32.gmra.mxu3 %vm339_vm1, %v6400_v3  ;;  %v441_v3 = vld [vmem:[#allocation2 + $0xb8] sm:$0x3] }
  0x9c   : > { %v554_v59 = vrot.slane %v441_v3, 1  ;;  %v648_v36 = vrot.slane %v441_v3, 2  ;;  %v6493_v3 = vsel %vm520_vm3, %v592_v44, %v594_v15  ;;  %v671_v15 = vrot.slane %v6125_v31, 2 }
  0x9d   : > { %10633 = vst [vmem:[#allocation41_spill] sm:$0xff] %v6493_v3  ;;  %v6526_v31 = vpop.f32.mrf.mxu2 }
  0x9e   : > { %v6480_v56 = vsel %vm609_vm4, %v646_v38, %v648_v36  ;;  %10639 = vst [vmem:[#allocation47_spill] sm:$0xff] %v6526_v31  ;;  %v6547_v31 = vld [vmem:[#allocation2 + $0xe0] sm:$0xff] }
  0x9f   : > { %10631 = vst [vmem:[#allocation39_spill] sm:$0xff] %v6480_v56 }
  0xa0   : > { %5269 = vmatmul.msk.f32.gmra.mxu1 %vm339_vm1, %v6416_v27  ;;  %5302 = vmatmul.msk.f32.gmra.mxu2 %vm339_vm1, %v6419_v28 }
  0xa1   : > { %5237 = vmatmul.msk.f32.gmra.mxu0 %vm339_vm1, %v6423_v53 }
  0xa3   : > { %5285 = vmatmul.msk.f32.gmra.mxu3 %vm339_vm1, %v6432_v20  ;;  %v6463_v20 = vsel %vm520_vm3, %v591_v21, %v592_v44  ;;  %v6477_v21 = vsel %vm520_vm3, %v552_v7, %v554_v59  ;;  %v6507_v44 = vpop.f32.mrf.mxu0  ;;  %v670_v59 = vrot.slane %v6101_v19, 2 }
  0xa4   : > { %10628 = vst [vmem:[#allocation36_spill] sm:$0xff] %v6463_v20 }
  0xa5   : > { %10630 = vst [vmem:[#allocation38_spill] sm:$0xff] %v6477_v21 }
  0xa6   : > { %10635 = vst [vmem:[#allocation43_spill] sm:$0xff] %v6507_v44 }
  0xa8   : > { %5270 = vmatmul.msk.f32.gmra.mxu1 %vm339_vm1, %v6455_v1  ;;  %5303 = vmatmul.msk.f32.gmra.mxu2 %vm339_vm1, %v6458_v43  ;;  %v326_v43 = vld [vmem:[%s6074_s19 + $0x98] sm:$0xff]  ;;  %v6484_v1 = vld [vmem:[#allocation2 + $0xc0] sm:$0xff] }
  0xa9   : > { %5238 = vmatmul.msk.f32.gmra.mxu0 %vm339_vm1, %v6425_v2  ;;  %v6486_v2 = vld [vmem:[#allocation2 + $0xc8] sm:$0xff]  ;;  %405 = vst.msk [vmem:[#allocation2 + $0xf9] sm:$0xff] %vm339_vm1, %v326_v43  ;;  %v556_v36 = vrot.slane %v6484_v1, 1  ;;  %v650_v37 = vrot.slane %v6484_v1, 2  ;;  %v6505_v43 = vpop.f32.mrf.mxu1 }
  0xaa   : > { %10632 = vst [vmem:[#allocation40_spill] sm:$0xff] %v6486_v2  ;;  %v557_v7 = vrot.slane %v6486_v2, 1  ;;  %v651_v38 = vrot.slane %v6486_v2, 2 }
  0xab   : > { %5286 = vmatmul.msk.f32.gmra.mxu3 %vm339_vm1, %v6463_v20  ;;  %10634 = vst [vmem:[#allocation42_spill] sm:$0xff] %v6505_v43 }
  0xac   : > { %v6512_v20 = vsel %vm520_vm3, %v556_v36, %v557_v7  ;;  %v6515_v13 = vsel %vm609_vm4, %v650_v37, %v651_v38  ;;  %v673_v37 = vrot.slane %v6296_v41, 2 }
  0xad   : > { %10636 = vst [vmem:[#allocation44_spill] sm:$0xff] %v6512_v20 }
  0xae   : > { %10637 = vst [vmem:[#allocation45_spill] sm:$0xff] %v6515_v13  ;;  %v6554_v41 = vsel %vm609_vm4, %v671_v15, %v673_v37 }
  0xaf   : > { %10644 = vst [vmem:[#allocation52_spill] sm:$0xff] %v6554_v41 }
  0xb0   : > { %5271 = vmatmul.msk.f32.gmra.mxu1 %vm339_vm1, %v6477_v21  ;;  %5304 = vmatmul.msk.f32.gmra.mxu2 %vm339_vm1, %v6480_v56  ;;  %v444_v56 = vld [vmem:[#allocation2 + $0xd0] sm:$0x3] }
  0xb1   : > { %5239 = vmatmul.msk.f32.gmra.mxu0 %vm339_vm1, %v6484_v1  ;;  %v559_v19 = vrot.slane %v444_v56, 1  ;;  %v653_v36 = vrot.slane %v444_v56, 2  ;;  %v6545_v56 = vld [vmem:[#allocation2 + $0xd8] sm:$0xff] }
  0xb3   : > { %5287 = vmatmul.msk.f32.gmra.mxu3 %vm339_vm1, %v6493_v3  ;;  %v6520_v3 = vsel %vm609_vm4, %v670_v59, %v671_v15  ;;  %v6534_v59 = vsel %vm520_vm3, %v557_v7, %v559_v19  ;;  %v6537_v43 = vsel %vm609_vm4, %v651_v38, %v653_v36  ;;  %v561_v7 = vrot.slane %v6545_v56, 1 }
  0xb4   : > { %10638 = vst [vmem:[#allocation46_spill] sm:$0xff] %v6520_v3  ;;  %v562_v38 = vrot.slane %v6547_v31, 1  ;;  %v675_v15 = vrot.slane %v6153_v42, 2  ;;  %v676_v36 = vrot.slane %v6179_v52, 2 }
  0xb5   : > { %10641 = vst [vmem:[#allocation49_spill] sm:$0xff] %v6534_v59 }
  0xb6   : > { %10642 = vst [vmem:[#allocation50_spill] sm:$0xff] %v6537_v43  ;;  %v6585_v42 = vsel %vm609_vm4, %v675_v15, %v676_v36 }
  0xb7   : > { %10650 = vst [vmem:[#allocation58_spill] sm:$0xff] %v6585_v42 }
  0xb8   : > { %5272 = vmatmul.msk.f32.gmra.mxu1 %vm339_vm1, %v6512_v20  ;;  %5305 = vmatmul.msk.f32.gmra.mxu2 %vm339_vm1, %v6515_v13  ;;  %v327_v13 = vld [vmem:[%s6074_s19 + $0xa0] sm:$0xff]  ;;  %v328_v20 = vld [vmem:[%s6074_s19 + $0xa8] sm:$0xff] }
  0xb9   : > { %5240 = vmatmul.msk.f32.gmra.mxu0 %vm339_vm1, %v6486_v2  ;;  %406 = vst.msk [vmem:[#allocation2 + $0x109] sm:$0xff] %vm339_vm1, %v327_v13  ;;  %v655_v13 = vrot.slane %v6545_v56, 2 }
  0xba   : > { %407 = vst.msk [vmem:[#allocation2 + $0x111] sm:$0xff] %vm339_vm1, %v328_v20  ;;  %v656_v20 = vrot.slane %v6547_v31, 2 }
  0xbb   : > { %5313 = vmatmul.msk.f32.vlgmr.msra.gmra.mxu3 %vm339_vm1, %v6520_v3  ;;  %v6573_v3 = vsel %vm520_vm3, %v561_v7, %v562_v38 }
  0xbc   : > { %10647 = vst [vmem:[#allocation55_spill] sm:$0xff] %v6573_v3 }
  0xbd   : > { %v6531_v44 = vpop.f32.mrf.mxu1 }
  0xbe   : > { %10640 = vst [vmem:[#allocation48_spill] sm:$0xff] %v6531_v44  ;;  %v6541_v2 = vpop.f32.mrf.mxu3  ;;  %v6543_v21 = vpop.f32.mrf.mxu0 }
  0xbf   : > { %10643 = vst [vmem:[#allocation51_spill] sm:$0xff] %v6543_v21  ;;  %v6576_v21 = vsel %vm609_vm4, %v655_v13, %v656_v20 }
  0xc0   : > { %5273 = vmatmul.msk.f32.gmra.mxu1 %vm339_vm1, %v6534_v59  ;;  %5306 = vmatmul.msk.f32.gmra.mxu2 %vm339_vm1, %v6537_v43  ;;  %10648 = vst [vmem:[#allocation56_spill] sm:$0xff] %v6576_v21  ;;  %v447_v59 = vld [vmem:[#allocation2 + $0xe8] sm:$0x3] }
  0xc1   : > { %5241 = vmatmul.msk.f32.gmra.mxu0 %vm339_vm1, %v6545_v56  ;;  %v564_v52 = vrot.slane %v447_v59, 1  ;;  %v658_v7 = vrot.slane %v447_v59, 2  ;;  %v6608_v59 = vld [vmem:[#allocation2 + $0xf0] sm:$0xff] }
  0xc2   : > { %10656 = vst [vmem:[#allocation64_spill] sm:$0xff] %v6608_v59 }
  0xc3   : > { %5314 = vmatmul.msk.f32.gmra.mxu3 %vm339_vm1, %v6554_v41  ;;  %v6566_v19 = vpop.f32.mrf.mxu2  ;;  %v678_v41 = vrot.slane %v6347_v16, 2  ;;  %v6599_v15 = vsel %vm520_vm3, %v562_v38, %v564_v52  ;;  %v566_v38 = vrot.slane %v6608_v59, 1  ;;  %v660_v52 = vrot.slane %v6608_v59, 2 }
  0xc4   : > { %10645 = vst [vmem:[#allocation53_spill] sm:$0xff] %v6566_v19 }
  0xc5   : > { %v6570_v37 = vpop.f32.mrf.mxu1  ;;  %10653 = vst [vmem:[#allocation61_spill] sm:$0xff] %v6599_v15  ;;  %v6615_v16 = vsel %vm609_vm4, %v676_v36, %v678_v41  ;;  %v680_v41 = vrot.slane %v6199_v60, 2  ;;  %v681_v36 = vrot.slane %v6223_v6, 2 }
  0xc6   : > { %10646 = vst [vmem:[#allocation54_spill] sm:$0xff] %v6570_v37  ;;  %v6578_v44 = vpop.f32.mrf.mxu3  ;;  %v6580_v43 = vpop.f32.mrf.mxu0  ;;  %v6602_v37 = vsel %vm609_vm4, %v656_v20, %v658_v7 }
  0xc7   : > { %10649 = vst [vmem:[#allocation57_spill] sm:$0xff] %v6580_v43  ;;  %v6646_v60 = vsel %vm609_vm4, %v680_v41, %v681_v36  ;;  %v683_v41 = vrot.slane %v6406_v10, 2 }
  0xc8   : > { %5274 = vmatmul.msk.f32.gmra.mxu1 %vm339_vm1, %v6573_v3  ;;  %5307 = vmatmul.msk.f32.gmra.mxu2 %vm339_vm1, %v6576_v21  ;;  %10654 = vst [vmem:[#allocation62_spill] sm:$0xff] %v6602_v37  ;;  %v6610_v3 = vld [vmem:[#allocation2 + $0xf8] sm:$0xff] }
  0xc9   : > { %5242 = vmatmul.msk.f32.gmra.mxu0 %vm339_vm1, %v6547_v31  ;;  %10657 = vst [vmem:[#allocation65_spill] sm:$0xff] %v6615_v16  ;;  %v567_v20 = vrot.slane %v6610_v3, 1  ;;  %v661_v7 = vrot.slane %v6610_v3, 2  ;;  %v6680_v10 = vsel %vm609_vm4, %v681_v36, %v683_v41  ;;  %v716_v36 = vld [vmem:[%s10413_s1 + $0x20] sm:$0xf]  ;;  %v685_v41 = vrot.slane %v6243_v14, 2 }
  0xca   : > { %10663 = vst [vmem:[#allocation71_spill] sm:$0xff] %v6646_v60  ;;  %5486 = vmatpush.msk.msra.mxu0 %vm781_vm0, %v716_v36  ;;  %v688_v36 = vrot.slane %v6469_v49, 2 }
  0xcb   : > { %5315 = vmatmul.msk.f32.gmra.mxu3 %vm339_vm1, %v6585_v42  ;;  %v6593_v13 = vpop.f32.mrf.mxu2  ;;  %10670 = vst [vmem:[#allocation78_spill] sm:$0xff] %v6680_v10 }
  0xcc   : > { %10651 = vst [vmem:[#allocation59_spill] sm:$0xff] %v6593_v13  ;;  %v6637_v13 = vsel %vm609_vm4, %v660_v52, %v661_v7 }
  0xcd   : > { %v6596_v43 = vpop.f32.mrf.mxu1  ;;  %10661 = vst [vmem:[#allocation69_spill] sm:$0xff] %v6637_v13 }
  0xce   : > { %10652 = vst [vmem:[#allocation60_spill] sm:$0xff] %v6596_v43  ;;  %v6604_v19 = vpop.f32.mrf.mxu3  ;;  %v6606_v21 = vpop.f32.mrf.mxu0  ;;  %v6634_v43 = vsel %vm520_vm3, %v566_v38, %v567_v20 }
  0xcf   : > { %10655 = vst [vmem:[#allocation63_spill] sm:$0xff] %v6606_v21 }
  0xd0   : > { %5275 = vmatmul.msk.f32.gmra.mxu1 %vm339_vm1, %v6599_v15  ;;  %5308 = vmatmul.msk.f32.gmra.mxu2 %vm339_vm1, %v6602_v37  ;;  %10660 = vst [vmem:[#allocation68_spill] sm:$0xff] %v6634_v43 }
  0xd1   : > { %5243 = vmatmul.msk.f32.gmra.mxu0 %vm339_vm1, %v6608_v59  ;;  %v450_v59 = vld [vmem:[#allocation2 + $0x100] sm:$0x3] }
  0xd2   : > { %v569_v6 = vrot.slane %v450_v59, 1  ;;  %v663_v38 = vrot.slane %v450_v59, 2 }
  0xd3   : > { %5316 = vmatmul.msk.f32.gmra.mxu3 %vm339_vm1, %v6615_v16  ;;  %v6627_v42 = vpop.f32.mrf.mxu2  ;;  %v715_v16 = vld [vmem:[%s10413_s1 + $0x1c] sm:$0xf] }
  0xd4   : > { %10658 = vst [vmem:[#allocation66_spill] sm:$0xff] %v6627_v42  ;;  %5453 = vmatpush.msk.msra.mxu3 %vm781_vm0, %v715_v16  ;;  %v6667_v59 = vsel %vm609_vm4, %v661_v7, %v663_v38 }
  0xd5   : > { %v6631_v21 = vpop.f32.mrf.mxu1  ;;  %10667 = vst [vmem:[#allocation75_spill] sm:$0xff] %v6667_v59 }
  0xd6   : > { %10659 = vst [vmem:[#allocation67_spill] sm:$0xff] %v6631_v21  ;;  %v6639_v37 = vpop.f32.mrf.mxu3  ;;  %v6641_v15 = vpop.f32.mrf.mxu0  ;;  %v6664_v21 = vsel %vm520_vm3, %v567_v20, %v569_v6 }
  0xd7   : > { %10662 = vst [vmem:[#allocation70_spill] sm:$0xff] %v6641_v15 }
  0xd8   : > { %5276 = vmatmul.msk.f32.gmra.mxu1 %vm339_vm1, %v6634_v43  ;;  %5309 = vmatmul.msk.f32.gmra.mxu2 %vm339_vm1, %v6637_v13  ;;  %10666 = vst [vmem:[#allocation74_spill] sm:$0xff] %v6664_v21  ;;  %v6675_v13 = vld [vmem:[#allocation2 + $0x110] sm:$0xff] }
  0xd9   : > { %5244 = vmatmul.msk.f32.gmra.mxu0 %vm339_vm1, %v6610_v3  ;;  %v572_v20 = vrot.slane %v6675_v13, 1  ;;  %v666_v6 = vrot.slane %v6675_v13, 2 }
  0xdb   : > { %5317 = vmatmul.msk.f32.gmra.mxu3 %vm339_vm1, %v6646_v60  ;;  %v6654_v52 = vpop.f32.mrf.mxu2 }
  0xdc   : > { %10664 = vst [vmem:[#allocation72_spill] sm:$0xff] %v6654_v52  ;;  %v6673_v52 = vld [vmem:[#allocation2 + $0x108] sm:$0xff] }
  0xdd   : > { %v6661_v15 = vpop.f32.mrf.mxu1  ;;  %10669 = vst [vmem:[#allocation77_spill] sm:$0xff] %v6673_v52  ;;  %v571_v16 = vrot.slane %v6673_v52, 1  ;;  %v665_v7 = vrot.slane %v6673_v52, 2 }
  0xde   : > { %10665 = vst [vmem:[#allocation73_spill] sm:$0xff] %v6661_v15  ;;  %v6669_v42 = vpop.f32.mrf.mxu3  ;;  %v6671_v60 = vpop.f32.mrf.mxu0 }
  0xdf   : > { %10668 = vst [vmem:[#allocation76_spill] sm:$0xff] %v6671_v60  ;;  %v686_v60 = vrot.slane %v6267_v24, 2 }
  0xe0   : > { %5277 = vmatmul.msk.f32.gmra.mxu1 %vm339_vm1, %v6664_v21  ;;  %5310 = vmatmul.msk.f32.gmra.mxu2 %vm339_vm1, %v6667_v59  ;;  %v6703_v59 = vsel %vm520_vm3, %v571_v16, %v572_v20  ;;  %v6706_v21 = vsel %vm609_vm4, %v665_v7, %v666_v6 }
  0xe1   : > { %5245 = vmatmul.msk.f32.gmra.mxu0 %vm339_vm1, %v6673_v52  ;;  %10673 = vst [vmem:[#allocation81_spill] sm:$0xff] %v6703_v59  ;;  %v453_v52 = vld [vmem:[#allocation2 + $0x118] sm:$0x3]  ;;  %v6715_v14 = vsel %vm609_vm4, %v685_v41, %v686_v60 }
  0xe2   : > { %10674 = vst [vmem:[#allocation82_spill] sm:$0xff] %v6706_v21  ;;  %v574_v24 = vrot.slane %v453_v52, 1  ;;  %v668_v16 = vrot.slane %v453_v52, 2  ;;  %v6741_v52 = vsel %vm609_vm4, %v686_v60, %v688_v36 }
  0xe3   : > { %5318 = vmatmul.msk.f32.gmra.mxu3 %vm339_vm1, %v6680_v10  ;;  %v6692_v38 = vpop.f32.mrf.mxu2  ;;  %10676 = vst [vmem:[#allocation84_spill] sm:$0xff] %v6715_v14 }
  0xe4   : > { %10671 = vst [vmem:[#allocation79_spill] sm:$0xff] %v6692_v38  ;;  %v6729_v41 = vsel %vm520_vm3, %v572_v20, %v574_v24 }
  0xe5   : > { %v6700_v15 = vpop.f32.mrf.mxu1  ;;  %10677 = vst [vmem:[#allocation85_spill] sm:$0xff] %v6729_v41 }
  0xe6   : > { %10672 = vst [vmem:[#allocation80_spill] sm:$0xff] %v6700_v15  ;;  %v6708_v10 = vpop.f32.mrf.mxu3  ;;  %v6710_v38 = vpop.f32.mrf.mxu0  ;;  %v6732_v15 = vsel %vm609_vm4, %v666_v6, %v668_v16 }
  0xe7   : > { %10675 = vst [vmem:[#allocation83_spill] sm:$0xff] %v6710_v38 }
  0xe8   : > { %5278 = vmatmul.msk.f32.gmra.mxu1 %vm339_vm1, %v6703_v59  ;;  %5311 = vmatmul.msk.f32.gmra.mxu2 %vm339_vm1, %v6706_v21  ;;  %10678 = vst [vmem:[#allocation86_spill] sm:$0xff] %v6741_v52 }
  0xe9   : > { %5246 = vmatmul.msk.f32.gmra.mxu0 %vm339_vm1, %v6675_v13 }
  0xeb   : > { %5319 = vmatmul.msk.f32.gmra.mxu3 %vm339_vm1, %v6715_v14  ;;  %v6723_v7 = vpop.f32.mrf.mxu2 }
  0xed   : > { %v6726_v38 = vpop.f32.mrf.mxu1 }
  0xee   : > { %v6734_v21 = vpop.f32.mrf.mxu3  ;;  %v6736_v59 = vpop.f32.mrf.mxu0 }
  0xf0   : > { %5279 = vmatmul.msk.f32.gmra.mxu1 %vm339_vm1, %v6729_v41  ;;  %5312 = vmatmul.msk.f32.gmra.mxu2 %vm339_vm1, %v6732_v15 }
  0xf1   : > { %5355 = vmatmul.msk.f32.vlgmr.msrb.gmra.mxu0 %vm339_vm1, %v6146_v39 }
  0xf3   : > { %5320 = vmatmul.msk.f32.gmra.mxu3 %vm339_vm1, %v6741_v52  ;;  %v6749_v49 = vpop.f32.mrf.mxu2  ;;  %v2387_v52 = vsel %vm1978_vm6, %v6541_v2, 0.0 }
  0xf5   : > { %v6751_v20 = vpop.f32.mrf.mxu1 }
  0xf6   : > { %v6753_v6 = vpop.f32.mrf.mxu3  ;;  %v6755_v24 = vpop.f32.mrf.mxu0 }
  0xf8   : > { %5388 = vmatmul.msk.f32.vlgmr.msrb.gmra.mxu1 %vm339_vm1, %v6149_v40  ;;  %5421 = vmatmul.msk.f32.vlgmr.msrb.gmra.mxu2 %vm339_vm1, %v6171_v50 }
  0xf9   : > { %5356 = vmatmul.msk.f32.gmra.mxu0 %vm339_vm1, %v6164_v46 }
  0xfb   : > { %5322 = vmatmul.msk.f32.vlgmr.msrb.gmra.mxu3 %vm339_vm1, %v6127_v32  ;;  %v6765_v60 = vpop.f32.mrf.mxu2 }
  0xfd   : > { %v6767_v16 = vpop.f32.mrf.mxu1 }
  0xfe   : > { %v1054_v36 = vpop.f32.mrf.mxu3  ;;  %v6769_v39 = vpop.f32.mrf.mxu0 }
  0xff   : > { %v2388_v40 = vsel %vm1978_vm6, %v1054_v36, 0.0 }
 0x100   : > { %v6774_v14 = vadd.f32 %v2388_v40, %v2387_v52  ;;  %5389 = vmatmul.msk.f32.gmra.mxu1 %vm339_vm1, %v6167_v47  ;;  %5422 = vmatmul.msk.f32.gmra.mxu2 %vm339_vm1, %v6173_v51  ;;  %v2404_v52 = vsel %vm1978_vm6, %v6578_v44, 0.0 }
 0x101   : > { %5357 = vmatmul.msk.f32.gmra.mxu0 %vm339_vm1, %v6192_v57 }
 0x103   : > { %5323 = vmatmul.msk.f32.gmra.mxu3 %vm339_vm1, %v6133_v33  ;;  %v6784_v32 = vpop.f32.mrf.mxu2 }
 0x105   : > { %v6786_v46 = vpop.f32.mrf.mxu1 }
 0x106   : > { %v1057_v2 = vpop.f32.mrf.mxu3  ;;  %v6788_v36 = vpop.f32.mrf.mxu0 }
 0x107   : > { %v2405_v47 = vsel %vm1978_vm6, %v1057_v2, 0.0 }
 0x108   : > { %v6793_v40 = vadd.f32 %v2405_v47, %v2404_v52  ;;  %5390 = vmatmul.msk.f32.gmra.mxu1 %vm339_vm1, %v6195_v58  ;;  %5423 = vmatmul.msk.f32.gmra.mxu2 %vm339_vm1, %v6215_v4  ;;  %v2421_v52 = vsel %vm1978_vm6, %v6604_v19, 0.0 }
 0x109   : > { %5358 = vmatmul.msk.f32.gmra.mxu0 %vm339_vm1, %v6208_v63 }
 0x10b   : > { %5324 = vmatmul.msk.f32.gmra.mxu3 %vm339_vm1, %v6171_v50  ;;  %v6803_v33 = vpop.f32.mrf.mxu2 }
 0x10d   : > { %v6805_v57 = vpop.f32.mrf.mxu1 }
 0x10e   : > { %v1060_v44 = vpop.f32.mrf.mxu3  ;;  %v6807_v2 = vpop.f32.mrf.mxu0 }
 0x10f   : > { %v2422_v47 = vsel %vm1978_vm6, %v1060_v44, 0.0 }
 0x110   : > { %v6812_v58 = vadd.f32 %v2422_v47, %v2421_v52  ;;  %5391 = vmatmul.msk.f32.gmra.mxu1 %vm339_vm1, %v6211_v0  ;;  %5424 = vmatmul.msk.f32.gmra.mxu2 %vm339_vm1, %v6217_v5  ;;  %v2438_v52 = vsel %vm1978_vm6, %v6639_v37, 0.0 }
 0x111   : > { %5359 = vmatmul.msk.f32.gmra.mxu0 %vm339_vm1, %v6236_v11 }
 0x113   : > { %5325 = vmatmul.msk.f32.gmra.mxu3 %vm339_vm1, %v6173_v51  ;;  %v6822_v50 = vpop.f32.mrf.mxu2 }
 0x115   : > { %v6824_v63 = vpop.f32.mrf.mxu1 }
 0x116   : > { %v1063_v19 = vpop.f32.mrf.mxu3  ;;  %v6826_v44 = vpop.f32.mrf.mxu0 }
 0x117   : > { %v2439_v47 = vsel %vm1978_vm6, %v1063_v19, 0.0 }
 0x118   : > { %v6831_v0 = vadd.f32 %v2439_v47, %v2438_v52  ;;  %5392 = vmatmul.msk.f32.gmra.mxu1 %vm339_vm1, %v6239_v12  ;;  %5425 = vmatmul.msk.f32.gmra.mxu2 %vm339_vm1, %v6259_v22  ;;  %v2455_v52 = vsel %vm1978_vm6, %v6669_v42, 0.0 }
 0x119   : > { %5360 = vmatmul.msk.f32.gmra.mxu0 %vm339_vm1, %v6252_v17 }
 0x11b   : > { %5326 = vmatmul.msk.f32.gmra.mxu3 %vm339_vm1, %v6215_v4  ;;  %v6841_v51 = vpop.f32.mrf.mxu2 }
 0x11d   : > { %v6843_v11 = vpop.f32.mrf.mxu1 }
 0x11e   : > { %v1066_v37 = vpop.f32.mrf.mxu3  ;;  %v6845_v19 = vpop.f32.mrf.mxu0 }
 0x11f   : > { %v2456_v47 = vsel %vm1978_vm6, %v1066_v37, 0.0 }
 0x120   : > { %v6850_v12 = vadd.f32 %v2456_v47, %v2455_v52  ;;  %5393 = vmatmul.msk.f32.gmra.mxu1 %vm339_vm1, %v6255_v18  ;;  %5426 = vmatmul.msk.f32.gmra.mxu2 %vm339_vm1, %v6261_v23  ;;  %v2472_v52 = vsel %vm1978_vm6, %v6708_v10, 0.0 }
 0x121   : > { %5361 = vmatmul.msk.f32.gmra.mxu0 %vm339_vm1, %v6282_v34 }
 0x123   : > { %5327 = vmatmul.msk.f32.gmra.mxu3 %vm339_vm1, %v6217_v5  ;;  %v6860_v4 = vpop.f32.mrf.mxu2 }
 0x125   : > { %v6862_v17 = vpop.f32.mrf.mxu1 }
 0x126   : > { %v1069_v42 = vpop.f32.mrf.mxu3  ;;  %v6864_v37 = vpop.f32.mrf.mxu0 }
 0x127   : > { %v2473_v47 = vsel %vm1978_vm6, %v1069_v42, 0.0 }
 0x128   : > { %v6869_v18 = vadd.f32 %v2473_v47, %v2472_v52  ;;  %5394 = vmatmul.msk.f32.gmra.mxu1 %vm339_vm1, %v6285_v35  ;;  %5427 = vmatmul.msk.f32.gmra.mxu2 %vm339_vm1, %v6309_v54  ;;  %v2489_v52 = vsel %vm1978_vm6, %v6734_v21, 0.0 }
 0x129   : > { %5362 = vmatmul.msk.f32.gmra.mxu0 %vm339_vm1, %v6302_v45 }
 0x12b   : > { %5328 = vmatmul.msk.f32.gmra.mxu3 %vm339_vm1, %v6259_v22  ;;  %v6879_v5 = vpop.f32.mrf.mxu2 }
 0x12d   : > { %v6881_v34 = vpop.f32.mrf.mxu1 }
 0x12e   : > { %v1072_v10 = vpop.f32.mrf.mxu3  ;;  %v6883_v42 = vpop.f32.mrf.mxu0 }
 0x12f   : > { %v2490_v47 = vsel %vm1978_vm6, %v1072_v10, 0.0 }
 0x130   : > { %v6888_v35 = vadd.f32 %v2490_v47, %v2489_v52  ;;  %5395 = vmatmul.msk.f32.gmra.mxu1 %vm339_vm1, %v6305_v48  ;;  %5428 = vmatmul.msk.f32.gmra.mxu2 %vm339_vm1, %v6311_v55  ;;  %v2506_v52 = vsel %vm1978_vm6, %v6753_v6, 0.0 }
 0x131   : > { %5363 = vmatmul.msk.f32.gmra.mxu0 %vm339_vm1, %v6333_v8 }
 0x133   : > { %5329 = vmatmul.msk.f32.gmra.mxu3 %vm339_vm1, %v6261_v23  ;;  %v6898_v22 = vpop.f32.mrf.mxu2 }
 0x135   : > { %v6900_v45 = vpop.f32.mrf.mxu1 }
 0x136   : > { %v1075_v21 = vpop.f32.mrf.mxu3  ;;  %v6902_v10 = vpop.f32.mrf.mxu0 }
 0x137   : > { %v2507_v47 = vsel %vm1978_vm6, %v1075_v21, 0.0 }
 0x138   : > { %v6907_v48 = vadd.f32 %v2507_v47, %v2506_v52  ;;  %5396 = vmatmul.msk.f32.gmra.mxu1 %vm339_vm1, %v6336_v9  ;;  %5429 = vmatmul.msk.f32.gmra.mxu2 %vm339_vm1, %v6360_v29 }
 0x139   : > { %5364 = vmatmul.msk.f32.gmra.mxu0 %vm339_vm1, %v6353_v25 }
 0x13b   : > { %5330 = vmatmul.msk.f32.gmra.mxu3 %vm339_vm1, %v6309_v54  ;;  %v6917_v23 = vpop.f32.mrf.mxu2 }
 0x13d   : > { %v6919_v8 = vpop.f32.mrf.mxu1 }
 0x13e   : > { %v1234_v6 = vpop.f32.mrf.mxu3  ;;  %v6921_v21 = vpop.f32.mrf.mxu0 }
 0x13f   : > { %v2390_v52 = vsel %vm1978_vm6, %v1234_v6, 0.0 }
 0x140   : > { %v6925_v47 = vadd.f32 %v2390_v52, %v6774_v14  ;;  %5397 = vmatmul.msk.f32.gmra.mxu1 %vm339_vm1, %v6356_v26  ;;  %5430 = vmatmul.msk.f32.gmra.mxu2 %vm339_vm1, %v6362_v30 }
 0x141   : > { %5365 = vmatmul.msk.f32.gmra.mxu0 %vm339_vm1, %v6392_v61 }
 0x142   : > { %10679 = vst [vmem:[#allocation87_spill] sm:$0xff] %v6925_v47 }
 0x143   : > { %5331 = vmatmul.msk.f32.gmra.mxu3 %vm339_vm1, %v6311_v55  ;;  %v6935_v54 = vpop.f32.mrf.mxu2 }
 0x145   : > { %v6937_v25 = vpop.f32.mrf.mxu1 }
 0x146   : > { %v1237_v6 = vpop.f32.mrf.mxu3  ;;  %v6939_v9 = vpop.f32.mrf.mxu0 }
 0x147   : > { %10680 = vst [vmem:[#allocation88_spill] sm:$0xff] %v6939_v9  ;;  %v2407_v14 = vsel %vm1978_vm6, %v1237_v6, 0.0 }
 0x148   : > { %v6943_v52 = vadd.f32 %v2407_v14, %v6793_v40  ;;  %5398 = vmatmul.msk.f32.gmra.mxu1 %vm339_vm1, %v6395_v62  ;;  %5431 = vmatmul.msk.f32.gmra.mxu2 %vm339_vm1, %v6423_v53 }
 0x149   : > { %5366 = vmatmul.msk.f32.gmra.mxu0 %vm339_vm1, %v6416_v27  ;;  %v10687_v27 = vld [vmem:[#allocation34_spill] sm:$0xff] }
 0x14a   : > { %10681 = vst [vmem:[#allocation89_spill] sm:$0xff] %v6943_v52  ;;  %v10686_v52 = vld [vmem:[#allocation32_spill] sm:$0xff] }
 0x14b   : > { %5332 = vmatmul.msk.f32.gmra.mxu3 %vm339_vm1, %v6360_v29  ;;  %v6953_v55 = vpop.f32.mrf.mxu2 }
 0x14c   : > { %10682 = vst [vmem:[#allocation90_spill] sm:$0xff] %v6953_v55  ;;  %v10725_v55 = vld [vmem:[#allocation51_spill] sm:$0xff] }
 0x14d   : > { %v6955_v47 = vpop.f32.mrf.mxu1 }
 0x14e   : > { %10683 = vst [vmem:[#allocation91_spill] sm:$0xff] %v6955_v47  ;;  %v1240_v6 = vpop.f32.mrf.mxu3  ;;  %v6957_v61 = vpop.f32.mrf.mxu0 }
 0x14f   : > { %10684 = vst [vmem:[#allocation92_spill] sm:$0xff] %v6957_v61  ;;  %v2424_v40 = vsel %vm1978_vm6, %v1240_v6, 0.0  ;;  %v10721_v61 = vld [vmem:[#allocation48_spill] sm:$0xff] }
 0x150   : > { %v6961_v14 = vadd.f32 %v2424_v40, %v6812_v58  ;;  %5399 = vmatmul.msk.f32.gmra.mxu1 %vm339_vm1, %v6419_v28  ;;  %5432 = vmatmul.msk.f32.gmra.mxu2 %vm339_vm1, %v10686_v52 }
 0x151   : > { %5367 = vmatmul.msk.f32.gmra.mxu0 %vm339_vm1, %v10687_v27  ;;  %v10693_v27 = vld [vmem:[#allocation38_spill] sm:$0xff] }
 0x152   : > { %10685 = vst [vmem:[#allocation93_spill] sm:$0xff] %v6961_v14  ;;  %v10692_v14 = vld [vmem:[#allocation35_spill] sm:$0xff] }
 0x153   : > { %5333 = vmatmul.msk.f32.gmra.mxu3 %vm339_vm1, %v6362_v30  ;;  %v6971_v29 = vpop.f32.mrf.mxu2 }
 0x154   : > { %10688 = vst [vmem:[#allocation32_spill] sm:$0xff] %v6971_v29  ;;  %v1997_v29 = vsel %vm1978_vm6, %v10721_v61, 0.0 }
 0x155   : > { %v6973_v62 = vpop.f32.mrf.mxu1 }
 0x156   : > { %10689 = vst [vmem:[#allocation94_spill] sm:$0xff] %v6973_v62  ;;  %v1243_v6 = vpop.f32.mrf.mxu3  ;;  %v6975_v26 = vpop.f32.mrf.mxu0  ;;  %v10720_v62 = vld [vmem:[#allocation43_spill] sm:$0xff] }
 0x157   : > { %10690 = vst [vmem:[#allocation95_spill] sm:$0xff] %v6975_v26  ;;  %v2441_v58 = vsel %vm1978_vm6, %v1243_v6, 0.0 }
 0x158   : > { %v6979_v40 = vadd.f32 %v2441_v58, %v6831_v0  ;;  %5400 = vmatmul.msk.f32.gmra.mxu1 %vm339_vm1, %v10692_v14  ;;  %5433 = vmatmul.msk.f32.gmra.mxu2 %vm339_vm1, %v6484_v1  ;;  %v10699_v14 = vld [vmem:[#allocation40_spill] sm:$0xff] }
 0x159   : > { %5368 = vmatmul.msk.f32.gmra.mxu0 %vm339_vm1, %v10693_v27  ;;  %v10700_v27 = vld [vmem:[#allocation44_spill] sm:$0xff] }
 0x15a   : > { %10691 = vst [vmem:[#allocation96_spill] sm:$0xff] %v6979_v40  ;;  %v10698_v40 = vld [vmem:[#allocation39_spill] sm:$0xff] }
 0x15b   : > { %5334 = vmatmul.msk.f32.gmra.mxu3 %vm339_vm1, %v6423_v53  ;;  %v6989_v30 = vpop.f32.mrf.mxu2  ;;  %v3142_v53 = vld [vmem:[%s10415_s3] sm:$0xff] }
 0x15c   : > { %10694 = vst [vmem:[#allocation97_spill] sm:$0xff] %v6989_v30  ;;  %3230 = vmatpush.msra.mxu2 %v3142_v53  ;;  %v10706_v53 = vld [vmem:[#allocation49_spill] sm:$0xff]  ;;  %v10719_v30 = vld [vmem:[#allocation47_spill] sm:$0xff] }
 0x15d   : > { %v6991_v28 = vpop.f32.mrf.mxu1 }
 0x15e   : > { %10695 = vst [vmem:[#allocation98_spill] sm:$0xff] %v6991_v28  ;;  %v1246_v6 = vpop.f32.mrf.mxu3  ;;  %v6993_v26 = vpop.f32.mrf.mxu0 }
 0x15f   : > { %10696 = vst [vmem:[#allocation99_spill] sm:$0xff] %v6993_v26  ;;  %v2458_v0 = vsel %vm1978_vm6, %v1246_v6, 0.0 }
 0x160   : > { %v6997_v58 = vadd.f32 %v2458_v0, %v6850_v12  ;;  %5401 = vmatmul.msk.f32.gmra.mxu1 %vm339_vm1, %v10698_v40  ;;  %5434 = vmatmul.msk.f32.gmra.mxu2 %vm339_vm1, %v10699_v14  ;;  %v2655_v40 = vld [vmem:[%s10417_s5] sm:$0xf] }
 0x161   : > { %5369 = vmatmul.msk.f32.gmra.mxu0 %vm339_vm1, %v10700_v27  ;;  %5519 = vmatpush.msk.msra.mxu1 %vm781_vm0, %v2655_v40 }
 0x162   : > { %10697 = vst [vmem:[#allocation100_spill] sm:$0xff] %v6997_v58 }
 0x163   : > { %5335 = vmatmul.msk.f32.gmra.mxu3 %vm339_vm1, %v10686_v52  ;;  %v7010_v6 = vpop.f32.mrf.mxu2  ;;  %v10705_v52 = vld [vmem:[#allocation45_spill] sm:$0xff] }
 0x164   : > { %10701 = vst [vmem:[#allocation40_spill] sm:$0xff] %v7010_v6 }
 0x165   : > { %v7012_v12 = vpop.f32.mrf.mxu1 }
 0x166   : > { %10702 = vst [vmem:[#allocation101_spill] sm:$0xff] %v7012_v12  ;;  %v1249_v0 = vpop.f32.mrf.mxu3  ;;  %v7014_v58 = vpop.f32.mrf.mxu0 }
 0x167   : > { %10703 = vst [vmem:[#allocation102_spill] sm:$0xff] %v7014_v58  ;;  %v2475_v27 = vsel %vm1978_vm6, %v1249_v0, 0.0 }
 0x168   : > { %v7022_v26 = vadd.f32 %v2475_v27, %v6869_v18  ;;  %5402 = vmatmul.msk.f32.gmra.mxu1 %vm339_vm1, %v10705_v52  ;;  %5435 = vmatmul.msk.f32.gmra.mxu2 %vm339_vm1, %v6545_v56 }
 0x169   : > { %5370 = vmatmul.msk.f32.gmra.mxu0 %vm339_vm1, %v10706_v53  ;;  %v10711_v53 = vld [vmem:[#allocation55_spill] sm:$0xff] }
 0x16a   : > { %10704 = vst [vmem:[#allocation103_spill] sm:$0xff] %v7022_v26  ;;  %v10710_v26 = vld [vmem:[#allocation50_spill] sm:$0xff] }
 0x16b   : > { %5336 = vmatmul.msk.f32.gmra.mxu3 %vm339_vm1, %v6484_v1  ;;  %v7032_v58 = vpop.f32.mrf.mxu2 }
 0x16c   : > { %10707 = vst [vmem:[#allocation104_spill] sm:$0xff] %v7032_v58  ;;  %v10713_v58 = vld [vmem:[#allocation37_spill] sm:$0xff] }
 0x16d   : > { %v7034_v0 = vpop.f32.mrf.mxu1 }
 0x16e   : > { %10708 = vst [vmem:[#allocation105_spill] sm:$0xff] %v7034_v0  ;;  %v1252_v40 = vpop.f32.mrf.mxu3  ;;  %v1402_v12 = vpop.f32.mrf.mxu0 }
 0x16f   : > { %v2492_v18 = vsel %vm1978_vm6, %v1252_v40, 0.0 }
 0x170   : > { %v7038_v27 = vadd.f32 %v2492_v18, %v6888_v35  ;;  %5403 = vmatmul.msk.f32.gmra.mxu1 %vm339_vm1, %v10710_v26  ;;  %5436 = vmatmul.msk.f32.gmra.mxu2 %vm339_vm1, %v6547_v31  ;;  %v1979_v35 = vsel %vm1978_vm6, %v10713_v58, 0.0  ;;  %v10714_v18 = vld [vmem:[#allocation42_spill] sm:$0xff]  ;;  %v1982_v58 = vsel %vm1978_vm6, %v10719_v30, 0.0 }
 0x171   : > { %5371 = vmatmul.msk.f32.gmra.mxu0 %vm339_vm1, %v10711_v53  ;;  %v10716_v53 = vld [vmem:[#allocation56_spill] sm:$0xff]  ;;  %v10722_v30 = vld [vmem:[#allocation62_spill] sm:$0xff] }
 0x172   : > { %10709 = vst [vmem:[#allocation106_spill] sm:$0xff] %v7038_v27  ;;  %v1980_v27 = vsel %vm1978_vm6, %v10714_v18, 0.0 }
 0x173   : > { %5337 = vmatmul.msk.f32.gmra.mxu3 %vm339_vm1, %v10699_v14  ;;  %v7048_v1 = vpop.f32.mrf.mxu2  ;;  %v10717_v14 = vld [vmem:[#allocation64_spill] sm:$0xff]  ;;  %v1981_v28 = vadd.f32 %v1980_v27, %v1979_v35 }
 0x174   : > { %10712 = vst [vmem:[#allocation107_spill] sm:$0xff] %v7048_v1  ;;  %v10718_v1 = vld [vmem:[#allocation61_spill] sm:$0xff] }
 0x175   : > { %v1522_v52 = vpop.f32.mrf.mxu1 }
 0x176   : > { %v1255_v0 = vpop.f32.mrf.mxu3  ;;  %v1405_v40 = vpop.f32.mrf.mxu0 }
 0x177   : > { %v2509_v26 = vsel %vm1978_vm6, %v1255_v0, 0.0 }
 0x178   : > { %v7056_v6 = vadd.f32 %v2509_v26, %v6907_v48  ;;  %5404 = vmatmul.msk.f32.gmra.mxu1 %vm339_vm1, %v10716_v53  ;;  %5437 = vmatmul.msk.f32.gmra.mxu2 %vm339_vm1, %v10717_v14  ;;  %v1983_v48 = vadd.f32 %v1982_v58, %v1981_v28  ;;  %v1996_v53 = vsel %vm1978_vm6, %v10720_v62, 0.0  ;;  %v1988_v28 = vsel %vm1978_vm6, %v1522_v52, 0.0  ;;  %v10723_v58 = vld [vmem:[#allocation53_spill] sm:$0xff] }
 0x179   : > { %5372 = vmatmul.msk.f32.gmra.mxu0 %vm339_vm1, %v10718_v1  ;;  %v1986_v1 = vsel %vm1978_vm6, %v1402_v12, 0.0  ;;  %v1998_v62 = vadd.f32 %v1997_v29, %v1996_v53  ;;  %v1999_v61 = vsel %vm1978_vm6, %v10723_v58, 0.0  ;;  %v2013_v29 = vsel %vm1978_vm6, %v10725_v55, 0.0  ;;  %v10726_v53 = vld [vmem:[#allocation54_spill] sm:$0xff] }
 0x17a   : > { %10715 = vst [vmem:[#allocation37_spill] sm:$0xff] %v7056_v6 }
 0x17b   : > { %5338 = vmatmul.msk.f32.gmra.mxu3 %vm339_vm1, %v6545_v56  ;;  %v1642_v0 = vpop.f32.mrf.mxu2 }
 0x17c   : > { %v1990_v12 = vsel %vm1978_vm6, %v1642_v0, 0.0  ;;  %v10727_v0 = vld [vmem:[#allocation69_spill] sm:$0xff] }
 0x17d   : > { %v1525_v18 = vpop.f32.mrf.mxu1 }
 0x17e   : > { %v1282_v26 = vpop.f32.mrf.mxu3  ;;  %v1408_v6 = vpop.f32.mrf.mxu0 }
 0x17f   : > { %v1984_v27 = vsel %vm1978_vm6, %v1282_v26, 0.0 }
 0x180   : > { %v1985_v35 = vadd.f32 %v1984_v27, %v1983_v48  ;;  %5405 = vmatmul.msk.f32.gmra.mxu1 %vm339_vm1, %v10722_v30  ;;  %5438 = vmatmul.msk.f32.gmra.mxu2 %vm339_vm1, %v6610_v3  ;;  %v2000_v30 = vadd.f32 %v1999_v61, %v1998_v62  ;;  %v2005_v62 = vsel %vm1978_vm6, %v1525_v18, 0.0 }
 0x181   : > { %5373 = vmatmul.msk.f32.gmra.mxu0 %vm339_vm1, %v6634_v43 }
 0x182   : > { %v1987_v56 = vadd.f32 %v1986_v1, %v1985_v35  ;;  %v2014_v1 = vsel %vm1978_vm6, %v10726_v53, 0.0  ;;  %v2003_v35 = vsel %vm1978_vm6, %v1405_v40, 0.0 }
 0x183   : > { %5339 = vmatmul.msk.f32.gmra.mxu3 %vm339_vm1, %v6547_v31  ;;  %v1645_v48 = vpop.f32.mrf.mxu2  ;;  %v2015_v55 = vadd.f32 %v2014_v1, %v2013_v29  ;;  %v10733_v1 = vld [vmem:[#allocation60_spill] sm:$0xff] }
 0x184   : > { %v1989_v26 = vadd.f32 %v1988_v28, %v1987_v56  ;;  %v10728_v28 = vld [vmem:[#allocation77_spill] sm:$0xff]  ;;  %v10729_v56 = vld [vmem:[#allocation74_spill] sm:$0xff]  ;;  %v2007_v40 = vsel %vm1978_vm6, %v1645_v48, 0.0  ;;  %v10734_v48 = vld [vmem:[#allocation75_spill] sm:$0xff] }
 0x185   : > { %v1528_v27 = vpop.f32.mrf.mxu1 }
 0x186   : > { %v7086_v47 = vadd.f32 %v1990_v12, %v1989_v26  ;;  %v1285_v52 = vpop.f32.mrf.mxu3  ;;  %v1411_v9 = vpop.f32.mrf.mxu0  ;;  %v10730_v12 = vld [vmem:[#allocation59_spill] sm:$0xff] }
 0x187   : > { %v2001_v31 = vsel %vm1978_vm6, %v1285_v52, 0.0  ;;  %v2016_v26 = vsel %vm1978_vm6, %v10730_v12, 0.0 }
 0x188   : > { %10724 = vst [vmem:[#allocation42_spill] sm:$0xff] %v7086_v47  ;;  %v2002_v58 = vadd.f32 %v2001_v31, %v2000_v30  ;;  %5406 = vmatmul.msk.f32.gmra.mxu1 %vm339_vm1, %v10727_v0  ;;  %5439 = vmatmul.msk.f32.gmra.mxu2 %vm339_vm1, %v10728_v28  ;;  %v2017_v31 = vadd.f32 %v2016_v26, %v2015_v55  ;;  %v10732_v0 = vld [vmem:[#allocation57_spill] sm:$0xff]  ;;  %v10736_v26 = vld [vmem:[#allocation66_spill] sm:$0xff] }
 0x189   : > { %5374 = vmatmul.msk.f32.gmra.mxu0 %vm339_vm1, %v10729_v56  ;;  %v2030_v29 = vsel %vm1978_vm6, %v10732_v0, 0.0  ;;  %v10735_v55 = vld [vmem:[#allocation81_spill] sm:$0xff]  ;;  %v10738_v56 = vld [vmem:[#allocation63_spill] sm:$0xff] }
 0x18a   : > { %v2004_v61 = vadd.f32 %v2003_v35, %v2002_v58  ;;  %v2031_v35 = vsel %vm1978_vm6, %v10733_v1, 0.0  ;;  %v2020_v58 = vsel %vm1978_vm6, %v1408_v6, 0.0 }
 0x18b   : > { %5340 = vmatmul.msk.f32.gmra.mxu3 %vm339_vm1, %v10717_v14  ;;  %v1648_v30 = vpop.f32.mrf.mxu2  ;;  %v2032_v0 = vadd.f32 %v2031_v35, %v2030_v29  ;;  %v2047_v29 = vsel %vm1978_vm6, %v10738_v56, 0.0  ;;  %v10739_v35 = vld [vmem:[#allocation67_spill] sm:$0xff] }
 0x18c   : > { %v2006_v52 = vadd.f32 %v2005_v62, %v2004_v61  ;;  %v2022_v62 = vsel %vm1978_vm6, %v1528_v27, 0.0  ;;  %v2024_v6 = vsel %vm1978_vm6, %v1648_v30, 0.0  ;;  %v10740_v30 = vld [vmem:[#allocation82_spill] sm:$0xff] }
 0x18d   : > { %v1531_v53 = vpop.f32.mrf.mxu1 }
 0x18e   : > { %v7106_v47 = vadd.f32 %v2007_v40, %v2006_v52  ;;  %v1288_v18 = vpop.f32.mrf.mxu3  ;;  %v1414_v43 = vpop.f32.mrf.mxu0  ;;  %v2033_v40 = vsel %vm1978_vm6, %v10736_v26, 0.0 }
 0x18f   : > { %v2018_v14 = vsel %vm1978_vm6, %v1288_v18, 0.0  ;;  %v2034_v1 = vadd.f32 %v2033_v40, %v2032_v0  ;;  %v2039_v0 = vsel %vm1978_vm6, %v1531_v53, 0.0  ;;  %v10741_v40 = vld [vmem:[#allocation72_spill] sm:$0xff] }
 0x190   : > { %10731 = vst [vmem:[#allocation64_spill] sm:$0xff] %v7106_v47  ;;  %v2019_v12 = vadd.f32 %v2018_v14, %v2017_v31  ;;  %5407 = vmatmul.msk.f32.gmra.mxu1 %vm339_vm1, %v10734_v48  ;;  %5440 = vmatmul.msk.f32.gmra.mxu2 %vm339_vm1, %v6675_v13 }
 0x191   : > { %5375 = vmatmul.msk.f32.gmra.mxu0 %vm339_vm1, %v10735_v55  ;;  %v10743_v55 = vld [vmem:[#allocation70_spill] sm:$0xff] }
 0x192   : > { %v2021_v61 = vadd.f32 %v2020_v58, %v2019_v12  ;;  %v2048_v58 = vsel %vm1978_vm6, %v10739_v35, 0.0  ;;  %v2037_v12 = vsel %vm1978_vm6, %v1411_v9, 0.0 }
 0x193   : > { %5341 = vmatmul.msk.f32.gmra.mxu3 %vm339_vm1, %v6610_v3  ;;  %v1651_v52 = vpop.f32.mrf.mxu2  ;;  %v2049_v56 = vadd.f32 %v2048_v58, %v2047_v29  ;;  %v2064_v29 = vsel %vm1978_vm6, %v10743_v55, 0.0  ;;  %v10744_v58 = vld [vmem:[#allocation73_spill] sm:$0xff] }
 0x194   : > { %v2023_v31 = vadd.f32 %v2022_v62, %v2021_v61  ;;  %v5859_v62 = vld [vmem:[#allocation2 + $0x120] sm:$0xff]  ;;  %v2041_v9 = vsel %vm1978_vm6, %v1651_v52, 0.0  ;;  %v5860_v52 = vld [vmem:[#allocation2 + $0x128] sm:$0xff] }
 0x195   : > { %v1534_v18 = vpop.f32.mrf.mxu1 }
 0x196   : > { %v7126_v14 = vadd.f32 %v2024_v6, %v2023_v31  ;;  %v1291_v27 = vpop.f32.mrf.mxu3  ;;  %v1417_v47 = vpop.f32.mrf.mxu0  ;;  %v2050_v6 = vsel %vm1978_vm6, %v10741_v40, 0.0 }
 0x197   : > { %v2035_v3 = vsel %vm1978_vm6, %v1291_v27, 0.0  ;;  %v2051_v35 = vadd.f32 %v2050_v6, %v2049_v56  ;;  %v10745_v56 = vld [vmem:[#allocation17_spill] sm:$0xff]  ;;  %v10746_v6 = vld [vmem:[#allocation79_spill] sm:$0xff] }
 0x198   : > { %10737 = vst [vmem:[#allocation47_spill] sm:$0xff] %v7126_v14  ;;  %v2036_v26 = vadd.f32 %v2035_v3, %v2034_v1  ;;  %5408 = vmatmul.msk.f32.gmra.mxu1 %vm339_vm1, %v10740_v30  ;;  %5441 = vmatmul.msk.f32.gmra.mxu2 %vm339_vm1, %v5859_v62 }
 0x199   : > { %5376 = vmatmul.msk.f32.gmra.mxu0 %vm339_vm1, %v6729_v41  ;;  %v10748_v41 = vld [vmem:[#allocation76_spill] sm:$0xff] }
 0x19a   : > { %v2038_v61 = vadd.f32 %v2037_v12, %v2036_v26  ;;  %v2065_v12 = vsel %vm1978_vm6, %v10744_v58, 0.0  ;;  %v2054_v26 = vsel %vm1978_vm6, %v1414_v43, 0.0 }
 0x19b   : > { %5342 = vmatmul.msk.f32.gmra.mxu3 %vm339_vm1, %v10728_v28  ;;  %v1654_v31 = vpop.f32.mrf.mxu2  ;;  %v2066_v55 = vadd.f32 %v2065_v12, %v2064_v29  ;;  %v2081_v29 = vsel %vm1978_vm6, %v10748_v41, 0.0  ;;  %v10749_v12 = vld [vmem:[#allocation80_spill] sm:$0xff] }
 0x19c   : > { %v2040_v1 = vadd.f32 %v2039_v0, %v2038_v61  ;;  %v2056_v0 = vsel %vm1978_vm6, %v1534_v18, 0.0  ;;  %v2058_v43 = vsel %vm1978_vm6, %v1654_v31, 0.0  ;;  %v10750_v31 = vld [vmem:[#allocation46_spill] sm:$0xff] }
 0x19d   : > { %v1537_v27 = vpop.f32.mrf.mxu1 }
 0x19e   : > { %v7145_v3 = vadd.f32 %v2041_v9, %v2040_v1  ;;  %v1294_v53 = vpop.f32.mrf.mxu3  ;;  %v1420_v14 = vpop.f32.mrf.mxu0  ;;  %v2067_v9 = vsel %vm1978_vm6, %v10746_v6, 0.0 }
 0x19f   : > { %v2052_v28 = vsel %vm1978_vm6, %v1294_v53, 0.0  ;;  %v2068_v58 = vadd.f32 %v2067_v9, %v2066_v55  ;;  %v2073_v55 = vsel %vm1978_vm6, %v1537_v27, 0.0 }
 0x1a0   : > { %10742 = vst [vmem:[#allocation43_spill] sm:$0xff] %v7145_v3  ;;  %v2053_v40 = vadd.f32 %v2052_v28, %v2051_v35  ;;  %5409 = vmatmul.msk.f32.gmra.mxu1 %vm339_vm1, %v6732_v15  ;;  %5442 = vmatmul.msk.f32.gmra.mxu2 %vm339_vm1, %v5860_v52 }
 0x1a1   : > { %5377 = vmatmul.msk.f32.gmra.mxu0 %vm339_vm1, %v10745_v56  ;;  %v10752_v56 = vld [vmem:[#allocation83_spill] sm:$0xff] }
 0x1a2   : > { %v2055_v61 = vadd.f32 %v2054_v26, %v2053_v40  ;;  %v2082_v26 = vsel %vm1978_vm6, %v10749_v12, 0.0  ;;  %v2071_v40 = vsel %vm1978_vm6, %v1417_v47, 0.0 }
 0x1a3   : > { %5343 = vmatmul.msk.f32.gmra.mxu3 %vm339_vm1, %v6675_v13  ;;  %v1657_v1 = vpop.f32.mrf.mxu2  ;;  %v2083_v41 = vadd.f32 %v2082_v26, %v2081_v29  ;;  %v2098_v29 = vsel %vm1978_vm6, %v10752_v56, 0.0  ;;  %v2099_v26 = vsel %vm1978_vm6, %v6726_v38, 0.0  ;;  %v2101_v38 = vsel %vm1978_vm6, %v6749_v49, 0.0 }
 0x1a4   : > { %v2057_v35 = vadd.f32 %v2056_v0, %v2055_v61  ;;  %v5861_v0 = vld [vmem:[#allocation2 + $0x138] sm:$0xff]  ;;  %v2075_v47 = vsel %vm1978_vm6, %v1657_v1, 0.0  ;;  %v2100_v56 = vadd.f32 %v2099_v26, %v2098_v29  ;;  %v2115_v29 = vsel %vm1978_vm6, %v6736_v59, 0.0 }
 0x1a5   : > { %v1540_v53 = vpop.f32.mrf.mxu1  ;;  %v10751_v61 = vld [vmem:[#allocation20_spill] sm:$0xff]  ;;  %v2116_v49 = vsel %vm1978_vm6, %v6751_v20, 0.0 }
 0x1a6   : > { %v7164_v28 = vadd.f32 %v2058_v43, %v2057_v35  ;;  %v1297_v18 = vpop.f32.mrf.mxu3  ;;  %v1423_v3 = vpop.f32.mrf.mxu0  ;;  %v2084_v43 = vsel %vm1978_vm6, %v6723_v7, 0.0  ;;  %v2088_v7 = vsel %vm1978_vm6, %v1420_v14, 0.0  ;;  %v2117_v59 = vadd.f32 %v2116_v49, %v2115_v29 }
 0x1a7   : > { %v2069_v13 = vsel %vm1978_vm6, %v1297_v18, 0.0  ;;  %v2085_v12 = vadd.f32 %v2084_v43, %v2083_v41  ;;  %v10754_v41 = vld [vmem:[#allocation23_spill] sm:$0xff]  ;;  %v2132_v29 = vsel %vm1978_vm6, %v6755_v24, 0.0  ;;  %v2135_v24 = vsel %vm1978_vm6, %v6784_v32, 0.0  ;;  %v5865_v32 = vld [vmem:[#allocation2 + $0x168] sm:$0xff] }
 0x1a8   : > { %10747 = vst [vmem:[#allocation48_spill] sm:$0xff] %v7164_v28  ;;  %v2070_v6 = vadd.f32 %v2069_v13, %v2068_v58  ;;  %5410 = vmatmul.msk.f32.gmra.mxu1 %vm339_vm1, %v10750_v31  ;;  %5443 = vmatmul.msk.f32.gmra.mxu2 %vm339_vm1, %v5861_v0 }
 0x1a9   : > { %5378 = vmatmul.msk.f32.gmra.mxu0 %vm339_vm1, %v10751_v61 }
 0x1aa   : > { %v2072_v9 = vadd.f32 %v2071_v40, %v2070_v6  ;;  %v10753_v40 = vld [vmem:[#allocation52_spill] sm:$0xff]  ;;  %v5862_v6 = vld [vmem:[#allocation2 + $0x140] sm:$0xff] }
 0x1ab   : > { %5344 = vmatmul.msk.f32.gmra.mxu3 %vm339_vm1, %v5859_v62  ;;  %v1660_v18 = vpop.f32.mrf.mxu2 }
 0x1ac   : > { %v2074_v35 = vadd.f32 %v2073_v55, %v2072_v9  ;;  %v2090_v55 = vsel %vm1978_vm6, %v1540_v53, 0.0  ;;  %v2092_v14 = vsel %vm1978_vm6, %v1660_v18, 0.0 }
 0x1ad   : > { %v1543_v58 = vpop.f32.mrf.mxu1 }
 0x1ae   : > { %v7182_v13 = vadd.f32 %v2075_v47, %v2074_v35  ;;  %v1300_v28 = vpop.f32.mrf.mxu3  ;;  %v7184_v27 = vpop.f32.mrf.mxu0  ;;  %v2102_v47 = vadd.f32 %v2101_v38, %v2100_v56  ;;  %v2107_v56 = vsel %vm1978_vm6, %v1543_v58, 0.0  ;;  %v2118_v38 = vsel %vm1978_vm6, %v6765_v60, 0.0 }
 0x1af   : > { %v2086_v62 = vsel %vm1978_vm6, %v1300_v28, 0.0  ;;  %v2119_v58 = vadd.f32 %v2118_v38, %v2117_v59  ;;  %v2133_v60 = vsel %vm1978_vm6, %v6767_v16, 0.0  ;;  %v2149_v38 = vsel %vm1978_vm6, %v6769_v39, 0.0 }
 0x1b0   : > { %v2087_v1 = vadd.f32 %v2086_v62, %v2085_v12  ;;  %5411 = vmatmul.msk.f32.gmra.mxu1 %vm339_vm1, %v10753_v40  ;;  %5444 = vmatmul.msk.f32.gmra.mxu2 %vm339_vm1, %v5862_v6  ;;  %v2152_v39 = vsel %vm1978_vm6, %v6803_v33, 0.0  ;;  %v5866_v33 = vld [vmem:[#allocation2 + $0x170] sm:$0xff] }
 0x1b1   : > { %5379 = vmatmul.msk.f32.gmra.mxu0 %vm339_vm1, %v10754_v41 }
 0x1b2   : > { %v2089_v9 = vadd.f32 %v2088_v7, %v2087_v1  ;;  %v10755_v7 = vld [vmem:[#allocation58_spill] sm:$0xff]  ;;  %v5863_v1 = vld [vmem:[#allocation2 + $0x150] sm:$0xff] }
 0x1b3   : > { %5345 = vmatmul.msk.f32.gmra.mxu3 %vm339_vm1, %v5860_v52  ;;  %v2105_v52 = vsel %vm1978_vm6, %v1423_v3, 0.0  ;;  %v1663_v62 = vpop.f32.mrf.mxu2  ;;  %v338_v3 = vld [vmem:[%s6074_s19 + $0xf8] sm:$0xff] }
 0x1b4   : > { %v2091_v28 = vadd.f32 %v2090_v55, %v2089_v9  ;;  %v337_v55 = vld [vmem:[%s6074_s19 + $0xf0] sm:$0xff]  ;;  %v10756_v9 = vld [vmem:[#allocation26_spill] sm:$0xff]  ;;  %417 = vst.msk [vmem:[#allocation2 + $0x189] sm:$0xff] %vm339_vm1, %v338_v3 }
 0x1b5   : > { %v7202_v43 = vpop.f32.mrf.mxu1  ;;  %416 = vst.msk [vmem:[#allocation2 + $0x181] sm:$0xff] %vm339_vm1, %v337_v55 }
 0x1b6   : > { %v7204_v35 = vadd.f32 %v2092_v14, %v2091_v28  ;;  %v1303_v53 = vpop.f32.mrf.mxu3  ;;  %v7206_v12 = vpop.f32.mrf.mxu0  ;;  %v2109_v14 = vsel %vm1978_vm6, %v1663_v62, 0.0  ;;  %v10758_v62 = vld [vmem:[#allocation29_spill] sm:$0xff] }
 0x1b7   : > { %v2103_v18 = vsel %vm1978_vm6, %v1303_v53, 0.0 }
 0x1b8   : > { %v2104_v26 = vadd.f32 %v2103_v18, %v2102_v47  ;;  %5412 = vmatmul.msk.f32.gmra.mxu1 %vm339_vm1, %v10755_v7  ;;  %5445 = vmatmul.msk.f32.gmra.mxu2 %vm339_vm1, %v5863_v1 }
 0x1b9   : > { %5380 = vmatmul.msk.f32.gmra.mxu0 %vm339_vm1, %v10756_v9 }
 0x1ba   : > { %v2106_v20 = vadd.f32 %v2105_v52, %v2104_v26  ;;  %v10757_v52 = vld [vmem:[#allocation65_spill] sm:$0xff]  ;;  %v5864_v26 = vld [vmem:[#allocation2 + $0x158] sm:$0xff] }
 0x1bb   : > { %5346 = vmatmul.msk.f32.gmra.mxu3 %vm339_vm1, %v5861_v0 }
 0x1bc   : > { %v2108_v28 = vadd.f32 %v2107_v56, %v2106_v20  ;;  %v2134_v56 = vadd.f32 %v2133_v60, %v2132_v29 }
 0x1bd   : > { %v7228_v47 = vpop.f32.mrf.mxu1 }
 0x1be   : > { %v7230_v53 = vadd.f32 %v2109_v14, %v2108_v28  ;;  %v1306_v18 = vpop.f32.mrf.mxu3  ;;  %v7232_v55 = vpop.f32.mrf.mxu0  ;;  %v2136_v59 = vadd.f32 %v2135_v24, %v2134_v56  ;;  %v2150_v14 = vsel %vm1978_vm6, %v6786_v46, 0.0  ;;  %v2166_v24 = vsel %vm1978_vm6, %v6788_v36, 0.0 }
 0x1bf   : > { %v2120_v0 = vsel %vm1978_vm6, %v1306_v18, 0.0  ;;  %v10759_v18 = vld [vmem:[#allocation71_spill] sm:$0xff]  ;;  %v2151_v29 = vadd.f32 %v2150_v14, %v2149_v38  ;;  %v10763_v14 = vld [vmem:[#allocation78_spill] sm:$0xff]  ;;  %v2169_v36 = vsel %vm1978_vm6, %v6822_v50, 0.0  ;;  %v10768_v50 = vld [vmem:[#allocation84_spill] sm:$0xff] }
 0x1c0   : > { %v7239_v49 = vadd.f32 %v2120_v0, %v2119_v58  ;;  %5413 = vmatmul.msk.f32.gmra.mxu1 %vm339_vm1, %v10757_v52  ;;  %5446 = vmatmul.msk.f32.gmra.mxu2 %vm339_vm1, %v5864_v26 }
 0x1c1   : > { %5381 = vmatmul.msk.f32.gmra.mxu0 %vm339_vm1, %v10758_v62  ;;  %v2153_v60 = vadd.f32 %v2152_v39, %v2151_v29  ;;  %v466_v29 = vld [vmem:[#allocation2 + $0x180] sm:$0xff] }
 0x1c3   : > { %5347 = vmatmul.msk.f32.gmra.mxu3 %vm339_vm1, %v5862_v6  ;;  %v10760_v6 = vld [vmem:[#allocation33_spill] sm:$0xff] }
 0x1c5   : > { %v7249_v16 = vpop.f32.mrf.mxu1 }
 0x1c6   : > { %v1309_v20 = vpop.f32.mrf.mxu3  ;;  %v7251_v3 = vpop.f32.mrf.mxu0 }
 0x1c7   : > { %v2137_v28 = vsel %vm1978_vm6, %v1309_v20, 0.0 }
 0x1c8   : > { %v7258_v58 = vadd.f32 %v2137_v28, %v2136_v59  ;;  %5414 = vmatmul.msk.f32.gmra.mxu1 %vm339_vm1, %v10759_v18  ;;  %5447 = vmatmul.msk.f32.gmra.mxu2 %vm339_vm1, %v5865_v32  ;;  %v2167_v59 = vsel %vm1978_vm6, %v6805_v57, 0.0 }
 0x1c9   : > { %5382 = vmatmul.msk.f32.gmra.mxu0 %vm339_vm1, %v10760_v6  ;;  %v2168_v28 = vadd.f32 %v2167_v59, %v2166_v24  ;;  %v467_v59 = vld [vmem:[#allocation2 + $0x188] sm:$0xff] }
 0x1cb   : > { %5348 = vmatmul.msk.f32.gmra.mxu3 %vm339_vm1, %v5863_v1  ;;  %v10764_v1 = vld [vmem:[#allocation36_spill] sm:$0xff]  ;;  %v2170_v39 = vadd.f32 %v2169_v36, %v2168_v28  ;;  %v596_v36 = vrot.slane %v466_v29, 1 }
 0x1cd   : > { %v7268_v46 = vpop.f32.mrf.mxu1 }
 0x1ce   : > { %10761 = vst [vmem:[#allocation53_spill] sm:$0xff] %v7268_v46  ;;  %v1312_v0 = vpop.f32.mrf.mxu3  ;;  %v7270_v56 = vpop.f32.mrf.mxu0 }
 0x1cf   : > { %10762 = vst [vmem:[#allocation51_spill] sm:$0xff] %v7270_v56  ;;  %v2154_v20 = vsel %vm1978_vm6, %v1312_v0, 0.0  ;;  %v2184_v56 = vsel %vm1978_vm6, %v6824_v63, 0.0 }
 0x1d0   : > { %v7277_v38 = vadd.f32 %v2154_v20, %v2153_v60  ;;  %5415 = vmatmul.msk.f32.gmra.mxu1 %vm339_vm1, %v10763_v14  ;;  %5448 = vmatmul.msk.f32.gmra.mxu2 %vm339_vm1, %v5866_v33  ;;  %v2183_v20 = vsel %vm1978_vm6, %v6807_v2, 0.0  ;;  %v2186_v2 = vsel %vm1978_vm6, %v6841_v51, 0.0  ;;  %v468_v51 = vld [vmem:[#allocation2 + $0x190] sm:$0x3] }
 0x1d1   : > { %5383 = vmatmul.msk.f32.gmra.mxu0 %vm339_vm1, %v10764_v1  ;;  %v2185_v28 = vadd.f32 %v2184_v56, %v2183_v20  ;;  %v2201_v56 = vsel %vm1978_vm6, %v6843_v11, 0.0  ;;  %v2203_v11 = vsel %vm1978_vm6, %v6860_v4, 0.0  ;;  %v2218_v4 = vsel %vm1978_vm6, %v6862_v17, 0.0 }
 0x1d3   : > { %5349 = vmatmul.msk.f32.gmra.mxu3 %vm339_vm1, %v5864_v26  ;;  %v10769_v26 = vld [vmem:[#allocation41_spill] sm:$0xff] }
 0x1d5   : > { %v7287_v57 = vpop.f32.mrf.mxu1 }
 0x1d6   : > { %10765 = vst [vmem:[#allocation54_spill] sm:$0xff] %v7287_v57  ;;  %v1315_v60 = vpop.f32.mrf.mxu3  ;;  %v7289_v0 = vpop.f32.mrf.mxu0 }
 0x1d7   : > { %10766 = vst [vmem:[#allocation77_spill] sm:$0xff] %v7289_v0  ;;  %v2171_v24 = vsel %vm1978_vm6, %v1315_v60, 0.0  ;;  %v597_v0 = vrot.slane %v467_v59, 1 }
 0x1d8   : > { %v7296_v46 = vadd.f32 %v2171_v24, %v2170_v39  ;;  %5416 = vmatmul.msk.f32.gmra.mxu1 %vm339_vm1, %v10768_v50  ;;  %5449 = vmatmul.msk.f32.gmra.mxu2 %vm339_vm1, %v466_v29  ;;  %v2187_v39 = vadd.f32 %v2186_v2, %v2185_v28  ;;  %v690_v28 = vrot.slane %v466_v29, 2 }
 0x1d9   : > { %5384 = vmatmul.msk.f32.gmra.mxu0 %vm339_vm1, %v10769_v26  ;;  %v7311_v57 = vsel %vm520_vm3, %v596_v36, %v597_v0  ;;  %v2200_v26 = vsel %vm1978_vm6, %v6826_v44, 0.0  ;;  %v691_v36 = vrot.slane %v467_v59, 2  ;;  %v599_v44 = vrot.slane %v468_v51, 1 }
 0x1da   : > { %10767 = vst [vmem:[#allocation59_spill] sm:$0xff] %v7296_v46  ;;  %v2202_v2 = vadd.f32 %v2201_v56, %v2200_v26  ;;  %v2217_v26 = vsel %vm1978_vm6, %v6845_v19, 0.0  ;;  %v2220_v19 = vsel %vm1978_vm6, %v6879_v5, 0.0 }
 0x1db   : > { %5350 = vmatmul.msk.f32.gmra.mxu3 %vm339_vm1, %v5865_v32  ;;  %10772 = vst [vmem:[#allocation75_spill] sm:$0xff] %v7311_v57  ;;  %v10774_v32 = vld [vmem:[#allocation86_spill] sm:$0xff] }
 0x1dd   : > { %v7306_v63 = vpop.f32.mrf.mxu1 }
 0x1de   : > { %10770 = vst [vmem:[#allocation57_spill] sm:$0xff] %v7306_v63  ;;  %v1318_v60 = vpop.f32.mrf.mxu3  ;;  %v7308_v24 = vpop.f32.mrf.mxu0 }
 0x1df   : > { %10771 = vst [vmem:[#allocation60_spill] sm:$0xff] %v7308_v24  ;;  %v2188_v20 = vsel %vm1978_vm6, %v1318_v60, 0.0  ;;  %v2204_v24 = vadd.f32 %v2203_v11, %v2202_v2 }
 0x1e0   : > { %v7318_v46 = vadd.f32 %v2188_v20, %v2187_v39  ;;  %5417 = vmatmul.msk.f32.gmra.mxu1 %vm339_vm1, %v10774_v32  ;;  %5450 = vmatmul.msk.f32.gmra.mxu2 %vm339_vm1, %v467_v59  ;;  %v7331_v39 = vsel %vm609_vm4, %v690_v28, %v691_v36  ;;  %v7333_v20 = vld [vmem:[#allocation2 + $0x198] sm:$0xff]  ;;  %v2219_v28 = vadd.f32 %v2218_v4, %v2217_v26  ;;  %v2235_v26 = vsel %vm1978_vm6, %v6881_v34, 0.0 }
 0x1e1   : > { %5385 = vmatmul.msk.f32.gmra.mxu0 %vm339_vm1, %v7311_v57  ;;  %v7338_v57 = vsel %vm520_vm3, %v597_v0, %v599_v44  ;;  %v693_v0 = vrot.slane %v468_v51, 2  ;;  %v2234_v51 = vsel %vm1978_vm6, %v6864_v37, 0.0  ;;  %v2237_v37 = vsel %vm1978_vm6, %v6898_v22, 0.0  ;;  %v10783_v22 = vld [vmem:[#allocation10_spill] sm:$0xff] }
 0x1e2   : > { %10773 = vst [vmem:[#allocation66_spill] sm:$0xff] %v7318_v46  ;;  %v2221_v2 = vadd.f32 %v2220_v19, %v2219_v28  ;;  %v2236_v4 = vadd.f32 %v2235_v26, %v2234_v51  ;;  %v2251_v19 = vsel %vm1978_vm6, %v6883_v42, 0.0  ;;  %v10782_v26 = vld [vmem:[#allocation5_spill] sm:$0xff] }
 0x1e3   : > { %5351 = vmatmul.msk.f32.gmra.mxu3 %vm339_vm1, %v5866_v33 }
 0x1e5   : > { %v7328_v60 = vpop.f32.mrf.mxu1 }
 0x1e6   : > { %v1321_v63 = vpop.f32.mrf.mxu3  ;;  %v7335_v46 = vpop.f32.mrf.mxu0 }
 0x1e7   : > { %10775 = vst [vmem:[#allocation63_spill] sm:$0xff] %v7335_v46  ;;  %v2205_v33 = vsel %vm1978_vm6, %v1321_v63, 0.0  ;;  %v7359_v63 = vsel %vm609_vm4, %v691_v36, %v693_v0  ;;  %v10778_v36 = vld [vmem:[#allocation8_spill] sm:$0xff] }
 0x1e8   : > { %v7345_v56 = vadd.f32 %v2205_v33, %v2204_v24  ;;  %5418 = vmatmul.msk.f32.gmra.mxu1 %vm339_vm1, %v7331_v39  ;;  %5451 = vmatmul.msk.f32.gmra.mxu2 %vm339_vm1, %v7333_v20  ;;  %v7361_v24 = vld [vmem:[#allocation2 + $0x1a0] sm:$0xff]  ;;  %v2238_v33 = vadd.f32 %v2237_v37, %v2236_v4 }
 0x1e9   : > { %5386 = vmatmul.msk.f32.gmra.mxu0 %vm339_vm1, %v7338_v57 }
 0x1eb   : > { %5352 = vmatmul.msk.f32.gmra.mxu3 %vm339_vm1, %v466_v29 }
 0x1ed   : > { %v7356_v17 = vpop.f32.mrf.mxu1 }
 0x1ee   : > { %10776 = vst [vmem:[#allocation67_spill] sm:$0xff] %v7356_v17  ;;  %v1324_v44 = vpop.f32.mrf.mxu3  ;;  %v7363_v11 = vpop.f32.mrf.mxu0 }
 0x1ef   : > { %10777 = vst [vmem:[#allocation82_spill] sm:$0xff] %v7363_v11  ;;  %v2222_v5 = vsel %vm1978_vm6, %v1324_v44, 0.0  ;;  %v10896_v11 = vld [vmem:[#allocation74_spill] sm:$0xff] }
 0x1f0   : > { %v7370_v29 = vadd.f32 %v2222_v5, %v2221_v2  ;;  %5419 = vmatmul.msk.f32.gmra.mxu1 %vm339_vm1, %v7359_v63  ;;  %5452 = vmatmul.msk.f32.gmra.mxu2 %vm339_vm1, %v7361_v24  ;;  %v2252_v2 = vsel %vm1978_vm6, %v6900_v45, 0.0  ;;  %v2254_v5 = vsel %vm1978_vm6, %v6917_v23, 0.0  ;;  %v10788_v23 = vld [vmem:[#allocation6_spill] sm:$0xff] }
 0x1f1   : > { %5487 = vmatmul.msk.f32.vlgmr.msra.gmra.mxu0 %vm339_vm1, %v10778_v36  ;;  %v10784_v36 = vld [vmem:[#allocation7_spill] sm:$0xff] }
 0x1f3   : > { %5353 = vmatmul.msk.f32.gmra.mxu3 %vm339_vm1, %v467_v59  ;;  %v2253_v59 = vadd.f32 %v2252_v2, %v2251_v19 }
 0x1f5   : > { %v7381_v34 = vpop.f32.mrf.mxu1  ;;  %v2255_v45 = vadd.f32 %v2254_v5, %v2253_v59  ;;  %v10790_v59 = vld [vmem:[#allocation9_spill] sm:$0xff] }
 0x1f6   : > { %10779 = vst [vmem:[#allocation72_spill] sm:$0xff] %v7381_v34  ;;  %v1327_v0 = vpop.f32.mrf.mxu3  ;;  %v7383_v28 = vpop.f32.mrf.mxu0 }
 0x1f7   : > { %10780 = vst [vmem:[#allocation70_spill] sm:$0xff] %v7383_v28  ;;  %v2239_v44 = vsel %vm1978_vm6, %v1327_v0, 0.0  ;;  %v2269_v0 = vsel %vm1978_vm6, %v6919_v8, 0.0 }
 0x1f8   : > { %v7390_v51 = vadd.f32 %v2239_v44, %v2238_v33  ;;  %5520 = vmatmul.msk.f32.vlgmr.msra.gmra.mxu1 %vm339_vm1, %v10782_v26  ;;  %v2268_v33 = vsel %vm1978_vm6, %v6902_v10, 0.0  ;;  %v10789_v44 = vld [vmem:[#allocation12_spill] sm:$0xff] }
 0x1f9   : > { %5488 = vmatmul.msk.f32.gmra.mxu0 %vm339_vm1, %v10783_v22  ;;  %v2270_v26 = vadd.f32 %v2269_v0, %v2268_v33  ;;  %v2271_v22 = vsel %vm1978_vm6, %v6935_v54, 0.0  ;;  %v10794_v54 = vld [vmem:[#allocation14_spill] sm:$0xff] }
 0x1fa   : > { %10781 = vst [vmem:[#allocation73_spill] sm:$0xff] %v7390_v51 }
 0x1fb   : > { %5454 = vmatmul.msk.f32.vlgmr.msra.gmra.mxu3 %vm339_vm1, %v10784_v36  ;;  %v2272_v8 = vadd.f32 %v2271_v22, %v2270_v26  ;;  %v10796_v22 = vld [vmem:[#allocation11_spill] sm:$0xff] }
 0x1fd   : > { %v7400_v42 = vpop.f32.mrf.mxu1 }
 0x1fe   : > { %10785 = vst [vmem:[#allocation79_spill] sm:$0xff] %v7400_v42  ;;  %v1330_v4 = vpop.f32.mrf.mxu3  ;;  %v7402_v37 = vpop.f32.mrf.mxu0  ;;  %v10824_v42 = vld [vmem:[#allocation101_spill] sm:$0xff] }
 0x1ff   : > { %10786 = vst [vmem:[#allocation76_spill] sm:$0xff] %v7402_v37  ;;  %v2256_v19 = vsel %vm1978_vm6, %v1330_v4, 0.0 }
 0x200   : > { %v7409_v2 = vadd.f32 %v2256_v19, %v2255_v45  ;;  %5521 = vmatmul.msk.f32.gmra.mxu1 %vm339_vm1, %v10788_v23  ;;  %v2285_v45 = vsel %vm1978_vm6, %v6921_v21, 0.0  ;;  %v2286_v19 = vsel %vm1978_vm6, %v6937_v25, 0.0 }
 0x201   : > { %5489 = vmatmul.msk.f32.gmra.mxu0 %vm339_vm1, %v10789_v44  ;;  %v2287_v23 = vadd.f32 %v2286_v19, %v2285_v45  ;;  %v10795_v44 = vld [vmem:[#allocation90_spill] sm:$0xff] }
 0x202   : > { %10787 = vst [vmem:[#allocation80_spill] sm:$0xff] %v7409_v2  ;;  %v2288_v26 = vsel %vm1978_vm6, %v10795_v44, 0.0  ;;  %v10802_v44 = vld [vmem:[#allocation16_spill] sm:$0xff] }
 0x203   : > { %5455 = vmatmul.msk.f32.gmra.mxu3 %vm339_vm1, %v10790_v59  ;;  %v2289_v25 = vadd.f32 %v2288_v26, %v2287_v23  ;;  %v10803_v26 = vld [vmem:[#allocation32_spill] sm:$0xff] }
 0x205   : > { %v7419_v10 = vpop.f32.mrf.mxu1 }
 0x206   : > { %10791 = vst [vmem:[#allocation46_spill] sm:$0xff] %v7419_v10  ;;  %v1333_v5 = vpop.f32.mrf.mxu3  ;;  %v7421_v4 = vpop.f32.mrf.mxu0 }
 0x207   : > { %10792 = vst [vmem:[#allocation20_spill] sm:$0xff] %v7421_v4  ;;  %v2273_v33 = vsel %vm1978_vm6, %v1333_v5, 0.0 }
 0x208   : > { %v7428_v0 = vadd.f32 %v2273_v33, %v2272_v8  ;;  %5522 = vmatmul.msk.f32.gmra.mxu1 %vm339_vm1, %v10784_v36  ;;  %v10799_v8 = vld [vmem:[#allocation88_spill] sm:$0xff]  ;;  %v10800_v36 = vld [vmem:[#allocation91_spill] sm:$0xff] }
 0x209   : > { %5490 = vmatmul.msk.f32.gmra.mxu0 %vm339_vm1, %v10794_v54  ;;  %v2302_v33 = vsel %vm1978_vm6, %v10799_v8, 0.0  ;;  %v2303_v10 = vsel %vm1978_vm6, %v10800_v36, 0.0  ;;  %v7451_v54 = vpop.f32.mrf.mxu2  ;;  %v10804_v8 = vld [vmem:[#allocation13_spill] sm:$0xff] }
 0x20a   : > { %10793 = vst [vmem:[#allocation83_spill] sm:$0xff] %v7428_v0  ;;  %v2304_v23 = vadd.f32 %v2303_v10, %v2302_v33 }
 0x20b   : > { %5456 = vmatmul.msk.f32.gmra.mxu3 %vm339_vm1, %v10796_v22 }
 0x20d   : > { %v7438_v21 = vpop.f32.mrf.mxu1 }
 0x20e   : > { %10797 = vst [vmem:[#allocation52_spill] sm:$0xff] %v7438_v21  ;;  %v1336_v4 = vpop.f32.mrf.mxu3  ;;  %v7440_v5 = vpop.f32.mrf.mxu0  ;;  %v10807_v21 = vld [vmem:[#allocation92_spill] sm:$0xff] }
 0x20f   : > { %10798 = vst [vmem:[#allocation23_spill] sm:$0xff] %v7440_v5  ;;  %v2290_v45 = vsel %vm1978_vm6, %v1336_v4, 0.0  ;;  %v2305_v5 = vsel %vm1978_vm6, %v10803_v26, 0.0 }
 0x210   : > { %v7447_v19 = vadd.f32 %v2290_v45, %v2289_v25  ;;  %5523 = vmatmul.msk.f32.gmra.mxu1 %vm339_vm1, %v10790_v59  ;;  %v2306_v4 = vadd.f32 %v2305_v5, %v2304_v23  ;;  %v2319_v59 = vsel %vm1978_vm6, %v10807_v21, 0.0  ;;  %v10811_v23 = vld [vmem:[#allocation97_spill] sm:$0xff]  ;;  %v10812_v21 = vld [vmem:[#allocation15_spill] sm:$0xff] }
 0x211   : > { %5491 = vmatmul.msk.f32.gmra.mxu0 %vm339_vm1, %v10802_v44  ;;  %v10810_v44 = vld [vmem:[#allocation19_spill] sm:$0xff]  ;;  %v2322_v26 = vsel %vm1978_vm6, %v10811_v23, 0.0  ;;  %v10818_v23 = vld [vmem:[#allocation22_spill] sm:$0xff] }
 0x212   : > { %10801 = vst [vmem:[#allocation58_spill] sm:$0xff] %v7447_v19  ;;  %v10808_v19 = vld [vmem:[#allocation94_spill] sm:$0xff] }
 0x213   : > { %5457 = vmatmul.msk.f32.gmra.mxu3 %vm339_vm1, %v10804_v8  ;;  %v2320_v37 = vsel %vm1978_vm6, %v10808_v19, 0.0 }
 0x214   : > { %v2321_v5 = vadd.f32 %v2320_v37, %v2319_v59 }
 0x215   : > { %v7459_v36 = vpop.f32.mrf.mxu1 }
 0x216   : > { %10805 = vst [vmem:[#allocation26_spill] sm:$0xff] %v7459_v36  ;;  %v1339_v25 = vpop.f32.mrf.mxu3  ;;  %v7461_v45 = vpop.f32.mrf.mxu0  ;;  %v10815_v36 = vld [vmem:[#allocation95_spill] sm:$0xff] }
 0x217   : > { %10806 = vst [vmem:[#allocation65_spill] sm:$0xff] %v7461_v45  ;;  %v2307_v10 = vsel %vm1978_vm6, %v1339_v25, 0.0  ;;  %v7476_v45 = vpop.f32.mrf.mxu2  ;;  %v2323_v25 = vadd.f32 %v2322_v26, %v2321_v5  ;;  %v10819_v26 = vld [vmem:[#allocation40_spill] sm:$0xff] }
 0x218   : > { %v7468_v33 = vadd.f32 %v2307_v10, %v2306_v4  ;;  %5524 = vmatmul.msk.f32.gmra.mxu1 %vm339_vm1, %v10796_v22  ;;  %v2336_v22 = vsel %vm1978_vm6, %v10815_v36, 0.0 }
 0x219   : > { %5492 = vmatmul.msk.f32.gmra.mxu0 %vm339_vm1, %v10810_v44 }
 0x21a   : > { %10809 = vst [vmem:[#allocation29_spill] sm:$0xff] %v7468_v33  ;;  %v10816_v33 = vld [vmem:[#allocation98_spill] sm:$0xff] }
 0x21b   : > { %5458 = vmatmul.msk.f32.gmra.mxu3 %vm339_vm1, %v10812_v21  ;;  %v2337_v37 = vsel %vm1978_vm6, %v10816_v33, 0.0 }
 0x21c   : > { %v2338_v5 = vadd.f32 %v2337_v37, %v2336_v22  ;;  %v2354_v22 = vsel %vm1978_vm6, %v10824_v42, 0.0 }
 0x21d   : > { %v7480_v19 = vpop.f32.mrf.mxu1 }
 0x21e   : > { %10813 = vst [vmem:[#allocation71_spill] sm:$0xff] %v7480_v19  ;;  %v1342_v4 = vpop.f32.mrf.mxu3  ;;  %v7482_v10 = vpop.f32.mrf.mxu0  ;;  %v10820_v19 = vld [vmem:[#allocation18_spill] sm:$0xff] }
 0x21f   : > { %10814 = vst [vmem:[#allocation33_spill] sm:$0xff] %v7482_v10  ;;  %v2324_v59 = vsel %vm1978_vm6, %v1342_v4, 0.0  ;;  %v2339_v10 = vsel %vm1978_vm6, %v10819_v26, 0.0  ;;  %v7499_v36 = vpop.f32.mrf.mxu2  ;;  %v10826_v26 = vld [vmem:[#allocation25_spill] sm:$0xff] }
 0x220   : > { %v7489_v44 = vadd.f32 %v2324_v59, %v2323_v25  ;;  %5525 = vmatmul.msk.f32.gmra.mxu1 %vm339_vm1, %v10804_v8  ;;  %v2340_v4 = vadd.f32 %v2339_v10, %v2338_v5  ;;  %v10827_v5 = vld [vmem:[#allocation104_spill] sm:$0xff] }
 0x221   : > { %5493 = vmatmul.msk.f32.gmra.mxu0 %vm339_vm1, %v10818_v23 }
 0x222   : > { %10817 = vst [vmem:[#allocation78_spill] sm:$0xff] %v7489_v44  ;;  %v10823_v44 = vld [vmem:[#allocation99_spill] sm:$0xff] }
 0x223   : > { %5459 = vmatmul.msk.f32.gmra.mxu3 %vm339_vm1, %v10820_v19  ;;  %v2353_v8 = vsel %vm1978_vm6, %v10823_v44, 0.0 }
 0x224   : > { %v2355_v10 = vadd.f32 %v2354_v22, %v2353_v8 }
 0x225   : > { %v7501_v33 = vpop.f32.mrf.mxu1 }
 0x226   : > { %10821 = vst [vmem:[#allocation36_spill] sm:$0xff] %v7501_v33  ;;  %v1345_v25 = vpop.f32.mrf.mxu3  ;;  %v7503_v59 = vpop.f32.mrf.mxu0  ;;  %v10828_v33 = vld [vmem:[#allocation21_spill] sm:$0xff] }
 0x227   : > { %10822 = vst [vmem:[#allocation84_spill] sm:$0xff] %v7503_v59  ;;  %v2341_v37 = vsel %vm1978_vm6, %v1345_v25, 0.0  ;;  %v2356_v59 = vsel %vm1978_vm6, %v10827_v5, 0.0  ;;  %v10834_v5 = vld [vmem:[#allocation28_spill] sm:$0xff] }
 0x228   : > { %v7510_v23 = vadd.f32 %v2341_v37, %v2340_v4  ;;  %5526 = vmatmul.msk.f32.gmra.mxu1 %vm339_vm1, %v10812_v21  ;;  %v2357_v42 = vadd.f32 %v2356_v59, %v2355_v10  ;;  %v10831_v4 = vld [vmem:[#allocation102_spill] sm:$0xff]  ;;  %v10832_v21 = vld [vmem:[#allocation105_spill] sm:$0xff]  ;;  %v10835_v10 = vld [vmem:[#allocation107_spill] sm:$0xff] }
 0x229   : > { %5494 = vmatmul.msk.f32.gmra.mxu0 %vm339_vm1, %v10826_v26  ;;  %v2370_v37 = vsel %vm1978_vm6, %v10831_v4, 0.0  ;;  %v7528_v26 = vpop.f32.mrf.mxu2  ;;  %v10836_v4 = vld [vmem:[#allocation24_spill] sm:$0xff] }
 0x22a   : > { %10825 = vst [vmem:[#allocation86_spill] sm:$0xff] %v7510_v23  ;;  %v2371_v23 = vsel %vm1978_vm6, %v10832_v21, 0.0 }
 0x22b   : > { %5460 = vmatmul.msk.f32.gmra.mxu3 %vm339_vm1, %v10828_v33  ;;  %v2372_v59 = vadd.f32 %v2371_v23, %v2370_v37  ;;  %v10840_v23 = vld [vmem:[#allocation31_spill] sm:$0xff] }
 0x22c   : > { %v10841_v37 = vld [vmem:[#allocation27_spill] sm:$0xff] }
 0x22d   : > { %v7520_v44 = vpop.f32.mrf.mxu1 }
 0x22e   : > { %10829 = vst [vmem:[#allocation8_spill] sm:$0xff] %v7520_v44  ;;  %v1348_v0 = vpop.f32.mrf.mxu3  ;;  %v7522_v25 = vpop.f32.mrf.mxu0 }
 0x22f   : > { %10830 = vst [vmem:[#allocation5_spill] sm:$0xff] %v7522_v25  ;;  %v2358_v8 = vsel %vm1978_vm6, %v1348_v0, 0.0  ;;  %v2373_v25 = vsel %vm1978_vm6, %v10835_v10, 0.0 }
 0x230   : > { %v7531_v22 = vadd.f32 %v2358_v8, %v2357_v42  ;;  %5527 = vmatmul.msk.f32.gmra.mxu1 %vm339_vm1, %v10820_v19  ;;  %v2374_v44 = vadd.f32 %v2373_v25, %v2372_v59 }
 0x231   : > { %5495 = vmatmul.msk.f32.gmra.mxu0 %vm339_vm1, %v10834_v5  ;;  %v7550_v19 = vpop.f32.mrf.mxu2 }
 0x232   : > { %10833 = vst [vmem:[#allocation10_spill] sm:$0xff] %v7531_v22 }
 0x233   : > { %5461 = vmatmul.msk.f32.gmra.mxu3 %vm339_vm1, %v10836_v4 }
 0x235   : > { %v7541_v21 = vpop.f32.mrf.mxu1 }
 0x236   : > { %10837 = vst [vmem:[#allocation7_spill] sm:$0xff] %v7541_v21  ;;  %v1351_v28 = vpop.f32.mrf.mxu3  ;;  %v7543_v0 = vpop.f32.mrf.mxu0 }
 0x237   : > { %10838 = vst [vmem:[#allocation6_spill] sm:$0xff] %v7543_v0  ;;  %v2375_v42 = vsel %vm1978_vm6, %v1351_v28, 0.0 }
 0x238   : > { %v7546_v8 = vadd.f32 %v2375_v42, %v2374_v44  ;;  %5528 = vmatmul.msk.f32.gmra.mxu1 %vm339_vm1, %v10828_v33  ;;  %v10844_v44 = vld [vmem:[#allocation87_spill] sm:$0xff] }
 0x239   : > { %5496 = vmatmul.msk.f32.gmra.mxu0 %vm339_vm1, %v10840_v23  ;;  %v10846_v33 = vld [vmem:[#allocation35_spill] sm:$0xff]  ;;  %v7568_v42 = vpop.f32.mrf.mxu2  ;;  %v10847_v23 = vld [vmem:[#allocation30_spill] sm:$0xff] }
 0x23a   : > { %10839 = vst [vmem:[#allocation12_spill] sm:$0xff] %v7546_v8 }
 0x23b   : > { %5462 = vmatmul.msk.f32.gmra.mxu3 %vm339_vm1, %v10841_v37 }
 0x23d   : > { %v7556_v5 = vpop.f32.mrf.mxu1 }
 0x23e   : > { %10842 = vst [vmem:[#allocation9_spill] sm:$0xff] %v7556_v5  ;;  %v1354_v25 = vpop.f32.mrf.mxu3  ;;  %v7558_v59 = vpop.f32.mrf.mxu0 }
 0x23f   : > { %10843 = vst [vmem:[#allocation14_spill] sm:$0xff] %v7558_v59  ;;  %v2392_v28 = vsel %vm1978_vm6, %v1354_v25, 0.0 }
 0x240   : > { %v7562_v10 = vadd.f32 %v2392_v28, %v10844_v44  ;;  %5529 = vmatmul.msk.f32.gmra.mxu1 %vm339_vm1, %v10836_v4  ;;  %v10850_v28 = vld [vmem:[#allocation89_spill] sm:$0xff]  ;;  %v10852_v4 = vld [vmem:[#allocation39_spill] sm:$0xff] }
 0x241   : > { %5497 = vmatmul.msk.f32.gmra.mxu0 %vm339_vm1, %v10846_v33  ;;  %v10853_v33 = vld [vmem:[#allocation34_spill] sm:$0xff] }
 0x242   : > { %10845 = vst [vmem:[#allocation90_spill] sm:$0xff] %v7562_v10  ;;  %v7586_v10 = vpop.f32.mrf.mxu2 }
 0x243   : > { %5463 = vmatmul.msk.f32.gmra.mxu3 %vm339_vm1, %v10847_v23  ;;  %10854 = vst [vmem:[#allocation16_spill] sm:$0xff] %v7586_v10  ;;  %v10898_v10 = vld [vmem:[#allocation64_spill] sm:$0xff] }
 0x245   : > { %v7572_v5 = vpop.f32.mrf.mxu1 }
 0x246   : > { %10848 = vst [vmem:[#allocation11_spill] sm:$0xff] %v7572_v5  ;;  %v1357_v0 = vpop.f32.mrf.mxu3  ;;  %v7574_v59 = vpop.f32.mrf.mxu0 }
 0x247   : > { %10849 = vst [vmem:[#allocation88_spill] sm:$0xff] %v7574_v59  ;;  %v2409_v25 = vsel %vm1978_vm6, %v1357_v0, 0.0 }
 0x248   : > { %v7578_v44 = vadd.f32 %v2409_v25, %v10850_v28  ;;  %5530 = vmatmul.msk.f32.gmra.mxu1 %vm339_vm1, %v10841_v37  ;;  %v10857_v25 = vld [vmem:[#allocation93_spill] sm:$0xff] }
 0x249   : > { %5498 = vmatmul.msk.f32.gmra.mxu0 %vm339_vm1, %v10852_v4  ;;  %v10859_v37 = vld [vmem:[#allocation45_spill] sm:$0xff]  ;;  %v10860_v4 = vld [vmem:[#allocation38_spill] sm:$0xff] }
 0x24a   : > { %10851 = vst [vmem:[#allocation91_spill] sm:$0xff] %v7578_v44 }
 0x24b   : > { %5464 = vmatmul.msk.f32.gmra.mxu3 %vm339_vm1, %v10853_v33 }
 0x24d   : > { %v7588_v5 = vpop.f32.mrf.mxu1 }
 0x24e   : > { %10855 = vst [vmem:[#allocation32_spill] sm:$0xff] %v7588_v5  ;;  %v1360_v21 = vpop.f32.mrf.mxu3  ;;  %v7590_v59 = vpop.f32.mrf.mxu0 }
 0x24f   : > { %10856 = vst [vmem:[#allocation13_spill] sm:$0xff] %v7590_v59  ;;  %v2426_v0 = vsel %vm1978_vm6, %v1360_v21, 0.0  ;;  %v7606_v59 = vpop.f32.mrf.mxu2 }
 0x250   : > { %v7594_v28 = vadd.f32 %v2426_v0, %v10857_v25  ;;  %5531 = vmatmul.msk.f32.gmra.mxu1 %vm339_vm1, %v10847_v23  ;;  %10863 = vst [vmem:[#allocation97_spill] sm:$0xff] %v7606_v59  ;;  %v10864_v0 = vld [vmem:[#allocation96_spill] sm:$0xff]  ;;  %v10866_v23 = vld [vmem:[#allocation50_spill] sm:$0xff]  ;;  %v7774_v59 = vld [vmem:[%s10414_s2] ss:$0 sm:$0xff] }
 0x251   : > { %5499 = vmatmul.msk.f32.gmra.mxu0 %vm339_vm1, %v10859_v37  ;;  %v10867_v37 = vmov 0.0  }
 0x252   : > { %10858 = vst [vmem:[#allocation92_spill] sm:$0xff] %v7594_v28 }
 0x253   : > { %5465 = vmatmul.msk.f32.gmra.mxu3 %vm339_vm1, %v10860_v4  ;;  %2785 = vst.msk [vmem:[#allocation3] sm:$0x1] %vm2784_vm7, %v10867_v37 }
 0x254   : > { %2786 = vst.msk [vmem:[#allocation3 + $0x18] sm:$0x1] %vm2784_vm7, %v10867_v37 }
 0x255   : > { %v7602_v44 = vpop.f32.mrf.mxu1  ;;  %2787 = vst.msk [vmem:[#allocation3 + $0x30] sm:$0x1] %vm2784_vm7, %v10867_v37 }
 0x256   : > { %10861 = vst [vmem:[#allocation94_spill] sm:$0xff] %v7602_v44  ;;  %v1363_v5 = vpop.f32.mrf.mxu3  ;;  %v7604_v8 = vpop.f32.mrf.mxu0 }
 0x257   : > { %10862 = vst [vmem:[#allocation19_spill] sm:$0xff] %v7604_v8  ;;  %v2443_v21 = vsel %vm1978_vm6, %v1363_v5, 0.0  ;;  %v10868_v8 = vld [vmem:[#allocation44_spill] sm:$0xff]  ;;  %v3143_v5 = vld [vmem:[%s10415_s3 + $0x8] sm:$0xff] }
 0x258   : > { %v7610_v25 = vadd.f32 %v2443_v21, %v10864_v0  ;;  %5532 = vmatmul.msk.f32.gmra.mxu1 %vm339_vm1, %v10853_v33  ;;  %3407 = vmatpush.msrb.mxu3 %v3143_v5  ;;  %2788 = vst.msk [vmem:[#allocation3 + $0x48] sm:$0x1] %vm2784_vm7, %v10867_v37  ;;  %v10871_v5 = vld [vmem:[#allocation100_spill] sm:$0xff] }
 0x259   : > { %5500 = vmatmul.msk.f32.gmra.mxu0 %vm339_vm1, %v10866_v23  ;;  %2789 = vst.msk [vmem:[#allocation3 + $0x60] sm:$0x1] %vm2784_vm7, %v10867_v37 }
 0x25a   : > { %10865 = vst [vmem:[#allocation15_spill] sm:$0xff] %v7610_v25  ;;  %v10874_v25 = vld [vmem:[#allocation56_spill] sm:$0xff] }
 0x25b   : > { %5466 = vmatmul.msk.f32.gmra.mxu3 %vm339_vm1, %v10868_v8  ;;  %2790 = vst.msk [vmem:[#allocation3 + $0x78] sm:$0x1] %vm2784_vm7, %v10867_v37 }
 0x25c   : > { %2791 = vst.msk [vmem:[#allocation3 + $0x90] sm:$0x1] %vm2784_vm7, %v10867_v37 }
 0x25d   : > { %v7629_v33 = vpop.f32.mrf.mxu1  ;;  %2792 = vst.msk [vmem:[#allocation3 + $0xa8] sm:$0x1] %vm2784_vm7, %v10867_v37 }
 0x25e   : > { %10869 = vst [vmem:[#allocation95_spill] sm:$0xff] %v7629_v33  ;;  %v1366_v21 = vpop.f32.mrf.mxu3  ;;  %v7633_v0 = vpop.f32.mrf.mxu0  ;;  %v7645_v33 = vld [vmem:[#allocation3] sm:$0xff] }
 0x25f   : > { %10870 = vst [vmem:[#allocation98_spill] sm:$0xff] %v7633_v0  ;;  %v2460_v23 = vsel %vm1978_vm6, %v1366_v21, 0.0  ;;  %v7649_v0 = vpop.f32.mrf.mxu2  ;;  %5552 = vmatmul.msk.f32.vlgmr.msra.gmra.mxu2 %vm1978_vm6, %v7645_v33 }
 0x260   : > { %v7641_v44 = vadd.f32 %v2460_v23, %v10871_v5  ;;  %5533 = vmatmul.msk.f32.gmra.mxu1 %vm339_vm1, %v10860_v4  ;;  %10873 = vst [vmem:[#allocation40_spill] sm:$0xff] %v7649_v0  ;;  %v10875_v4 = vld [vmem:[#allocation49_spill] sm:$0xff] }
 0x261   : > { %5501 = vmatmul.msk.f32.gmra.mxu0 %vm339_vm1, %v10874_v25  ;;  %2793 = vst.msk [vmem:[#allocation3 + $0xc0] sm:$0x1] %vm2784_vm7, %v10867_v37  ;;  %v10890_v0 = vld [vmem:[#allocation37_spill] sm:$0xff] }
 0x262   : > { %10872 = vst [vmem:[#allocation22_spill] sm:$0xff] %v7641_v44  ;;  %v10878_v44 = vld [vmem:[#allocation103_spill] sm:$0xff] }
 0x263   : > { %2794 = vst.msk [vmem:[#allocation3 + $0xd8] sm:$0x1] %vm2784_vm7, %v10867_v37  ;;  %5467 = vmatmul.msk.f32.gmra.mxu3 %vm339_vm1, %v10875_v4 }
 0x264   : > { %2795 = vst.msk [vmem:[#allocation3 + $0xf0] sm:$0x1] %vm2784_vm7, %v10867_v37 }
 0x265   : > { %2796 = vst.msk [vmem:[#allocation3 + $0x108] sm:$0x1] %vm2784_vm7, %v10867_v37  ;;  %v7665_v21 = vpop.f32.mrf.mxu1 }
 0x266   : > { %10876 = vst [vmem:[#allocation18_spill] sm:$0xff] %v7665_v21  ;;  %v1369_v25 = vpop.f32.mrf.mxu3  ;;  %v7669_v23 = vpop.f32.mrf.mxu0  ;;  %v7683_v21 = vld [vmem:[#allocation3 + $0x8] sm:$0xff] }
 0x267   : > { %2797 = vst.msk [vmem:[#allocation3 + $0x120] sm:$0x1] %vm2784_vm7, %v10867_v37  ;;  %v2477_v5 = vsel %vm1978_vm6, %v1369_v25, 0.0  ;;  %v3146_v25 = vld [vmem:[%s10415_s3 + $0x20] sm:$0xff]  ;;  %5553 = vmatmul.msk.f32.gmra.mxu2 %vm1978_vm6, %v7683_v21 }
 0x268   : > { %10877 = vst [vmem:[#allocation99_spill] sm:$0xff] %v7669_v23  ;;  %v7677_v28 = vadd.f32 %v2477_v5, %v10878_v44  ;;  %5534 = vmatmul.msk.f32.gmra.mxu1 %vm339_vm1, %v10868_v8  ;;  %v10880_v23 = vld [vmem:[#allocation62_spill] sm:$0xff]  ;;  %v3144_v44 = vld [vmem:[%s10415_s3 + $0x10] sm:$0xff]  ;;  %3818 = vmatpush.msrb.mxu2 %v3146_v25  ;;  %v3145_v8 = vld [vmem:[%s10415_s3 + $0x18] sm:$0xff] }
 0x269   : > { %2798 = vst.msk [vmem:[#allocation3 + $0x138] sm:$0x1] %vm2784_vm7, %v10867_v37  ;;  %5502 = vmatmul.msk.f32.gmra.mxu0 %vm339_vm1, %v10880_v23  ;;  %v7702_v23 = vpop.f32.mrf.mxu2  ;;  %v10882_v5 = vld [vmem:[#allocation55_spill] sm:$0xff]  ;;  %3701 = vmatpush.msrb.mxu1 %v3145_v8 }
 0x26a   : > { %2799 = vst.msk [vmem:[#allocation3 + $0x150] sm:$0x1] %vm2784_vm7, %v10867_v37  ;;  %3584 = vmatpush.msrb.mxu0 %v3144_v44 }
 0x26b   : > { %10879 = vst [vmem:[#allocation101_spill] sm:$0xff] %v7677_v28  ;;  %5468 = vmatmul.msk.f32.gmra.mxu3 %vm339_vm1, %v10882_v5 }
 0x26c   : > { %2800 = vst.msk [vmem:[#allocation3 + $0x168] sm:$0x1] %vm2784_vm7, %v10867_v37 }
 0x26d   : > { %2801 = vst.msk [vmem:[#allocation3 + $0x180] sm:$0x1] %vm2784_vm7, %v10867_v37  ;;  %v7710_v28 = vpop.f32.mrf.mxu1 }
 0x26e   : > { %2802 = vst.msk [vmem:[#allocation3 + $0x198] sm:$0x1] %vm2784_vm7, %v10867_v37  ;;  %v1372_v25 = vpop.f32.mrf.mxu3  ;;  %v1882_v44 = vpop.f32.mrf.mxu0 }
 0x26f   : > { %10881 = vst [vmem:[#allocation25_spill] sm:$0xff] %v7702_v23  ;;  %v2494_v22 = vsel %vm1978_vm6, %v1372_v25, 0.0  ;;  %v10884_v23 = vld [vmem:[#allocation106_spill] sm:$0xff]  ;;  %v10887_v25 = vld [vmem:[#allocation61_spill] sm:$0xff] }
 0x270   : > { %2804 = vst.msk [vmem:[#allocation3 + $0x29] sm:$0x1] %vm2784_vm7, %v10867_v37  ;;  %v7720_v8 = vadd.f32 %v2494_v22, %v10884_v23  ;;  %5535 = vmatmul.msk.f32.gmra.mxu1 %vm339_vm1, %v10875_v4 }
 0x271   : > { %2805 = vst.msk [vmem:[#allocation3 + $0x41] sm:$0x1] %vm2784_vm7, %v10867_v37  ;;  %v7738_v22 = vpop.f32.mrf.mxu2 }
 0x272   : > { %10883 = vst [vmem:[#allocation104_spill] sm:$0xff] %v7710_v28  ;;  %v10886_v28 = vld [vmem:[#allocation69_spill] sm:$0xff] }
 0x273   : > { %2806 = vst.msk [vmem:[#allocation3 + $0x59] sm:$0x1] %vm2784_vm7, %v10867_v37  ;;  %5503 = vmatmul.msk.f32.gmra.mxu0 %vm339_vm1, %v10886_v28  ;;  %5469 = vmatmul.msk.f32.gmra.mxu3 %vm339_vm1, %v10887_v25 }
 0x274   : > { %2807 = vst.msk [vmem:[#allocation3 + $0x71] sm:$0x1] %vm2784_vm7, %v10867_v37 }
 0x275   : > { %2808 = vst.msk [vmem:[#allocation3 + $0x89] sm:$0x1] %vm2784_vm7, %v10867_v37  ;;  %v7740_v4 = vpop.f32.mrf.mxu1 }
 0x276   : > { %10885 = vst [vmem:[#allocation21_spill] sm:$0xff] %v7720_v8  ;;  %v1375_v28 = vpop.f32.mrf.mxu3  ;;  %v1885_v23 = vpop.f32.mrf.mxu0 }
 0x277   : > { %2809 = vst.msk [vmem:[#allocation3 + $0xa1] sm:$0x1] %vm2784_vm7, %v10867_v37  ;;  %v2511_v8 = vsel %vm1978_vm6, %v1375_v28, 0.0  ;;  %v10892_v28 = vld [vmem:[#allocation68_spill] sm:$0xff]  ;;  %v2011_v17 = vsel %vm1978_vm6, %v1885_v23, 0.0 }
 0x278   : > { %2810 = vst.msk [vmem:[#allocation3 + $0xb9] sm:$0x1] %vm2784_vm7, %v10867_v37  ;;  %v7750_v2 = vadd.f32 %v2511_v8, %v10890_v0  ;;  %5536 = vmatmul.msk.f32.gmra.mxu1 %vm339_vm1, %v10882_v5 }
 0x279   : > { %2811 = vst.msk [vmem:[#allocation3 + $0xd1] sm:$0x1] %vm2784_vm7, %v10867_v37  ;;  %v7766_v5 = vpop.f32.mrf.mxu2 }
 0x27a   : > { %2812 = vst.msk [vmem:[#allocation3 + $0xe9] sm:$0x1] %vm2784_vm7, %v10867_v37 }
 0x27b   : > { %2813 = vst.msk [vmem:[#allocation3 + $0x101] sm:$0x1] %vm2784_vm7, %v10867_v37  ;;  %5504 = vmatmul.msk.f32.gmra.mxu0 %vm339_vm1, %v10734_v48  ;;  %5470 = vmatmul.msk.f32.gmra.mxu3 %vm339_vm1, %v10892_v28  ;;  %v10895_v48 = vld [vmem:[#allocation42_spill] sm:$0xff] }
 0x27c   : > { %10888 = vst [vmem:[#allocation102_spill] sm:$0xff] %v7738_v22 }
 0x27d   : > { %10889 = vst [vmem:[#allocation105_spill] sm:$0xff] %v7740_v4  ;;  %v7764_v0 = vpop.f32.mrf.mxu1 }
 0x27e   : > { %2814 = vst.msk [vmem:[#allocation3 + $0x119] sm:$0x1] %vm2784_vm7, %v10867_v37  ;;  %v1762_v8 = vpop.f32.mrf.mxu3  ;;  %v1888_v4 = vpop.f32.mrf.mxu0 }
 0x27f   : > { %2815 = vst.msk [vmem:[#allocation3 + $0x131] sm:$0x1] %vm2784_vm7, %v10867_v37  ;;  %v1992_v22 = vsel %vm1978_vm6, %v1762_v8, 0.0 }
 0x280   : > { %2816 = vst.msk [vmem:[#allocation3 + $0x149] sm:$0x1] %vm2784_vm7, %v10867_v37  ;;  %v1993_v34 = vadd.f32 %v1992_v22, %v10895_v48  ;;  %5537 = vmatmul.msk.f32.gmra.mxu1 %vm339_vm1, %v10887_v25 }
 0x281   : > { %10891 = vst [vmem:[#allocation28_spill] sm:$0xff] %v7750_v2  ;;  %v1994_v2 = vsel %vm1978_vm6, %v1882_v44, 0.0 }
 0x282   : > { %2817 = vst.msk [vmem:[#allocation3 + $0x161] sm:$0x1] %vm2784_vm7, %v10867_v37 }
 0x283   : > { %2818 = vst.msk [vmem:[#allocation3 + $0x179] sm:$0x1] %vm2784_vm7, %v10867_v37  ;;  %5505 = vmatmul.msk.f32.gmra.mxu0 %vm339_vm1, %v10740_v30  ;;  %5471 = vmatmul.msk.f32.gmra.mxu3 %vm339_vm1, %v10896_v11  ;;  %v7790_v30 = vpop.f32.mrf.mxu2 }
 0x284   : > { %2819 = vst.msk [vmem:[#allocation3 + $0x191] sm:$0x1] %vm2784_vm7, %v10867_v37 }
 0x285   : > { %10893 = vst [vmem:[#allocation107_spill] sm:$0xff] %v7764_v0  ;;  %v1995_v0 = vadd.f32 %v1994_v2, %v1993_v34  ;;  %v7783_v8 = vpop.f32.mrf.mxu1  ;;  %v10899_v2 = vld [vmem:[#allocation81_spill] sm:$0xff] }
 0x286   : > { %10894 = vst [vmem:[#allocation24_spill] sm:$0xff] %v7766_v5  ;;  %v1765_v48 = vpop.f32.mrf.mxu3  ;;  %v1891_v5 = vpop.f32.mrf.mxu0 }
 0x287   : > { %v2527_v44 = vadd.f32 %v7774_v59, %v1995_v0  ;;  %10897 = vst [vmem:[#allocation31_spill] sm:$0xff] %v7783_v8  ;;  %v2009_v51 = vsel %vm1978_vm6, %v1765_v48, 0.0 }
 0x288   : > { %v2010_v46 = vadd.f32 %v2009_v51, %v10898_v10  ;;  %5538 = vmatmul.msk.f32.gmra.mxu1 %vm339_vm1, %v10892_v28  ;;  %v2028_v28 = vsel %vm1978_vm6, %v1888_v4, 0.0  ;;  %v10902_v4 = vld [vmem:[#allocation85_spill] sm:$0xff]  ;;  %2779 = vst.msk [vmem:[#allocation3 + $0x10] sm:$0x3] %vm2778_vm5, %v10867_v37 }
 0x289   : > { %vm2559_vm8 = vcmp.gt.f32.partialorder %v2527_v44, 0.0  ;;  %v2591_v22 = vmul.f32 0.2, %v2527_v44  ;;  %2803 = vst.msk [vmem:[#allocation3 + $0x11] sm:$0x1] %vm2784_vm7, %v10867_v37 }
 0x28a   : > { %v2012_v34 = vadd.f32 %v2011_v17, %v2010_v46  ;;  %2783 = vst.msk [vmem:[#allocation3 + $0x1a8] sm:$0x3] %vm2778_vm5, %v10867_v37 }
 0x28b   : > { %v2623_v25 = vsel %vm2559_vm8, %v2527_v44, %v2591_v22  ;;  %5506 = vmatmul.msk.f32.gmra.mxu0 %vm339_vm1, %v6732_v15  ;;  %5472 = vmatmul.msk.f32.gmra.mxu3 %vm339_vm1, %v10899_v2  ;;  %v7812_v17 = vpop.f32.mrf.mxu2  ;;  %2820 = vst.msk [vmem:[#allocation3 + $0x1a9] sm:$0x1] %vm2784_vm7, %v10867_v37 }
 0x28c   : > { %2822 = vst.msk [vmem:[#allocation3 + $0x19] sm:$0xff] %vm1978_vm6, %v2623_v25  ;;  %v2528_v23 = vadd.f32 %v7774_v59, %v2012_v34  ;;  %v10901_v25 = vld [vmem:[#allocation47_spill] sm:$0xff] }
 0x28d   : > { %v7798_v0 = vpop.f32.mrf.mxu1 }
 0x28e   : > { %10900 = vst [vmem:[#allocation27_spill] sm:$0xff] %v7798_v0  ;;  %vm2560_vm9 = vcmp.gt.f32.partialorder %v2528_v23, 0.0  ;;  %v2592_v51 = vmul.f32 0.2, %v2528_v23  ;;  %v1768_v10 = vpop.f32.mrf.mxu3  ;;  %v1894_v44 = vpop.f32.mrf.mxu0 }
 0x28f   : > { %v2026_v22 = vsel %vm1978_vm6, %v1768_v10, 0.0 }
 0x290   : > { %v2624_v48 = vsel %vm2560_vm9, %v2528_v23, %v2592_v51  ;;  %v2027_v8 = vadd.f32 %v2026_v22, %v10901_v25  ;;  %5539 = vmatmul.msk.f32.gmra.mxu1 %vm339_vm1, %v10896_v11  ;;  %v2045_v22 = vsel %vm1978_vm6, %v1891_v5, 0.0  ;;  %v10905_v5 = vld [vmem:[#allocation17_spill] sm:$0xff] }
 0x291   : > { %2823 = vst.msk [vmem:[#allocation3 + $0x21] sm:$0xff] %vm1978_vm6, %v2624_v48 }
 0x292   : > { %v2029_v46 = vadd.f32 %v2028_v28, %v2027_v8 }
 0x293   : > { %v7805_v15 = vld [vmem:[#allocation3 + $0x18] sm:$0xff]  ;;  %5507 = vmatmul.msk.f32.gmra.mxu0 %vm339_vm1, %v10750_v31  ;;  %5473 = vmatmul.msk.f32.gmra.mxu3 %vm339_vm1, %v10902_v4  ;;  %v10904_v31 = vld [vmem:[#allocation43_spill] sm:$0xff] }
 0x294   : > { %5554 = vmatmul.msk.f32.gmra.mxu2 %vm1978_vm6, %v7805_v15  ;;  %v2529_v34 = vadd.f32 %v7774_v59, %v2029_v46 }
 0x295   : > { %v7817_v23 = vpop.f32.mrf.mxu1 }
 0x296   : > { %10903 = vst [vmem:[#allocation87_spill] sm:$0xff] %v7817_v23  ;;  %vm2561_vm10 = vcmp.gt.f32.partialorder %v2529_v34, 0.0  ;;  %v2593_v11 = vmul.f32 0.2, %v2529_v34  ;;  %v1771_v51 = vpop.f32.mrf.mxu3  ;;  %v1897_v10 = vpop.f32.mrf.mxu0 }
 0x297   : > { %v2043_v48 = vsel %vm1978_vm6, %v1771_v51, 0.0 }
 0x298   : > { %v2625_v25 = vsel %vm2561_vm10, %v2529_v34, %v2593_v11  ;;  %v2044_v8 = vadd.f32 %v2043_v48, %v10904_v31  ;;  %5540 = vmatmul.msk.f32.gmra.mxu1 %vm339_vm1, %v10899_v2  ;;  %v7824_v28 = vld [vmem:[#allocation3 + $0x20] sm:$0xff]  ;;  %v7834_v11 = vpop.f32.mrf.mxu2  ;;  %v2062_v31 = vsel %vm1978_vm6, %v1894_v44, 0.0 }
 0x299   : > { %2824 = vst.msk [vmem:[#allocation3 + $0x31] sm:$0xff] %vm1978_vm6, %v2625_v25 }
 0x29a   : > { %v2046_v46 = vadd.f32 %v2045_v22, %v2044_v8 }
 0x29b   : > { %5508 = vmatmul.msk.f32.gmra.mxu0 %vm339_vm1, %v10753_v40  ;;  %5474 = vmatmul.msk.f32.gmra.mxu3 %vm339_vm1, %v10905_v5  ;;  %v10907_v40 = vld [vmem:[#allocation48_spill] sm:$0xff] }
 0x29c   : > { %5555 = vmatmul.msk.f32.gmra.mxu2 %vm1978_vm6, %v7824_v28  ;;  %v2530_v34 = vadd.f32 %v7774_v59, %v2046_v46 }
 0x29d   : > { %v7836_v51 = vpop.f32.mrf.mxu1 }
 0x29e   : > { %10906 = vst [vmem:[#allocation35_spill] sm:$0xff] %v7836_v51  ;;  %vm2562_vm11 = vcmp.gt.f32.partialorder %v2530_v34, 0.0  ;;  %v2594_v2 = vmul.f32 0.2, %v2530_v34  ;;  %v1774_v48 = vpop.f32.mrf.mxu3  ;;  %v1900_v25 = vpop.f32.mrf.mxu0 }
 0x29f   : > { %v2060_v23 = vsel %vm1978_vm6, %v1774_v48, 0.0 }
 0x2a0   : > { %v2626_v0 = vsel %vm2562_vm11, %v2530_v34, %v2594_v2  ;;  %v2061_v22 = vadd.f32 %v2060_v23, %v10907_v40  ;;  %5541 = vmatmul.msk.f32.gmra.mxu1 %vm339_vm1, %v10902_v4  ;;  %v7843_v8 = vld [vmem:[#allocation3 + $0x30] sm:$0xff]  ;;  %v7855_v48 = vpop.f32.mrf.mxu2 }
 0x2a1   : > { %2825 = vst.msk [vmem:[#allocation3 + $0x39] sm:$0xff] %vm1978_vm6, %v2626_v0  ;;  %v2079_v0 = vsel %vm1978_vm6, %v1897_v10, 0.0 }
 0x2a2   : > { %v2063_v46 = vadd.f32 %v2062_v31, %v2061_v22 }
 0x2a3   : > { %5509 = vmatmul.msk.f32.gmra.mxu0 %vm339_vm1, %v10755_v7  ;;  %5475 = vmatmul.msk.f32.gmra.mxu3 %vm339_vm1, %v10751_v61 }
 0x2a4   : > { %5556 = vmatmul.msk.f32.gmra.mxu2 %vm1978_vm6, %v7843_v8  ;;  %v2531_v44 = vadd.f32 %v7774_v59, %v2063_v46 }
 0x2a5   : > { %v7853_v23 = vpop.f32.mrf.mxu1 }
 0x2a6   : > { %10908 = vst [vmem:[#allocation30_spill] sm:$0xff] %v7853_v23  ;;  %vm2563_vm12 = vcmp.gt.f32.partialorder %v2531_v44, 0.0  ;;  %v2595_v4 = vmul.f32 0.2, %v2531_v44  ;;  %v1777_v34 = vpop.f32.mrf.mxu3  ;;  %v1903_v2 = vpop.f32.mrf.mxu0 }
 0x2a7   : > { %v2077_v40 = vsel %vm1978_vm6, %v1777_v34, 0.0 }
 0x2a8   : > { %v2627_v51 = vsel %vm2563_vm12, %v2531_v44, %v2595_v4  ;;  %v2078_v7 = vadd.f32 %v2077_v40, %v7182_v13  ;;  %5542 = vmatmul.msk.f32.gmra.mxu1 %vm339_vm1, %v10905_v5  ;;  %v7862_v31 = vld [vmem:[#allocation3 + $0x38] sm:$0xff] }
 0x2a9   : > { %2826 = vst.msk [vmem:[#allocation3 + $0x49] sm:$0xff] %vm1978_vm6, %v2627_v51  ;;  %v2096_v51 = vsel %vm1978_vm6, %v1900_v25, 0.0 }
 0x2aa   : > { %v2080_v22 = vadd.f32 %v2079_v0, %v2078_v7  ;;  %v7881_v0 = vpop.f32.mrf.mxu2  ;;  %v2122_v7 = vsel %vm1978_vm6, %v7184_v27, 0.0 }
 0x2ab   : > { %5510 = vmatmul.msk.f32.gmra.mxu0 %vm339_vm1, %v10757_v52  ;;  %5476 = vmatmul.msk.f32.gmra.mxu3 %vm339_vm1, %v10754_v41 }
 0x2ac   : > { %5557 = vmatmul.msk.f32.gmra.mxu2 %vm1978_vm6, %v7862_v31  ;;  %v2532_v10 = vadd.f32 %v7774_v59, %v2080_v22  ;;  %v2123_v22 = vadd.f32 %v2122_v7, %v7239_v49 }
 0x2ad   : > { %v7872_v13 = vpop.f32.mrf.mxu1 }
 0x2ae   : > { %10909 = vst [vmem:[#allocation89_spill] sm:$0xff] %v7872_v13  ;;  %vm2564_vm13 = vcmp.gt.f32.partialorder %v2532_v10, 0.0  ;;  %v2596_v5 = vmul.f32 0.2, %v2532_v10  ;;  %v1780_v46 = vpop.f32.mrf.mxu3  ;;  %v1906_v44 = vpop.f32.mrf.mxu0 }
 0x2af   : > { %v2094_v4 = vsel %vm1978_vm6, %v1780_v46, 0.0 }
 0x2b0   : > { %v2628_v34 = vsel %vm2564_vm13, %v2532_v10, %v2596_v5  ;;  %v2095_v40 = vadd.f32 %v2094_v4, %v7204_v35  ;;  %5543 = vmatmul.msk.f32.gmra.mxu1 %vm339_vm1, %v10751_v61  ;;  %v7879_v52 = vld [vmem:[#allocation3 + $0x48] sm:$0xff] }
 0x2b1   : > { %2827 = vst.msk [vmem:[#allocation3 + $0x51] sm:$0xff] %vm1978_vm6, %v2628_v34 }
 0x2b2   : > { %v2097_v25 = vadd.f32 %v2096_v51, %v2095_v40  ;;  %v2113_v51 = vsel %vm1978_vm6, %v1903_v2, 0.0 }
 0x2b3   : > { %5511 = vmatmul.msk.f32.gmra.mxu0 %vm339_vm1, %v10759_v18  ;;  %5477 = vmatmul.msk.f32.gmra.mxu3 %vm339_vm1, %v10756_v9  ;;  %v2124_v18 = vsel %vm1978_vm6, %v7202_v43, 0.0  ;;  %v2139_v43 = vsel %vm1978_vm6, %v7206_v12, 0.0 }
 0x2b4   : > { %5558 = vmatmul.msk.f32.gmra.mxu2 %vm1978_vm6, %v7879_v52  ;;  %v2533_v61 = vadd.f32 %v7774_v59, %v2097_v25  ;;  %v2125_v49 = vadd.f32 %v2124_v18, %v2123_v22  ;;  %v7914_v25 = vpop.f32.mrf.mxu2  ;;  %v2140_v7 = vadd.f32 %v2139_v43, %v7258_v58 }
 0x2b5   : > { %v7893_v35 = vpop.f32.mrf.mxu1 }
 0x2b6   : > { %10910 = vst [vmem:[#allocation39_spill] sm:$0xff] %v7893_v35  ;;  %vm2565_vm14 = vcmp.gt.f32.partialorder %v2533_v61, 0.0  ;;  %v2597_v10 = vmul.f32 0.2, %v2533_v61  ;;  %v1783_v5 = vpop.f32.mrf.mxu3  ;;  %v1909_v46 = vpop.f32.mrf.mxu0 }
 0x2b7   : > { %v2111_v27 = vsel %vm1978_vm6, %v1783_v5, 0.0 }
 0x2b8   : > { %v2629_v4 = vsel %vm2565_vm14, %v2533_v61, %v2597_v10  ;;  %v2112_v34 = vadd.f32 %v2111_v27, %v7230_v53  ;;  %5544 = vmatmul.msk.f32.gmra.mxu1 %vm339_vm1, %v10754_v41  ;;  %v7903_v40 = vld [vmem:[#allocation3 + $0x50] sm:$0xff]  ;;  %v2126_v53 = vsel %vm1978_vm6, %v7451_v54, 0.0  ;;  %v2130_v54 = vsel %vm1978_vm6, %v1906_v44, 0.0 }
 0x2b9   : > { %2828 = vst.msk [vmem:[#allocation3 + $0x61] sm:$0xff] %vm1978_vm6, %v2629_v4  ;;  %v2127_v12 = vadd.f32 %v2126_v53, %v2125_v49  ;;  %v2156_v44 = vsel %vm1978_vm6, %v7232_v55, 0.0 }
 0x2ba   : > { %v2114_v2 = vadd.f32 %v2113_v51, %v2112_v34  ;;  %v703_v34 = vrot.slane %v7333_v20, 2  ;;  %v2157_v53 = vadd.f32 %v2156_v44, %v7277_v38  ;;  %v2158_v38 = vsel %vm1978_vm6, %v7249_v16, 0.0  ;;  %v10913_v44 = vld [vmem:[#allocation59_spill] sm:$0xff] }
 0x2bb   : > { %5512 = vmatmul.msk.f32.gmra.mxu0 %vm339_vm1, %v10763_v14  ;;  %5478 = vmatmul.msk.f32.gmra.mxu3 %vm339_vm1, %v10758_v62  ;;  %v2141_v14 = vsel %vm1978_vm6, %v7228_v47, 0.0  ;;  %v704_v47 = vrot.slane %v7361_v24, 2  ;;  %v2173_v16 = vsel %vm1978_vm6, %v7251_v3, 0.0  ;;  %v10915_v3 = vld [vmem:[#allocation53_spill] sm:$0xff] }
 0x2bc   : > { %5559 = vmatmul.msk.f32.gmra.mxu2 %vm1978_vm6, %v7903_v40  ;;  %v2534_v41 = vadd.f32 %v7774_v59, %v2114_v2  ;;  %v2142_v4 = vadd.f32 %v2141_v14, %v2140_v7 }
 0x2bd   : > { %v7920_v61 = vpop.f32.mrf.mxu1  ;;  %v7952_v55 = vsel %vm609_vm4, %v703_v34, %v704_v47 }
 0x2be   : > { %10911 = vst [vmem:[#allocation34_spill] sm:$0xff] %v7920_v61  ;;  %vm2566_vm15 = vcmp.gt.f32.partialorder %v2534_v41, 0.0  ;;  %v2598_v22 = vmul.f32 0.2, %v2534_v41  ;;  %v1786_v10 = vpop.f32.mrf.mxu3  ;;  %v1912_v5 = vpop.f32.mrf.mxu0 }
 0x2bf   : > { %v2128_v18 = vsel %vm1978_vm6, %v1786_v10, 0.0  ;;  %v2147_v10 = vsel %vm1978_vm6, %v1909_v46, 0.0 }
 0x2c0   : > { %v2630_v51 = vsel %vm2566_vm15, %v2534_v41, %v2598_v22  ;;  %v2129_v27 = vadd.f32 %v2128_v18, %v2127_v12  ;;  %5545 = vmatmul.msk.f32.gmra.mxu1 %vm339_vm1, %v10756_v9  ;;  %v7928_v58 = vld [vmem:[#allocation3 + $0x60] sm:$0xff]  ;;  %v2143_v9 = vsel %vm1978_vm6, %v7476_v45, 0.0  ;;  %v7945_v41 = vpop.f32.mrf.mxu2  ;;  %v699_v45 = vrot.slane %v7361_v24, 1 }
 0x2c1   : > { %2829 = vst.msk [vmem:[#allocation3 + $0x69] sm:$0xff] %vm1978_vm6, %v2630_v51  ;;  %v2144_v2 = vadd.f32 %v2143_v9, %v2142_v4 }
 0x2c2   : > { %v2131_v43 = vadd.f32 %v2130_v54, %v2129_v27 }
 0x2c3   : > { %5513 = vmatmul.msk.f32.gmra.mxu0 %vm339_vm1, %v10768_v50  ;;  %5479 = vmatmul.msk.f32.gmra.mxu3 %vm339_vm1, %v10760_v6  ;;  %v698_v50 = vrot.slane %v7333_v20, 1  ;;  %v2159_v20 = vadd.f32 %v2158_v38, %v2157_v53 }
 0x2c4   : > { %5560 = vmatmul.msk.f32.gmra.mxu2 %vm1978_vm6, %v7928_v58  ;;  %v2535_v49 = vadd.f32 %v7774_v59, %v2131_v43  ;;  %v2175_v43 = vsel %vm1978_vm6, %v10915_v3, 0.0 }
 0x2c5   : > { %v7947_v7 = vpop.f32.mrf.mxu1  ;;  %v7974_v4 = vsel %vm520_vm3, %v698_v50, %v699_v45 }
 0x2c6   : > { %10912 = vst [vmem:[#allocation93_spill] sm:$0xff] %v7947_v7  ;;  %vm2567_vm0 = vcmp.gt.f32.partialorder %v2535_v49, 0.0  ;;  %v2599_v14 = vmul.f32 0.2, %v2535_v49  ;;  %v1789_v12 = vpop.f32.mrf.mxu3  ;;  %v1915_v22 = vpop.f32.mrf.mxu0 }
 0x2c7   : > { %v2145_v54 = vsel %vm1978_vm6, %v1789_v12, 0.0 }
 0x2c8   : > { %v2631_v18 = vsel %vm2567_vm0, %v2535_v49, %v2599_v14  ;;  %v2146_v51 = vadd.f32 %v2145_v54, %v2144_v2  ;;  %5546 = vmatmul.msk.f32.gmra.mxu1 %vm339_vm1, %v10758_v62  ;;  %v7962_v27 = vld [vmem:[#allocation3 + $0x68] sm:$0xff]  ;;  %v2160_v62 = vsel %vm1978_vm6, %v7499_v36, 0.0  ;;  %v7986_v14 = vpop.f32.mrf.mxu2  ;;  %v2164_v36 = vsel %vm1978_vm6, %v1912_v5, 0.0  ;;  %v10916_v5 = vld [vmem:[#allocation51_spill] sm:$0xff] }
 0x2c9   : > { %2830 = vst.msk [vmem:[#allocation3 + $0x79] sm:$0xff] %vm1978_vm6, %v2631_v18  ;;  %v2161_v49 = vadd.f32 %v2160_v62, %v2159_v20  ;;  %v2190_v20 = vsel %vm1978_vm6, %v10916_v5, 0.0  ;;  %v10917_v62 = vld [vmem:[#allocation41_spill] sm:$0xff]  ;;  %v2977_v23 = vrot.slane %v7962_v27, 1 }
 0x2ca   : > { %v2148_v46 = vadd.f32 %v2147_v10, %v2146_v51  ;;  %v3036_v51 = vrot.slane %v7645_v33, 2 }
 0x2cb   : > { %5514 = vmatmul.msk.f32.gmra.mxu0 %vm339_vm1, %v10774_v32  ;;  %5480 = vmatmul.msk.f32.gmra.mxu3 %vm339_vm1, %v10764_v1  ;;  %v2174_v32 = vadd.f32 %v2173_v16, %v10913_v44  ;;  %v3037_v16 = vrot.slane %v7683_v21, 2  ;;  %v10918_v44 = vld [vmem:[#allocation66_spill] sm:$0xff] }
 0x2cc   : > { %5561 = vmatmul.msk.f32.gmra.mxu2 %vm1978_vm6, %v7962_v27  ;;  %v2536_v34 = vadd.f32 %v7774_v59, %v2148_v46 }
 0x2cd   : > { %v7982_v9 = vpop.f32.mrf.mxu1  ;;  %v2176_v18 = vadd.f32 %v2175_v43, %v2174_v32  ;;  %v2191_v32 = vadd.f32 %v2190_v20, %v10918_v44  ;;  %v2956_v43 = vrot.slane %v7645_v33, 1 }
 0x2ce   : > { %10914 = vst [vmem:[#allocation45_spill] sm:$0xff] %v7982_v9  ;;  %vm2568_vm2 = vcmp.gt.f32.partialorder %v2536_v34, 0.0  ;;  %v2600_v2 = vmul.f32 0.2, %v2536_v34  ;;  %v1792_v53 = vpop.f32.mrf.mxu3  ;;  %v1918_v50 = vpop.f32.mrf.mxu0 }
 0x2cf   : > { %v2162_v12 = vsel %vm1978_vm6, %v1792_v53, 0.0 }
 0x2d0   : > { %v2632_v38 = vsel %vm2568_vm2, %v2536_v34, %v2600_v2  ;;  %v2163_v10 = vadd.f32 %v2162_v12, %v2161_v49  ;;  %5547 = vmatmul.msk.f32.gmra.mxu1 %vm339_vm1, %v10760_v6  ;;  %v7992_v54 = vld [vmem:[#allocation3 + $0x78] sm:$0xff]  ;;  %v2177_v6 = vsel %vm1978_vm6, %v7528_v26, 0.0  ;;  %v8018_v26 = vsel %vm609_vm4, %v3036_v51, %v3037_v16  ;;  %v8032_v33 = vpop.f32.mrf.mxu2 }
 0x2d1   : > { %2831 = vst.msk [vmem:[#allocation3 + $0x81] sm:$0xff] %vm1978_vm6, %v2632_v38  ;;  %v2957_v49 = vrot.slane %v7683_v21, 1  ;;  %v10920_v12 = vld [vmem:[#allocation54_spill] sm:$0xff] }
 0x2d2   : > { %v2165_v46 = vadd.f32 %v2164_v36, %v2163_v10  ;;  %v2192_v38 = vsel %vm1978_vm6, %v10920_v12, 0.0  ;;  %v2181_v10 = vsel %vm1978_vm6, %v1915_v22, 0.0  ;;  %v10921_v22 = vld [vmem:[#allocation77_spill] sm:$0xff] }
 0x2d3   : > { %5515 = vmatmul.msk.f32.gmra.mxu0 %vm339_vm1, %v7331_v39  ;;  %5481 = vmatmul.msk.f32.gmra.mxu3 %vm339_vm1, %v10917_v62  ;;  %v2178_v39 = vadd.f32 %v2177_v6, %v2176_v18  ;;  %v2207_v20 = vsel %vm1978_vm6, %v10921_v22, 0.0  ;;  %v2193_v6 = vadd.f32 %v2192_v38, %v2191_v32 }
 0x2d4   : > { %5562 = vmatmul.msk.f32.gmra.mxu2 %vm1978_vm6, %v7992_v54  ;;  %v2537_v34 = vadd.f32 %v7774_v59, %v2165_v46 }
 0x2d5   : > { %v8013_v3 = vpop.f32.mrf.mxu1 }
 0x2d6   : > { %10919 = vst [vmem:[#allocation38_spill] sm:$0xff] %v8013_v3  ;;  %vm2569_vm8 = vcmp.gt.f32.partialorder %v2537_v34, 0.0  ;;  %v2601_v2 = vmul.f32 0.2, %v2537_v34  ;;  %v1795_v53 = vpop.f32.mrf.mxu3  ;;  %v1921_v36 = vpop.f32.mrf.mxu0 }
 0x2d7   : > { %v2179_v18 = vsel %vm1978_vm6, %v1795_v53, 0.0  ;;  %v10924_v53 = vld [vmem:[#allocation57_spill] sm:$0xff] }
 0x2d8   : > { %v2633_v51 = vsel %vm2569_vm8, %v2537_v34, %v2601_v2  ;;  %v2180_v5 = vadd.f32 %v2179_v18, %v2178_v39  ;;  %5548 = vmatmul.msk.f32.gmra.mxu1 %vm339_vm1, %v10764_v1  ;;  %v8030_v37 = vld [vmem:[#allocation3 + $0x80] sm:$0xff]  ;;  %v8044_v1 = vsel %vm520_vm3, %v2956_v43, %v2957_v49  ;;  %v2194_v34 = vsel %vm1978_vm6, %v7550_v19, 0.0 }
 0x2d9   : > { %2832 = vst.msk [vmem:[#allocation3 + $0x91] sm:$0xff] %vm1978_vm6, %v2633_v51  ;;  %v10922_v39 = vld [vmem:[#allocation75_spill] sm:$0xff]  ;;  %v2209_v32 = vsel %vm1978_vm6, %v10924_v53, 0.0  ;;  %v2195_v12 = vadd.f32 %v2194_v34, %v2193_v6  ;;  %v2198_v18 = vsel %vm1978_vm6, %v1918_v50, 0.0  ;;  %v471_v51 = vld [vmem:[#allocation2 + $0x1a8] sm:$0x3] }
 0x2da   : > { %v2182_v46 = vadd.f32 %v2181_v10, %v2180_v5  ;;  %v2211_v50 = vsel %vm1978_vm6, %v7568_v42, 0.0  ;;  %v10925_v34 = vld [vmem:[#allocation60_spill] sm:$0xff] }
 0x2db   : > { %5516 = vmatmul.msk.f32.gmra.mxu0 %vm339_vm1, %v7359_v63  ;;  %5482 = vmatmul.msk.f32.gmra.mxu3 %vm339_vm1, %v10922_v39  ;;  %v2208_v63 = vadd.f32 %v2207_v20, %v7345_v56 }
 0x2dc   : > { %5563 = vmatmul.msk.f32.gmra.mxu2 %vm1978_vm6, %v8030_v37  ;;  %v2538_v44 = vadd.f32 %v7774_v59, %v2182_v46  ;;  %v706_v46 = vrot.slane %v471_v51, 2 }
 0x2dd   : > { %v8052_v2 = vpop.f32.mrf.mxu1  ;;  %v2210_v20 = vadd.f32 %v2209_v32, %v2208_v63 }
 0x2de   : > { %10923 = vst [vmem:[#allocation96_spill] sm:$0xff] %v8052_v2  ;;  %vm2570_vm7 = vcmp.gt.f32.partialorder %v2538_v44, 0.0  ;;  %v2602_v38 = vmul.f32 0.2, %v2538_v44  ;;  %v1798_v43 = vpop.f32.mrf.mxu3  ;;  %v1924_v10 = vpop.f32.mrf.mxu0 }
 0x2df   : > { %v2196_v19 = vsel %vm1978_vm6, %v1798_v43, 0.0  ;;  %v2212_v53 = vadd.f32 %v2211_v50, %v2210_v20  ;;  %v707_v43 = vsel %vm609_vm4, %v704_v47, %v706_v46  ;;  %v10927_v50 = vld [vmem:[#allocation63_spill] sm:$0xff] }
 0x2e0   : > { %v2634_v5 = vsel %vm2570_vm7, %v2538_v44, %v2602_v38  ;;  %v2197_v22 = vadd.f32 %v2196_v19, %v2195_v12  ;;  %5549 = vmatmul.msk.f32.gmra.mxu1 %vm339_vm1, %v10917_v62  ;;  %v8060_v56 = vld [vmem:[#allocation3 + $0x90] sm:$0xff]  ;;  %v2224_v44 = vsel %vm1978_vm6, %v10925_v34, 0.0  ;;  %v8071_v62 = vpop.f32.mrf.mxu2  ;;  %v2215_v19 = vsel %vm1978_vm6, %v1921_v36, 0.0 }
 0x2e1   : > { %2833 = vst.msk [vmem:[#allocation3 + $0x99] sm:$0xff] %vm1978_vm6, %v2634_v5  ;;  %v2241_v36 = vsel %vm1978_vm6, %v10927_v50, 0.0  ;;  %v701_v34 = vrot.slane %v471_v51, 1 }
 0x2e2   : > { %v2199_v6 = vadd.f32 %v2198_v18, %v2197_v22  ;;  %v2226_v18 = vsel %vm1978_vm6, %v7328_v60, 0.0 }
 0x2e3   : > { %5517 = vmatmul.msk.f32.gmra.mxu0 %vm339_vm1, %v7952_v55  ;;  %5483 = vmatmul.msk.f32.gmra.mxu3 %vm339_vm1, %v7338_v57  ;;  %v2225_v55 = vadd.f32 %v2224_v44, %v7370_v29  ;;  %v702_v50 = vsel %vm520_vm3, %v699_v45, %v701_v34  ;;  %v10934_v45 = vld [vmem:[#allocation72_spill] sm:$0xff] }
 0x2e4   : > { %5564 = vmatmul.msk.f32.gmra.mxu2 %vm1978_vm6, %v8060_v56  ;;  %v2539_v63 = vadd.f32 %v7774_v59, %v2199_v6  ;;  %v10928_v6 = vld [vmem:[#allocation16_spill] sm:$0xff]  ;;  %v2260_v34 = vsel %vm1978_vm6, %v10934_v45, 0.0 }
 0x2e5   : > { %v8076_v32 = vpop.f32.mrf.mxu1  ;;  %v2227_v47 = vadd.f32 %v2226_v18, %v2225_v55  ;;  %v2228_v46 = vsel %vm1978_vm6, %v10928_v6, 0.0 }
 0x2e6   : > { %10926 = vst [vmem:[#allocation50_spill] sm:$0xff] %v8076_v32  ;;  %vm2571_vm9 = vcmp.gt.f32.partialorder %v2539_v63, 0.0  ;;  %v2603_v12 = vmul.f32 0.2, %v2539_v63  ;;  %v1801_v42 = vpop.f32.mrf.mxu3  ;;  %v1927_v38 = vpop.f32.mrf.mxu0  ;;  %v2967_v32 = vrot.slane %v7862_v31, 1 }
 0x2e7   : > { %v2213_v5 = vsel %vm1978_vm6, %v1801_v42, 0.0 }
 0x2e8   : > { %v2635_v22 = vsel %vm2571_vm9, %v2539_v63, %v2603_v12  ;;  %v2214_v20 = vadd.f32 %v2213_v5, %v2212_v53  ;;  %5550 = vmatmul.msk.f32.gmra.mxu1 %vm339_vm1, %v10922_v39  ;;  %v8088_v29 = vld [vmem:[#allocation3 + $0x98] sm:$0xff]  ;;  %v8101_v44 = vpop.f32.mrf.mxu2  ;;  %v2229_v53 = vadd.f32 %v2228_v46, %v2227_v47  ;;  %v10930_v12 = vld [vmem:[#allocation73_spill] sm:$0xff] }
 0x2e9   : > { %2834 = vst.msk [vmem:[#allocation3 + $0xa9] sm:$0xff] %vm1978_vm6, %v2635_v22  ;;  %v2242_v55 = vadd.f32 %v2241_v36, %v10930_v12  ;;  %v2232_v22 = vsel %vm1978_vm6, %v1924_v10, 0.0  ;;  %v10932_v10 = vld [vmem:[#allocation82_spill] sm:$0xff]  ;;  %v10935_v12 = vld [vmem:[#allocation80_spill] sm:$0xff] }
 0x2ea   : > { %v2216_v60 = vadd.f32 %v2215_v19, %v2214_v20  ;;  %v10931_v19 = vld [vmem:[#allocation67_spill] sm:$0xff]  ;;  %v2856_v20 = vld [vmem:[#allocation3 + $0x10] sm:$0x3]  ;;  %v2258_v36 = vsel %vm1978_vm6, %v10932_v10, 0.0 }
 0x2eb   : > { %5518 = vmatmul.msk.f32.gmra.mxu0 %vm339_vm1, %v707_v43  ;;  %5484 = vmatmul.msk.f32.gmra.mxu3 %vm339_vm1, %v7974_v4  ;;  %v2243_v5 = vsel %vm1978_vm6, %v10931_v19, 0.0  ;;  %v2959_v45 = vrot.slane %v2856_v20, 1 }
 0x2ec   : > { %5565 = vmatmul.msk.f32.gmra.mxu2 %vm1978_vm6, %v8088_v29  ;;  %v2540_v39 = vadd.f32 %v7774_v59, %v2216_v60  ;;  %v2244_v6 = vadd.f32 %v2243_v5, %v2242_v55 }
 0x2ed   : > { %v8103_v63 = vpop.f32.mrf.mxu1 }
 0x2ee   : > { %10929 = vst [vmem:[#allocation44_spill] sm:$0xff] %v8103_v63  ;;  %vm2572_vm10 = vcmp.gt.f32.partialorder %v2540_v39, 0.0  ;;  %v2604_v42 = vmul.f32 0.2, %v2540_v39  ;;  %v1804_v43 = vpop.f32.mrf.mxu3  ;;  %v10958_v63 = vld [vmem:[#allocation26_spill] sm:$0xff] }
 0x2ef   : > { %v2230_v4 = vsel %vm1978_vm6, %v1804_v43, 0.0 }
 0x2f0   : > { %v1930_v18 = vpop.f32.mrf.mxu0  ;;  %v2636_v51 = vsel %vm2572_vm10, %v2540_v39, %v2604_v42  ;;  %v2231_v60 = vadd.f32 %v2230_v4, %v2229_v53  ;;  %5551 = vmatmul.msk.f32.gmra.mxu1 %vm339_vm1, %v7338_v57  ;;  %v8112_v47 = vld [vmem:[#allocation3 + $0xa8] sm:$0xff]  ;;  %v3039_v57 = vrot.slane %v2856_v20, 2  ;;  %v10933_v39 = vld [vmem:[#allocation97_spill] sm:$0xff]  ;;  %v2259_v42 = vadd.f32 %v2258_v36, %v10935_v12 }
 0x2f1   : > { %2835 = vst.msk [vmem:[#allocation3 + $0xb1] sm:$0xff] %vm1978_vm6, %v2636_v51  ;;  %v2245_v53 = vsel %vm1978_vm6, %v10933_v39, 0.0  ;;  %v2249_v4 = vsel %vm1978_vm6, %v1927_v38, 0.0 }
 0x2f2   : > { %v2233_v46 = vadd.f32 %v2232_v22, %v2231_v60  ;;  %v3040_v22 = vsel %vm609_vm4, %v3037_v16, %v3039_v57  ;;  %v8138_v60 = vpop.f32.mrf.mxu2  ;;  %v10937_v16 = vld [vmem:[#allocation40_spill] sm:$0xff]  ;;  %v10938_v57 = vld [vmem:[#allocation70_spill] sm:$0xff] }
 0x2f3   : > { %5616 = vmatmul.msk.f32.vlgmr.msrb.gmra.mxu0 %vm1978_vm6, %v8018_v26  ;;  %5485 = vmatmul.msk.f32.gmra.mxu3 %vm339_vm1, %v702_v50  ;;  %v2246_v26 = vadd.f32 %v2245_v53, %v2244_v6  ;;  %v2261_v6 = vadd.f32 %v2260_v34, %v2259_v42  ;;  %v2262_v38 = vsel %vm1978_vm6, %v10937_v16, 0.0  ;;  %v2275_v39 = vsel %vm1978_vm6, %v10938_v57, 0.0  ;;  %v10940_v42 = vld [vmem:[#allocation83_spill] sm:$0xff] }
 0x2f4   : > { %5566 = vmatmul.msk.f32.gmra.mxu2 %vm1978_vm6, %v8112_v47  ;;  %v2541_v24 = vadd.f32 %v7774_v59, %v2233_v46  ;;  %v3042_v53 = vrot.slane %v7824_v28, 2 }
 0x2f5   : > { %v8131_v43 = vpop.f32.mrf.mxu1  ;;  %v2263_v34 = vadd.f32 %v2262_v38, %v2261_v6  ;;  %v2960_v38 = vsel %vm520_vm3, %v2957_v49, %v2959_v45  ;;  %v10944_v45 = vld [vmem:[#allocation25_spill] sm:$0xff] }
 0x2f6   : > { %10936 = vst [vmem:[#allocation100_spill] sm:$0xff] %v8131_v43  ;;  %vm2573_vm11 = vcmp.gt.f32.partialorder %v2541_v24, 0.0  ;;  %v2605_v19 = vmul.f32 0.2, %v2541_v24  ;;  %v1807_v55 = vpop.f32.mrf.mxu3 }
 0x2f7   : > { %v2247_v51 = vsel %vm1978_vm6, %v1807_v55, 0.0 }
 0x2f8   : > { %v1933_v5 = vpop.f32.mrf.mxu0  ;;  %v2637_v50 = vsel %vm2573_vm11, %v2541_v24, %v2605_v19  ;;  %v2248_v10 = vadd.f32 %v2247_v51, %v2246_v26  ;;  %v8140_v36 = vld [vmem:[#allocation3 + $0xb0] sm:$0xff]  ;;  %5648 = vmatmul.msk.f32.vlgmr.msrb.gmra.mxu1 %vm1978_vm6, %v7805_v15  ;;  %v2276_v26 = vadd.f32 %v2275_v39, %v10940_v42  ;;  %v3041_v19 = vrot.slane %v7805_v15, 2  ;;  %v10941_v51 = vld [vmem:[#allocation79_spill] sm:$0xff]  ;;  %v10943_v39 = vld [vmem:[#allocation76_spill] sm:$0xff] }
 0x2f9   : > { %2836 = vst.msk [vmem:[#allocation3 + $0xc1] sm:$0xff] %vm1978_vm6, %v2637_v50  ;;  %v2277_v50 = vsel %vm1978_vm6, %v10941_v51, 0.0  ;;  %v2292_v21 = vsel %vm1978_vm6, %v10943_v39, 0.0  ;;  %v10946_v51 = vld [vmem:[#allocation58_spill] sm:$0xff] }
 0x2fa   : > { %v2250_v46 = vadd.f32 %v2249_v4, %v2248_v10  ;;  %v8174_v57 = vsel %vm609_vm4, %v3041_v19, %v3042_v53 }
 0x2fb   : > { %5617 = vmatmul.msk.f32.gmra.mxu0 %vm1978_vm6, %v3040_v22  ;;  %5584 = vmatmul.msk.f32.vlgmr.msrb.gmra.mxu3 %vm1978_vm6, %v8044_v1  ;;  %v2266_v1 = vsel %vm1978_vm6, %v1930_v18, 0.0  ;;  %10942 = vst [vmem:[#allocation49_spill] sm:$0xff] %v8174_v57  ;;  %v8181_v18 = vld [vmem:[#allocation3 + $0x28] sm:$0x3] }
 0x2fc   : > { %5567 = vmatmul.msk.f32.gmra.mxu2 %vm1978_vm6, %v8140_v36  ;;  %v2542_v24 = vadd.f32 %v7774_v59, %v2250_v46  ;;  %v8171_v46 = vpop.f32.mrf.mxu2  ;;  %v3044_v19 = vrot.slane %v8181_v18, 2 }
 0x2fd   : > { %v8156_v12 = vpop.f32.mrf.mxu1 }
 0x2fe   : > { %10939 = vst [vmem:[#allocation56_spill] sm:$0xff] %v8156_v12  ;;  %vm2574_vm1 = vcmp.gt.f32.partialorder %v2542_v24, 0.0  ;;  %v2606_v55 = vmul.f32 0.2, %v2542_v24  ;;  %v1810_v22 = vpop.f32.mrf.mxu3 }
 0x2ff   : > { %v2264_v10 = vsel %vm1978_vm6, %v1810_v22, 0.0 }
 0x300   : > { %v1936_v4 = vpop.f32.mrf.mxu0  ;;  %v2638_v16 = vsel %vm2574_vm1, %v2542_v24, %v2606_v55  ;;  %v2265_v20 = vadd.f32 %v2264_v10, %v2263_v34  ;;  %v8164_v6 = vld [vmem:[#allocation3 + $0xc0] sm:$0xff]  ;;  %5649 = vmatmul.msk.f32.gmra.mxu1 %vm1978_vm6, %v7824_v28  ;;  %v2278_v24 = vadd.f32 %v2277_v50, %v2276_v26  ;;  %v2279_v34 = vsel %vm1978_vm6, %v10944_v45, 0.0  ;;  %v10945_v55 = vld [vmem:[#allocation46_spill] sm:$0xff] }
 0x301   : > { %2837 = vst.msk [vmem:[#allocation3 + $0xc9] sm:$0xff] %vm1978_vm6, %v2638_v16  ;;  %v2294_v22 = vsel %vm1978_vm6, %v10945_v55, 0.0  ;;  %v2293_v10 = vadd.f32 %v2292_v21, %v10946_v51  ;;  %v2962_v26 = vrot.slane %v7824_v28, 1  ;;  %v8204_v21 = vsel %vm609_vm4, %v3042_v53, %v3044_v19 }
 0x302   : > { %v2267_v49 = vadd.f32 %v2266_v1, %v2265_v20  ;;  %v2280_v12 = vadd.f32 %v2279_v34, %v2278_v24  ;;  %10948 = vst [vmem:[#allocation62_spill] sm:$0xff] %v8204_v21 }
 0x303   : > { %5618 = vmatmul.msk.f32.gmra.mxu0 %vm1978_vm6, %v8174_v57  ;;  %5585 = vmatmul.msk.f32.gmra.mxu3 %vm1978_vm6, %v2960_v38  ;;  %v2283_v38 = vsel %vm1978_vm6, %v1933_v5, 0.0  ;;  %v2295_v28 = vadd.f32 %v2294_v22, %v2293_v10  ;;  %v3047_v22 = vrot.slane %v7862_v31, 2  ;;  %v10952_v10 = vld [vmem:[#allocation29_spill] sm:$0xff] }
 0x304   : > { %5568 = vmatmul.msk.f32.gmra.mxu2 %vm1978_vm6, %v8164_v6  ;;  %v2543_v42 = vadd.f32 %v7774_v59, %v2267_v49  ;;  %v2961_v49 = vrot.slane %v7805_v15, 1  ;;  %v10949_v15 = vld [vmem:[#allocation20_spill] sm:$0xff]  ;;  %v8218_v53 = vpop.f32.mrf.mxu2 }
 0x305   : > { %v8193_v16 = vpop.f32.mrf.mxu1  ;;  %v2309_v5 = vsel %vm1978_vm6, %v10949_v15, 0.0  ;;  %10951 = vst [vmem:[#allocation55_spill] sm:$0xff] %v8218_v53  ;;  %v10954_v15 = vld [vmem:[#allocation52_spill] sm:$0xff] }
 0x306   : > { %10947 = vst [vmem:[#allocation103_spill] sm:$0xff] %v8193_v16  ;;  %vm2575_vm12 = vcmp.gt.f32.partialorder %v2543_v42, 0.0  ;;  %v2607_v50 = vmul.f32 0.2, %v2543_v42  ;;  %v1813_v1 = vpop.f32.mrf.mxu3 }
 0x307   : > { %v2281_v39 = vsel %vm1978_vm6, %v1813_v1, 0.0 }
 0x308   : > { %v1939_v20 = vpop.f32.mrf.mxu0  ;;  %v2639_v45 = vsel %vm2575_vm12, %v2543_v42, %v2607_v50  ;;  %v2282_v43 = vadd.f32 %v2281_v39, %v2280_v12  ;;  %v8199_v55 = vld [vmem:[#allocation3 + $0xc8] sm:$0xff]  ;;  %5650 = vmatmul.msk.f32.gmra.mxu1 %vm1978_vm6, %v7843_v8  ;;  %v10950_v12 = vld [vmem:[#allocation102_spill] sm:$0xff]  ;;  %v8216_v42 = vsel %vm520_vm3, %v2961_v49, %v2962_v26  ;;  %v2310_v50 = vadd.f32 %v2309_v5, %v10952_v10 }
 0x309   : > { %2838 = vst.msk [vmem:[#allocation3 + $0xd9] sm:$0xff] %vm1978_vm6, %v2639_v45  ;;  %v2296_v24 = vsel %vm1978_vm6, %v10950_v12, 0.0  ;;  %v2964_v49 = vrot.slane %v8181_v18, 1  ;;  %v3046_v45 = vrot.slane %v7843_v8, 2  ;;  %v2311_v12 = vsel %vm1978_vm6, %v10954_v15, 0.0  ;;  %v10956_v18 = vld [vmem:[#allocation23_spill] sm:$0xff] }
 0x30a   : > { %v2284_v34 = vadd.f32 %v2283_v38, %v2282_v43  ;;  %v2297_v51 = vadd.f32 %v2296_v24, %v2295_v28 }
 0x30b   : > { %5619 = vmatmul.msk.f32.gmra.mxu0 %vm1978_vm6, %v8204_v21  ;;  %5586 = vmatmul.msk.f32.gmra.mxu3 %vm1978_vm6, %v8216_v42 }
 0x30c   : > { %5569 = vmatmul.msk.f32.gmra.mxu2 %vm1978_vm6, %v8199_v55  ;;  %v2544_v19 = vadd.f32 %v7774_v59, %v2284_v34  ;;  %v2300_v34 = vsel %vm1978_vm6, %v1936_v4, 0.0  ;;  %v8247_v4 = vld [vmem:[#allocation3 + $0x40] sm:$0x3] }
 0x30d   : > { %v8225_v1 = vpop.f32.mrf.mxu1  ;;  %v3049_v16 = vrot.slane %v8247_v4, 2 }
 0x30e   : > { %10953 = vst [vmem:[#allocation106_spill] sm:$0xff] %v8225_v1  ;;  %vm2576_vm13 = vcmp.gt.f32.partialorder %v2544_v19, 0.0  ;;  %v2608_v39 = vmul.f32 0.2, %v2544_v19  ;;  %v1816_v43 = vpop.f32.mrf.mxu3  ;;  %v8240_v1 = vsel %vm609_vm4, %v3046_v45, %v3047_v22  ;;  %v10957_v45 = vld [vmem:[#allocation24_spill] sm:$0xff] }
 0x30f   : > { %v2298_v28 = vsel %vm1978_vm6, %v1816_v43, 0.0  ;;  %10955 = vst [vmem:[#allocation69_spill] sm:$0xff] %v8240_v1  ;;  %v8252_v43 = vsel %vm520_vm3, %v2962_v26, %v2964_v49  ;;  %v2313_v15 = vsel %vm1978_vm6, %v10957_v45, 0.0 }
 0x310   : > { %v8227_v38 = vpop.f32.mrf.mxu0  ;;  %v2640_v24 = vsel %vm2576_vm13, %v2544_v19, %v2608_v39  ;;  %v2299_v5 = vadd.f32 %v2298_v28, %v2297_v51  ;;  %v8235_v10 = vld [vmem:[#allocation3 + $0xd8] sm:$0xff]  ;;  %5651 = vmatmul.msk.f32.gmra.mxu1 %vm1978_vm6, %v7862_v31  ;;  %v2326_v19 = vsel %vm1978_vm6, %v10956_v18, 0.0  ;;  %v2312_v51 = vadd.f32 %v2311_v12, %v2310_v50  ;;  %v10962_v31 = vld [vmem:[#allocation65_spill] sm:$0xff] }
 0x311   : > { %2839 = vst.msk [vmem:[#allocation3 + $0xe1] sm:$0xff] %vm1978_vm6, %v2640_v24  ;;  %v2328_v18 = vsel %vm1978_vm6, %v10958_v63, 0.0  ;;  %v10959_v50 = vld [vmem:[#allocation78_spill] sm:$0xff]  ;;  %v2966_v63 = vrot.slane %v7843_v8, 1 }
 0x312   : > { %v2301_v39 = vadd.f32 %v2300_v34, %v2299_v5  ;;  %v2327_v12 = vadd.f32 %v2326_v19, %v10959_v50  ;;  %v2314_v26 = vadd.f32 %v2313_v15, %v2312_v51  ;;  %v8276_v19 = vsel %vm609_vm4, %v3047_v22, %v3049_v16 }
 0x313   : > { %5620 = vmatmul.msk.f32.gmra.mxu0 %vm1978_vm6, %v8240_v1  ;;  %5587 = vmatmul.msk.f32.gmra.mxu3 %vm1978_vm6, %v8252_v43  ;;  %10961 = vst [vmem:[#allocation37_spill] sm:$0xff] %v8276_v19  ;;  %v8288_v8 = vsel %vm520_vm3, %v2966_v63, %v2967_v32  ;;  %v3052_v22 = vrot.slane %v7903_v40, 2 }
 0x314   : > { %5570 = vmatmul.msk.f32.gmra.mxu2 %vm1978_vm6, %v8235_v10  ;;  %v2545_v28 = vadd.f32 %v7774_v59, %v2301_v39  ;;  %v2317_v39 = vsel %vm1978_vm6, %v1939_v20, 0.0  ;;  %v2329_v51 = vadd.f32 %v2328_v18, %v2327_v12  ;;  %v2330_v20 = vsel %vm1978_vm6, %v7790_v30, 0.0  ;;  %v10963_v18 = vld [vmem:[#allocation86_spill] sm:$0xff] }
 0x315   : > { %v8265_v34 = vpop.f32.mrf.mxu1 }
 0x316   : > { %10960 = vst [vmem:[#allocation61_spill] sm:$0xff] %v8265_v34  ;;  %vm2577_vm14 = vcmp.gt.f32.partialorder %v2545_v28, 0.0  ;;  %v2609_v49 = vmul.f32 0.2, %v2545_v28  ;;  %v1819_v5 = vpop.f32.mrf.mxu3  ;;  %v2972_v34 = vrot.slane %v7903_v40, 1 }
 0x317   : > { %v8259_v24 = vpop.f32.mrf.mxu2  ;;  %v2315_v2 = vsel %vm1978_vm6, %v1819_v5, 0.0  ;;  %v3051_v5 = vrot.slane %v7879_v52, 2 }
 0x318   : > { %v1945_v45 = vpop.f32.mrf.mxu0  ;;  %v2641_v3 = vsel %vm2577_vm14, %v2545_v28, %v2609_v49  ;;  %v2316_v9 = vadd.f32 %v2315_v2, %v2314_v26  ;;  %v8270_v7 = vld [vmem:[#allocation3 + $0xe0] sm:$0xff]  ;;  %5652 = vmatmul.msk.f32.gmra.mxu1 %vm1978_vm6, %v7879_v52  ;;  %v2343_v2 = vsel %vm1978_vm6, %v10962_v31, 0.0  ;;  %v2331_v28 = vadd.f32 %v2330_v20, %v2329_v51 }
 0x319   : > { %2840 = vst.msk [vmem:[#allocation3 + $0xf1] sm:$0xff] %vm1978_vm6, %v2641_v3  ;;  %v2344_v50 = vadd.f32 %v2343_v2, %v10963_v18  ;;  %v2969_v49 = vrot.slane %v8247_v4, 1  ;;  %v2334_v31 = vsel %vm1978_vm6, %v8227_v38, 0.0  ;;  %v8313_v18 = vsel %vm609_vm4, %v3051_v5, %v3052_v22  ;;  %v8320_v38 = vld [vmem:[#allocation3 + $0x58] sm:$0x3]  ;;  %v10967_v4 = vld [vmem:[#allocation33_spill] sm:$0xff] }
 0x31a   : > { %v2318_v15 = vadd.f32 %v2317_v39, %v2316_v9  ;;  %v10965_v39 = vld [vmem:[#allocation71_spill] sm:$0xff]  ;;  %10966 = vst [vmem:[#allocation42_spill] sm:$0xff] %v8313_v18  ;;  %v2347_v5 = vsel %vm1978_vm6, %v7812_v17, 0.0 }
 0x31b   : > { %5621 = vmatmul.msk.f32.gmra.mxu0 %vm1978_vm6, %v8276_v19  ;;  %5588 = vmatmul.msk.f32.gmra.mxu3 %vm1978_vm6, %v8288_v8  ;;  %v2345_v63 = vsel %vm1978_vm6, %v10965_v39, 0.0 }
 0x31c   : > { %5571 = vmatmul.msk.f32.gmra.mxu2 %vm1978_vm6, %v8270_v7  ;;  %v2546_v3 = vadd.f32 %v7774_v59, %v2318_v15 }
 0x31d   : > { %v8297_v12 = vpop.f32.mrf.mxu1 }
 0x31e   : > { %10964 = vst [vmem:[#allocation68_spill] sm:$0xff] %v8297_v12  ;;  %vm2578_vm15 = vcmp.gt.f32.partialorder %v2546_v3, 0.0  ;;  %v2610_v30 = vmul.f32 0.2, %v2546_v3  ;;  %v1822_v9 = vpop.f32.mrf.mxu3  ;;  %v10968_v12 = vld [vmem:[#allocation36_spill] sm:$0xff] }
 0x31f   : > { %v8293_v16 = vpop.f32.mrf.mxu2  ;;  %v2332_v51 = vsel %vm1978_vm6, %v1822_v9, 0.0  ;;  %v8325_v9 = vsel %vm520_vm3, %v2967_v32, %v2969_v49 }
 0x320   : > { %v8299_v26 = vpop.f32.mrf.mxu0  ;;  %v2642_v2 = vsel %vm2578_vm15, %v2546_v3, %v2610_v30  ;;  %v2333_v20 = vadd.f32 %v2332_v51, %v2331_v28  ;;  %v8308_v15 = vld [vmem:[#allocation3 + $0xf0] sm:$0xff]  ;;  %5653 = vmatmul.msk.f32.gmra.mxu1 %vm1978_vm6, %v7903_v40  ;;  %v2360_v3 = vsel %vm1978_vm6, %v10967_v4, 0.0  ;;  %v2346_v28 = vadd.f32 %v2345_v63, %v2344_v50  ;;  %v10969_v50 = vld [vmem:[#allocation10_spill] sm:$0xff]  ;;  %v10972_v40 = vld [vmem:[#allocation84_spill] sm:$0xff] }
 0x321   : > { %2841 = vst.msk [vmem:[#allocation3 + $0xf9] sm:$0xff] %vm1978_vm6, %v2642_v2  ;;  %v3054_v2 = vrot.slane %v8320_v38, 2  ;;  %v2362_v4 = vsel %vm1978_vm6, %v10968_v12, 0.0  ;;  %v2361_v63 = vadd.f32 %v2360_v3, %v10969_v50  ;;  %v2971_v12 = vrot.slane %v7879_v52, 1 }
 0x322   : > { %v2335_v30 = vadd.f32 %v2334_v31, %v2333_v20  ;;  %v2348_v32 = vadd.f32 %v2347_v5, %v2346_v28  ;;  %v2364_v5 = vsel %vm1978_vm6, %v7834_v11, 0.0  ;;  %v10973_v11 = vld [vmem:[#allocation12_spill] sm:$0xff] }
 0x323   : > { %5622 = vmatmul.msk.f32.gmra.mxu0 %vm1978_vm6, %v8313_v18  ;;  %5589 = vmatmul.msk.f32.gmra.mxu3 %vm1978_vm6, %v8325_v9  ;;  %v8349_v3 = vsel %vm609_vm4, %v3052_v22, %v3054_v2  ;;  %v2363_v28 = vadd.f32 %v2362_v4, %v2361_v63  ;;  %v8361_v52 = vsel %vm520_vm3, %v2971_v12, %v2972_v34  ;;  %v3057_v4 = vrot.slane %v7962_v27, 2  ;;  %v10975_v12 = vld [vmem:[#allocation8_spill] sm:$0xff] }
 0x324   : > { %5572 = vmatmul.msk.f32.gmra.mxu2 %vm1978_vm6, %v8308_v15  ;;  %v2547_v39 = vadd.f32 %v7774_v59, %v2335_v30  ;;  %v2351_v59 = vsel %vm1978_vm6, %v1945_v45, 0.0  ;;  %10971 = vst [vmem:[#allocation64_spill] sm:$0xff] %v8349_v3  ;;  %v2377_v45 = vsel %vm1978_vm6, %v10972_v40, 0.0  ;;  %v2379_v40 = vsel %vm1978_vm6, %v10975_v12, 0.0 }
 0x325   : > { %v8338_v31 = vpop.f32.mrf.mxu1  ;;  %v2365_v50 = vadd.f32 %v2364_v5, %v2363_v28 }
 0x326   : > { %10970 = vst [vmem:[#allocation74_spill] sm:$0xff] %v8338_v31  ;;  %vm2579_vm0 = vcmp.gt.f32.partialorder %v2547_v39, 0.0  ;;  %v2611_v49 = vmul.f32 0.2, %v2547_v39  ;;  %v1825_v17 = vpop.f32.mrf.mxu3  ;;  %v10978_v31 = vld [vmem:[#allocation7_spill] sm:$0xff] }
 0x327   : > { %v8332_v51 = vpop.f32.mrf.mxu2  ;;  %v2349_v30 = vsel %vm1978_vm6, %v1825_v17, 0.0 }
 0x328   : > { %v1951_v20 = vpop.f32.mrf.mxu0  ;;  %v2643_v61 = vsel %vm2579_vm0, %v2547_v39, %v2611_v49  ;;  %v2350_v35 = vadd.f32 %v2349_v30, %v2348_v32  ;;  %v8343_v13 = vld [vmem:[#allocation3 + $0xf8] sm:$0xff]  ;;  %5654 = vmatmul.msk.f32.gmra.mxu1 %vm1978_vm6, %v7928_v58  ;;  %v3056_v30 = vrot.slane %v7928_v58, 2 }
 0x329   : > { %2842 = vst.msk [vmem:[#allocation3 + $0x109] sm:$0xff] %vm1978_vm6, %v2643_v61  ;;  %v8368_v61 = vld [vmem:[%s10414_s2] ss:$0 sm:$0xff] }
 0x32a   : > { %v2352_v39 = vadd.f32 %v2351_v59, %v2350_v35  ;;  %v2378_v35 = vadd.f32 %v2377_v45, %v10973_v11  ;;  %v2974_v59 = vrot.slane %v8320_v38, 1  ;;  %v10977_v38 = vld [vmem:[#allocation5_spill] sm:$0xff] }
 0x32b   : > { %5623 = vmatmul.msk.f32.gmra.mxu0 %vm1978_vm6, %v8349_v3  ;;  %5590 = vmatmul.msk.f32.gmra.mxu3 %vm1978_vm6, %v8361_v52 }
 0x32c   : > { %5573 = vmatmul.msk.f32.gmra.mxu2 %vm1978_vm6, %v8343_v13  ;;  %v2548_v22 = vadd.f32 %v8368_v61, %v2352_v39  ;;  %v2368_v39 = vsel %vm1978_vm6, %v8299_v26, 0.0  ;;  %v8398_v26 = vld [vmem:[#allocation3 + $0x70] sm:$0x3] }
 0x32d   : > { %v8375_v63 = vpop.f32.mrf.mxu1 }
 0x32e   : > { %10974 = vst [vmem:[#allocation81_spill] sm:$0xff] %v8375_v63  ;;  %vm2580_vm2 = vcmp.gt.f32.partialorder %v2548_v22, 0.0  ;;  %v2612_v32 = vmul.f32 0.2, %v2548_v22  ;;  %v1828_v49 = vpop.f32.mrf.mxu3  ;;  %v8391_v63 = vsel %vm609_vm4, %v3056_v30, %v3057_v4  ;;  %v2381_v30 = vsel %vm1978_vm6, %v7855_v48, 0.0 }
 0x32f   : > { %v8371_v2 = vpop.f32.mrf.mxu2  ;;  %v2366_v28 = vsel %vm1978_vm6, %v1828_v49, 0.0  ;;  %10976 = vst [vmem:[#allocation47_spill] sm:$0xff] %v8391_v63  ;;  %v8403_v49 = vsel %vm520_vm3, %v2972_v34, %v2974_v59 }
 0x330   : > { %v8377_v17 = vpop.f32.mrf.mxu0  ;;  %v2644_v45 = vsel %vm2580_vm2, %v2548_v22, %v2612_v32  ;;  %v2367_v5 = vadd.f32 %v2366_v28, %v2365_v50  ;;  %v8386_v11 = vld [vmem:[#allocation3 + $0x108] sm:$0xff]  ;;  %5655 = vmatmul.msk.f32.gmra.mxu1 %vm1978_vm6, %v7962_v27  ;;  %v2394_v22 = vsel %vm1978_vm6, %v10977_v38, 0.0  ;;  %v2380_v50 = vadd.f32 %v2379_v40, %v2378_v35  ;;  %v10979_v35 = vld [vmem:[#allocation90_spill] sm:$0xff] }
 0x331   : > { %2843 = vst.msk [vmem:[#allocation3 + $0x111] sm:$0xff] %vm1978_vm6, %v2644_v45  ;;  %v3059_v45 = vrot.slane %v8398_v26, 2  ;;  %v2396_v38 = vsel %vm1978_vm6, %v10978_v31, 0.0  ;;  %v2395_v40 = vadd.f32 %v2394_v22, %v10979_v35  ;;  %v2976_v31 = vrot.slane %v7928_v58, 1  ;;  %v10982_v27 = vld [vmem:[#allocation6_spill] sm:$0xff] }
 0x332   : > { %v2369_v32 = vadd.f32 %v2368_v39, %v2367_v5  ;;  %v2382_v34 = vadd.f32 %v2381_v30, %v2380_v50 }
 0x333   : > { %5624 = vmatmul.msk.f32.gmra.mxu0 %vm1978_vm6, %v8391_v63  ;;  %5591 = vmatmul.msk.f32.gmra.mxu3 %vm1978_vm6, %v8403_v49  ;;  %v8427_v22 = vsel %vm609_vm4, %v3057_v4, %v3059_v45  ;;  %v2397_v50 = vadd.f32 %v2396_v38, %v2395_v40  ;;  %v8439_v58 = vsel %vm520_vm3, %v2976_v31, %v2977_v23  ;;  %v10983_v38 = vld [vmem:[#allocation91_spill] sm:$0xff] }
 0x334   : > { %5574 = vmatmul.msk.f32.gmra.mxu2 %vm1978_vm6, %v8386_v11  ;;  %v2549_v12 = vadd.f32 %v8368_v61, %v2369_v32  ;;  %v2385_v32 = vsel %vm1978_vm6, %v1951_v20, 0.0  ;;  %10981 = vst [vmem:[#allocation43_spill] sm:$0xff] %v8427_v22  ;;  %v2411_v20 = vsel %vm1978_vm6, %v10982_v27, 0.0  ;;  %v2402_v27 = vsel %vm1978_vm6, %v8377_v17, 0.0  ;;  %v8471_v17 = vld [vmem:[#allocation3 + $0x88] sm:$0x3] }
 0x335   : > { %v8416_v39 = vpop.f32.mrf.mxu1  ;;  %v2412_v35 = vadd.f32 %v2411_v20, %v10983_v38 }
 0x336   : > { %10980 = vst [vmem:[#allocation85_spill] sm:$0xff] %v8416_v39  ;;  %vm2581_vm5 = vcmp.gt.f32.partialorder %v2549_v12, 0.0  ;;  %v2613_v59 = vmul.f32 0.2, %v2549_v12  ;;  %v1831_v48 = vpop.f32.mrf.mxu3  ;;  %v2982_v39 = vrot.slane %v8030_v37, 1 }
 0x337   : > { %v8410_v28 = vpop.f32.mrf.mxu2  ;;  %v2383_v63 = vsel %vm1978_vm6, %v1831_v48, 0.0  ;;  %v3061_v48 = vrot.slane %v7992_v54, 2 }
 0x338   : > { %v1957_v5 = vpop.f32.mrf.mxu0  ;;  %v2645_v3 = vsel %vm2581_vm5, %v2549_v12, %v2613_v59  ;;  %v2384_v18 = vadd.f32 %v2383_v63, %v2382_v34  ;;  %v8421_v19 = vld [vmem:[#allocation3 + $0x110] sm:$0xff]  ;;  %5656 = vmatmul.msk.f32.gmra.mxu1 %vm1978_vm6, %v7992_v54  ;;  %v2398_v63 = vsel %vm1978_vm6, %v7881_v0, 0.0  ;;  %v3062_v12 = vrot.slane %v8030_v37, 2 }
 0x339   : > { %2844 = vst.msk [vmem:[#allocation3 + $0x121] sm:$0xff] %vm1978_vm6, %v2645_v3  ;;  %v2399_v45 = vadd.f32 %v2398_v63, %v2397_v50  ;;  %v2979_v59 = vrot.slane %v8398_v26, 1  ;;  %v10987_v26 = vld [vmem:[#allocation14_spill] sm:$0xff] }
 0x33a   : > { %v2386_v30 = vadd.f32 %v2385_v32, %v2384_v18  ;;  %v10985_v32 = vld [vmem:[#allocation9_spill] sm:$0xff]  ;;  %v8464_v38 = vsel %vm609_vm4, %v3061_v48, %v3062_v12  ;;  %v2415_v48 = vsel %vm1978_vm6, %v7914_v25, 0.0 }
 0x33b   : > { %5625 = vmatmul.msk.f32.gmra.mxu0 %vm1978_vm6, %v8427_v22  ;;  %5592 = vmatmul.msk.f32.gmra.mxu3 %vm1978_vm6, %v8439_v58  ;;  %v2413_v31 = vsel %vm1978_vm6, %v10985_v32, 0.0  ;;  %10986 = vst [vmem:[#allocation48_spill] sm:$0xff] %v8464_v38 }
 0x33c   : > { %5575 = vmatmul.msk.f32.gmra.mxu2 %vm1978_vm6, %v8421_v19  ;;  %v2550_v3 = vadd.f32 %v8368_v61, %v2386_v30 }
 0x33d   : > { %v8448_v40 = vpop.f32.mrf.mxu1 }
 0x33e   : > { %10984 = vst [vmem:[#allocation17_spill] sm:$0xff] %v8448_v40  ;;  %vm2582_vm8 = vcmp.gt.f32.partialorder %v2550_v3, 0.0  ;;  %v2614_v0 = vmul.f32 0.2, %v2550_v3  ;;  %v1834_v18 = vpop.f32.mrf.mxu3  ;;  %v10988_v40 = vld [vmem:[#allocation11_spill] sm:$0xff] }
 0x33f   : > { %v8444_v4 = vpop.f32.mrf.mxu2  ;;  %v2400_v50 = vsel %vm1978_vm6, %v1834_v18, 0.0  ;;  %v8476_v18 = vsel %vm520_vm3, %v2977_v23, %v2979_v59 }
 0x340   : > { %v8450_v34 = vpop.f32.mrf.mxu0  ;;  %v2646_v20 = vsel %vm2582_vm8, %v2550_v3, %v2614_v0  ;;  %v2401_v63 = vadd.f32 %v2400_v50, %v2399_v45  ;;  %v8459_v30 = vld [vmem:[#allocation3 + $0x120] sm:$0xff]  ;;  %5657 = vmatmul.msk.f32.gmra.mxu1 %vm1978_vm6, %v8030_v37  ;;  %v2428_v3 = vsel %vm1978_vm6, %v10987_v26, 0.0  ;;  %v2414_v45 = vadd.f32 %v2413_v31, %v2412_v35  ;;  %v10989_v35 = vld [vmem:[#allocation92_spill] sm:$0xff] }
 0x341   : > { %2845 = vst.msk [vmem:[#allocation3 + $0x129] sm:$0xff] %vm1978_vm6, %v2646_v20  ;;  %v3064_v20 = vrot.slane %v8471_v17, 2  ;;  %v2430_v26 = vsel %vm1978_vm6, %v10988_v40, 0.0  ;;  %v2429_v31 = vadd.f32 %v2428_v3, %v10989_v35  ;;  %v2981_v40 = vrot.slane %v7992_v54, 1  ;;  %v10992_v37 = vld [vmem:[#allocation88_spill] sm:$0xff] }
 0x342   : > { %v2403_v0 = vadd.f32 %v2402_v27, %v2401_v63  ;;  %v2416_v23 = vadd.f32 %v2415_v48, %v2414_v45 }
 0x343   : > { %5626 = vmatmul.msk.f32.gmra.mxu0 %vm1978_vm6, %v8464_v38  ;;  %5593 = vmatmul.msk.f32.gmra.mxu3 %vm1978_vm6, %v8476_v18  ;;  %v8500_v3 = vsel %vm609_vm4, %v3062_v12, %v3064_v20  ;;  %v2431_v45 = vadd.f32 %v2430_v26, %v2429_v31  ;;  %v8512_v54 = vsel %vm520_vm3, %v2981_v40, %v2982_v39  ;;  %v10993_v26 = vld [vmem:[#allocation15_spill] sm:$0xff] }
 0x344   : > { %5576 = vmatmul.msk.f32.gmra.mxu2 %vm1978_vm6, %v8459_v30  ;;  %v2551_v32 = vadd.f32 %v8368_v61, %v2403_v0  ;;  %v2419_v0 = vsel %vm1978_vm6, %v1957_v5, 0.0  ;;  %10991 = vst [vmem:[#allocation53_spill] sm:$0xff] %v8500_v3  ;;  %v2445_v5 = vsel %vm1978_vm6, %v10992_v37, 0.0  ;;  %v2436_v37 = vsel %vm1978_vm6, %v8450_v34, 0.0  ;;  %v8544_v34 = vld [vmem:[#allocation3 + $0xa0] sm:$0x3] }
 0x345   : > { %v8489_v27 = vpop.f32.mrf.mxu1  ;;  %v2446_v35 = vadd.f32 %v2445_v5, %v10993_v26 }
 0x346   : > { %10990 = vst [vmem:[#allocation59_spill] sm:$0xff] %v8489_v27  ;;  %vm2583_vm7 = vcmp.gt.f32.partialorder %v2551_v32, 0.0  ;;  %v2615_v59 = vmul.f32 0.2, %v2551_v32  ;;  %v1837_v25 = vpop.f32.mrf.mxu3  ;;  %v2987_v27 = vrot.slane %v8088_v29, 1 }
 0x347   : > { %v8483_v50 = vpop.f32.mrf.mxu2  ;;  %v2417_v38 = vsel %vm1978_vm6, %v1837_v25, 0.0  ;;  %v3066_v25 = vrot.slane %v8060_v56, 2 }
 0x348   : > { %v1963_v63 = vpop.f32.mrf.mxu0  ;;  %v2647_v22 = vsel %vm2583_vm7, %v2551_v32, %v2615_v59  ;;  %v2418_v1 = vadd.f32 %v2417_v38, %v2416_v23  ;;  %v8494_v21 = vld [vmem:[#allocation3 + $0x128] sm:$0xff]  ;;  %5658 = vmatmul.msk.f32.gmra.mxu1 %vm1978_vm6, %v8060_v56  ;;  %v2432_v38 = vsel %vm1978_vm6, %v7945_v41, 0.0  ;;  %v3067_v32 = vrot.slane %v8088_v29, 2 }
 0x349   : > { %2846 = vst.msk [vmem:[#allocation3 + $0x139] sm:$0xff] %vm1978_vm6, %v2647_v22  ;;  %v2433_v20 = vadd.f32 %v2432_v38, %v2431_v45  ;;  %v2984_v59 = vrot.slane %v8471_v17, 1  ;;  %v10997_v17 = vld [vmem:[#allocation13_spill] sm:$0xff] }
 0x34a   : > { %v2420_v48 = vadd.f32 %v2419_v0, %v2418_v1  ;;  %v10995_v0 = vld [vmem:[#allocation32_spill] sm:$0xff]  ;;  %v8537_v26 = vsel %vm609_vm4, %v3066_v25, %v3067_v32  ;;  %v2449_v25 = vsel %vm1978_vm6, %v7986_v14, 0.0 }
 0x34b   : > { %5627 = vmatmul.msk.f32.gmra.mxu0 %vm1978_vm6, %v8500_v3  ;;  %5594 = vmatmul.msk.f32.gmra.mxu3 %vm1978_vm6, %v8512_v54  ;;  %v2447_v40 = vsel %vm1978_vm6, %v10995_v0, 0.0  ;;  %10996 = vst [vmem:[#allocation41_spill] sm:$0xff] %v8537_v26 }
 0x34c   : > { %5577 = vmatmul.msk.f32.gmra.mxu2 %vm1978_vm6, %v8494_v21  ;;  %v2552_v22 = vadd.f32 %v8368_v61, %v2420_v48 }
 0x34d   : > { %v8521_v31 = vpop.f32.mrf.mxu1 }
 0x34e   : > { %10994 = vst [vmem:[#allocation51_spill] sm:$0xff] %v8521_v31  ;;  %vm2584_vm9 = vcmp.gt.f32.partialorder %v2552_v22, 0.0  ;;  %v2616_v41 = vmul.f32 0.2, %v2552_v22  ;;  %v1840_v1 = vpop.f32.mrf.mxu3  ;;  %v10998_v31 = vld [vmem:[#allocation94_spill] sm:$0xff] }
 0x34f   : > { %v8517_v12 = vpop.f32.mrf.mxu2  ;;  %v2434_v45 = vsel %vm1978_vm6, %v1840_v1, 0.0  ;;  %v8549_v1 = vsel %vm520_vm3, %v2982_v39, %v2984_v59 }
 0x350   : > { %v8523_v23 = vpop.f32.mrf.mxu0  ;;  %v2648_v5 = vsel %vm2584_vm9, %v2552_v22, %v2616_v41  ;;  %v2435_v38 = vadd.f32 %v2434_v45, %v2433_v20  ;;  %v8532_v48 = vld [vmem:[#allocation3 + $0x138] sm:$0xff]  ;;  %5659 = vmatmul.msk.f32.gmra.mxu1 %vm1978_vm6, %v8088_v29  ;;  %v2462_v22 = vsel %vm1978_vm6, %v10997_v17, 0.0  ;;  %v2448_v20 = vadd.f32 %v2447_v40, %v2446_v35  ;;  %v11002_v29 = vld [vmem:[#allocation19_spill] sm:$0xff] }
 0x351   : > { %2847 = vst.msk [vmem:[#allocation3 + $0x141] sm:$0xff] %vm1978_vm6, %v2648_v5  ;;  %v3069_v5 = vrot.slane %v8544_v34, 2  ;;  %v2464_v17 = vsel %vm1978_vm6, %v10998_v31, 0.0  ;;  %v10999_v35 = vld [vmem:[#allocation22_spill] sm:$0xff]  ;;  %v2986_v31 = vrot.slane %v8060_v56, 1 }
 0x352   : > { %v2437_v41 = vadd.f32 %v2436_v37, %v2435_v38  ;;  %v2463_v40 = vadd.f32 %v2462_v22, %v10999_v35  ;;  %v2450_v39 = vadd.f32 %v2449_v25, %v2448_v20 }
 0x353   : > { %5628 = vmatmul.msk.f32.gmra.mxu0 %vm1978_vm6, %v8537_v26  ;;  %5595 = vmatmul.msk.f32.gmra.mxu3 %vm1978_vm6, %v8549_v1  ;;  %v8575_v22 = vsel %vm609_vm4, %v3067_v32, %v3069_v5  ;;  %v8587_v56 = vsel %vm520_vm3, %v2986_v31, %v2987_v27 }
 0x354   : > { %5578 = vmatmul.msk.f32.gmra.mxu2 %vm1978_vm6, %v8532_v48  ;;  %v2553_v0 = vadd.f32 %v8368_v61, %v2437_v41  ;;  %v2453_v41 = vsel %vm1978_vm6, %v1963_v63, 0.0  ;;  %11001 = vst [vmem:[#allocation54_spill] sm:$0xff] %v8575_v22  ;;  %v2465_v20 = vadd.f32 %v2464_v17, %v2463_v40  ;;  %v2479_v63 = vsel %vm1978_vm6, %v11002_v29, 0.0  ;;  %v11003_v17 = vld [vmem:[#allocation101_spill] sm:$0xff] }
 0x355   : > { %v8562_v37 = vpop.f32.mrf.mxu1  ;;  %v2480_v35 = vadd.f32 %v2479_v63, %v11003_v17  ;;  %v2470_v29 = vsel %vm1978_vm6, %v8523_v23, 0.0  ;;  %v8619_v23 = vld [vmem:[#allocation3 + $0xb8] sm:$0x3] }
 0x356   : > { %11000 = vst [vmem:[#allocation66_spill] sm:$0xff] %v8562_v37  ;;  %vm2585_vm10 = vcmp.gt.f32.partialorder %v2553_v0, 0.0  ;;  %v2617_v59 = vmul.f32 0.2, %v2553_v0  ;;  %v1843_v14 = vpop.f32.mrf.mxu3 }
 0x357   : > { %v8556_v45 = vpop.f32.mrf.mxu2  ;;  %v2451_v26 = vsel %vm1978_vm6, %v1843_v14, 0.0  ;;  %v3071_v14 = vrot.slane %v8112_v47, 2 }
 0x358   : > { %v8564_v38 = vpop.f32.mrf.mxu0  ;;  %v2649_v3 = vsel %vm2585_vm10, %v2553_v0, %v2617_v59  ;;  %v2452_v53 = vadd.f32 %v2451_v26, %v2450_v39  ;;  %v8569_v57 = vld [vmem:[#allocation3 + $0x140] sm:$0xff]  ;;  %5660 = vmatmul.msk.f32.gmra.mxu1 %vm1978_vm6, %v8112_v47  ;;  %v2466_v26 = vsel %vm1978_vm6, %v8032_v33, 0.0  ;;  %v3072_v0 = vrot.slane %v8140_v36, 2 }
 0x359   : > { %2848 = vst.msk [vmem:[#allocation3 + $0x151] sm:$0xff] %vm1978_vm6, %v2649_v3  ;;  %v2467_v5 = vadd.f32 %v2466_v26, %v2465_v20  ;;  %v2989_v59 = vrot.slane %v8544_v34, 1  ;;  %v3147_v34 = vld [vmem:[%s10415_s3 + $0x28] sm:$0xff] }
 0x35a   : > { %v2454_v25 = vadd.f32 %v2453_v41, %v2452_v53  ;;  %v11005_v41 = vld [vmem:[#allocation95_spill] sm:$0xff]  ;;  %v8612_v17 = vsel %vm609_vm4, %v3071_v14, %v3072_v0  ;;  %3935 = vmatpush.msra.mxu3 %v3147_v34 }
 0x35b   : > { %5629 = vmatmul.msk.f32.gmra.mxu0 %vm1978_vm6, %v8575_v22  ;;  %5596 = vmatmul.msk.f32.gmra.mxu3 %vm1978_vm6, %v8587_v56  ;;  %v2481_v31 = vsel %vm1978_vm6, %v11005_v41, 0.0  ;;  %11006 = vst [vmem:[#allocation75_spill] sm:$0xff] %v8612_v17  ;;  %v8627_v14 = vsel %vm520_vm3, %v2987_v27, %v2989_v59  ;;  %v3150_v41 = vld [vmem:[%s10415_s3 + $0x40] sm:$0xff]  ;;  %v3074_v59 = vrot.slane %v8619_v23, 2 }
 0x35c   : > { %5579 = vmatmul.msk.f32.gmra.mxu2 %vm1978_vm6, %v8569_v57  ;;  %v2554_v3 = vadd.f32 %v8368_v61, %v2454_v25 }
 0x35d   : > { %v8596_v40 = vpop.f32.mrf.mxu1  ;;  %4286 = vmatpush.msra.mxu2 %v3150_v41 }
 0x35e   : > { %11004 = vst [vmem:[#allocation77_spill] sm:$0xff] %v8596_v40  ;;  %vm2586_vm11 = vcmp.gt.f32.partialorder %v2554_v3, 0.0  ;;  %v2618_v33 = vmul.f32 0.2, %v2554_v3  ;;  %v1846_v53 = vpop.f32.mrf.mxu3 }
 0x35f   : > { %v8592_v32 = vpop.f32.mrf.mxu2  ;;  %v2468_v20 = vsel %vm1978_vm6, %v1846_v53, 0.0 }
 0x360   : > { %v8598_v39 = vpop.f32.mrf.mxu0  ;;  %v2650_v63 = vsel %vm2586_vm11, %v2554_v3, %v2618_v33  ;;  %v2469_v26 = vadd.f32 %v2468_v20, %v2467_v5  ;;  %v8607_v25 = vld [vmem:[#allocation3 + $0x150] sm:$0xff]  ;;  %5661 = vmatmul.msk.f32.gmra.mxu1 %vm1978_vm6, %v8140_v36  ;;  %v11007_v3 = vld [vmem:[#allocation98_spill] sm:$0xff]  ;;  %v2482_v33 = vadd.f32 %v2481_v31, %v2480_v35  ;;  %v2483_v20 = vsel %vm1978_vm6, %v8071_v62, 0.0  ;;  %v3148_v35 = vld [vmem:[%s10415_s3 + $0x30] sm:$0xff] }
 0x361   : > { %2849 = vst.msk [vmem:[#allocation3 + $0x159] sm:$0xff] %vm1978_vm6, %v2650_v63  ;;  %v2496_v5 = vsel %vm1978_vm6, %v11007_v3, 0.0  ;;  %4052 = vmatpush.msra.mxu0 %v3148_v35  ;;  %v3149_v3 = vld [vmem:[%s10415_s3 + $0x38] sm:$0xff]  ;;  %v2487_v35 = vsel %vm1978_vm6, %v8564_v38, 0.0 }
 0x362   : > { %v2471_v53 = vadd.f32 %v2470_v29, %v2469_v26  ;;  %v11008_v29 = vld [vmem:[#allocation18_spill] sm:$0xff]  ;;  %v11009_v26 = vld [vmem:[#allocation21_spill] sm:$0xff]  ;;  %v2484_v41 = vadd.f32 %v2483_v20, %v2482_v33  ;;  %4169 = vmatpush.msra.mxu1 %v3149_v3  ;;  %v2991_v33 = vrot.slane %v8112_v47, 1  ;;  %v8661_v20 = vsel %vm609_vm4, %v3072_v0, %v3074_v59  ;;  %v11013_v3 = vld [vmem:[#allocation28_spill] sm:$0xff] }
 0x363   : > { %5630 = vmatmul.msk.f32.gmra.mxu0 %vm1978_vm6, %v8612_v17  ;;  %5597 = vmatmul.msk.f32.gmra.mxu3 %vm1978_vm6, %v8627_v14  ;;  %v2498_v63 = vsel %vm1978_vm6, %v11008_v29, 0.0  ;;  %v2497_v62 = vadd.f32 %v2496_v5, %v11009_v26  ;;  %v2992_v17 = vrot.slane %v8140_v36, 1  ;;  %11011 = vst [vmem:[#allocation60_spill] sm:$0xff] %v8661_v20  ;;  %v11012_v36 = vld [vmem:[#allocation99_spill] sm:$0xff] }
 0x364   : > { %5580 = vmatmul.msk.f32.gmra.mxu2 %vm1978_vm6, %v8607_v25  ;;  %v2555_v31 = vadd.f32 %v8368_v61, %v2471_v53  ;;  %v2513_v38 = vsel %vm1978_vm6, %v11012_v36, 0.0 }
 0x365   : > { %v8646_v34 = vpop.f32.mrf.mxu1  ;;  %v2499_v22 = vadd.f32 %v2498_v63, %v2497_v62  ;;  %v8673_v47 = vsel %vm520_vm3, %v2991_v33, %v2992_v17  ;;  %v3077_v63 = vrot.slane %v8199_v55, 2  ;;  %v11015_v33 = vld [vmem:[#allocation104_spill] sm:$0xff] }
 0x366   : > { %11010 = vst [vmem:[#allocation57_spill] sm:$0xff] %v8646_v34  ;;  %vm2587_vm1 = vcmp.gt.f32.partialorder %v2555_v31, 0.0  ;;  %v2619_v40 = vmul.f32 0.2, %v2555_v31  ;;  %v1849_v53 = vpop.f32.mrf.mxu3  ;;  %v2515_v36 = vsel %vm1978_vm6, %v11015_v33, 0.0 }
 0x367   : > { %v8640_v27 = vpop.f32.mrf.mxu2  ;;  %v2485_v29 = vsel %vm1978_vm6, %v1849_v53, 0.0 }
 0x368   : > { %v1975_v37 = vpop.f32.mrf.mxu0  ;;  %v2651_v5 = vsel %vm2587_vm1, %v2555_v31, %v2619_v40  ;;  %v2486_v26 = vadd.f32 %v2485_v29, %v2484_v41  ;;  %v8655_v34 = vld [vmem:[#allocation3 + $0x158] sm:$0xff]  ;;  %5662 = vmatmul.msk.f32.gmra.mxu1 %vm1978_vm6, %v8164_v6  ;;  %v2500_v40 = vsel %vm1978_vm6, %v8101_v44, 0.0  ;;  %v2514_v41 = vadd.f32 %v2513_v38, %v11013_v3 }
 0x369   : > { %2850 = vst.msk [vmem:[#allocation3 + $0x169] sm:$0xff] %vm1978_vm6, %v2651_v5  ;;  %v2501_v62 = vadd.f32 %v2500_v40, %v2499_v22  ;;  %v2994_v29 = vrot.slane %v8619_v23, 1 }
 0x36a   : > { %v2488_v31 = vadd.f32 %v2487_v35, %v2486_v26  ;;  %v3076_v26 = vrot.slane %v8164_v6, 2 }
 0x36b   : > { %5631 = vmatmul.msk.f32.gmra.mxu0 %vm1978_vm6, %v8661_v20  ;;  %5598 = vmatmul.msk.f32.gmra.mxu3 %vm1978_vm6, %v8673_v47 }
 0x36c   : > { %5581 = vmatmul.msk.f32.gmra.mxu2 %vm1978_vm6, %v8655_v34  ;;  %v2556_v0 = vadd.f32 %v8368_v61, %v2488_v31  ;;  %v2504_v31 = vsel %vm1978_vm6, %v8598_v39, 0.0  ;;  %v8698_v23 = vsel %vm609_vm4, %v3076_v26, %v3077_v63  ;;  %v2880_v39 = vld [vmem:[#allocation3 + $0xd0] sm:$0x3] }
 0x36d   : > { %v8682_v53 = vpop.f32.mrf.mxu1  ;;  %11016 = vst [vmem:[#allocation16_spill] sm:$0xff] %v8698_v23 }
 0x36e   : > { %11014 = vst [vmem:[#allocation63_spill] sm:$0xff] %v8682_v53  ;;  %vm2588_vm12 = vcmp.gt.f32.partialorder %v2556_v0, 0.0  ;;  %v2620_v44 = vmul.f32 0.2, %v2556_v0  ;;  %v1852_v35 = vpop.f32.mrf.mxu3 }
 0x36f   : > { %v8678_v59 = vpop.f32.mrf.mxu2  ;;  %v2502_v22 = vsel %vm1978_vm6, %v1852_v35, 0.0  ;;  %v2516_v35 = vadd.f32 %v2515_v36, %v2514_v41 }
 0x370   : > { %v8685_v5 = vpop.f32.mrf.mxu0  ;;  %v2652_v38 = vsel %vm2588_vm12, %v2556_v0, %v2620_v44  ;;  %v2503_v40 = vadd.f32 %v2502_v22, %v2501_v62  ;;  %v8693_v3 = vld [vmem:[#allocation3 + $0x168] sm:$0xff]  ;;  %5663 = vmatmul.msk.f32.gmra.mxu1 %vm1978_vm6, %v8199_v55  ;;  %v8706_v62 = vsel %vm520_vm3, %v2992_v17, %v2994_v29  ;;  %v2517_v44 = vsel %vm1978_vm6, %v8138_v60, 0.0 }
 0x371   : > { %2851 = vst.msk [vmem:[#allocation3 + $0x171] sm:$0xff] %vm1978_vm6, %v2652_v38  ;;  %v3079_v22 = vrot.slane %v2880_v39, 2  ;;  %v2518_v53 = vadd.f32 %v2517_v44, %v2516_v35  ;;  %v2997_v17 = vrot.slane %v8199_v55, 1  ;;  %v2521_v60 = vsel %vm1978_vm6, %v1975_v37, 0.0 }
 0x372   : > { %v2505_v0 = vadd.f32 %v2504_v31, %v2503_v40  ;;  %v2996_v35 = vrot.slane %v8164_v6, 1 }
 0x373   : > { %5632 = vmatmul.msk.f32.gmra.mxu0 %vm1978_vm6, %v8698_v23  ;;  %5599 = vmatmul.msk.f32.gmra.mxu3 %vm1978_vm6, %v8706_v62  ;;  %v8728_v44 = vsel %vm609_vm4, %v3077_v63, %v3079_v22  ;;  %v3082_v63 = vrot.slane %v8270_v7, 2 }
 0x374   : > { %5582 = vmatmul.msk.f32.gmra.mxu2 %vm1978_vm6, %v8693_v3  ;;  %v2557_v26 = vadd.f32 %v8368_v61, %v2505_v0  ;;  %11017 = vst [vmem:[#allocation73_spill] sm:$0xff] %v8728_v44  ;;  %v8736_v37 = vsel %vm520_vm3, %v2996_v35, %v2997_v17 }
 0x375   : > { %v8715_v38 = vpop.f32.mrf.mxu1 }
 0x376   : > { %vm2589_vm13 = vcmp.gt.f32.partialorder %v2557_v26, 0.0  ;;  %v2621_v41 = vmul.f32 0.2, %v2557_v26  ;;  %v1855_v36 = vpop.f32.mrf.mxu3 }
 0x377   : > { %v8713_v33 = vpop.f32.mrf.mxu2  ;;  %v2519_v31 = vsel %vm1978_vm6, %v1855_v36, 0.0  ;;  %v2999_v36 = vrot.slane %v2880_v39, 1  ;;  %v2883_v39 = vld [vmem:[#allocation3 + $0xe8] sm:$0x3] }
 0x378   : > { %v8718_v29 = vpop.f32.mrf.mxu0  ;;  %v2653_v40 = vsel %vm2589_vm13, %v2557_v26, %v2621_v41  ;;  %v2520_v23 = vadd.f32 %v2519_v31, %v2518_v53  ;;  %v8722_v0 = vld [vmem:[#allocation3 + $0x170] sm:$0xff]  ;;  %5664 = vmatmul.msk.f32.gmra.mxu1 %vm1978_vm6, %v8235_v10 }
 0x379   : > { %2852 = vst.msk [vmem:[#allocation3 + $0x181] sm:$0xff] %vm1978_vm6, %v2653_v40  ;;  %v8762_v40 = vsel %vm520_vm3, %v2997_v17, %v2999_v36  ;;  %v3001_v17 = vrot.slane %v8235_v10, 1 }
 0x37a   : > { %v2522_v55 = vadd.f32 %v2521_v60, %v2520_v23  ;;  %v3081_v60 = vrot.slane %v8235_v10, 2 }
 0x37b   : > { %5633 = vmatmul.msk.f32.gmra.mxu0 %vm1978_vm6, %v8728_v44  ;;  %5600 = vmatmul.msk.f32.gmra.mxu3 %vm1978_vm6, %v8736_v37 }
 0x37c   : > { %5583 = vmatmul.msk.f32.gmra.mxu2 %vm1978_vm6, %v8722_v0  ;;  %v2558_v6 = vadd.f32 %v8368_v61, %v2522_v55  ;;  %v8754_v61 = vsel %vm609_vm4, %v3081_v60, %v3082_v63  ;;  %v3084_v55 = vrot.slane %v2883_v39, 2  ;;  %v3002_v60 = vrot.slane %v8270_v7, 1 }
 0x37d   : > { %v8744_v26 = vpop.f32.mrf.mxu1  ;;  %11018 = vst [vmem:[#allocation67_spill] sm:$0xff] %v8754_v61 }
 0x37e   : > { %vm2590_vm14 = vcmp.gt.f32.partialorder %v2558_v6, 0.0  ;;  %v2622_v22 = vmul.f32 0.2, %v2558_v6  ;;  %v8746_v41 = vpop.f32.mrf.mxu3  ;;  %v8779_v36 = vsel %vm609_vm4, %v3082_v63, %v3084_v55  ;;  %v3004_v55 = vrot.slane %v2883_v39, 1  ;;  %v2886_v39 = vld [vmem:[#allocation3 + $0x100] sm:$0x3] }
 0x37f   : > { %v8741_v53 = vpop.f32.mrf.mxu2  ;;  %11021 = vst [vmem:[#allocation72_spill] sm:$0xff] %v8779_v36 }
 0x380   : > { %v8748_v23 = vpop.f32.mrf.mxu0  ;;  %v2654_v31 = vsel %vm2590_vm14, %v2558_v6, %v2622_v22  ;;  %5665 = vmatmul.msk.f32.gmra.mxu1 %vm1978_vm6, %v8270_v7 }
 0x381   : > { %2853 = vst.msk [vmem:[#allocation3 + $0x189] sm:$0xff] %vm1978_vm6, %v2654_v31  ;;  %v8786_v31 = vsel %vm520_vm3, %v3001_v17, %v3002_v60 }
 0x383   : > { %5634 = vmatmul.msk.f32.gmra.mxu0 %vm1978_vm6, %v8754_v61  ;;  %5601 = vmatmul.msk.f32.gmra.mxu3 %vm1978_vm6, %v8762_v40  ;;  %v3087_v61 = vrot.slane %v8343_v13, 2 }
 0x384   : > { %5680 = vmatmul.msk.f32.vlgmr.msrb.gmra.mxu2 %vm1978_vm6, %v8216_v42 }
 0x385   : > { %v8768_v6 = vpop.f32.mrf.mxu1 }
 0x386   : > { %11019 = vst [vmem:[#allocation82_spill] sm:$0xff] %v8768_v6  ;;  %v8770_v22 = vpop.f32.mrf.mxu3 }
 0x387   : > { %v8766_v35 = vpop.f32.mrf.mxu2 }
 0x388   : > { %v8773_v42 = vpop.f32.mrf.mxu0  ;;  %5666 = vmatmul.msk.f32.gmra.mxu1 %vm1978_vm6, %v8308_v15 }
 0x389   : > { %11020 = vst [vmem:[#allocation97_spill] sm:$0xff] %v8773_v42 }
 0x38b   : > { %5635 = vmatmul.msk.f32.gmra.mxu0 %vm1978_vm6, %v8779_v36  ;;  %5602 = vmatmul.msk.f32.gmra.mxu3 %vm1978_vm6, %v8786_v31  ;;  %v4418_v36 = vsel %vm1978_vm6, %v8259_v24, 0.0 }
 0x38c   : > { %5681 = vmatmul.msk.f32.gmra.mxu2 %vm1978_vm6, %v8252_v43  ;;  %v3086_v43 = vrot.slane %v8308_v15, 2 }
 0x38d   : > { %v8793_v10 = vpop.f32.mrf.mxu1 }
 0x38e   : > { %11022 = vst [vmem:[#allocation80_spill] sm:$0xff] %v8793_v10  ;;  %v3415_v63 = vpop.f32.mrf.mxu3  ;;  %v8806_v42 = vsel %vm609_vm4, %v3086_v43, %v3087_v61 }
 0x38f   : > { %v8790_v7 = vpop.f32.mrf.mxu2  ;;  %v4419_v17 = vsel %vm1978_vm6, %v3415_v63, 0.0  ;;  %11025 = vst [vmem:[#allocation83_spill] sm:$0xff] %v8806_v42 }
 0x390   : > { %v8795_v44 = vpop.f32.mrf.mxu0  ;;  %v8801_v20 = vadd.f32 %v4419_v17, %v4418_v36  ;;  %5667 = vmatmul.msk.f32.gmra.mxu1 %vm1978_vm6, %v8343_v13  ;;  %v3089_v36 = vrot.slane %v2886_v39, 2  ;;  %v3007_v17 = vrot.slane %v8343_v13, 1 }
 0x391   : > { %11023 = vst [vmem:[#allocation40_spill] sm:$0xff] %v8795_v44  ;;  %v8813_v44 = vsel %vm520_vm3, %v3002_v60, %v3004_v55  ;;  %v3006_v55 = vrot.slane %v8308_v15, 1 }
 0x392   : > { %11024 = vst [vmem:[#allocation70_spill] sm:$0xff] %v8801_v20  ;;  %v8833_v20 = vsel %vm609_vm4, %v3087_v61, %v3089_v36  ;;  %v3091_v36 = vrot.slane %v8386_v11, 2 }
 0x393   : > { %5636 = vmatmul.msk.f32.gmra.mxu0 %vm1978_vm6, %v8806_v42  ;;  %5603 = vmatmul.msk.f32.gmra.mxu3 %vm1978_vm6, %v8813_v44  ;;  %v4435_v42 = vsel %vm1978_vm6, %v8293_v16, 0.0  ;;  %11028 = vst [vmem:[#allocation25_spill] sm:$0xff] %v8833_v20  ;;  %v8840_v13 = vsel %vm520_vm3, %v3006_v55, %v3007_v17 }
 0x394   : > { %5682 = vmatmul.msk.f32.gmra.mxu2 %vm1978_vm6, %v8288_v8 }
 0x395   : > { %v8819_v63 = vpop.f32.mrf.mxu1 }
 0x396   : > { %11026 = vst [vmem:[#allocation79_spill] sm:$0xff] %v8819_v63  ;;  %v3418_v43 = vpop.f32.mrf.mxu3 }
 0x397   : > { %v8817_v24 = vpop.f32.mrf.mxu2  ;;  %v4436_v6 = vsel %vm1978_vm6, %v3418_v43, 0.0  ;;  %v4452_v43 = vsel %vm1978_vm6, %v8332_v51, 0.0 }
 0x398   : > { %v8822_v10 = vpop.f32.mrf.mxu0  ;;  %v8827_v60 = vadd.f32 %v4436_v6, %v4435_v42  ;;  %5668 = vmatmul.msk.f32.gmra.mxu1 %vm1978_vm6, %v8386_v11  ;;  %v3092_v6 = vrot.slane %v8421_v19, 2  ;;  %v3009_v42 = vrot.slane %v2886_v39, 1  ;;  %v2889_v39 = vld [vmem:[#allocation3 + $0x118] sm:$0x3] }
 0x399   : > { %11027 = vst [vmem:[#allocation76_spill] sm:$0xff] %v8822_v10 }
 0x39a   : > { %v8860_v63 = vsel %vm609_vm4, %v3091_v36, %v3092_v6  ;;  %v8867_v51 = vsel %vm520_vm3, %v3007_v17, %v3009_v42  ;;  %v3012_v36 = vrot.slane %v8421_v19, 1  ;;  %v3011_v17 = vrot.slane %v8386_v11, 1 }
 0x39b   : > { %5637 = vmatmul.msk.f32.gmra.mxu0 %vm1978_vm6, %v8833_v20  ;;  %5604 = vmatmul.msk.f32.gmra.mxu3 %vm1978_vm6, %v8840_v13  ;;  %11032 = vst [vmem:[#allocation102_spill] sm:$0xff] %v8860_v63  ;;  %v3097_v11 = vrot.slane %v8494_v21, 2 }
 0x39c   : > { %5683 = vmatmul.msk.f32.gmra.mxu2 %vm1978_vm6, %v8325_v9 }
 0x39d   : > { %v8847_v15 = vpop.f32.mrf.mxu1 }
 0x39e   : > { %11029 = vst [vmem:[#allocation46_spill] sm:$0xff] %v8847_v15  ;;  %v3421_v61 = vpop.f32.mrf.mxu3  ;;  %v4469_v15 = vsel %vm1978_vm6, %v8371_v2, 0.0 }
 0x39f   : > { %v8844_v16 = vpop.f32.mrf.mxu2  ;;  %v4453_v20 = vsel %vm1978_vm6, %v3421_v61, 0.0  ;;  %v3094_v61 = vrot.slane %v2889_v39, 2 }
 0x3a0   : > { %v8853_v55 = vpop.f32.mrf.mxu0  ;;  %v8855_v10 = vadd.f32 %v4453_v20, %v4452_v43  ;;  %5669 = vmatmul.msk.f32.gmra.mxu1 %vm1978_vm6, %v8421_v19  ;;  %v8894_v19 = vsel %vm520_vm3, %v3011_v17, %v3012_v36 }
 0x3a1   : > { %11030 = vst [vmem:[#allocation58_spill] sm:$0xff] %v8853_v55  ;;  %v8885_v42 = vsel %vm609_vm4, %v3092_v6, %v3094_v61  ;;  %v3014_v6 = vrot.slane %v2889_v39, 1  ;;  %v4486_v61 = vsel %vm1978_vm6, %v8410_v28, 0.0  ;;  %v2892_v39 = vld [vmem:[#allocation3 + $0x130] sm:$0x3] }
 0x3a2   : > { %11031 = vst [vmem:[#allocation20_spill] sm:$0xff] %v8855_v10 }
 0x3a3   : > { %5638 = vmatmul.msk.f32.gmra.mxu0 %vm1978_vm6, %v8860_v63  ;;  %5605 = vmatmul.msk.f32.gmra.mxu3 %vm1978_vm6, %v8867_v51  ;;  %11035 = vst [vmem:[#allocation23_spill] sm:$0xff] %v8885_v42  ;;  %v8919_v28 = vsel %vm520_vm3, %v3012_v36, %v3014_v6  ;;  %v3016_v36 = vrot.slane %v8459_v30, 1 }
 0x3a4   : > { %5684 = vmatmul.msk.f32.gmra.mxu2 %vm1978_vm6, %v8361_v52 }
 0x3a5   : > { %v8873_v55 = vpop.f32.mrf.mxu1 }
 0x3a6   : > { %v3424_v43 = vpop.f32.mrf.mxu3  ;;  %11033 = vst [vmem:[#allocation29_spill] sm:$0xff] %v8873_v55 }
 0x3a7   : > { %v8871_v20 = vpop.f32.mrf.mxu2  ;;  %v4470_v63 = vsel %vm1978_vm6, %v3424_v43, 0.0 }
 0x3a8   : > { %v8879_v10 = vadd.f32 %v4470_v63, %v4469_v15  ;;  %5670 = vmatmul.msk.f32.gmra.mxu1 %vm1978_vm6, %v8459_v30  ;;  %v8889_v55 = vpop.f32.mrf.mxu0  ;;  %v3096_v15 = vrot.slane %v8459_v30, 2  ;;  %v3102_v30 = vrot.slane %v8569_v57, 2 }
 0x3a9   : > { %11036 = vst [vmem:[#allocation24_spill] sm:$0xff] %v8889_v55 }
 0x3aa   : > { %11034 = vst [vmem:[#allocation52_spill] sm:$0xff] %v8879_v10  ;;  %v8912_v55 = vsel %vm609_vm4, %v3096_v15, %v3097_v11 }
 0x3ab   : > { %5639 = vmatmul.msk.f32.gmra.mxu0 %vm1978_vm6, %v8885_v42  ;;  %5606 = vmatmul.msk.f32.gmra.mxu3 %vm1978_vm6, %v8894_v19  ;;  %11039 = vst [vmem:[#allocation65_spill] sm:$0xff] %v8912_v55 }
 0x3ac   : > { %5685 = vmatmul.msk.f32.gmra.mxu2 %vm1978_vm6, %v8403_v49 }
 0x3ad   : > { %v8907_v17 = vpop.f32.mrf.mxu1 }
 0x3ae   : > { %v3427_v63 = vpop.f32.mrf.mxu3  ;;  %11038 = vst [vmem:[#allocation78_spill] sm:$0xff] %v8907_v17  ;;  %v3017_v17 = vrot.slane %v8494_v21, 1 }
 0x3af   : > { %v8898_v2 = vpop.f32.mrf.mxu2  ;;  %v4487_v43 = vsel %vm1978_vm6, %v3427_v63, 0.0 }
 0x3b0   : > { %v8905_v42 = vadd.f32 %v4487_v43, %v4486_v61  ;;  %5671 = vmatmul.msk.f32.gmra.mxu1 %vm1978_vm6, %v8494_v21  ;;  %v8923_v63 = vpop.f32.mrf.mxu0  ;;  %v3099_v43 = vrot.slane %v2892_v39, 2 }
 0x3b1   : > { %11040 = vst [vmem:[#allocation86_spill] sm:$0xff] %v8923_v63 }
 0x3b2   : > { %11037 = vst [vmem:[#allocation26_spill] sm:$0xff] %v8905_v42  ;;  %v4503_v42 = vsel %vm1978_vm6, %v8444_v4, 0.0  ;;  %v8937_v6 = vsel %vm609_vm4, %v3097_v11, %v3099_v43  ;;  %v8946_v4 = vsel %vm520_vm3, %v3016_v36, %v3017_v17  ;;  %v3019_v43 = vrot.slane %v2892_v39, 1  ;;  %v2895_v39 = vld [vmem:[#allocation3 + $0x148] sm:$0x3] }
 0x3b3   : > { %5640 = vmatmul.msk.f32.gmra.mxu0 %vm1978_vm6, %v8912_v55  ;;  %5607 = vmatmul.msk.f32.gmra.mxu3 %vm1978_vm6, %v8919_v28  ;;  %11042 = vst [vmem:[#allocation33_spill] sm:$0xff] %v8937_v6 }
 0x3b4   : > { %5686 = vmatmul.msk.f32.gmra.mxu2 %vm1978_vm6, %v8439_v58 }
 0x3b5   : > { %v8943_v21 = vpop.f32.mrf.mxu1 }
 0x3b6   : > { %v3430_v15 = vpop.f32.mrf.mxu3  ;;  %11043 = vst [vmem:[#allocation36_spill] sm:$0xff] %v8943_v21 }
 0x3b7   : > { %v8925_v61 = vpop.f32.mrf.mxu2  ;;  %v4504_v55 = vsel %vm1978_vm6, %v3430_v15, 0.0  ;;  %v3101_v15 = vrot.slane %v8532_v48, 2 }
 0x3b8   : > { %v8931_v10 = vadd.f32 %v4504_v55, %v4503_v42  ;;  %5672 = vmatmul.msk.f32.gmra.mxu1 %vm1978_vm6, %v8532_v48  ;;  %v8953_v42 = vpop.f32.mrf.mxu0 }
 0x3b9   : > { %11044 = vst [vmem:[#allocation10_spill] sm:$0xff] %v8953_v42  ;;  %v8964_v63 = vsel %vm609_vm4, %v3101_v15, %v3102_v30  ;;  %v8971_v42 = vsel %vm520_vm3, %v3017_v17, %v3019_v43  ;;  %v3022_v15 = vrot.slane %v8569_v57, 1  ;;  %v3021_v43 = vrot.slane %v8532_v48, 1 }
 0x3ba   : > { %11041 = vst [vmem:[#allocation71_spill] sm:$0xff] %v8931_v10 }
 0x3bb   : > { %5641 = vmatmul.msk.f32.gmra.mxu0 %vm1978_vm6, %v8937_v6  ;;  %5608 = vmatmul.msk.f32.gmra.mxu3 %vm1978_vm6, %v8946_v4  ;;  %v4520_v6 = vsel %vm1978_vm6, %v8483_v50, 0.0  ;;  %11046 = vst [vmem:[#allocation12_spill] sm:$0xff] %v8964_v63 }
 0x3bc   : > { %5687 = vmatmul.msk.f32.gmra.mxu2 %vm1978_vm6, %v8476_v18 }
 0x3bd   : > { %v8975_v50 = vpop.f32.mrf.mxu1 }
 0x3be   : > { %v3433_v11 = vpop.f32.mrf.mxu3  ;;  %11047 = vst [vmem:[#allocation8_spill] sm:$0xff] %v8975_v50 }
 0x3bf   : > { %v8950_v55 = vpop.f32.mrf.mxu2  ;;  %v4521_v21 = vsel %vm1978_vm6, %v3433_v11, 0.0 }
 0x3c0   : > { %v8959_v36 = vadd.f32 %v4521_v21, %v4520_v6  ;;  %5673 = vmatmul.msk.f32.gmra.mxu1 %vm1978_vm6, %v8569_v57  ;;  %v3104_v21 = vrot.slane %v2895_v39, 2  ;;  %v8982_v10 = vpop.f32.mrf.mxu0  ;;  %v8998_v57 = vsel %vm520_vm3, %v3021_v43, %v3022_v15 }
 0x3c1   : > { %11048 = vst [vmem:[#allocation5_spill] sm:$0xff] %v8982_v10 }
 0x3c2   : > { %11045 = vst [vmem:[#allocation84_spill] sm:$0xff] %v8959_v36  ;;  %v4537_v36 = vsel %vm1978_vm6, %v8517_v12, 0.0  ;;  %v8991_v50 = vsel %vm609_vm4, %v3102_v30, %v3104_v21  ;;  %v3106_v21 = vrot.slane %v8607_v25, 2 }
 0x3c3   : > { %5642 = vmatmul.msk.f32.gmra.mxu0 %vm1978_vm6, %v8964_v63  ;;  %5609 = vmatmul.msk.f32.gmra.mxu3 %vm1978_vm6, %v8971_v42  ;;  %11050 = vst [vmem:[#allocation90_spill] sm:$0xff] %v8991_v50 }
 0x3c4   : > { %5688 = vmatmul.msk.f32.gmra.mxu2 %vm1978_vm6, %v8512_v54 }
 0x3c5   : > { %v9005_v48 = vpop.f32.mrf.mxu1 }
 0x3c6   : > { %v3436_v11 = vpop.f32.mrf.mxu3  ;;  %11051 = vst [vmem:[#allocation6_spill] sm:$0xff] %v9005_v48 }
 0x3c7   : > { %v8977_v6 = vpop.f32.mrf.mxu2  ;;  %v4538_v63 = vsel %vm1978_vm6, %v3436_v11, 0.0  ;;  %v4554_v11 = vsel %vm1978_vm6, %v8556_v45, 0.0 }
 0x3c8   : > { %v8985_v17 = vadd.f32 %v4538_v63, %v4537_v36  ;;  %5674 = vmatmul.msk.f32.gmra.mxu1 %vm1978_vm6, %v8607_v25  ;;  %v3107_v63 = vrot.slane %v8655_v34, 2  ;;  %v3024_v36 = vrot.slane %v2895_v39, 1  ;;  %v2898_v39 = vld [vmem:[#allocation3 + $0x160] sm:$0x3] }
 0x3ca   : > { %11049 = vst [vmem:[#allocation7_spill] sm:$0xff] %v8985_v17  ;;  %v9016_v10 = vsel %vm609_vm4, %v3106_v21, %v3107_v63  ;;  %v9018_v17 = vpop.f32.mrf.mxu0  ;;  %v9025_v45 = vsel %vm520_vm3, %v3022_v15, %v3024_v36  ;;  %v3026_v15 = vrot.slane %v8607_v25, 1  ;;  %v3112_v25 = vrot.slane %v8722_v0, 2 }
 0x3cb   : > { %5643 = vmatmul.msk.f32.gmra.mxu0 %vm1978_vm6, %v8991_v50  ;;  %5610 = vmatmul.msk.f32.gmra.mxu3 %vm1978_vm6, %v8998_v57  ;;  %11053 = vst [vmem:[#allocation9_spill] sm:$0xff] %v9016_v10 }
 0x3cc   : > { %5689 = vmatmul.msk.f32.gmra.mxu2 %vm1978_vm6, %v8549_v1  ;;  %11054 = vst [vmem:[#allocation14_spill] sm:$0xff] %v9018_v17  ;;  %v4571_v17 = vsel %vm1978_vm6, %v8592_v32, 0.0 }
 0x3ce   : > { %v3439_v30 = vpop.f32.mrf.mxu3 }
 0x3cf   : > { %v9002_v12 = vpop.f32.mrf.mxu2  ;;  %v4555_v50 = vsel %vm1978_vm6, %v3439_v30, 0.0  ;;  %v3109_v30 = vrot.slane %v2898_v39, 2 }
 0x3d0   : > { %v9011_v43 = vadd.f32 %v4555_v50, %v4554_v11  ;;  %5675 = vmatmul.msk.f32.gmra.mxu1 %vm1978_vm6, %v8655_v34  ;;  %v3027_v11 = vrot.slane %v8655_v34, 1 }
 0x3d1   : > { %v9043_v36 = vsel %vm609_vm4, %v3107_v63, %v3109_v30  ;;  %v3111_v30 = vrot.slane %v8693_v3, 2 }
 0x3d2   : > { %11052 = vst [vmem:[#allocation91_spill] sm:$0xff] %v9011_v43  ;;  %v9035_v43 = vpop.f32.mrf.mxu1  ;;  %v9050_v32 = vsel %vm520_vm3, %v3026_v15, %v3027_v11  ;;  %v9052_v34 = vpop.f32.mrf.mxu0 }
 0x3d3   : > { %5644 = vmatmul.msk.f32.gmra.mxu0 %vm1978_vm6, %v9016_v10  ;;  %5611 = vmatmul.msk.f32.gmra.mxu3 %vm1978_vm6, %v9025_v45  ;;  %11055 = vst [vmem:[#allocation11_spill] sm:$0xff] %v9035_v43 }
 0x3d4   : > { %5690 = vmatmul.msk.f32.gmra.mxu2 %vm1978_vm6, %v8587_v56  ;;  %11057 = vst [vmem:[#allocation88_spill] sm:$0xff] %v9043_v36 }
 0x3d5   : > { %11058 = vst [vmem:[#allocation15_spill] sm:$0xff] %v9052_v34  ;;  %v9068_v34 = vsel %vm609_vm4, %v3111_v30, %v3112_v25 }
 0x3d6   : > { %v3442_v21 = vpop.f32.mrf.mxu3  ;;  %11060 = vst [vmem:[#allocation13_spill] sm:$0xff] %v9068_v34 }
 0x3d7   : > { %v9029_v50 = vpop.f32.mrf.mxu2  ;;  %v4572_v48 = vsel %vm1978_vm6, %v3442_v21, 0.0  ;;  %v4588_v21 = vsel %vm1978_vm6, %v8640_v27, 0.0 }
 0x3d8   : > { %v9037_v10 = vadd.f32 %v4572_v48, %v4571_v17  ;;  %5676 = vmatmul.msk.f32.gmra.mxu1 %vm1978_vm6, %v8693_v3  ;;  %v3029_v48 = vrot.slane %v2898_v39, 1  ;;  %v2901_v39 = vld [vmem:[#allocation3 + $0x178] sm:$0x3] }
 0x3da   : > { %11056 = vst [vmem:[#allocation92_spill] sm:$0xff] %v9037_v10  ;;  %v9074_v43 = vpop.f32.mrf.mxu1  ;;  %v9077_v27 = vsel %vm520_vm3, %v3027_v11, %v3029_v48  ;;  %v9083_v30 = vpop.f32.mrf.mxu0  ;;  %v3031_v48 = vrot.slane %v8693_v3, 1 }
 0x3db   : > { %5645 = vmatmul.msk.f32.gmra.mxu0 %vm1978_vm6, %v9043_v36  ;;  %5612 = vmatmul.msk.f32.gmra.mxu3 %vm1978_vm6, %v9050_v32  ;;  %11061 = vst [vmem:[#allocation94_spill] sm:$0xff] %v9074_v43  ;;  %v9089_v43 = vld [vmem:[#allocation3 + $0x180] sm:$0xff] }
 0x3dc   : > { %5691 = vmatmul.msk.f32.gmra.mxu2 %vm1978_vm6, %v8627_v14  ;;  %11063 = vst [vmem:[#allocation19_spill] sm:$0xff] %v9089_v43 }
 0x3de   : > { %v3445_v63 = vpop.f32.mrf.mxu3 }
 0x3df   : > { %v9056_v17 = vpop.f32.mrf.mxu2  ;;  %v4589_v36 = vsel %vm1978_vm6, %v3445_v63, 0.0  ;;  %v3114_v63 = vrot.slane %v2901_v39, 2 }
 0x3e0   : > { %v9063_v15 = vadd.f32 %v4589_v36, %v4588_v21  ;;  %5677 = vmatmul.msk.f32.gmra.mxu1 %vm1978_vm6, %v8722_v0 }
 0x3e2   : > { %11059 = vst [vmem:[#allocation32_spill] sm:$0xff] %v9063_v15  ;;  %v3032_v15 = vrot.slane %v8722_v0, 1  ;;  %v9108_v0 = vpop.f32.mrf.mxu1 }
 0x3e3   : > { %5646 = vmatmul.msk.f32.gmra.mxu0 %vm1978_vm6, %v9068_v34  ;;  %5613 = vmatmul.msk.f32.gmra.mxu3 %vm1978_vm6, %v9077_v27  ;;  %v4605_v34 = vsel %vm1978_vm6, %v8678_v59, 0.0 }
 0x3e4   : > { %5692 = vmatmul.msk.f32.gmra.mxu2 %vm1978_vm6, %v8673_v47  ;;  %v9104_v59 = vsel %vm520_vm3, %v3031_v48, %v3032_v15 }
 0x3e6   : > { %v3448_v21 = vpop.f32.mrf.mxu3 }
 0x3e7   : > { %v9081_v36 = vpop.f32.mrf.mxu2  ;;  %v4606_v10 = vsel %vm1978_vm6, %v3448_v21, 0.0 }
 0x3e8   : > { %11062 = vst [vmem:[#allocation22_spill] sm:$0xff] %v9081_v36  ;;  %v9091_v11 = vadd.f32 %v4606_v10, %v4605_v34  ;;  %5678 = vmatmul.msk.f32.gmra.mxu1 %vm1978_vm6, %v9089_v43  ;;  %v9097_v36 = vsel %vm609_vm4, %v3112_v25, %v3114_v63  ;;  %v3034_v34 = vrot.slane %v2901_v39, 1  ;;  %v4622_v25 = vsel %vm1978_vm6, %v8713_v33, 0.0  ;;  %v9114_v63 = vpop.f32.mrf.mxu0  ;;  %v5868_v43 = vld [vmem:[#allocation3 + $0x30] sm:$0xff] }
 0x3e9   : > { %11064 = vst [vmem:[#allocation101_spill] sm:$0xff] %v9097_v36 }
 0x3ea   : > { %11065 = vst [vmem:[#allocation95_spill] sm:$0xff] %v9114_v63  ;;  %v9127_v39 = vsel %vm520_vm3, %v3032_v15, %v3034_v34  ;;  %v5869_v34 = vld [vmem:[#allocation3 + $0x38] sm:$0xff] }
 0x3eb   : > { %5647 = vmatmul.msk.f32.gmra.mxu0 %vm1978_vm6, %v9097_v36  ;;  %5614 = vmatmul.msk.f32.gmra.mxu3 %vm1978_vm6, %v9104_v59  ;;  %v9117_v36 = vld [vmem:[#allocation3 + $0x188] sm:$0xff] }
 0x3ec   : > { %5693 = vmatmul.msk.f32.gmra.mxu2 %vm1978_vm6, %v8706_v62  ;;  %11066 = vst [vmem:[#allocation98_spill] sm:$0xff] %v9117_v36 }
 0x3ee   : > { %v3451_v3 = vpop.f32.mrf.mxu3 }
 0x3ef   : > { %v9110_v10 = vpop.f32.mrf.mxu2  ;;  %v4623_v21 = vsel %vm1978_vm6, %v3451_v3, 0.0  ;;  %v9133_v3 = vpop.f32.mrf.mxu1 }
 0x3f0   : > { %v9119_v48 = vadd.f32 %v4623_v21, %v4622_v25  ;;  %5679 = vmatmul.msk.f32.gmra.mxu1 %vm1978_vm6, %v9117_v36  ;;  %11069 = vst [vmem:[#allocation99_spill] sm:$0xff] %v9133_v3  ;;  %v4639_v21 = vsel %vm1978_vm6, %v8741_v53, 0.0  ;;  %v9144_v15 = vpop.f32.mrf.mxu0  ;;  %v4384_v53 = vsel %vm1978_vm6, %v8171_v46, 0.0  ;;  %v4402_v46 = vsel %vm1978_vm6, %v8770_v22, 0.0 }
 0x3f1   : > { %11071 = vst [vmem:[#allocation104_spill] sm:$0xff] %v9144_v15 }
 0x3f2   : > { %11067 = vst [vmem:[#allocation18_spill] sm:$0xff] %v9119_v48 }
 0x3f3   : > { %5744 = vmatmul.msk.f32.vlgmr.msra.gmra.mxu0 %vm1978_vm6, %v5868_v43  ;;  %5615 = vmatmul.msk.f32.gmra.mxu3 %vm1978_vm6, %v9127_v39  ;;  %v4385_v43 = vsel %vm1978_vm6, %v8746_v41, 0.0 }
 0x3f4   : > { %5694 = vmatmul.msk.f32.gmra.mxu2 %vm1978_vm6, %v8736_v37 }
 0x3f6   : > { %v3454_v25 = vpop.f32.mrf.mxu3 }
 0x3f7   : > { %v9131_v33 = vpop.f32.mrf.mxu2  ;;  %v4640_v48 = vsel %vm1978_vm6, %v3454_v25, 0.0  ;;  %v11072_v25 = vld [vmem:[#allocation49_spill] sm:$0xff] }
 0x3f8   : > { %11068 = vst [vmem:[#allocation21_spill] sm:$0xff] %v9131_v33  ;;  %v9138_v63 = vadd.f32 %v4640_v48, %v4639_v21  ;;  %5776 = vmatmul.msk.f32.vlgmr.msra.gmra.mxu1 %vm1978_vm6, %v8288_v8  ;;  %v4386_v48 = vadd.f32 %v4385_v43, %v4384_v53  ;;  %v4387_v8 = vsel %vm1978_vm6, %v8685_v5, 0.0  ;;  %v5870_v5 = vld [vmem:[#allocation3 + $0x48] sm:$0xff]  ;;  %v4389_v53 = vsel %vm1978_vm6, %v8715_v38, 0.0 }
 0x3fa   : > { %11070 = vst [vmem:[#allocation28_spill] sm:$0xff] %v9138_v63  ;;  %v4656_v63 = vsel %vm1978_vm6, %v8766_v35, 0.0  ;;  %v4388_v3 = vadd.f32 %v4387_v8, %v4386_v48  ;;  %v11074_v35 = vld [vmem:[#allocation55_spill] sm:$0xff]  ;;  %v4404_v48 = vsel %vm1978_vm6, %v8718_v29, 0.0  ;;  %v5871_v29 = vld [vmem:[#allocation3 + $0x50] sm:$0xff] }
 0x3fb   : > { %5745 = vmatmul.msk.f32.gmra.mxu0 %vm1978_vm6, %v5869_v34  ;;  %5712 = vmatmul.msk.f32.vlgmr.msra.gmra.mxu3 %vm1978_vm6, %v11072_v25  ;;  %v9160_v34 = vpop.f32.mrf.mxu1  ;;  %v4401_v43 = vsel %vm1978_vm6, %v11074_v35, 0.0  ;;  %v4673_v35 = vsel %vm1978_vm6, %v8790_v7, 0.0  ;;  %v11077_v7 = vld [vmem:[#allocation69_spill] sm:$0xff] }
 0x3fc   : > { %5695 = vmatmul.msk.f32.gmra.mxu2 %vm1978_vm6, %v8762_v40  ;;  %v4390_v22 = vadd.f32 %v4389_v53, %v4388_v3 }
 0x3fe   : > { %v3457_v41 = vpop.f32.mrf.mxu3 }
 0x3ff   : > { %v9153_v21 = vpop.f32.mrf.mxu2  ;;  %v4657_v15 = vsel %vm1978_vm6, %v3457_v41, 0.0 }
 0x400   : > { %v9162_v33 = vadd.f32 %v4657_v15, %v4656_v63  ;;  %5777 = vmatmul.msk.f32.gmra.mxu1 %vm1978_vm6, %v8325_v9  ;;  %v9175_v63 = vpop.f32.mrf.mxu0  ;;  %v11076_v15 = vld [vmem:[#allocation62_spill] sm:$0xff]  ;;  %v4403_v9 = vadd.f32 %v4402_v46, %v4401_v43  ;;  %v4406_v46 = vsel %vm1978_vm6, %v8744_v26, 0.0 }
 0x401   : > { %11075 = vst [vmem:[#allocation55_spill] sm:$0xff] %v9175_v63 }
 0x402   : > { %11073 = vst [vmem:[#allocation49_spill] sm:$0xff] %v9162_v33  ;;  %v4405_v33 = vadd.f32 %v4404_v48, %v4403_v9  ;;  %v4690_v48 = vsel %vm1978_vm6, %v8817_v24, 0.0 }
 0x403   : > { %5746 = vmatmul.msk.f32.gmra.mxu0 %vm1978_vm6, %v5870_v5  ;;  %5713 = vmatmul.msk.f32.gmra.mxu3 %vm1978_vm6, %v11076_v15  ;;  %v9194_v3 = vpop.f32.mrf.mxu1 }
 0x404   : > { %5696 = vmatmul.msk.f32.gmra.mxu2 %vm1978_vm6, %v8786_v31  ;;  %v4407_v53 = vadd.f32 %v4406_v46, %v4405_v33  ;;  %v5872_v33 = vld [vmem:[#allocation3 + $0x60] sm:$0xff] }
 0x406   : > { %v3460_v5 = vpop.f32.mrf.mxu3 }
 0x407   : > { %v3820_v25 = vpop.f32.mrf.mxu2  ;;  %v4674_v38 = vsel %vm1978_vm6, %v3460_v5, 0.0 }
 0x408   : > { %v4391_v8 = vsel %vm1978_vm6, %v3820_v25, 0.0  ;;  %v9187_v63 = vadd.f32 %v4674_v38, %v4673_v35  ;;  %5778 = vmatmul.msk.f32.gmra.mxu1 %vm1978_vm6, %v8361_v52  ;;  %v9200_v15 = vpop.f32.mrf.mxu0  ;;  %v11079_v38 = vld [vmem:[#allocation82_spill] sm:$0xff] }
 0x409   : > { %v9182_v41 = vadd.f32 %v4391_v8, %v4390_v22  ;;  %v4421_v22 = vsel %vm1978_vm6, %v8748_v23, 0.0  ;;  %v11078_v8 = vld [vmem:[#allocation70_spill] sm:$0xff]  ;;  %v4423_v23 = vsel %vm1978_vm6, %v11079_v38, 0.0 }
 0x40a   : > { %v4422_v5 = vadd.f32 %v4421_v22, %v11078_v8 }
 0x40b   : > { %5747 = vmatmul.msk.f32.gmra.mxu0 %vm1978_vm6, %v5871_v29  ;;  %5714 = vmatmul.msk.f32.gmra.mxu3 %vm1978_vm6, %v11077_v7  ;;  %v11080_v29 = vld [vmem:[#allocation37_spill] sm:$0xff]  ;;  %v9222_v24 = vpop.f32.mrf.mxu1 }
 0x40c   : > { %5697 = vmatmul.msk.f32.gmra.mxu2 %vm1978_vm6, %v8813_v44 }
 0x40e   : > { %v3463_v25 = vpop.f32.mrf.mxu3 }
 0x40f   : > { %v3823_v43 = vpop.f32.mrf.mxu2  ;;  %v4691_v26 = vsel %vm1978_vm6, %v3463_v25, 0.0  ;;  %v11081_v25 = vld [vmem:[#allocation97_spill] sm:$0xff] }
 0x410   : > { %v4408_v52 = vsel %vm1978_vm6, %v3823_v43, 0.0  ;;  %v9211_v35 = vadd.f32 %v4691_v26, %v4690_v48  ;;  %5779 = vmatmul.msk.f32.gmra.mxu1 %vm1978_vm6, %v8403_v49  ;;  %v4424_v43 = vadd.f32 %v4423_v23, %v4422_v5  ;;  %v4438_v22 = vsel %vm1978_vm6, %v11081_v25, 0.0  ;;  %v9231_v26 = vpop.f32.mrf.mxu0  ;;  %v5873_v5 = vld [vmem:[#allocation3 + $0x68] sm:$0xff] }
 0x411   : > { %v9203_v9 = vadd.f32 %v4408_v52, %v4407_v53  ;;  %v4707_v48 = vsel %vm1978_vm6, %v8844_v16, 0.0  ;;  %v11083_v23 = vld [vmem:[#allocation80_spill] sm:$0xff] }
 0x412   : > { %v4440_v16 = vsel %vm1978_vm6, %v11083_v23, 0.0  ;;  %v11087_v23 = vld [vmem:[#allocation20_spill] sm:$0xff] }
 0x413   : > { %5748 = vmatmul.msk.f32.gmra.mxu0 %vm1978_vm6, %v5872_v33  ;;  %5715 = vmatmul.msk.f32.gmra.mxu3 %vm1978_vm6, %v11080_v29  ;;  %v4439_v33 = vadd.f32 %v4438_v22, %v8827_v60  ;;  %v11086_v22 = vld [vmem:[#allocation40_spill] sm:$0xff] }
 0x414   : > { %5698 = vmatmul.msk.f32.gmra.mxu2 %vm1978_vm6, %v8840_v13 }
 0x416   : > { %v3466_v49 = vpop.f32.mrf.mxu3 }
 0x417   : > { %v3826_v46 = vpop.f32.mrf.mxu2  ;;  %v4708_v8 = vsel %vm1978_vm6, %v3466_v49, 0.0  ;;  %v9247_v49 = vpop.f32.mrf.mxu1 }
 0x418   : > { %v4425_v53 = vsel %vm1978_vm6, %v3826_v46, 0.0  ;;  %v9235_v38 = vadd.f32 %v4708_v8, %v4707_v48  ;;  %5780 = vmatmul.msk.f32.gmra.mxu1 %vm1978_vm6, %v8439_v58  ;;  %v11084_v46 = vld [vmem:[#allocation42_spill] sm:$0xff]  ;;  %v4455_v48 = vsel %vm1978_vm6, %v11086_v22, 0.0  ;;  %v4724_v8 = vsel %vm1978_vm6, %v8871_v20, 0.0 }
 0x419   : > { %v9225_v52 = vadd.f32 %v4425_v53, %v4424_v43  ;;  %v4441_v53 = vadd.f32 %v4440_v16, %v4439_v33  ;;  %v9261_v33 = vpop.f32.mrf.mxu0  ;;  %v5874_v16 = vld [vmem:[#allocation3 + $0x78] sm:$0xff] }
 0x41a   : > { %11082 = vst [vmem:[#allocation62_spill] sm:$0xff] %v9235_v38  ;;  %v4456_v38 = vadd.f32 %v4455_v48, %v11087_v23  ;;  %v4741_v23 = vsel %vm1978_vm6, %v8898_v2, 0.0 }
 0x41b   : > { %5749 = vmatmul.msk.f32.gmra.mxu0 %vm1978_vm6, %v5873_v5  ;;  %5716 = vmatmul.msk.f32.gmra.mxu3 %vm1978_vm6, %v11084_v46 }
 0x41c   : > { %5699 = vmatmul.msk.f32.gmra.mxu2 %vm1978_vm6, %v8867_v51 }
 0x41e   : > { %v3469_v58 = vpop.f32.mrf.mxu3 }
 0x41f   : > { %v3829_v43 = vpop.f32.mrf.mxu2  ;;  %v4725_v5 = vsel %vm1978_vm6, %v3469_v58, 0.0 }
 0x420   : > { %v4442_v60 = vsel %vm1978_vm6, %v3829_v43, 0.0  ;;  %v9257_v46 = vadd.f32 %v4725_v5, %v4724_v8  ;;  %5781 = vmatmul.msk.f32.gmra.mxu1 %vm1978_vm6, %v8476_v18  ;;  %v11089_v43 = vld [vmem:[#allocation79_spill] sm:$0xff]  ;;  %v11092_v8 = vld [vmem:[#allocation76_spill] sm:$0xff] }
 0x421   : > { %v9249_v25 = vadd.f32 %v4442_v60, %v4441_v53  ;;  %v4457_v20 = vsel %vm1978_vm6, %v11089_v43, 0.0  ;;  %v11090_v53 = vld [vmem:[#allocation64_spill] sm:$0xff]  ;;  %v4472_v5 = vsel %vm1978_vm6, %v11092_v8, 0.0 }
 0x422   : > { %11088 = vst [vmem:[#allocation70_spill] sm:$0xff] %v9257_v46  ;;  %v4458_v58 = vadd.f32 %v4457_v20, %v4456_v38  ;;  %v11093_v46 = vld [vmem:[#allocation52_spill] sm:$0xff]  ;;  %v5875_v38 = vld [vmem:[#allocation3 + $0x80] sm:$0xff]  ;;  %v11095_v20 = vld [vmem:[#allocation46_spill] sm:$0xff] }
 0x423   : > { %11085 = vst [vmem:[#allocation69_spill] sm:$0xff] %v9249_v25  ;;  %5750 = vmatmul.msk.f32.gmra.mxu0 %vm1978_vm6, %v5874_v16  ;;  %5717 = vmatmul.msk.f32.gmra.mxu3 %vm1978_vm6, %v11090_v53  ;;  %v4473_v43 = vadd.f32 %v4472_v5, %v11093_v46  ;;  %v9279_v25 = vpop.f32.mrf.mxu1  ;;  %v4474_v2 = vsel %vm1978_vm6, %v11095_v20, 0.0  ;;  %v11098_v5 = vld [vmem:[#allocation58_spill] sm:$0xff] }
 0x424   : > { %5700 = vmatmul.msk.f32.gmra.mxu2 %vm1978_vm6, %v8894_v19  ;;  %v11099_v20 = vld [vmem:[#allocation26_spill] sm:$0xff] }
 0x426   : > { %v3472_v18 = vpop.f32.mrf.mxu3 }
 0x427   : > { %v3832_v60 = vpop.f32.mrf.mxu2  ;;  %v4742_v16 = vsel %vm1978_vm6, %v3472_v18, 0.0 }
 0x428   : > { %v4459_v22 = vsel %vm1978_vm6, %v3832_v60, 0.0  ;;  %v9281_v53 = vadd.f32 %v4742_v16, %v4741_v23  ;;  %5782 = vmatmul.msk.f32.gmra.mxu1 %vm1978_vm6, %v8512_v54  ;;  %v9290_v60 = vpop.f32.mrf.mxu0  ;;  %v4489_v23 = vsel %vm1978_vm6, %v11098_v5, 0.0  ;;  %v4758_v16 = vsel %vm1978_vm6, %v8925_v61, 0.0 }
 0x429   : > { %v9271_v48 = vadd.f32 %v4459_v22, %v4458_v58  ;;  %v11096_v58 = vld [vmem:[#allocation47_spill] sm:$0xff]  ;;  %v4475_v22 = vadd.f32 %v4474_v2, %v4473_v43  ;;  %v5876_v43 = vld [vmem:[#allocation3 + $0x90] sm:$0xff] }
 0x42a   : > { %11094 = vst [vmem:[#allocation37_spill] sm:$0xff] %v9281_v53  ;;  %v4490_v53 = vadd.f32 %v4489_v23, %v11099_v20 }
 0x42b   : > { %11091 = vst [vmem:[#allocation82_spill] sm:$0xff] %v9271_v48  ;;  %5751 = vmatmul.msk.f32.gmra.mxu0 %vm1978_vm6, %v5875_v38  ;;  %5718 = vmatmul.msk.f32.gmra.mxu3 %vm1978_vm6, %v11096_v58  ;;  %v9310_v2 = vpop.f32.mrf.mxu1 }
 0x42c   : > { %5701 = vmatmul.msk.f32.gmra.mxu2 %vm1978_vm6, %v8919_v28 }
 0x42e   : > { %v3475_v54 = vpop.f32.mrf.mxu3 }
 0x42f   : > { %v3835_v46 = vpop.f32.mrf.mxu2  ;;  %v4759_v38 = vsel %vm1978_vm6, %v3475_v54, 0.0 }
 0x430   : > { %v4476_v18 = vsel %vm1978_vm6, %v3835_v46, 0.0  ;;  %v9303_v48 = vadd.f32 %v4759_v38, %v4758_v16  ;;  %5783 = vmatmul.msk.f32.gmra.mxu1 %vm1978_vm6, %v8549_v1  ;;  %v11101_v46 = vld [vmem:[#allocation29_spill] sm:$0xff]  ;;  %v9316_v5 = vpop.f32.mrf.mxu0  ;;  %v11104_v38 = vld [vmem:[#allocation24_spill] sm:$0xff] }
 0x431   : > { %v9295_v8 = vadd.f32 %v4476_v18, %v4475_v22  ;;  %v4491_v61 = vsel %vm1978_vm6, %v11101_v46, 0.0  ;;  %v11102_v22 = vld [vmem:[#allocation43_spill] sm:$0xff]  ;;  %v4506_v20 = vsel %vm1978_vm6, %v11104_v38, 0.0 }
 0x432   : > { %11100 = vst [vmem:[#allocation80_spill] sm:$0xff] %v9303_v48  ;;  %v4492_v54 = vadd.f32 %v4491_v61, %v4490_v53  ;;  %v11105_v48 = vld [vmem:[#allocation71_spill] sm:$0xff]  ;;  %v5877_v53 = vld [vmem:[#allocation3 + $0x98] sm:$0xff] }
 0x433   : > { %11097 = vst [vmem:[#allocation97_spill] sm:$0xff] %v9295_v8  ;;  %5752 = vmatmul.msk.f32.gmra.mxu0 %vm1978_vm6, %v5876_v43  ;;  %5719 = vmatmul.msk.f32.gmra.mxu3 %vm1978_vm6, %v11102_v22  ;;  %v4775_v43 = vsel %vm1978_vm6, %v8950_v55, 0.0  ;;  %v4507_v8 = vadd.f32 %v4506_v20, %v11105_v48  ;;  %v11107_v61 = vld [vmem:[#allocation78_spill] sm:$0xff]  ;;  %v9338_v55 = vpop.f32.mrf.mxu1 }
 0x434   : > { %5702 = vmatmul.msk.f32.gmra.mxu2 %vm1978_vm6, %v8946_v4  ;;  %v11109_v20 = vld [vmem:[#allocation86_spill] sm:$0xff] }
 0x436   : > { %v3478_v16 = vpop.f32.mrf.mxu3 }
 0x437   : > { %v3838_v18 = vpop.f32.mrf.mxu2  ;;  %v4776_v46 = vsel %vm1978_vm6, %v3478_v16, 0.0 }
 0x438   : > { %v4493_v1 = vsel %vm1978_vm6, %v3838_v18, 0.0  ;;  %v9327_v22 = vadd.f32 %v4776_v46, %v4775_v43  ;;  %5784 = vmatmul.msk.f32.gmra.mxu1 %vm1978_vm6, %v8587_v56  ;;  %v4508_v18 = vsel %vm1978_vm6, %v11107_v61, 0.0  ;;  %v4523_v43 = vsel %vm1978_vm6, %v11109_v20, 0.0 }
 0x439   : > { %v9319_v23 = vadd.f32 %v4493_v1, %v4492_v54  ;;  %v11108_v54 = vld [vmem:[#allocation48_spill] sm:$0xff]  ;;  %v4509_v1 = vadd.f32 %v4508_v18, %v4507_v8  ;;  %v4792_v46 = vsel %vm1978_vm6, %v8977_v6, 0.0 }
 0x43a   : > { %11106 = vst [vmem:[#allocation20_spill] sm:$0xff] %v9327_v22  ;;  %v11110_v22 = vld [vmem:[#allocation84_spill] sm:$0xff] }
 0x43b   : > { %11103 = vst [vmem:[#allocation40_spill] sm:$0xff] %v9319_v23  ;;  %5753 = vmatmul.msk.f32.gmra.mxu0 %vm1978_vm6, %v5877_v53  ;;  %5720 = vmatmul.msk.f32.gmra.mxu3 %vm1978_vm6, %v11108_v54  ;;  %v9347_v53 = vpop.f32.mrf.mxu0  ;;  %v4524_v54 = vadd.f32 %v4523_v43, %v11110_v22  ;;  %v5878_v8 = vld [vmem:[#allocation3 + $0xa8] sm:$0xff]  ;;  %v11115_v43 = vld [vmem:[#allocation10_spill] sm:$0xff] }
 0x43c   : > { %5703 = vmatmul.msk.f32.gmra.mxu2 %vm1978_vm6, %v8971_v42  ;;  %v11112_v18 = vld [vmem:[#allocation36_spill] sm:$0xff] }
 0x43d   : > { %v4525_v6 = vsel %vm1978_vm6, %v11112_v18, 0.0  ;;  %v11116_v18 = vld [vmem:[#allocation7_spill] sm:$0xff] }
 0x43e   : > { %v3481_v56 = vpop.f32.mrf.mxu3 }
 0x43f   : > { %v3841_v48 = vpop.f32.mrf.mxu2  ;;  %v4793_v61 = vsel %vm1978_vm6, %v3481_v56, 0.0  ;;  %v9363_v56 = vpop.f32.mrf.mxu1 }
 0x440   : > { %v4510_v16 = vsel %vm1978_vm6, %v3841_v48, 0.0  ;;  %v9351_v23 = vadd.f32 %v4793_v61, %v4792_v46  ;;  %5785 = vmatmul.msk.f32.gmra.mxu1 %vm1978_vm6, %v8627_v14  ;;  %v11113_v48 = vld [vmem:[#allocation53_spill] sm:$0xff]  ;;  %v4540_v46 = vsel %vm1978_vm6, %v11115_v43, 0.0  ;;  %v4809_v61 = vsel %vm1978_vm6, %v9002_v12, 0.0 }
 0x441   : > { %v9341_v38 = vadd.f32 %v4510_v16, %v4509_v1  ;;  %v4526_v16 = vadd.f32 %v4525_v6, %v4524_v54  ;;  %v5879_v6 = vld [vmem:[#allocation3 + $0xb0] sm:$0xff] }
 0x442   : > { %11111 = vst [vmem:[#allocation79_spill] sm:$0xff] %v9351_v23  ;;  %v4541_v23 = vadd.f32 %v4540_v46, %v11116_v18  ;;  %v4826_v18 = vsel %vm1978_vm6, %v9029_v50, 0.0 }
 0x443   : > { %5754 = vmatmul.msk.f32.gmra.mxu0 %vm1978_vm6, %v5878_v8  ;;  %5721 = vmatmul.msk.f32.gmra.mxu3 %vm1978_vm6, %v11113_v48  ;;  %v9377_v54 = vpop.f32.mrf.mxu0 }
 0x444   : > { %5704 = vmatmul.msk.f32.gmra.mxu2 %vm1978_vm6, %v8998_v57 }
 0x446   : > { %v3484_v14 = vpop.f32.mrf.mxu3 }
 0x447   : > { %v3844_v1 = vpop.f32.mrf.mxu2  ;;  %v4810_v8 = vsel %vm1978_vm6, %v3484_v14, 0.0 }
 0x448   : > { %v4527_v22 = vsel %vm1978_vm6, %v3844_v1, 0.0  ;;  %v9373_v48 = vadd.f32 %v4810_v8, %v4809_v61  ;;  %5786 = vmatmul.msk.f32.gmra.mxu1 %vm1978_vm6, %v8673_v47  ;;  %v11118_v1 = vld [vmem:[#allocation8_spill] sm:$0xff]  ;;  %v11121_v61 = vld [vmem:[#allocation5_spill] sm:$0xff] }
 0x449   : > { %v9365_v20 = vadd.f32 %v4527_v22, %v4526_v16  ;;  %v4542_v12 = vsel %vm1978_vm6, %v11118_v1, 0.0  ;;  %v11119_v16 = vld [vmem:[#allocation41_spill] sm:$0xff]  ;;  %v4557_v8 = vsel %vm1978_vm6, %v11121_v61, 0.0 }
 0x44a   : > { %11117 = vst [vmem:[#allocation52_spill] sm:$0xff] %v9373_v48  ;;  %v4543_v14 = vadd.f32 %v4542_v12, %v4541_v23  ;;  %v9395_v48 = vpop.f32.mrf.mxu1  ;;  %v5880_v23 = vld [vmem:[#allocation3 + $0xc0] sm:$0xff]  ;;  %v11124_v12 = vld [vmem:[#allocation6_spill] sm:$0xff] }
 0x44b   : > { %11114 = vst [vmem:[#allocation76_spill] sm:$0xff] %v9365_v20  ;;  %5755 = vmatmul.msk.f32.gmra.mxu0 %vm1978_vm6, %v5879_v6  ;;  %5722 = vmatmul.msk.f32.gmra.mxu3 %vm1978_vm6, %v11119_v16  ;;  %v11122_v20 = vld [vmem:[#allocation91_spill] sm:$0xff]  ;;  %v4559_v50 = vsel %vm1978_vm6, %v11124_v12, 0.0  ;;  %v11128_v12 = vld [vmem:[#allocation92_spill] sm:$0xff] }
 0x44c   : > { %5705 = vmatmul.msk.f32.gmra.mxu2 %vm1978_vm6, %v9025_v45  ;;  %v4558_v1 = vadd.f32 %v4557_v8, %v11122_v20  ;;  %v11127_v8 = vld [vmem:[#allocation14_spill] sm:$0xff] }
 0x44e   : > { %v3487_v47 = vpop.f32.mrf.mxu3 }
 0x44f   : > { %v3847_v22 = vpop.f32.mrf.mxu2  ;;  %v4827_v6 = vsel %vm1978_vm6, %v3487_v47, 0.0 }
 0x450   : > { %v4544_v43 = vsel %vm1978_vm6, %v3847_v22, 0.0  ;;  %v9397_v16 = vadd.f32 %v4827_v6, %v4826_v18  ;;  %5787 = vmatmul.msk.f32.gmra.mxu1 %vm1978_vm6, %v8706_v62  ;;  %v9406_v22 = vpop.f32.mrf.mxu0  ;;  %v4574_v18 = vsel %vm1978_vm6, %v11127_v8, 0.0  ;;  %v4843_v6 = vsel %vm1978_vm6, %v9056_v17, 0.0 }
 0x451   : > { %v9387_v46 = vadd.f32 %v4544_v43, %v4543_v14  ;;  %v11125_v14 = vld [vmem:[#allocation54_spill] sm:$0xff]  ;;  %v4560_v43 = vadd.f32 %v4559_v50, %v4558_v1  ;;  %v5881_v1 = vld [vmem:[#allocation3 + $0xc8] sm:$0xff] }
 0x452   : > { %11123 = vst [vmem:[#allocation47_spill] sm:$0xff] %v9397_v16  ;;  %v9426_v50 = vpop.f32.mrf.mxu1 }
 0x453   : > { %11120 = vst [vmem:[#allocation46_spill] sm:$0xff] %v9387_v46  ;;  %5756 = vmatmul.msk.f32.gmra.mxu0 %vm1978_vm6, %v5880_v23  ;;  %5723 = vmatmul.msk.f32.gmra.mxu3 %vm1978_vm6, %v11125_v14  ;;  %v4575_v46 = vadd.f32 %v4574_v18, %v11128_v12 }
 0x454   : > { %5706 = vmatmul.msk.f32.gmra.mxu2 %vm1978_vm6, %v9050_v32 }
 0x456   : > { %v3490_v62 = vpop.f32.mrf.mxu3 }
 0x457   : > { %v3850_v20 = vpop.f32.mrf.mxu2  ;;  %v4844_v23 = vsel %vm1978_vm6, %v3490_v62, 0.0 }
 0x458   : > { %v4561_v47 = vsel %vm1978_vm6, %v3850_v20, 0.0  ;;  %v9419_v16 = vadd.f32 %v4844_v23, %v4843_v6  ;;  %5788 = vmatmul.msk.f32.gmra.mxu1 %vm1978_vm6, %v8736_v37  ;;  %v11130_v20 = vld [vmem:[#allocation11_spill] sm:$0xff]  ;;  %v9432_v8 = vpop.f32.mrf.mxu0 }
 0x459   : > { %v9411_v61 = vadd.f32 %v4561_v47, %v4560_v43  ;;  %v4576_v17 = vsel %vm1978_vm6, %v11130_v20, 0.0  ;;  %v11131_v43 = vld [vmem:[#allocation75_spill] sm:$0xff] }
 0x45a   : > { %11129 = vst [vmem:[#allocation26_spill] sm:$0xff] %v9419_v16  ;;  %v4577_v62 = vadd.f32 %v4576_v17, %v4575_v46  ;;  %v11133_v23 = vld [vmem:[#allocation15_spill] sm:$0xff]  ;;  %v11135_v16 = vld [vmem:[#allocation32_spill] sm:$0xff]  ;;  %v5882_v46 = vld [vmem:[#allocation3 + $0xd8] sm:$0xff] }
 0x45b   : > { %11126 = vst [vmem:[#allocation58_spill] sm:$0xff] %v9411_v61  ;;  %5757 = vmatmul.msk.f32.gmra.mxu0 %vm1978_vm6, %v5881_v1  ;;  %5724 = vmatmul.msk.f32.gmra.mxu3 %vm1978_vm6, %v11131_v43  ;;  %v4591_v12 = vsel %vm1978_vm6, %v11133_v23, 0.0  ;;  %v11134_v1 = vld [vmem:[#allocation22_spill] sm:$0xff] }
 0x45c   : > { %5707 = vmatmul.msk.f32.gmra.mxu2 %vm1978_vm6, %v9077_v27  ;;  %v4860_v61 = vsel %vm1978_vm6, %v11134_v1, 0.0  ;;  %v4592_v14 = vadd.f32 %v4591_v12, %v11135_v16  ;;  %v11137_v17 = vld [vmem:[#allocation94_spill] sm:$0xff]  ;;  %v4608_v12 = vsel %vm1978_vm6, %v9083_v30, 0.0  ;;  %v4877_v1 = vsel %vm1978_vm6, %v9110_v10, 0.0  ;;  %v11141_v10 = vld [vmem:[#allocation16_spill] sm:$0xff] }
 0x45d   : > { %v4610_v30 = vsel %vm1978_vm6, %v9108_v0, 0.0  ;;  %v11145_v0 = vld [vmem:[#allocation21_spill] sm:$0xff] }
 0x45e   : > { %v3493_v6 = vpop.f32.mrf.mxu3 }
 0x45f   : > { %v3853_v47 = vpop.f32.mrf.mxu2  ;;  %v4861_v20 = vsel %vm1978_vm6, %v3493_v6, 0.0 }
 0x460   : > { %v4578_v37 = vsel %vm1978_vm6, %v3853_v47, 0.0  ;;  %v9443_v43 = vadd.f32 %v4861_v20, %v4860_v61  ;;  %5789 = vmatmul.msk.f32.gmra.mxu1 %vm1978_vm6, %v8762_v40  ;;  %v4593_v47 = vsel %vm1978_vm6, %v11137_v17, 0.0  ;;  %v9463_v20 = vpop.f32.mrf.mxu0  ;;  %v4609_v17 = vadd.f32 %v4608_v12, %v9091_v11 }
 0x461   : > { %v9435_v18 = vadd.f32 %v4578_v37, %v4577_v62  ;;  %v11138_v62 = vld [vmem:[#allocation60_spill] sm:$0xff]  ;;  %v9454_v37 = vpop.f32.mrf.mxu1  ;;  %v4594_v61 = vadd.f32 %v4593_v47, %v4592_v14  ;;  %v5883_v14 = vld [vmem:[#allocation3 + $0xe0] sm:$0xff]  ;;  %v3120_v47 = vrot.slane %v9117_v36, 1 }
 0x462   : > { %11136 = vst [vmem:[#allocation24_spill] sm:$0xff] %v9443_v43  ;;  %v11151_v36 = vld [vmem:[#allocation28_spill] sm:$0xff] }
 0x463   : > { %11132 = vst [vmem:[#allocation29_spill] sm:$0xff] %v9435_v18  ;;  %5758 = vmatmul.msk.f32.gmra.mxu0 %vm1978_vm6, %v5882_v46  ;;  %5725 = vmatmul.msk.f32.gmra.mxu3 %vm1978_vm6, %v11138_v62 }
 0x464   : > { %5708 = vmatmul.msk.f32.gmra.mxu2 %vm1978_vm6, %v9104_v59 }
 0x466   : > { %v3496_v40 = vpop.f32.mrf.mxu3 }
 0x467   : > { %v3856_v16 = vpop.f32.mrf.mxu2  ;;  %v4878_v46 = vsel %vm1978_vm6, %v3496_v40, 0.0 }
 0x468   : > { %v4595_v6 = vsel %vm1978_vm6, %v3856_v16, 0.0  ;;  %v9467_v18 = vadd.f32 %v4878_v46, %v4877_v1  ;;  %5790 = vmatmul.msk.f32.gmra.mxu1 %vm1978_vm6, %v8786_v31  ;;  %v4611_v16 = vadd.f32 %v4610_v30, %v4609_v17  ;;  %v11144_v46 = vld [vmem:[#allocation95_spill] sm:$0xff] }
 0x469   : > { %v9457_v23 = vadd.f32 %v4595_v6, %v4594_v61  ;;  %v11142_v6 = vld [vmem:[#allocation19_spill] sm:$0xff]  ;;  %v9481_v40 = vpop.f32.mrf.mxu1 }
 0x46a   : > { %11140 = vst [vmem:[#allocation78_spill] sm:$0xff] %v9467_v18  ;;  %v3119_v31 = vrot.slane %v11142_v6, 1 }
 0x46b   : > { %11139 = vst [vmem:[#allocation71_spill] sm:$0xff] %v9457_v23  ;;  %5759 = vmatmul.msk.f32.gmra.mxu0 %vm1978_vm6, %v5883_v14  ;;  %5726 = vmatmul.msk.f32.gmra.mxu3 %vm1978_vm6, %v11141_v10  ;;  %v4625_v14 = vsel %vm1978_vm6, %v11144_v46, 0.0  ;;  %v4894_v23 = vsel %vm1978_vm6, %v11145_v0, 0.0  ;;  %v11146_v10 = vld [vmem:[#allocation18_spill] sm:$0xff] }
 0x46c   : > { %5709 = vmatmul.msk.f32.gmra.mxu2 %vm1978_vm6, %v9127_v39  ;;  %v4626_v43 = vadd.f32 %v4625_v14, %v11146_v10  ;;  %v9494_v30 = vsel %vm520_vm3, %v3119_v31, %v3120_v47 }
 0x46e   : > { %v3499_v1 = vpop.f32.mrf.mxu3 }
 0x46f   : > { %v3859_v11 = vpop.f32.mrf.mxu2  ;;  %v4895_v18 = vsel %vm1978_vm6, %v3499_v1, 0.0  ;;  %v11148_v1 = vld [vmem:[#allocation99_spill] sm:$0xff] }
 0x470   : > { %v4612_v61 = vsel %vm1978_vm6, %v3859_v11, 0.0  ;;  %v9491_v17 = vadd.f32 %v4895_v18, %v4894_v23  ;;  %5791 = vmatmul.msk.f32.gmra.mxu1 %vm1978_vm6, %v8813_v44  ;;  %v9498_v11 = vpop.f32.mrf.mxu0  ;;  %v4627_v18 = vsel %vm1978_vm6, %v11148_v1, 0.0  ;;  %v11149_v23 = vld [vmem:[#allocation73_spill] sm:$0xff] }
 0x471   : > { %v9483_v12 = vadd.f32 %v4612_v61, %v4611_v16  ;;  %v5884_v16 = vld [vmem:[#allocation3 + $0xf0] sm:$0xff]  ;;  %v4628_v31 = vadd.f32 %v4627_v18, %v4626_v43 }
 0x472   : > { %11147 = vst [vmem:[#allocation84_spill] sm:$0xff] %v9491_v17  ;;  %v9503_v61 = vld [vmem:[#allocation3 + $0x190] sm:$0x3]  ;;  %v4911_v17 = vsel %vm1978_vm6, %v9153_v21, 0.0  ;;  %v4644_v21 = vsel %vm1978_vm6, %v9160_v34, 0.0 }
 0x473   : > { %11143 = vst [vmem:[#allocation86_spill] sm:$0xff] %v9483_v12  ;;  %5760 = vmatmul.msk.f32.gmra.mxu0 %vm1978_vm6, %v5884_v16  ;;  %5727 = vmatmul.msk.f32.gmra.mxu3 %vm1978_vm6, %v11149_v23  ;;  %v3122_v44 = vrot.slane %v9503_v61, 1  ;;  %v11150_v12 = vld [vmem:[#allocation104_spill] sm:$0xff]  ;;  %v9519_v23 = vpop.f32.mrf.mxu1 }
 0x474   : > { %5710 = vmatmul.msk.f32.gmra.mxu2 %vm1978_vm6, %v9494_v30  ;;  %v4642_v16 = vsel %vm1978_vm6, %v11150_v12, 0.0  ;;  %v5885_v12 = vld [vmem:[#allocation3 + $0xf8] sm:$0xff] }
 0x475   : > { %v4643_v62 = vadd.f32 %v4642_v16, %v11151_v36  ;;  %v9524_v18 = vsel %vm520_vm3, %v3120_v47, %v3122_v44 }
 0x476   : > { %v3502_v0 = vpop.f32.mrf.mxu3 }
 0x477   : > { %v3862_v10 = vpop.f32.mrf.mxu2  ;;  %v4912_v1 = vsel %vm1978_vm6, %v3502_v0, 0.0  ;;  %v4645_v47 = vadd.f32 %v4644_v21, %v4643_v62  ;;  %v5886_v62 = vld [vmem:[#allocation3 + $0x108] sm:$0xff] }
 0x478   : > { %v4629_v46 = vsel %vm1978_vm6, %v3862_v10, 0.0  ;;  %v9521_v43 = vadd.f32 %v4912_v1, %v4911_v17  ;;  %5792 = vmatmul.msk.f32.gmra.mxu1 %vm1978_vm6, %v8840_v13  ;;  %v9533_v36 = vpop.f32.mrf.mxu0  ;;  %v11152_v10 = vld [vmem:[#allocation67_spill] sm:$0xff]  ;;  %v11155_v1 = vld [vmem:[#allocation49_spill] sm:$0xff] }
 0x479   : > { %v9511_v14 = vadd.f32 %v4629_v46, %v4628_v31  ;;  %v11154_v46 = vld [vmem:[#allocation55_spill] sm:$0xff] }
 0x47a   : > { %v4659_v0 = vsel %vm1978_vm6, %v11154_v46, 0.0 }
 0x47b   : > { %5761 = vmatmul.msk.f32.gmra.mxu0 %vm1978_vm6, %v5885_v12  ;;  %5728 = vmatmul.msk.f32.gmra.mxu3 %vm1978_vm6, %v11152_v10  ;;  %v4660_v12 = vadd.f32 %v4659_v0, %v11155_v1  ;;  %v9552_v21 = vpop.f32.mrf.mxu1  ;;  %v4676_v0 = vsel %vm1978_vm6, %v9200_v15, 0.0  ;;  %v11158_v15 = vld [vmem:[#allocation83_spill] sm:$0xff] }
 0x47c   : > { %5711 = vmatmul.msk.f32.gmra.mxu2 %vm1978_vm6, %v9524_v18  ;;  %v4677_v1 = vadd.f32 %v4676_v0, %v9187_v63 }
 0x47e   : > { %v3937_v13 = vpop.f32.mrf.mxu3 }
 0x47f   : > { %v3865_v17 = vpop.f32.mrf.mxu2  ;;  %v4393_v16 = vsel %vm1978_vm6, %v3937_v13, 0.0 }
 0x480   : > { %v4646_v31 = vsel %vm1978_vm6, %v3865_v17, 0.0  ;;  %v9545_v34 = vadd.f32 %v4393_v16, %v9182_v41  ;;  %5793 = vmatmul.msk.f32.gmra.mxu1 %vm1978_vm6, %v8867_v51  ;;  %v4661_v17 = vsel %vm1978_vm6, %v9194_v3, 0.0  ;;  %v9558_v13 = vpop.f32.mrf.mxu0 }
 0x481   : > { %v9538_v44 = vadd.f32 %v4646_v31, %v4645_v47  ;;  %v11156_v47 = vld [vmem:[#allocation72_spill] sm:$0xff]  ;;  %v4662_v41 = vadd.f32 %v4661_v17, %v4660_v12  ;;  %v5887_v12 = vld [vmem:[#allocation3 + $0x110] sm:$0xff] }
 0x483   : > { %11153 = vst [vmem:[#allocation36_spill] sm:$0xff] %v9538_v44  ;;  %5762 = vmatmul.msk.f32.gmra.mxu0 %vm1978_vm6, %v5886_v62  ;;  %5729 = vmatmul.msk.f32.gmra.mxu3 %vm1978_vm6, %v11156_v47  ;;  %v4678_v62 = vsel %vm1978_vm6, %v9222_v24, 0.0  ;;  %v9579_v17 = vpop.f32.mrf.mxu1 }
 0x484   : > { %5808 = vmatmul.msk.f32.vlgmr.msra.gmra.mxu2 %vm1978_vm6, %v11077_v7 }
 0x486   : > { %v3940_v7 = vpop.f32.mrf.mxu3 }
 0x487   : > { %v3868_v31 = vpop.f32.mrf.mxu2  ;;  %v4410_v16 = vsel %vm1978_vm6, %v3940_v7, 0.0 }
 0x488   : > { %v4663_v51 = vsel %vm1978_vm6, %v3868_v31, 0.0  ;;  %v9568_v3 = vadd.f32 %v4410_v16, %v9203_v9  ;;  %5794 = vmatmul.msk.f32.gmra.mxu1 %vm1978_vm6, %v8894_v19  ;;  %v4679_v9 = vadd.f32 %v4678_v62, %v4677_v1  ;;  %v11160_v16 = vld [vmem:[#allocation42_spill] sm:$0xff]  ;;  %v5888_v1 = vld [vmem:[#allocation3 + $0x120] sm:$0xff] }
 0x489   : > { %v9561_v46 = vadd.f32 %v4663_v51, %v4662_v41  ;;  %v9586_v51 = vpop.f32.mrf.mxu0 }
 0x48b   : > { %11157 = vst [vmem:[#allocation10_spill] sm:$0xff] %v9561_v46  ;;  %5763 = vmatmul.msk.f32.gmra.mxu0 %vm1978_vm6, %v5887_v12  ;;  %5730 = vmatmul.msk.f32.gmra.mxu3 %vm1978_vm6, %v11158_v15  ;;  %v11161_v12 = vld [vmem:[#allocation25_spill] sm:$0xff]  ;;  %v11207_v46 = vld [vmem:[#allocation78_spill] sm:$0xff] }
 0x48c   : > { %5809 = vmatmul.msk.f32.gmra.mxu2 %vm1978_vm6, %v11080_v29  ;;  %v4693_v29 = vsel %vm1978_vm6, %v9231_v26, 0.0  ;;  %v4695_v26 = vsel %vm1978_vm6, %v9247_v49, 0.0  ;;  %v11164_v49 = vld [vmem:[#allocation69_spill] sm:$0xff] }
 0x48d   : > { %v4694_v24 = vadd.f32 %v4693_v29, %v9211_v35  ;;  %v11163_v29 = vld [vmem:[#allocation62_spill] sm:$0xff] }
 0x48e   : > { %v3943_v19 = vpop.f32.mrf.mxu3 }
 0x48f   : > { %v3871_v63 = vpop.f32.mrf.mxu2  ;;  %v4427_v7 = vsel %vm1978_vm6, %v3943_v19, 0.0  ;;  %v4696_v35 = vadd.f32 %v4695_v26, %v4694_v24  ;;  %v5889_v26 = vld [vmem:[#allocation3 + $0x128] sm:$0xff] }
 0x490   : > { %v4680_v31 = vsel %vm1978_vm6, %v3871_v63, 0.0  ;;  %v9591_v0 = vadd.f32 %v4427_v7, %v9225_v52  ;;  %5795 = vmatmul.msk.f32.gmra.mxu1 %vm1978_vm6, %v8919_v28  ;;  %v9603_v63 = vpop.f32.mrf.mxu1 }
 0x491   : > { %v9582_v41 = vadd.f32 %v4680_v31, %v4679_v9  ;;  %v4710_v31 = vsel %vm1978_vm6, %v9261_v33, 0.0  ;;  %v9616_v24 = vpop.f32.mrf.mxu0  ;;  %v4712_v33 = vsel %vm1978_vm6, %v9279_v25, 0.0  ;;  %v11169_v25 = vld [vmem:[#allocation82_spill] sm:$0xff] }
 0x492   : > { %v4711_v7 = vadd.f32 %v4710_v31, %v11163_v29 }
 0x493   : > { %11159 = vst [vmem:[#allocation7_spill] sm:$0xff] %v9582_v41  ;;  %5764 = vmatmul.msk.f32.gmra.mxu0 %vm1978_vm6, %v5888_v1  ;;  %5731 = vmatmul.msk.f32.gmra.mxu3 %vm1978_vm6, %v11161_v12  ;;  %v11165_v1 = vld [vmem:[#allocation64_spill] sm:$0xff]  ;;  %v3124_v41 = vrot.slane %v11142_v6, 2 }
 0x494   : > { %5810 = vmatmul.msk.f32.gmra.mxu2 %vm1978_vm6, %v11160_v16 }
 0x496   : > { %v3946_v28 = vpop.f32.mrf.mxu3 }
 0x497   : > { %v3874_v62 = vpop.f32.mrf.mxu2  ;;  %v4444_v19 = vsel %vm1978_vm6, %v3946_v28, 0.0 }
 0x498   : > { %v4697_v52 = vsel %vm1978_vm6, %v3874_v62, 0.0  ;;  %v9612_v16 = vadd.f32 %v4444_v19, %v11164_v49  ;;  %5796 = vmatmul.msk.f32.gmra.mxu1 %vm1978_vm6, %v8946_v4  ;;  %v11166_v62 = vld [vmem:[#allocation102_spill] sm:$0xff]  ;;  %v4727_v19 = vsel %vm1978_vm6, %v9290_v60, 0.0  ;;  %v4729_v60 = vsel %vm1978_vm6, %v9310_v2, 0.0  ;;  %v11173_v2 = vld [vmem:[#allocation97_spill] sm:$0xff] }
 0x499   : > { %v9605_v9 = vadd.f32 %v4697_v52, %v4696_v35  ;;  %v4713_v52 = vadd.f32 %v4712_v33, %v4711_v7  ;;  %v11168_v49 = vld [vmem:[#allocation70_spill] sm:$0xff]  ;;  %v9644_v33 = vpop.f32.mrf.mxu0 }
 0x49a   : > { %v5890_v7 = vld [vmem:[#allocation3 + $0x138] sm:$0xff] }
 0x49b   : > { %11162 = vst [vmem:[#allocation8_spill] sm:$0xff] %v9605_v9  ;;  %5765 = vmatmul.msk.f32.gmra.mxu0 %vm1978_vm6, %v5889_v26  ;;  %5732 = vmatmul.msk.f32.gmra.mxu3 %vm1978_vm6, %v11166_v62  ;;  %v9632_v26 = vpop.f32.mrf.mxu1 }
 0x49c   : > { %5811 = vmatmul.msk.f32.gmra.mxu2 %vm1978_vm6, %v11165_v1  ;;  %v4728_v1 = vadd.f32 %v4727_v19, %v11168_v49  ;;  %v11172_v49 = vld [vmem:[#allocation37_spill] sm:$0xff] }
 0x49e   : > { %v3949_v4 = vpop.f32.mrf.mxu3 }
 0x49f   : > { %v3877_v35 = vpop.f32.mrf.mxu2  ;;  %v4461_v29 = vsel %vm1978_vm6, %v3949_v4, 0.0 }
 0x4a0   : > { %v4714_v28 = vsel %vm1978_vm6, %v3877_v35, 0.0  ;;  %v9635_v9 = vadd.f32 %v4461_v29, %v11169_v25  ;;  %5797 = vmatmul.msk.f32.gmra.mxu1 %vm1978_vm6, %v8971_v42  ;;  %v11170_v35 = vld [vmem:[#allocation23_spill] sm:$0xff] }
 0x4a1   : > { %v9626_v31 = vadd.f32 %v4714_v28, %v4713_v52  ;;  %v4730_v28 = vadd.f32 %v4729_v60, %v4728_v1  ;;  %v5891_v1 = vld [vmem:[#allocation3 + $0x140] sm:$0xff] }
 0x4a3   : > { %11167 = vst [vmem:[#allocation5_spill] sm:$0xff] %v9626_v31  ;;  %5766 = vmatmul.msk.f32.gmra.mxu0 %vm1978_vm6, %v5890_v7  ;;  %5733 = vmatmul.msk.f32.gmra.mxu3 %vm1978_vm6, %v11170_v35  ;;  %v11174_v31 = vld [vmem:[#allocation43_spill] sm:$0xff]  ;;  %v9663_v60 = vpop.f32.mrf.mxu1 }
 0x4a4   : > { %5812 = vmatmul.msk.f32.gmra.mxu2 %vm1978_vm6, %v11096_v58  ;;  %v4744_v58 = vsel %vm1978_vm6, %v9316_v5, 0.0  ;;  %v4746_v5 = vsel %vm1978_vm6, %v9338_v55, 0.0  ;;  %v11178_v55 = vld [vmem:[#allocation40_spill] sm:$0xff] }
 0x4a5   : > { %v4745_v25 = vadd.f32 %v4744_v58, %v11172_v49 }
 0x4a6   : > { %v3952_v42 = vpop.f32.mrf.mxu3 }
 0x4a7   : > { %v3880_v52 = vpop.f32.mrf.mxu2  ;;  %v4478_v29 = vsel %vm1978_vm6, %v3952_v42, 0.0  ;;  %v9669_v42 = vpop.f32.mrf.mxu0 }
 0x4a8   : > { %v4731_v4 = vsel %vm1978_vm6, %v3880_v52, 0.0  ;;  %v9656_v7 = vadd.f32 %v4478_v29, %v11173_v2  ;;  %5798 = vmatmul.msk.f32.gmra.mxu1 %vm1978_vm6, %v8998_v57  ;;  %v11175_v52 = vld [vmem:[#allocation65_spill] sm:$0xff]  ;;  %v4761_v29 = vsel %vm1978_vm6, %v9347_v53, 0.0  ;;  %v11177_v2 = vld [vmem:[#allocation80_spill] sm:$0xff] }
 0x4a9   : > { %v9649_v19 = vadd.f32 %v4731_v4, %v4730_v28  ;;  %v4747_v4 = vadd.f32 %v4746_v5, %v4745_v25  ;;  %v11179_v25 = vld [vmem:[#allocation48_spill] sm:$0xff]  ;;  %v5892_v5 = vld [vmem:[#allocation3 + $0x150] sm:$0xff] }
 0x4aa   : > { %v11180_v53 = vld [vmem:[#allocation33_spill] sm:$0xff] }
 0x4ab   : > { %11171 = vst [vmem:[#allocation91_spill] sm:$0xff] %v9649_v19  ;;  %5767 = vmatmul.msk.f32.gmra.mxu0 %vm1978_vm6, %v5891_v1  ;;  %5734 = vmatmul.msk.f32.gmra.mxu3 %vm1978_vm6, %v11175_v52  ;;  %v4762_v1 = vadd.f32 %v4761_v29, %v11177_v2  ;;  %v4778_v2 = vsel %vm1978_vm6, %v9377_v54, 0.0  ;;  %v4780_v54 = vsel %vm1978_vm6, %v9395_v48, 0.0 }
 0x4ac   : > { %5813 = vmatmul.msk.f32.gmra.mxu2 %vm1978_vm6, %v11174_v31 }
 0x4ae   : > { %v3955_v31 = vpop.f32.mrf.mxu3 }
 0x4af   : > { %v3883_v28 = vpop.f32.mrf.mxu2  ;;  %v4495_v49 = vsel %vm1978_vm6, %v3955_v31, 0.0 }
 0x4b0   : > { %v4748_v57 = vsel %vm1978_vm6, %v3883_v28, 0.0  ;;  %v9679_v19 = vadd.f32 %v4495_v49, %v11178_v55  ;;  %5799 = vmatmul.msk.f32.gmra.mxu1 %vm1978_vm6, %v9025_v45  ;;  %v4763_v28 = vsel %vm1978_vm6, %v9363_v56, 0.0  ;;  %v9697_v55 = vpop.f32.mrf.mxu0  ;;  %v11182_v56 = vld [vmem:[#allocation20_spill] sm:$0xff] }
 0x4b1   : > { %v9672_v58 = vadd.f32 %v4748_v57, %v4747_v4  ;;  %v9690_v4 = vpop.f32.mrf.mxu1  ;;  %v4764_v31 = vadd.f32 %v4763_v28, %v4762_v1  ;;  %v11183_v1 = vld [vmem:[#allocation53_spill] sm:$0xff]  ;;  %v5893_v28 = vld [vmem:[#allocation3 + $0x158] sm:$0xff] }
 0x4b3   : > { %11176 = vst [vmem:[#allocation6_spill] sm:$0xff] %v9672_v58  ;;  %5768 = vmatmul.msk.f32.gmra.mxu0 %vm1978_vm6, %v5892_v5  ;;  %5735 = vmatmul.msk.f32.gmra.mxu3 %vm1978_vm6, %v11180_v53  ;;  %v4779_v5 = vadd.f32 %v4778_v2, %v11182_v56 }
 0x4b4   : > { %5814 = vmatmul.msk.f32.gmra.mxu2 %vm1978_vm6, %v11179_v25 }
 0x4b6   : > { %v3958_v45 = vpop.f32.mrf.mxu3 }
 0x4b7   : > { %v3886_v57 = vpop.f32.mrf.mxu2  ;;  %v4512_v25 = vsel %vm1978_vm6, %v3958_v45, 0.0 }
 0x4b8   : > { %v4765_v29 = vsel %vm1978_vm6, %v3886_v57, 0.0  ;;  %v9702_v58 = vadd.f32 %v4512_v25, %v9341_v38  ;;  %5800 = vmatmul.msk.f32.gmra.mxu1 %vm1978_vm6, %v9050_v32  ;;  %v11184_v57 = vld [vmem:[#allocation12_spill] sm:$0xff]  ;;  %v4795_v32 = vsel %vm1978_vm6, %v9406_v22, 0.0  ;;  %v11186_v25 = vld [vmem:[#allocation79_spill] sm:$0xff]  ;;  %v9723_v48 = vpop.f32.mrf.mxu0 }
 0x4b9   : > { %v9693_v49 = vadd.f32 %v4765_v29, %v4764_v31  ;;  %v4781_v29 = vadd.f32 %v4780_v54, %v4779_v5  ;;  %v9714_v45 = vpop.f32.mrf.mxu1  ;;  %v4796_v56 = vadd.f32 %v4795_v32, %v11186_v25  ;;  %v5894_v5 = vld [vmem:[#allocation3 + $0x168] sm:$0xff]  ;;  %v11188_v54 = vld [vmem:[#allocation90_spill] sm:$0xff] }
 0x4ba   : > { %v11190_v32 = vld [vmem:[#allocation52_spill] sm:$0xff] }
 0x4bb   : > { %11181 = vst [vmem:[#allocation14_spill] sm:$0xff] %v9693_v49  ;;  %5769 = vmatmul.msk.f32.gmra.mxu0 %vm1978_vm6, %v5893_v28  ;;  %5736 = vmatmul.msk.f32.gmra.mxu3 %vm1978_vm6, %v11184_v57  ;;  %v4797_v28 = vsel %vm1978_vm6, %v9426_v50, 0.0  ;;  %v11191_v50 = vld [vmem:[#allocation54_spill] sm:$0xff]  ;;  %v9820_v49 = vld [vmem:[#allocation3 + $0x1a8] sm:$0x3] }
 0x4bc   : > { %5815 = vmatmul.msk.f32.gmra.mxu2 %vm1978_vm6, %v11183_v1  ;;  %v11187_v1 = vld [vmem:[#allocation41_spill] sm:$0xff] }
 0x4bf   : > { %v3889_v31 = vpop.f32.mrf.mxu2 }
 0x4c0   : > { %v4782_v38 = vsel %vm1978_vm6, %v3889_v31, 0.0  ;;  %5801 = vmatmul.msk.f32.gmra.mxu1 %vm1978_vm6, %v9077_v27  ;;  %v4798_v31 = vadd.f32 %v4797_v28, %v4796_v56  ;;  %v4812_v27 = vsel %vm1978_vm6, %v9432_v8, 0.0  ;;  %v4814_v56 = vsel %vm1978_vm6, %v9454_v37, 0.0  ;;  %v9747_v28 = vpop.f32.mrf.mxu0  ;;  %v11195_v37 = vld [vmem:[#allocation75_spill] sm:$0xff] }
 0x4c1   : > { %v9716_v2 = vadd.f32 %v4782_v38, %v4781_v29  ;;  %v4813_v25 = vadd.f32 %v4812_v27, %v11190_v32  ;;  %v11194_v32 = vld [vmem:[#allocation47_spill] sm:$0xff] }
 0x4c3   : > { %11185 = vst [vmem:[#allocation92_spill] sm:$0xff] %v9716_v2  ;;  %5770 = vmatmul.msk.f32.gmra.mxu0 %vm1978_vm6, %v5894_v5  ;;  %5737 = vmatmul.msk.f32.gmra.mxu3 %vm1978_vm6, %v11188_v54  ;;  %v5895_v5 = vld [vmem:[#allocation3 + $0x170] sm:$0xff]  ;;  %v11204_v2 = vld [vmem:[#allocation16_spill] sm:$0xff] }
 0x4c4   : > { %5816 = vmatmul.msk.f32.gmra.mxu2 %vm1978_vm6, %v11187_v1  ;;  %v9738_v1 = vpop.f32.mrf.mxu1 }
 0x4c7   : > { %v3892_v22 = vpop.f32.mrf.mxu2 }
 0x4c8   : > { %v4799_v29 = vsel %vm1978_vm6, %v3892_v22, 0.0  ;;  %5802 = vmatmul.msk.f32.gmra.mxu1 %vm1978_vm6, %v9104_v59  ;;  %v11192_v22 = vld [vmem:[#allocation9_spill] sm:$0xff]  ;;  %v4829_v59 = vsel %vm1978_vm6, %v9463_v20, 0.0 }
 0x4c9   : > { %v9733_v38 = vadd.f32 %v4799_v29, %v4798_v31  ;;  %v4815_v31 = vadd.f32 %v4814_v56, %v4813_v25  ;;  %v4831_v25 = vsel %vm1978_vm6, %v9481_v40, 0.0  ;;  %v11196_v56 = vld [vmem:[#allocation88_spill] sm:$0xff] }
 0x4ca   : > { %v11199_v40 = vld [vmem:[#allocation60_spill] sm:$0xff] }
 0x4cb   : > { %11189 = vst [vmem:[#allocation11_spill] sm:$0xff] %v9733_v38  ;;  %5771 = vmatmul.msk.f32.gmra.mxu0 %vm1978_vm6, %v5895_v5  ;;  %5738 = vmatmul.msk.f32.gmra.mxu3 %vm1978_vm6, %v11192_v22 }
 0x4cc   : > { %5817 = vmatmul.msk.f32.gmra.mxu2 %vm1978_vm6, %v11191_v50  ;;  %v4830_v50 = vadd.f32 %v4829_v59, %v11194_v32  ;;  %v9763_v5 = vpop.f32.mrf.mxu1  ;;  %v4846_v59 = vsel %vm1978_vm6, %v9498_v11, 0.0  ;;  %v11198_v32 = vld [vmem:[#allocation26_spill] sm:$0xff] }
 0x4cf   : > { %v3895_v8 = vpop.f32.mrf.mxu2 }
 0x4d0   : > { %v4816_v29 = vsel %vm1978_vm6, %v3895_v8, 0.0  ;;  %5803 = vmatmul.msk.f32.gmra.mxu1 %vm1978_vm6, %v9127_v39  ;;  %v4832_v8 = vadd.f32 %v4831_v25, %v4830_v50  ;;  %v4848_v50 = vsel %vm1978_vm6, %v9519_v23, 0.0  ;;  %v11201_v25 = vld [vmem:[#allocation13_spill] sm:$0xff]  ;;  %v11203_v23 = vld [vmem:[#allocation24_spill] sm:$0xff] }
 0x4d1   : > { %v9752_v27 = vadd.f32 %v4816_v29, %v4815_v31  ;;  %v9769_v31 = vpop.f32.mrf.mxu0 }
 0x4d3   : > { %11193 = vst [vmem:[#allocation15_spill] sm:$0xff] %v9752_v27  ;;  %5772 = vmatmul.msk.f32.gmra.mxu0 %vm1978_vm6, %v11142_v6  ;;  %5739 = vmatmul.msk.f32.gmra.mxu3 %vm1978_vm6, %v11196_v56  ;;  %v11200_v27 = vld [vmem:[#allocation98_spill] sm:$0xff]  ;;  %v4882_v6 = vsel %vm1978_vm6, %v9579_v17, 0.0  ;;  %v4899_v17 = vsel %vm1978_vm6, %v9603_v63, 0.0  ;;  %v4916_v63 = vsel %vm1978_vm6, %v9632_v26, 0.0 }
 0x4d4   : > { %5818 = vmatmul.msk.f32.gmra.mxu2 %vm1978_vm6, %v11195_v37  ;;  %v4847_v37 = vadd.f32 %v4846_v59, %v11198_v32  ;;  %v9794_v32 = vld [vmem:[#allocation3 + $0x1a0] sm:$0xff] }
 0x4d7   : > { %v3898_v20 = vpop.f32.mrf.mxu2 }
 0x4d8   : > { %v4833_v39 = vsel %vm1978_vm6, %v3898_v20, 0.0  ;;  %5804 = vmatmul.msk.f32.gmra.mxu1 %vm1978_vm6, %v9494_v30  ;;  %v9787_v20 = vpop.f32.mrf.mxu1  ;;  %v9792_v30 = vld [vmem:[#allocation3 + $0x198] sm:$0xff] }
 0x4d9   : > { %v9772_v29 = vadd.f32 %v4833_v39, %v4832_v8  ;;  %v4849_v8 = vadd.f32 %v4848_v50, %v4847_v37  ;;  %v3132_v37 = vrot.slane %v9792_v30, 1  ;;  %v3133_v50 = vrot.slane %v9794_v32, 1 }
 0x4db   : > { %11197 = vst [vmem:[#allocation22_spill] sm:$0xff] %v9772_v29  ;;  %5773 = vmatmul.msk.f32.gmra.mxu0 %vm1978_vm6, %v11200_v27  ;;  %5740 = vmatmul.msk.f32.gmra.mxu3 %vm1978_vm6, %v11201_v25  ;;  %v9798_v29 = vpop.f32.mrf.mxu0 }
 0x4dc   : > { %5819 = vmatmul.msk.f32.gmra.mxu2 %vm1978_vm6, %v11199_v40  ;;  %v4863_v40 = vsel %vm1978_vm6, %v9533_v36, 0.0  ;;  %v4865_v36 = vsel %vm1978_vm6, %v9552_v21, 0.0  ;;  %v4880_v21 = vsel %vm1978_vm6, %v9558_v13, 0.0 }
 0x4dd   : > { %v4864_v38 = vadd.f32 %v4863_v40, %v11203_v23  ;;  %v3134_v40 = vsel %vm520_vm3, %v3132_v37, %v3133_v50  ;;  %v4881_v44 = vadd.f32 %v4880_v21, %v11207_v46  ;;  %v11208_v37 = vld [vmem:[#allocation73_spill] sm:$0xff]  ;;  %v11209_v21 = vld [vmem:[#allocation84_spill] sm:$0xff] }
 0x4df   : > { %v3901_v11 = vpop.f32.mrf.mxu2  ;;  %v4883_v46 = vadd.f32 %v4882_v6, %v4881_v44  ;;  %v4914_v6 = vsel %vm1978_vm6, %v9616_v24, 0.0 }
 0x4e0   : > { %v4850_v39 = vsel %vm1978_vm6, %v3901_v11, 0.0  ;;  %5805 = vmatmul.msk.f32.gmra.mxu1 %vm1978_vm6, %v9524_v18  ;;  %v11205_v11 = vld [vmem:[#allocation101_spill] sm:$0xff]  ;;  %v9816_v23 = vpop.f32.mrf.mxu1 }
 0x4e1   : > { %v9790_v59 = vadd.f32 %v4850_v39, %v4849_v8  ;;  %v4866_v39 = vadd.f32 %v4865_v36, %v4864_v38 }
 0x4e3   : > { %11202 = vst [vmem:[#allocation32_spill] sm:$0xff] %v9790_v59  ;;  %5774 = vmatmul.msk.f32.gmra.mxu0 %vm1978_vm6, %v9792_v30  ;;  %5741 = vmatmul.msk.f32.gmra.mxu3 %vm1978_vm6, %v11205_v11  ;;  %v9827_v38 = vpop.f32.mrf.mxu0 }
 0x4e4   : > { %5820 = vmatmul.msk.f32.gmra.mxu2 %vm1978_vm6, %v11204_v2  ;;  %v3125_v2 = vrot.slane %v11200_v27, 2  ;;  %v3135_v27 = vrot.slane %v9820_v49, 1 }
 0x4e6   : > { %v9835_v36 = vsel %vm609_vm4, %v3124_v41, %v3125_v2  ;;  %v4897_v41 = vsel %vm1978_vm6, %v9586_v51, 0.0 }
 0x4e7   : > { %v3904_v8 = vpop.f32.mrf.mxu2 }
 0x4e8   : > { %v4867_v18 = vsel %vm1978_vm6, %v3904_v8, 0.0  ;;  %5806 = vmatmul.msk.f32.gmra.mxu1 %vm1978_vm6, %v3134_v40  ;;  %v3127_v40 = vrot.slane %v9503_v61, 2 }
 0x4e9   : > { %v9818_v59 = vadd.f32 %v4867_v18, %v4866_v39  ;;  %v3136_v39 = vsel %vm520_vm3, %v3133_v50, %v3135_v27 }
 0x4ea   : > { %v9855_v44 = vsel %vm609_vm4, %v3125_v2, %v3127_v40  ;;  %v9884_v40 = vld [vmem:[%s10416_s4] ss:$0 sm:$0xff] }
 0x4eb   : > { %11206 = vst [vmem:[#allocation94_spill] sm:$0xff] %v9818_v59  ;;  %5775 = vmatmul.msk.f32.gmra.mxu0 %vm1978_vm6, %v9794_v32  ;;  %5742 = vmatmul.msk.f32.gmra.mxu3 %vm1978_vm6, %v9835_v36  ;;  %v9849_v59 = vpop.f32.mrf.mxu1 }
 0x4ec   : > { %5821 = vmatmul.msk.f32.gmra.mxu2 %vm1978_vm6, %v11208_v37  ;;  %v4898_v37 = vadd.f32 %v4897_v41, %v11209_v21 }
 0x4ee   : > { %v4900_v51 = vadd.f32 %v4899_v17, %v4898_v37  ;;  %v9897_v37 = vpop.f32.mrf.mxu3 }
 0x4ef   : > { %v3907_v13 = vpop.f32.mrf.mxu2 }
 0x4f0   : > { %v4884_v8 = vsel %vm1978_vm6, %v3907_v13, 0.0  ;;  %5807 = vmatmul.msk.f32.gmra.mxu1 %vm1978_vm6, %v3136_v39  ;;  %v4395_v39 = vsel %vm1978_vm6, %v9644_v33, 0.0  ;;  %v9890_v33 = vld [vmem:[%s10418_s6] ss:$0 sm:$0xff] }
 0x4f1   : > { %v9843_v18 = vadd.f32 %v4884_v8, %v4883_v46  ;;  %v4396_v24 = vadd.f32 %v4395_v39, %v9545_v34 }
 0x4f3   : > { %5743 = vmatmul.msk.f32.gmra.mxu3 %vm1978_vm6, %v9855_v44 }
 0x4f4   : > { %5822 = vmatmul.msk.f32.gmra.mxu2 %vm1978_vm6, %v11152_v10  ;;  %v4915_v10 = vadd.f32 %v4914_v6, %v9521_v43  ;;  %v4397_v43 = vsel %vm1978_vm6, %v9663_v60, 0.0  ;;  %v9894_v60 = vstv %s4964_s13  ;;  %v4414_v6 = vsel %vm1978_vm6, %v9690_v4, 0.0 }
 0x4f5   : > { %v4398_v26 = vadd.f32 %v4397_v43, %v4396_v24  ;;  %v4429_v4 = vsel %vm1978_vm6, %v9697_v55, 0.0  ;;  %v9921_v43 = vpop.f32.mrf.mxu1 }
 0x4f6   : > { %v4917_v13 = vadd.f32 %v4916_v63, %v4915_v10 }
 0x4f7   : > { %v3910_v61 = vpop.f32.mrf.mxu2 }
 0x4f8   : > { %v4901_v50 = vsel %vm1978_vm6, %v3910_v61, 0.0  ;;  %v11210_v61 = vld [vmem:[#allocation105_spill] sm:$0xff] }
 0x4f9   : > { %v9862_v27 = vadd.f32 %v4901_v50, %v4900_v51  ;;  %v2681_v51 = vadd.f32 %v9890_v33, %v11210_v61 }
 0x4fc   : > { %5823 = vmatmul.msk.f32.gmra.mxu2 %vm1978_vm6, %v11156_v47 }
 0x4ff   : > { %v3913_v2 = vpop.f32.mrf.mxu2 }
 0x500   : > { %v4918_v46 = vsel %vm1978_vm6, %v3913_v2, 0.0  ;;  %v9908_v2 = vpop.f32.mrf.mxu0 }
 0x501   : > { %v9872_v8 = vadd.f32 %v4918_v46, %v4917_v13  ;;  %v4430_v46 = vadd.f32 %v4429_v4, %v9591_v0  ;;  %v4431_v0 = vsel %vm1978_vm6, %v9714_v45, 0.0  ;;  %v11212_v45 = vld [vmem:[#allocation31_spill] sm:$0xff] }
 0x504   : > { %5824 = vmatmul.msk.f32.gmra.mxu2 %vm1978_vm6, %v11158_v15  ;;  %v4412_v15 = vsel %vm1978_vm6, %v9669_v42, 0.0 }
 0x505   : > { %v4413_v21 = vadd.f32 %v4412_v15, %v9568_v3 }
 0x507   : > { %v4288_v47 = vpop.f32.mrf.mxu2  ;;  %v4415_v63 = vadd.f32 %v4414_v6, %v4413_v21  ;;  %v4432_v21 = vadd.f32 %v4431_v0, %v4430_v46  ;;  %v11213_v0 = vld [vmem:[#allocation27_spill] sm:$0xff] }
 0x508   : > { %v4399_v41 = vsel %vm1978_vm6, %v4288_v47, 0.0  ;;  %v11211_v47 = vld [vmem:[#allocation107_spill] sm:$0xff]  ;;  %v9938_v6 = vpop.f32.mrf.mxu0 }
 0x509   : > { %v4400_v34 = vadd.f32 %v4399_v41, %v4398_v26  ;;  %v2684_v26 = vadd.f32 %v9890_v33, %v11211_v47  ;;  %v9929_v41 = vpop.f32.mrf.mxu3  ;;  %v4463_v47 = vsel %vm1978_vm6, %v9747_v28, 0.0  ;;  %v4465_v28 = vsel %vm1978_vm6, %v9763_v5, 0.0 }
 0x50b   : > { %v4932_v17 = vadd.f32 %v9884_v40, %v4400_v34 }
 0x50c   : > { %5825 = vmatmul.msk.f32.gmra.mxu2 %vm1978_vm6, %v11161_v12 }
 0x50d   : > { %v4966_v50 = vmul.f32 %v9894_v60, %v4932_v17 }
 0x50f   : > { %v4998_v42 = vadd.f32 %v4966_v50, %v2681_v51  ;;  %v4291_v10 = vpop.f32.mrf.mxu2 }
 0x510   : > { %v4416_v3 = vsel %vm1978_vm6, %v4291_v10, 0.0 }
 0x511   : > { %vm5030_vm3 = vcmp.gt.f32.partialorder %v4998_v42, 0.0  ;;  %v5062_v12 = vmul.f32 0.2, %v4998_v42  ;;  %v4417_v13 = vadd.f32 %v4416_v3, %v4415_v63  ;;  %v2687_v63 = vadd.f32 %v9890_v33, %v11212_v45 }
 0x513   : > { %v5094_v39 = vsel %vm5030_vm3, %v4998_v42, %v5062_v12  ;;  %v4933_v24 = vadd.f32 %v9884_v40, %v4417_v13  ;;  %v9952_v12 = vpop.f32.mrf.mxu3 }
 0x514   : > { %5126 = vst.msk [vmem:[%s9915_s21] sm:$0xff] %vm1978_vm6, %v5094_v39  ;;  %5826 = vmatmul.msk.f32.gmra.mxu2 %vm1978_vm6, %v11166_v62  ;;  %v4446_v62 = vsel %vm1978_vm6, %v9723_v48, 0.0  ;;  %v4448_v48 = vsel %vm1978_vm6, %v9738_v1, 0.0 }
 0x515   : > { %v4967_v55 = vmul.f32 %v9894_v60, %v4933_v24  ;;  %v4447_v50 = vadd.f32 %v4446_v62, %v9612_v16  ;;  %v9950_v16 = vpop.f32.mrf.mxu1 }
 0x517   : > { %v4999_v34 = vadd.f32 %v4967_v55, %v2684_v26  ;;  %v4294_v15 = vpop.f32.mrf.mxu2  ;;  %v4449_v46 = vadd.f32 %v4448_v48, %v4447_v50  ;;  %v4464_v26 = vadd.f32 %v4463_v47, %v9635_v9 }
 0x518   : > { %v4433_v17 = vsel %vm1978_vm6, %v4294_v15, 0.0  ;;  %v9965_v15 = vpop.f32.mrf.mxu0 }
 0x519   : > { %vm5031_vm15 = vcmp.gt.f32.partialorder %v4999_v34, 0.0  ;;  %v5063_v61 = vmul.f32 0.2, %v4999_v34  ;;  %v4434_v51 = vadd.f32 %v4433_v17, %v4432_v21 }
 0x51b   : > { %v5095_v42 = vsel %vm5031_vm15, %v4999_v34, %v5063_v61  ;;  %v4934_v10 = vadd.f32 %v9884_v40, %v4434_v51  ;;  %v2690_v34 = vadd.f32 %v9890_v33, %v11213_v0  ;;  %v4466_v61 = vadd.f32 %v4465_v28, %v4464_v26  ;;  %v9973_v50 = vpop.f32.mrf.mxu3 }
 0x51c   : > { %5127 = vst.msk [vmem:[%s9915_s21 + $0x8] sm:$0xff] %vm1978_vm6, %v5095_v42  ;;  %5827 = vmatmul.msk.f32.gmra.mxu2 %vm1978_vm6, %v11170_v35 }
 0x51d   : > { %v4968_v3 = vmul.f32 %v9894_v60, %v4934_v10  ;;  %v9970_v51 = vpop.f32.mrf.mxu1  ;;  %v4480_v10 = vsel %vm1978_vm6, %v9769_v31, 0.0 }
 0x51e   : > { %v4481_v45 = vadd.f32 %v4480_v10, %v9656_v7 }
 0x51f   : > { %v5000_v13 = vadd.f32 %v4968_v3, %v2687_v63  ;;  %v4297_v4 = vpop.f32.mrf.mxu2  ;;  %v11214_v3 = vld [vmem:[#allocation87_spill] sm:$0xff] }
 0x520   : > { %v4450_v39 = vsel %vm1978_vm6, %v4297_v4, 0.0  ;;  %v2693_v48 = vadd.f32 %v9890_v33, %v11214_v3  ;;  %v4482_v4 = vsel %vm1978_vm6, %v9787_v20, 0.0  ;;  %v9988_v31 = vpop.f32.mrf.mxu0  ;;  %v11216_v3 = vld [vmem:[#allocation30_spill] sm:$0xff] }
 0x521   : > { %vm5032_vm0 = vcmp.gt.f32.partialorder %v5000_v13, 0.0  ;;  %v5064_v35 = vmul.f32 0.2, %v5000_v13  ;;  %v4451_v24 = vadd.f32 %v4450_v39, %v4449_v46  ;;  %v4483_v39 = vadd.f32 %v4482_v4, %v4481_v45  ;;  %v11217_v4 = vld [vmem:[#allocation76_spill] sm:$0xff] }
 0x523   : > { %v5096_v55 = vsel %vm5032_vm0, %v5000_v13, %v5064_v35  ;;  %v4935_v1 = vadd.f32 %v9884_v40, %v4451_v24 }
 0x524   : > { %5128 = vst.msk [vmem:[%s9915_s21 + $0x10] sm:$0xff] %vm1978_vm6, %v5096_v55  ;;  %5828 = vmatmul.msk.f32.gmra.mxu2 %vm1978_vm6, %v11175_v52 }
 0x525   : > { %v4969_v21 = vmul.f32 %v9894_v60, %v4935_v1  ;;  %v9993_v26 = vpop.f32.mrf.mxu1  ;;  %v9996_v1 = vpop.f32.mrf.mxu3 }
 0x527   : > { %v5001_v9 = vadd.f32 %v4969_v21, %v2690_v34  ;;  %v4300_v17 = vpop.f32.mrf.mxu2  ;;  %v11215_v34 = vld [vmem:[#allocation35_spill] sm:$0xff] }
 0x528   : > { %v4467_v62 = vsel %vm1978_vm6, %v4300_v17, 0.0  ;;  %v2696_v21 = vadd.f32 %v9890_v33, %v11215_v34  ;;  %v11218_v34 = vld [vmem:[#allocation89_spill] sm:$0xff] }
 0x529   : > { %vm5033_vm2 = vcmp.gt.f32.partialorder %v5001_v9, 0.0  ;;  %v5065_v52 = vmul.f32 0.2, %v5001_v9  ;;  %v4468_v42 = vadd.f32 %v4467_v62, %v4466_v61  ;;  %v10009_v62 = vpop.f32.mrf.mxu0 }
 0x52b   : > { %v5097_v63 = vsel %vm5033_vm2, %v5001_v9, %v5065_v52  ;;  %v4936_v5 = vadd.f32 %v9884_v40, %v4468_v42 }
 0x52c   : > { %5129 = vst.msk [vmem:[%s9915_s21 + $0x18] sm:$0xff] %vm1978_vm6, %v5097_v63  ;;  %5829 = vmatmul.msk.f32.gmra.mxu2 %vm1978_vm6, %v11180_v53  ;;  %v4497_v53 = vsel %vm1978_vm6, %v9798_v29, 0.0  ;;  %v4499_v29 = vsel %vm1978_vm6, %v9816_v23, 0.0  ;;  %v4529_v23 = vsel %vm1978_vm6, %v9897_v37, 0.0 }
 0x52d   : > { %v4970_v13 = vmul.f32 %v9894_v60, %v4936_v5  ;;  %v4498_v55 = vadd.f32 %v4497_v53, %v9679_v19  ;;  %v10017_v5 = vpop.f32.mrf.mxu1  ;;  %v4530_v37 = vadd.f32 %v4529_v23, %v11217_v4  ;;  %v4563_v23 = vsel %vm1978_vm6, %v9952_v12, 0.0  ;;  %v11221_v4 = vld [vmem:[#allocation58_spill] sm:$0xff] }
 0x52f   : > { %v5002_v7 = vadd.f32 %v4970_v13, %v2693_v48  ;;  %v4303_v46 = vpop.f32.mrf.mxu2  ;;  %v4500_v17 = vadd.f32 %v4499_v29, %v4498_v55  ;;  %v2699_v48 = vadd.f32 %v9890_v33, %v11216_v3  ;;  %v10025_v13 = vpop.f32.mrf.mxu3  ;;  %v11220_v3 = vld [vmem:[#allocation39_spill] sm:$0xff] }
 0x530   : > { %v4484_v35 = vsel %vm1978_vm6, %v4303_v46, 0.0 }
 0x531   : > { %vm5034_vm5 = vcmp.gt.f32.partialorder %v5002_v7, 0.0  ;;  %v5066_v24 = vmul.f32 0.2, %v5002_v7  ;;  %v4485_v47 = vadd.f32 %v4484_v35, %v4483_v39  ;;  %v10034_v55 = vpop.f32.mrf.mxu0 }
 0x533   : > { %v5098_v20 = vsel %vm5034_vm5, %v5002_v7, %v5066_v24  ;;  %v4937_v0 = vadd.f32 %v9884_v40, %v4485_v47  ;;  %v4531_v47 = vsel %vm1978_vm6, %v9908_v2, 0.0  ;;  %v4533_v2 = vsel %vm1978_vm6, %v9921_v43, 0.0 }
 0x534   : > { %5130 = vst.msk [vmem:[%s9915_s21 + $0x20] sm:$0xff] %vm1978_vm6, %v5098_v20  ;;  %5830 = vmatmul.msk.f32.gmra.mxu2 %vm1978_vm6, %v11184_v57  ;;  %v4514_v57 = vsel %vm1978_vm6, %v9827_v38, 0.0  ;;  %v4516_v38 = vsel %vm1978_vm6, %v9849_v59, 0.0  ;;  %v4532_v53 = vadd.f32 %v4531_v47, %v4530_v37  ;;  %v4546_v59 = vsel %vm1978_vm6, %v9929_v41, 0.0 }
 0x535   : > { %v4971_v28 = vmul.f32 %v9894_v60, %v4937_v0  ;;  %v4515_v10 = vadd.f32 %v4514_v57, %v9702_v58  ;;  %v10048_v29 = vpop.f32.mrf.mxu1  ;;  %v4564_v37 = vadd.f32 %v4563_v23, %v11221_v4  ;;  %v4565_v47 = vsel %vm1978_vm6, %v9965_v15, 0.0 }
 0x536   : > { %v4567_v15 = vsel %vm1978_vm6, %v9970_v51, 0.0 }
 0x537   : > { %v5003_v19 = vadd.f32 %v4971_v28, %v2696_v21  ;;  %v4306_v9 = vpop.f32.mrf.mxu2  ;;  %v4517_v39 = vadd.f32 %v4516_v38, %v4515_v10  ;;  %v2702_v21 = vadd.f32 %v9890_v33, %v11218_v34  ;;  %v4548_v10 = vsel %vm1978_vm6, %v9938_v6, 0.0 }
 0x538   : > { %v4501_v61 = vsel %vm1978_vm6, %v4306_v9, 0.0  ;;  %v4550_v6 = vsel %vm1978_vm6, %v9950_v16, 0.0 }
 0x539   : > { %vm5035_vm8 = vcmp.gt.f32.partialorder %v5003_v19, 0.0  ;;  %v5067_v52 = vmul.f32 0.2, %v5003_v19  ;;  %v4502_v42 = vadd.f32 %v4501_v61, %v4500_v17  ;;  %v10051_v17 = vpop.f32.mrf.mxu3 }
 0x53b   : > { %v5099_v45 = vsel %vm5035_vm8, %v5003_v19, %v5067_v52  ;;  %v4938_v63 = vadd.f32 %v9884_v40, %v4502_v42  ;;  %v11219_v19 = vld [vmem:[#allocation46_spill] sm:$0xff]  ;;  %v4534_v52 = vadd.f32 %v4533_v2, %v4532_v53  ;;  %v4566_v53 = vadd.f32 %v4565_v47, %v4564_v37 }
 0x53c   : > { %5131 = vst.msk [vmem:[%s9915_s21 + $0x28] sm:$0xff] %vm1978_vm6, %v5099_v45  ;;  %5831 = vmatmul.msk.f32.gmra.mxu2 %vm1978_vm6, %v11188_v54  ;;  %v4547_v9 = vadd.f32 %v4546_v59, %v11219_v19  ;;  %v11222_v59 = vld [vmem:[#allocation34_spill] sm:$0xff] }
 0x53d   : > { %v4972_v58 = vmul.f32 %v9894_v60, %v4938_v63  ;;  %v2708_v34 = vadd.f32 %v9890_v33, %v11222_v59  ;;  %v11227_v59 = vld [vmem:[#allocation86_spill] sm:$0xff] }
 0x53e   : > { %v4549_v45 = vadd.f32 %v4548_v10, %v4547_v9 }
 0x53f   : > { %v5004_v7 = vadd.f32 %v4972_v58, %v2699_v48  ;;  %v4309_v46 = vpop.f32.mrf.mxu2  ;;  %v2705_v48 = vadd.f32 %v9890_v33, %v11220_v3  ;;  %v10065_v58 = vpop.f32.mrf.mxu0  ;;  %v4584_v3 = vsel %vm1978_vm6, %v9993_v26, 0.0 }
 0x540   : > { %v4518_v35 = vsel %vm1978_vm6, %v4309_v46, 0.0  ;;  %v4551_v46 = vadd.f32 %v4550_v6, %v4549_v45 }
 0x541   : > { %vm5036_vm7 = vcmp.gt.f32.partialorder %v5004_v7, 0.0  ;;  %v5068_v54 = vmul.f32 0.2, %v5004_v7  ;;  %v4519_v24 = vadd.f32 %v4518_v35, %v4517_v39  ;;  %v10071_v39 = vpop.f32.mrf.mxu1  ;;  %v10074_v35 = vpop.f32.mrf.mxu3 }
 0x543   : > { %v5100_v20 = vsel %vm5036_vm7, %v5004_v7, %v5068_v54  ;;  %v4939_v0 = vadd.f32 %v9884_v40, %v4519_v24 }
 0x544   : > { %5132 = vst.msk [vmem:[%s9915_s21 + $0x30] sm:$0xff] %vm1978_vm6, %v5100_v20  ;;  %5832 = vmatmul.msk.f32.gmra.mxu2 %vm1978_vm6, %v11192_v22 }
 0x545   : > { %v4973_v28 = vmul.f32 %v9894_v60, %v4939_v0  ;;  %v4580_v0 = vsel %vm1978_vm6, %v9973_v50, 0.0 }
 0x547   : > { %v5005_v41 = vadd.f32 %v4973_v28, %v2702_v21  ;;  %v4312_v61 = vpop.f32.mrf.mxu2  ;;  %v11223_v28 = vld [vmem:[#allocation29_spill] sm:$0xff]  ;;  %v10091_v19 = vpop.f32.mrf.mxu0 }
 0x548   : > { %v4535_v22 = vsel %vm1978_vm6, %v4312_v61, 0.0  ;;  %v4581_v2 = vadd.f32 %v4580_v0, %v11223_v28  ;;  %v4601_v0 = vsel %vm1978_vm6, %v10017_v5, 0.0  ;;  %v4631_v5 = vsel %vm1978_vm6, %v10051_v17, 0.0 }
 0x549   : > { %vm5037_vm9 = vcmp.gt.f32.partialorder %v5005_v41, 0.0  ;;  %v5069_v42 = vmul.f32 0.2, %v5005_v41  ;;  %v4536_v57 = vadd.f32 %v4535_v22, %v4534_v52  ;;  %v4582_v22 = vsel %vm1978_vm6, %v9988_v31, 0.0  ;;  %v10098_v51 = vpop.f32.mrf.mxu3 }
 0x54a   : > { %v4632_v17 = vadd.f32 %v4631_v5, %v9511_v14  ;;  %v4648_v14 = vsel %vm1978_vm6, %v10074_v35, 0.0 }
 0x54b   : > { %v5101_v43 = vsel %vm5037_vm9, %v5005_v41, %v5069_v42  ;;  %v4940_v63 = vadd.f32 %v9884_v40, %v4536_v57  ;;  %v4568_v41 = vadd.f32 %v4567_v15, %v4566_v53  ;;  %v10096_v42 = vpop.f32.mrf.mxu1  ;;  %v4583_v57 = vadd.f32 %v4582_v22, %v4581_v2  ;;  %v11226_v53 = vld [vmem:[#allocation45_spill] sm:$0xff] }
 0x54c   : > { %5133 = vst.msk [vmem:[%s9915_s21 + $0x38] sm:$0xff] %vm1978_vm6, %v5101_v43  ;;  %5833 = vmatmul.msk.f32.gmra.mxu2 %vm1978_vm6, %v11196_v56  ;;  %v4597_v43 = vsel %vm1978_vm6, %v9996_v1, 0.0 }
 0x54d   : > { %v4974_v38 = vmul.f32 %v9894_v60, %v4940_v63  ;;  %v11224_v63 = vld [vmem:[#allocation93_spill] sm:$0xff]  ;;  %v4585_v37 = vadd.f32 %v4584_v3, %v4583_v57  ;;  %v3137_v57 = vrot.slane %v9792_v30, 2 }
 0x54e   : > { %v2711_v23 = vadd.f32 %v9890_v33, %v11224_v63 }
 0x54f   : > { %v5006_v7 = vadd.f32 %v4974_v38, %v2705_v48  ;;  %v4315_v12 = vpop.f32.mrf.mxu2  ;;  %v11225_v48 = vld [vmem:[#allocation71_spill] sm:$0xff] }
 0x550   : > { %v4552_v56 = vsel %vm1978_vm6, %v4315_v12, 0.0  ;;  %v4598_v38 = vadd.f32 %v4597_v43, %v11225_v48 }
 0x551   : > { %vm5038_vm10 = vcmp.gt.f32.partialorder %v5006_v7, 0.0  ;;  %v5070_v54 = vmul.f32 0.2, %v5006_v7  ;;  %v4553_v24 = vadd.f32 %v4552_v56, %v4551_v46  ;;  %v4599_v46 = vsel %vm1978_vm6, %v10009_v62, 0.0 }
 0x552   : > { %v4600_v56 = vadd.f32 %v4599_v46, %v4598_v38  ;;  %v4635_v46 = vsel %vm1978_vm6, %v10071_v39, 0.0  ;;  %v4650_v39 = vsel %vm1978_vm6, %v10091_v19, 0.0  ;;  %v11232_v19 = vld [vmem:[#allocation10_spill] sm:$0xff] }
 0x553   : > { %v5102_v16 = vsel %vm5038_vm10, %v5006_v7, %v5070_v54  ;;  %v4941_v20 = vadd.f32 %v9884_v40, %v4553_v24  ;;  %v10114_v7 = vpop.f32.mrf.mxu0  ;;  %v4614_v24 = vsel %vm1978_vm6, %v10025_v13, 0.0  ;;  %v10121_v47 = vpop.f32.mrf.mxu1 }
 0x554   : > { %5134 = vst.msk [vmem:[%s9915_s21 + $0x40] sm:$0xff] %vm1978_vm6, %v5102_v16  ;;  %5834 = vmatmul.msk.f32.gmra.mxu2 %vm1978_vm6, %v11201_v25  ;;  %v2714_v16 = vadd.f32 %v9890_v33, %v11226_v53  ;;  %v4615_v13 = vadd.f32 %v4614_v24, %v11227_v59  ;;  %v4602_v15 = vadd.f32 %v4601_v0, %v4600_v56  ;;  %v11230_v56 = vld [vmem:[#allocation36_spill] sm:$0xff] }
 0x555   : > { %v4975_v21 = vmul.f32 %v9894_v60, %v4941_v20  ;;  %v10129_v20 = vpop.f32.mrf.mxu3 }
 0x557   : > { %v5007_v9 = vadd.f32 %v4975_v21, %v2708_v34  ;;  %v4318_v50 = vpop.f32.mrf.mxu2 }
 0x558   : > { %v4569_v61 = vsel %vm1978_vm6, %v4318_v50, 0.0 }
 0x559   : > { %vm5039_vm11 = vcmp.gt.f32.partialorder %v5007_v9, 0.0  ;;  %v5071_v25 = vmul.f32 0.2, %v5007_v9  ;;  %v4570_v52 = vadd.f32 %v4569_v61, %v4568_v41 }
 0x55b   : > { %v5103_v10 = vsel %vm5039_vm11, %v5007_v9, %v5071_v25  ;;  %v4942_v45 = vadd.f32 %v9884_v40, %v4570_v52  ;;  %v4616_v9 = vsel %vm1978_vm6, %v10034_v55, 0.0  ;;  %v10138_v41 = vpop.f32.mrf.mxu0  ;;  %v11228_v52 = vld [vmem:[#allocation38_spill] sm:$0xff]  ;;  %v10154_v43 = vpop.f32.mrf.mxu1 }
 0x55c   : > { %5135 = vst.msk [vmem:[%s9915_s21 + $0x48] sm:$0xff] %vm1978_vm6, %v5103_v10  ;;  %5835 = vmatmul.msk.f32.gmra.mxu2 %vm1978_vm6, %v11205_v11  ;;  %v4617_v50 = vadd.f32 %v4616_v9, %v4615_v13  ;;  %v2717_v22 = vadd.f32 %v9890_v33, %v11228_v52  ;;  %v3138_v10 = vrot.slane %v9794_v32, 2  ;;  %v4652_v9 = vsel %vm1978_vm6, %v10096_v42, 0.0 }
 0x55d   : > { %v4976_v31 = vmul.f32 %v9894_v60, %v4942_v45  ;;  %v4618_v45 = vsel %vm1978_vm6, %v10048_v29, 0.0  ;;  %v10157_v63 = vpop.f32.mrf.mxu3  ;;  %v4633_v29 = vsel %vm1978_vm6, %v10065_v58, 0.0  ;;  %v3140_v58 = vrot.slane %v9820_v49, 2 }
 0x55e   : > { %v3139_v32 = vsel %vm609_vm4, %v3137_v57, %v3138_v10  ;;  %v4634_v38 = vadd.f32 %v4633_v29, %v4632_v17 }
 0x55f   : > { %v5008_v6 = vadd.f32 %v4976_v31, %v2711_v23  ;;  %v4321_v4 = vpop.f32.mrf.mxu2  ;;  %v4619_v31 = vadd.f32 %v4618_v45, %v4617_v50  ;;  %v3141_v49 = vsel %vm609_vm4, %v3138_v10, %v3140_v58 }
 0x560   : > { %v4586_v1 = vsel %vm1978_vm6, %v4321_v4, 0.0  ;;  %v4636_v24 = vadd.f32 %v4635_v46, %v4634_v38  ;;  %v4699_v46 = vsel %vm1978_vm6, %v10157_v63, 0.0 }
 0x561   : > { %vm5040_vm1 = vcmp.gt.f32.partialorder %v5008_v6, 0.0  ;;  %v5072_v11 = vmul.f32 0.2, %v5008_v6  ;;  %v4587_v12 = vadd.f32 %v4586_v1, %v4585_v37  ;;  %v11229_v37 = vld [vmem:[#allocation96_spill] sm:$0xff] }
 0x562   : > { %v2720_v1 = vadd.f32 %v9890_v33, %v11229_v37 }
 0x563   : > { %v5104_v54 = vsel %vm5040_vm1, %v5008_v6, %v5072_v11  ;;  %v4943_v26 = vadd.f32 %v9884_v40, %v4587_v12  ;;  %v10171_v11 = vpop.f32.mrf.mxu0  ;;  %v10178_v53 = vpop.f32.mrf.mxu1 }
 0x564   : > { %5136 = vst.msk [vmem:[%s9915_s21 + $0x50] sm:$0xff] %vm1978_vm6, %v5104_v54  ;;  %5836 = vmatmul.msk.f32.gmra.mxu2 %vm1978_vm6, %v9835_v36  ;;  %v4649_v54 = vadd.f32 %v4648_v14, %v11230_v56 }
 0x565   : > { %v4977_v62 = vmul.f32 %v9894_v60, %v4943_v26 }
 0x566   : > { %v4651_v13 = vadd.f32 %v4650_v39, %v4649_v54  ;;  %v11235_v54 = vld [vmem:[#allocation100_spill] sm:$0xff] }
 0x567   : > { %v5009_v34 = vadd.f32 %v4977_v62, %v2714_v16  ;;  %v4324_v21 = vpop.f32.mrf.mxu2  ;;  %v10181_v62 = vpop.f32.mrf.mxu3 }
 0x568   : > { %v4603_v28 = vsel %vm1978_vm6, %v4324_v21, 0.0 }
 0x569   : > { %vm5041_vm12 = vcmp.gt.f32.partialorder %v5009_v34, 0.0  ;;  %v5073_v36 = vmul.f32 0.2, %v5009_v34  ;;  %v4604_v2 = vadd.f32 %v4603_v28, %v4602_v15  ;;  %v4665_v15 = vsel %vm1978_vm6, %v10098_v51, 0.0  ;;  %v11231_v28 = vld [vmem:[#allocation50_spill] sm:$0xff] }
 0x56a   : > { %v4666_v50 = vadd.f32 %v4665_v15, %v11232_v19  ;;  %v4653_v51 = vadd.f32 %v4652_v9, %v4651_v13  ;;  %v11237_v9 = vld [vmem:[#allocation56_spill] sm:$0xff] }
 0x56b   : > { %v5105_v61 = vsel %vm5041_vm12, %v5009_v34, %v5073_v36  ;;  %v4944_v25 = vadd.f32 %v9884_v40, %v4604_v2  ;;  %v2723_v36 = vadd.f32 %v9890_v33, %v11231_v28  ;;  %v10203_v10 = vpop.f32.mrf.mxu1  ;;  %v2732_v19 = vadd.f32 %v9890_v33, %v11237_v9 }
 0x56c   : > { %5137 = vst.msk [vmem:[%s9915_s21 + $0x58] sm:$0xff] %vm1978_vm6, %v5105_v61  ;;  %5837 = vmatmul.msk.f32.gmra.mxu2 %vm1978_vm6, %v9855_v44  ;;  %v10198_v61 = vpop.f32.mrf.mxu0 }
 0x56d   : > { %v4978_v55 = vmul.f32 %v9894_v60, %v4944_v25 }
 0x56f   : > { %v5010_v44 = vadd.f32 %v4978_v55, %v2717_v22  ;;  %v4327_v23 = vpop.f32.mrf.mxu2  ;;  %v4667_v55 = vsel %vm1978_vm6, %v10114_v7, 0.0  ;;  %v3997_v42 = vpop.f32.mrf.mxu3  ;;  %v4669_v7 = vsel %vm1978_vm6, %v10121_v47, 0.0 }
 0x570   : > { %v4620_v3 = vsel %vm1978_vm6, %v4327_v23, 0.0  ;;  %v4668_v45 = vadd.f32 %v4667_v55, %v4666_v50  ;;  %v4682_v23 = vsel %vm1978_vm6, %v10129_v20, 0.0 }
 0x571   : > { %vm5042_vm13 = vcmp.gt.f32.partialorder %v5010_v44, 0.0  ;;  %v5074_v30 = vmul.f32 0.2, %v5010_v44  ;;  %v4621_v48 = vadd.f32 %v4620_v3, %v4619_v31  ;;  %v11233_v31 = vld [vmem:[#allocation44_spill] sm:$0xff] }
 0x572   : > { %v2726_v3 = vadd.f32 %v9890_v33, %v11233_v31 }
 0x573   : > { %v5106_v6 = vsel %vm5042_vm13, %v5010_v44, %v5074_v30  ;;  %v4945_v4 = vadd.f32 %v9884_v40, %v4621_v48  ;;  %v11234_v48 = vld [vmem:[#allocation7_spill] sm:$0xff]  ;;  %v4231_v56 = vpop.f32.mrf.mxu1 }
 0x574   : > { %5138 = vst.msk [vmem:[%s9915_s21 + $0x60] sm:$0xff] %vm1978_vm6, %v5106_v6  ;;  %5838 = vmatmul.msk.f32.gmra.mxu2 %vm1978_vm6, %v3139_v32  ;;  %v4683_v32 = vadd.f32 %v4682_v23, %v11234_v48  ;;  %v4670_v6 = vadd.f32 %v4669_v7, %v4668_v45  ;;  %v10217_v14 = vpop.f32.mrf.mxu0 }
 0x575   : > { %v4979_v12 = vmul.f32 %v9894_v60, %v4945_v4 }
 0x577   : > { %v5011_v35 = vadd.f32 %v4979_v12, %v2720_v1  ;;  %v4330_v26 = vpop.f32.mrf.mxu2  ;;  %v4684_v1 = vsel %vm1978_vm6, %v10138_v41, 0.0  ;;  %v4686_v41 = vsel %vm1978_vm6, %v10154_v43, 0.0  ;;  %v4716_v43 = vsel %vm1978_vm6, %v10181_v62, 0.0 }
 0x578   : > { %v4637_v16 = vsel %vm1978_vm6, %v4330_v26, 0.0  ;;  %v4685_v12 = vadd.f32 %v4684_v1, %v4683_v32  ;;  %v4000_v26 = vpop.f32.mrf.mxu3 }
 0x579   : > { %vm5043_vm14 = vcmp.gt.f32.partialorder %v5011_v35, 0.0  ;;  %v5075_v0 = vmul.f32 0.2, %v5011_v35  ;;  %v4638_v59 = vadd.f32 %v4637_v16, %v4636_v24  ;;  %v11236_v16 = vld [vmem:[#allocation8_spill] sm:$0xff] }
 0x57a   : > { %v4687_v39 = vadd.f32 %v4686_v41, %v4685_v12 }
 0x57b   : > { %v5107_v34 = vsel %vm5043_vm14, %v5011_v35, %v5075_v0  ;;  %v4946_v21 = vadd.f32 %v9884_v40, %v4638_v59  ;;  %v2729_v35 = vadd.f32 %v9890_v33, %v11235_v54  ;;  %v4700_v0 = vadd.f32 %v4699_v46, %v11236_v16 }
 0x57c   : > { %5139 = vst.msk [vmem:[%s9915_s21 + $0x68] sm:$0xff] %vm1978_vm6, %v5107_v34  ;;  %5839 = vmatmul.msk.f32.gmra.mxu2 %vm1978_vm6, %v3141_v49  ;;  %v4117_v28 = vpop.f32.mrf.mxu0 }
 0x57d   : > { %v4980_v2 = vmul.f32 %v9894_v60, %v4946_v21  ;;  %v4701_v21 = vsel %vm1978_vm6, %v10171_v11, 0.0  ;;  %v4234_v11 = vpop.f32.mrf.mxu1 }
 0x57e   : > { %v4702_v15 = vadd.f32 %v4701_v21, %v4700_v0  ;;  %v4737_v0 = vsel %vm1978_vm6, %v4231_v56, 0.0 }
 0x57f   : > { %v5012_v25 = vadd.f32 %v4980_v2, %v2723_v36  ;;  %v4333_v5 = vpop.f32.mrf.mxu2 }
 0x580   : > { %v4654_v52 = vsel %vm1978_vm6, %v4333_v5, 0.0  ;;  %v11238_v5 = vld [vmem:[#allocation5_spill] sm:$0xff] }
 0x581   : > { %vm5044_vm4 = vcmp.gt.f32.partialorder %v5012_v25, 0.0  ;;  %v5076_v22 = vmul.f32 0.2, %v5012_v25  ;;  %v4655_v57 = vadd.f32 %v4654_v52, %v4653_v51  ;;  %v4717_v51 = vadd.f32 %v4716_v43, %v11238_v5  ;;  %v4003_v52 = vpop.f32.mrf.mxu3 }
 0x583   : > { %v5108_v17 = vsel %vm5044_vm4, %v5012_v25, %v5076_v22  ;;  %v4947_v44 = vadd.f32 %v9884_v40, %v4655_v57  ;;  %v4703_v25 = vsel %vm1978_vm6, %v10178_v53, 0.0 }
 0x584   : > { %5140 = vst.msk [vmem:[%s9915_s21 + $0x70] sm:$0xff] %vm1978_vm6, %v5108_v17  ;;  %v4704_v55 = vadd.f32 %v4703_v25, %v4702_v15  ;;  %v4120_v48 = vpop.f32.mrf.mxu0  ;;  %v4752_v15 = vsel %vm1978_vm6, %v4117_v28, 0.0 }
 0x585   : > { %v4981_v30 = vmul.f32 %v9894_v60, %v4947_v44  ;;  %v4718_v44 = vsel %vm1978_vm6, %v10198_v61, 0.0 }
 0x586   : > { %v4719_v23 = vadd.f32 %v4718_v44, %v4717_v51  ;;  %v4754_v51 = vsel %vm1978_vm6, %v4234_v11, 0.0 }
 0x587   : > { %v5013_v29 = vadd.f32 %v4981_v30, %v2726_v3  ;;  %v4336_v38 = vpop.f32.mrf.mxu2  ;;  %v4733_v3 = vsel %vm1978_vm6, %v3997_v42, 0.0  ;;  %v11239_v30 = vld [vmem:[#allocation103_spill] sm:$0xff] }
 0x588   : > { %v4671_v4 = vsel %vm1978_vm6, %v4336_v38, 0.0  ;;  %v2735_v7 = vadd.f32 %v9890_v33, %v11239_v30  ;;  %v11240_v38 = vld [vmem:[#allocation91_spill] sm:$0xff] }
 0x589   : > { %vm5045_vm3 = vcmp.gt.f32.partialorder %v5013_v29, 0.0  ;;  %v5077_v20 = vmul.f32 0.2, %v5013_v29  ;;  %v4672_v37 = vadd.f32 %v4671_v4, %v4670_v6  ;;  %v4734_v61 = vadd.f32 %v4733_v3, %v11240_v38  ;;  %v4006_v1 = vpop.f32.mrf.mxu3 }
 0x58a   : > { %v4784_v11 = vsel %vm1978_vm6, %v4006_v1, 0.0 }
 0x58b   : > { %v5109_v58 = vsel %vm5045_vm3, %v5013_v29, %v5077_v20  ;;  %v4948_v47 = vadd.f32 %v9884_v40, %v4672_v37  ;;  %v4720_v29 = vsel %vm1978_vm6, %v10203_v10, 0.0  ;;  %v4237_v37 = vpop.f32.mrf.mxu1 }
 0x58c   : > { %5141 = vst.msk [vmem:[%s9915_s21 + $0x78] sm:$0xff] %vm1978_vm6, %v5109_v58  ;;  %v4721_v20 = vadd.f32 %v4720_v29, %v4719_v23  ;;  %v4769_v23 = vsel %vm1978_vm6, %v4120_v48, 0.0 }
 0x58d   : > { %v4982_v24 = vmul.f32 %v9894_v60, %v4948_v47  ;;  %v4735_v47 = vsel %vm1978_vm6, %v10217_v14, 0.0 }
 0x58e   : > { %v4736_v46 = vadd.f32 %v4735_v47, %v4734_v61  ;;  %v4771_v61 = vsel %vm1978_vm6, %v4237_v37, 0.0  ;;  %v11247_v37 = vld [vmem:[#allocation74_spill] sm:$0xff] }
 0x58f   : > { %v5014_v59 = vadd.f32 %v4982_v24, %v2729_v35  ;;  %v4339_v49 = vpop.f32.mrf.mxu2  ;;  %v4750_v35 = vsel %vm1978_vm6, %v4000_v26, 0.0  ;;  %v11241_v24 = vld [vmem:[#allocation106_spill] sm:$0xff] }
 0x590   : > { %v4688_v63 = vsel %vm1978_vm6, %v4339_v49, 0.0  ;;  %v2738_v41 = vadd.f32 %v9890_v33, %v11241_v24 }
 0x591   : > { %vm5046_vm15 = vcmp.gt.f32.partialorder %v5014_v59, 0.0  ;;  %v5078_v13 = vmul.f32 0.2, %v5014_v59  ;;  %v4689_v34 = vadd.f32 %v4688_v63, %v4687_v39  ;;  %v4123_v39 = vpop.f32.mrf.mxu0  ;;  %v4009_v43 = vpop.f32.mrf.mxu3 }
 0x592   : > { %v4786_v47 = vsel %vm1978_vm6, %v4123_v39, 0.0  ;;  %v4801_v24 = vsel %vm1978_vm6, %v4009_v43, 0.0 }
 0x593   : > { %v5110_v36 = vsel %vm5046_vm15, %v5014_v59, %v5078_v13  ;;  %v4949_v2 = vadd.f32 %v9884_v40, %v4689_v34  ;;  %v11242_v59 = vld [vmem:[#allocation6_spill] sm:$0xff]  ;;  %v4738_v13 = vadd.f32 %v4737_v0, %v4736_v46 }
 0x594   : > { %5142 = vst.msk [vmem:[%s9915_s21 + $0x80] sm:$0xff] %vm1978_vm6, %v5110_v36  ;;  %v4751_v49 = vadd.f32 %v4750_v35, %v11242_v59  ;;  %v4240_v36 = vpop.f32.mrf.mxu1 }
 0x595   : > { %v4983_v50 = vmul.f32 %v9894_v60, %v4949_v2  ;;  %v4788_v0 = vsel %vm1978_vm6, %v4240_v36, 0.0 }
 0x596   : > { %v4753_v2 = vadd.f32 %v4752_v15, %v4751_v49  ;;  %v11248_v49 = vld [vmem:[#allocation11_spill] sm:$0xff] }
 0x597   : > { %v5015_v22 = vadd.f32 %v4983_v50, %v2732_v19  ;;  %v4342_v57 = vpop.f32.mrf.mxu2  ;;  %v4767_v19 = vsel %vm1978_vm6, %v4003_v52, 0.0  ;;  %v11243_v50 = vld [vmem:[#allocation61_spill] sm:$0xff]  ;;  %v4802_v39 = vadd.f32 %v4801_v24, %v11248_v49  ;;  %v11254_v49 = vld [vmem:[#allocation32_spill] sm:$0xff] }
 0x598   : > { %v4705_v62 = vsel %vm1978_vm6, %v4342_v57, 0.0  ;;  %v2741_v25 = vadd.f32 %v9890_v33, %v11243_v50 }
 0x599   : > { %vm5047_vm0 = vcmp.gt.f32.partialorder %v5015_v22, 0.0  ;;  %v5079_v45 = vmul.f32 0.2, %v5015_v22  ;;  %v4706_v17 = vadd.f32 %v4705_v62, %v4704_v55  ;;  %v4755_v62 = vadd.f32 %v4754_v51, %v4753_v2  ;;  %v4012_v29 = vpop.f32.mrf.mxu3 }
 0x59a   : > { %v4818_v36 = vsel %vm1978_vm6, %v4012_v29, 0.0 }
 0x59b   : > { %v5111_v31 = vsel %vm5047_vm0, %v5015_v22, %v5079_v45  ;;  %v4950_v53 = vadd.f32 %v9884_v40, %v4706_v17  ;;  %v11244_v22 = vld [vmem:[#allocation14_spill] sm:$0xff]  ;;  %v4126_v17 = vpop.f32.mrf.mxu0 }
 0x59c   : > { %5143 = vst.msk [vmem:[%s9915_s21 + $0x88] sm:$0xff] %vm1978_vm6, %v5111_v31  ;;  %v4768_v28 = vadd.f32 %v4767_v19, %v11244_v22  ;;  %v4243_v30 = vpop.f32.mrf.mxu1  ;;  %v4803_v2 = vsel %vm1978_vm6, %v4126_v17, 0.0  ;;  %v11249_v19 = vld [vmem:[#allocation81_spill] sm:$0xff]  ;;  %v11250_v22 = vld [vmem:[#allocation15_spill] sm:$0xff] }
 0x59d   : > { %v4984_v32 = vmul.f32 %v9894_v60, %v4950_v53  ;;  %v4804_v43 = vadd.f32 %v4803_v2, %v4802_v39  ;;  %v2750_v50 = vadd.f32 %v9890_v33, %v11249_v19  ;;  %v4805_v51 = vsel %vm1978_vm6, %v4243_v30, 0.0  ;;  %v10351_v19 = vld [vmem:[%s10418_s6] ss:$0 sm:$0xff] }
 0x59e   : > { %v4770_v31 = vadd.f32 %v4769_v23, %v4768_v28  ;;  %v4819_v28 = vadd.f32 %v4818_v36, %v11250_v22 }
 0x59f   : > { %v5016_v6 = vadd.f32 %v4984_v32, %v2735_v7  ;;  %v4345_v4 = vpop.f32.mrf.mxu2  ;;  %v11245_v7 = vld [vmem:[#allocation68_spill] sm:$0xff] }
 0x5a0   : > { %v4722_v42 = vsel %vm1978_vm6, %v4345_v4, 0.0  ;;  %v2744_v32 = vadd.f32 %v9890_v33, %v11245_v7  ;;  %v11251_v7 = vld [vmem:[#allocation85_spill] sm:$0xff] }
 0x5a1   : > { %vm5048_vm2 = vcmp.gt.f32.partialorder %v5016_v6, 0.0  ;;  %v5080_v12 = vmul.f32 0.2, %v5016_v6  ;;  %v4723_v58 = vadd.f32 %v4722_v42, %v4721_v20  ;;  %v4772_v42 = vadd.f32 %v4771_v61, %v4770_v31 }
 0x5a3   : > { %v5112_v54 = vsel %vm5048_vm2, %v5016_v6, %v5080_v12  ;;  %v4951_v10 = vadd.f32 %v9884_v40, %v4723_v58  ;;  %v11246_v6 = vld [vmem:[#allocation92_spill] sm:$0xff] }
 0x5a4   : > { %5144 = vst.msk [vmem:[%s9915_s21 + $0x90] sm:$0xff] %vm1978_vm6, %v5112_v54  ;;  %v4785_v48 = vadd.f32 %v4784_v11, %v11246_v6  ;;  %v4129_v54 = vpop.f32.mrf.mxu0  ;;  %v4246_v59 = vpop.f32.mrf.mxu1  ;;  %v11252_v6 = vld [vmem:[#allocation22_spill] sm:$0xff] }
 0x5a5   : > { %v4985_v16 = vmul.f32 %v9894_v60, %v4951_v10  ;;  %v4820_v31 = vsel %vm1978_vm6, %v4129_v54, 0.0 }
 0x5a6   : > { %v4787_v46 = vadd.f32 %v4786_v47, %v4785_v48 }
 0x5a7   : > { %v5017_v14 = vadd.f32 %v4985_v16, %v2738_v41  ;;  %v4348_v63 = vpop.f32.mrf.mxu2  ;;  %v2747_v41 = vadd.f32 %v9890_v33, %v11247_v37 }
 0x5a8   : > { %v4739_v34 = vsel %vm1978_vm6, %v4348_v63, 0.0 }
 0x5a9   : > { %vm5049_vm5 = vcmp.gt.f32.partialorder %v5017_v14, 0.0  ;;  %v5081_v26 = vmul.f32 0.2, %v5017_v14  ;;  %v4740_v21 = vadd.f32 %v4739_v34, %v4738_v13  ;;  %v4789_v34 = vadd.f32 %v4788_v0, %v4787_v46 }
 0x5ab   : > { %v5113_v9 = vsel %vm5049_vm5, %v5017_v14, %v5081_v26  ;;  %v4952_v56 = vadd.f32 %v9884_v40, %v4740_v21  ;;  %v4015_v14 = vpop.f32.mrf.mxu3 }
 0x5ac   : > { %5145 = vst.msk [vmem:[%s9915_s21 + $0x98] sm:$0xff] %vm1978_vm6, %v5113_v9  ;;  %v4835_v30 = vsel %vm1978_vm6, %v4015_v14, 0.0 }
 0x5ad   : > { %v4986_v5 = vmul.f32 %v9894_v60, %v4952_v56  ;;  %v4836_v48 = vadd.f32 %v4835_v30, %v11252_v6 }
 0x5af   : > { %v5018_v57 = vadd.f32 %v4986_v5, %v2741_v25  ;;  %v4351_v55 = vpop.f32.mrf.mxu2  ;;  %v4132_v25 = vpop.f32.mrf.mxu0 }
 0x5b0   : > { %v4756_v45 = vsel %vm1978_vm6, %v4351_v55, 0.0  ;;  %v4837_v47 = vsel %vm1978_vm6, %v4132_v25, 0.0 }
 0x5b1   : > { %vm5050_vm8 = vcmp.gt.f32.partialorder %v5018_v57, 0.0  ;;  %v5082_v52 = vmul.f32 0.2, %v5018_v57  ;;  %v4757_v44 = vadd.f32 %v4756_v45, %v4755_v62  ;;  %v4806_v62 = vadd.f32 %v4805_v51, %v4804_v43  ;;  %v4249_v45 = vpop.f32.mrf.mxu1  ;;  %v10342_v43 = vld [vmem:[%s10416_s4] ss:$0 sm:$0xff] }
 0x5b2   : > { %v4838_v54 = vadd.f32 %v4837_v47, %v4836_v48 }
 0x5b3   : > { %v5114_v53 = vsel %vm5050_vm8, %v5018_v57, %v5082_v52  ;;  %v4953_v3 = vadd.f32 %v9884_v40, %v4757_v44  ;;  %v4018_v52 = vpop.f32.mrf.mxu3 }
 0x5b4   : > { %5146 = vst.msk [vmem:[%s9915_s21 + $0xa0] sm:$0xff] %vm1978_vm6, %v5114_v53  ;;  %v4821_v53 = vadd.f32 %v4820_v31, %v4819_v28  ;;  %v4852_v37 = vsel %vm1978_vm6, %v4018_v52, 0.0  ;;  %v11256_v28 = vld [vmem:[#allocation94_spill] sm:$0xff] }
 0x5b5   : > { %v4987_v38 = vmul.f32 %v9894_v60, %v4953_v3  ;;  %v4853_v39 = vadd.f32 %v4852_v37, %v11254_v49 }
 0x5b7   : > { %v5019_v4 = vadd.f32 %v4987_v38, %v2744_v32  ;;  %v4354_v20 = vpop.f32.mrf.mxu2  ;;  %v2753_v32 = vadd.f32 %v9890_v33, %v11251_v7  ;;  %v4822_v38 = vsel %vm1978_vm6, %v4246_v59, 0.0  ;;  %v4135_v61 = vpop.f32.mrf.mxu0  ;;  %v4839_v59 = vsel %vm1978_vm6, %v4249_v45, 0.0  ;;  %v11257_v7 = vld [vmem:[#allocation51_spill] sm:$0xff] }
 0x5b8   : > { %v4773_v12 = vsel %vm1978_vm6, %v4354_v20, 0.0 }
 0x5b9   : > { %vm5051_vm7 = vcmp.gt.f32.partialorder %v5019_v4, 0.0  ;;  %v5083_v1 = vmul.f32 0.2, %v5019_v4  ;;  %v4774_v58 = vadd.f32 %v4773_v12, %v4772_v42  ;;  %v4823_v42 = vadd.f32 %v4822_v38, %v4821_v53  ;;  %v4252_v46 = vpop.f32.mrf.mxu1 }
 0x5ba   : > { %v4856_v22 = vsel %vm1978_vm6, %v4252_v46, 0.0 }
 0x5bb   : > { %v5115_v10 = vsel %vm5051_vm7, %v5019_v4, %v5083_v1  ;;  %v4954_v35 = vadd.f32 %v9884_v40, %v4774_v58 }
 0x5bc   : > { %5147 = vst.msk [vmem:[%s9915_s21 + $0xa8] sm:$0xff] %vm1978_vm6, %v5115_v10  ;;  %v4021_v10 = vpop.f32.mrf.mxu3 }
 0x5bd   : > { %v4988_v16 = vmul.f32 %v9894_v60, %v4954_v35  ;;  %v4869_v36 = vsel %vm1978_vm6, %v4021_v10, 0.0 }
 0x5bf   : > { %v5020_v63 = vadd.f32 %v4988_v16, %v2747_v41  ;;  %v4357_v13 = vpop.f32.mrf.mxu2  ;;  %v11253_v41 = vld [vmem:[#allocation17_spill] sm:$0xff] }
 0x5c0   : > { %v4790_v26 = vsel %vm1978_vm6, %v4357_v13, 0.0  ;;  %v2756_v16 = vadd.f32 %v9890_v33, %v11253_v41  ;;  %v4840_v13 = vadd.f32 %v4839_v59, %v4838_v54 }
 0x5c1   : > { %vm5052_vm9 = vcmp.gt.f32.partialorder %v5020_v63, 0.0  ;;  %v5084_v21 = vmul.f32 0.2, %v5020_v63  ;;  %v4791_v15 = vadd.f32 %v4790_v26, %v4789_v34 }
 0x5c3   : > { %v5116_v9 = vsel %vm5052_vm9, %v5020_v63, %v5084_v21  ;;  %v4955_v56 = vadd.f32 %v9884_v40, %v4791_v15  ;;  %v4854_v15 = vsel %vm1978_vm6, %v4135_v61, 0.0 }
 0x5c4   : > { %5148 = vst.msk [vmem:[%s9915_s21 + $0xb0] sm:$0xff] %vm1978_vm6, %v5116_v9  ;;  %v4855_v2 = vadd.f32 %v4854_v15, %v4853_v39 }
 0x5c5   : > { %v4989_v5 = vmul.f32 %v9894_v60, %v4955_v56  ;;  %v4255_v56 = vpop.f32.mrf.mxu1 }
 0x5c6   : > { %v4857_v45 = vadd.f32 %v4856_v22, %v4855_v2  ;;  %v4873_v38 = vsel %vm1978_vm6, %v4255_v56, 0.0 }
 0x5c7   : > { %v5021_v57 = vadd.f32 %v4989_v5, %v2750_v50  ;;  %v4360_v55 = vpop.f32.mrf.mxu2  ;;  %v11255_v50 = vld [vmem:[#allocation59_spill] sm:$0xff]  ;;  %v4024_v5 = vpop.f32.mrf.mxu3 }
 0x5c8   : > { %v4807_v17 = vsel %vm1978_vm6, %v4360_v55, 0.0  ;;  %v2759_v25 = vadd.f32 %v10351_v19, %v11255_v50  ;;  %v4886_v30 = vsel %vm1978_vm6, %v4024_v5, 0.0 }
 0x5c9   : > { %vm5053_vm10 = vcmp.gt.f32.partialorder %v5021_v57, 0.0  ;;  %v5085_v44 = vmul.f32 0.2, %v5021_v57  ;;  %v4808_v23 = vadd.f32 %v4807_v17, %v4806_v62  ;;  %v4887_v6 = vadd.f32 %v4886_v30, %v9843_v18  ;;  %v11258_v18 = vld [vmem:[#allocation66_spill] sm:$0xff] }
 0x5ca   : > { %v2765_v37 = vadd.f32 %v10351_v19, %v11258_v18 }
 0x5cb   : > { %v5117_v3 = vsel %vm5053_vm10, %v5021_v57, %v5085_v44  ;;  %v4956_v11 = vadd.f32 %v9884_v40, %v4808_v23  ;;  %v4870_v57 = vadd.f32 %v4869_v36, %v11256_v28 }
 0x5cc   : > { %5149 = vst.msk [vmem:[%s9915_s21 + $0xb8] sm:$0xff] %vm1978_vm6, %v5117_v3 }
 0x5cd   : > { %v4990_v29 = vmul.f32 %v9894_v60, %v4956_v11  ;;  %v4258_v61 = vpop.f32.mrf.mxu1 }
 0x5cf   : > { %v5022_v4 = vadd.f32 %v4990_v29, %v2753_v32  ;;  %v4363_v20 = vpop.f32.mrf.mxu2  ;;  %v2762_v32 = vadd.f32 %v10351_v19, %v11257_v7  ;;  %v4027_v48 = vpop.f32.mrf.mxu3 }
 0x5d0   : > { %v4824_v12 = vsel %vm1978_vm6, %v4363_v20, 0.0 }
 0x5d1   : > { %vm5054_vm11 = vcmp.gt.f32.partialorder %v5022_v4, 0.0  ;;  %v5086_v1 = vmul.f32 0.2, %v5022_v4  ;;  %v4825_v58 = vadd.f32 %v4824_v12, %v4823_v42 }
 0x5d3   : > { %v5118_v35 = vsel %vm5054_vm11, %v5022_v4, %v5086_v1  ;;  %v4957_v24 = vadd.f32 %v9884_v40, %v4825_v58  ;;  %v4138_v40 = vpop.f32.mrf.mxu0 }
 0x5d4   : > { %5150 = vst.msk [vmem:[%s9915_s21 + $0xc0] sm:$0xff] %vm1978_vm6, %v5118_v35  ;;  %v4871_v23 = vsel %vm1978_vm6, %v4138_v40, 0.0 }
 0x5d5   : > { %v4991_v0 = vmul.f32 %v9894_v60, %v4957_v24  ;;  %v4872_v53 = vadd.f32 %v4871_v23, %v4870_v57  ;;  %v4903_v24 = vsel %vm1978_vm6, %v4027_v48, 0.0  ;;  %v4261_v59 = vpop.f32.mrf.mxu1 }
 0x5d7   : > { %v5023_v14 = vadd.f32 %v4991_v0, %v2756_v16  ;;  %v4366_v63 = vpop.f32.mrf.mxu2  ;;  %v4874_v42 = vadd.f32 %v4873_v38, %v4872_v53  ;;  %v4890_v16 = vsel %vm1978_vm6, %v4258_v61, 0.0  ;;  %v4904_v0 = vadd.f32 %v4903_v24, %v9862_v27 }
 0x5d8   : > { %v4841_v34 = vsel %vm1978_vm6, %v4366_v63, 0.0 }
 0x5d9   : > { %vm5055_vm1 = vcmp.gt.f32.partialorder %v5023_v14, 0.0  ;;  %v5087_v26 = vmul.f32 0.2, %v5023_v14  ;;  %v4842_v21 = vadd.f32 %v4841_v34, %v4840_v13  ;;  %v4030_v34 = vpop.f32.mrf.mxu3 }
 0x5da   : > { %v4920_v27 = vsel %vm1978_vm6, %v4030_v34, 0.0 }
 0x5db   : > { %v5119_v33 = vsel %vm5055_vm1, %v5023_v14, %v5087_v26  ;;  %v4958_v9 = vadd.f32 %v10342_v43, %v4842_v21  ;;  %v4141_v31 = vpop.f32.mrf.mxu0  ;;  %v4921_v5 = vadd.f32 %v4920_v27, %v9872_v8  ;;  %v11260_v8 = vld [vmem:[#allocation57_spill] sm:$0xff] }
 0x5dc   : > { %5151 = vst.msk [vmem:[%s9915_s21 + $0xc8] sm:$0xff] %vm1978_vm6, %v5119_v33  ;;  %v4888_v47 = vsel %vm1978_vm6, %v4141_v31, 0.0  ;;  %v4907_v33 = vsel %vm1978_vm6, %v4261_v59, 0.0  ;;  %v2771_v31 = vadd.f32 %v10351_v19, %v11260_v8 }
 0x5dd   : > { %v4992_v51 = vmul.f32 %v9894_v60, %v4958_v9  ;;  %v4889_v46 = vadd.f32 %v4888_v47, %v4887_v6  ;;  %v11259_v9 = vld [vmem:[#allocation77_spill] sm:$0xff]  ;;  %v11261_v6 = vld [vmem:[#allocation63_spill] sm:$0xff] }
 0x5de   : > { %v2768_v56 = vadd.f32 %v10351_v19, %v11259_v9  ;;  %v2774_v48 = vadd.f32 %v10351_v19, %v11261_v6 }
 0x5df   : > { %v5024_v55 = vadd.f32 %v4992_v51, %v2759_v25  ;;  %v4369_v62 = vpop.f32.mrf.mxu2  ;;  %v4891_v14 = vadd.f32 %v4890_v16, %v4889_v46 }
 0x5e0   : > { %v4858_v17 = vsel %vm1978_vm6, %v4369_v62, 0.0 }
 0x5e1   : > { %vm5056_vm12 = vcmp.gt.f32.partialorder %v5024_v55, 0.0  ;;  %v5088_v52 = vmul.f32 0.2, %v5024_v55  ;;  %v4859_v44 = vadd.f32 %v4858_v17, %v4857_v45 }
 0x5e3   : > { %v5120_v3 = vsel %vm5056_vm12, %v5024_v55, %v5088_v52  ;;  %v4959_v11 = vadd.f32 %v10342_v43, %v4859_v44  ;;  %v4144_v54 = vpop.f32.mrf.mxu0  ;;  %v4264_v55 = vpop.f32.mrf.mxu1 }
 0x5e4   : > { %5152 = vst.msk [vmem:[%s9915_s21 + $0xd0] sm:$0xff] %vm1978_vm6, %v5120_v3  ;;  %v4905_v63 = vsel %vm1978_vm6, %v4144_v54, 0.0  ;;  %v4924_v23 = vsel %vm1978_vm6, %v4264_v55, 0.0 }
 0x5e5   : > { %v4993_v29 = vmul.f32 %v9894_v60, %v4959_v11  ;;  %v4906_v21 = vadd.f32 %v4905_v63, %v4904_v0 }
 0x5e7   : > { %v5025_v4 = vadd.f32 %v4993_v29, %v2762_v32  ;;  %v4372_v20 = vpop.f32.mrf.mxu2  ;;  %v4908_v25 = vadd.f32 %v4907_v33, %v4906_v21 }
 0x5e8   : > { %v4875_v12 = vsel %vm1978_vm6, %v4372_v20, 0.0 }
 0x5e9   : > { %vm5057_vm13 = vcmp.gt.f32.partialorder %v5025_v4, 0.0  ;;  %v5089_v1 = vmul.f32 0.2, %v5025_v4  ;;  %v4876_v58 = vadd.f32 %v4875_v12, %v4874_v42 }
 0x5eb   : > { %v5121_v10 = vsel %vm5057_vm13, %v5025_v4, %v5089_v1  ;;  %v4960_v35 = vadd.f32 %v10342_v43, %v4876_v58  ;;  %v4147_v36 = vpop.f32.mrf.mxu0 }
 0x5ec   : > { %5153 = vst.msk [vmem:[%s9915_s21 + $0xd8] sm:$0xff] %vm1978_vm6, %v5121_v10  ;;  %v4922_v28 = vsel %vm1978_vm6, %v4147_v36, 0.0 }
 0x5ed   : > { %v4994_v41 = vmul.f32 %v9894_v60, %v4960_v35  ;;  %v4923_v17 = vadd.f32 %v4922_v28, %v4921_v5 }
 0x5ef   : > { %v5026_v49 = vadd.f32 %v4994_v41, %v2765_v37  ;;  %v4375_v39 = vpop.f32.mrf.mxu2  ;;  %v4925_v3 = vadd.f32 %v4924_v23, %v4923_v17 }
 0x5f0   : > { %v4892_v13 = vsel %vm1978_vm6, %v4375_v39, 0.0 }
 0x5f1   : > { %vm5058_vm14 = vcmp.gt.f32.partialorder %v5026_v49, 0.0  ;;  %v5090_v40 = vmul.f32 0.2, %v5026_v49  ;;  %v4893_v26 = vadd.f32 %v4892_v13, %v4891_v14 }
 0x5f3   : > { %v5122_v15 = vsel %vm5058_vm14, %v5026_v49, %v5090_v40  ;;  %v4961_v2 = vadd.f32 %v10342_v43, %v4893_v26 }
 0x5f4   : > { %5154 = vst.msk [vmem:[%s9915_s21 + $0xe0] sm:$0xff] %vm1978_vm6, %v5122_v15 }
 0x5f5   : > { %v4995_v50 = vmul.f32 %v9894_v60, %v4961_v2 }
 0x5f7   : > { %v5027_v51 = vadd.f32 %v4995_v50, %v2768_v56  ;;  %v4378_v22 = vpop.f32.mrf.mxu2 }
 0x5f8   : > { %v4909_v57 = vsel %vm1978_vm6, %v4378_v22, 0.0 }
 0x5f9   : > { %vm5059_vm4 = vcmp.gt.f32.partialorder %v5027_v51, 0.0  ;;  %v5091_v62 = vmul.f32 0.2, %v5027_v51  ;;  %v4910_v45 = vadd.f32 %v4909_v57, %v4908_v25 }
 0x5fb   : > { %v5123_v52 = vsel %vm5059_vm4, %v5027_v51, %v5091_v62  ;;  %v4962_v44 = vadd.f32 %v10342_v43, %v4910_v45 }
 0x5fc   : > { %5155 = vst.msk [vmem:[%s9915_s21 + $0xe8] sm:$0xff] %vm1978_vm6, %v5123_v52 }
 0x5fd   : > { %v4996_v53 = vmul.f32 %v9894_v60, %v4962_v44 }
 0x5ff   : > { %v5028_v11 = vadd.f32 %v4996_v53, %v2771_v31  ;;  %v4381_v30 = vpop.f32.mrf.mxu2 }
 0x600   : > { %v4926_v7 = vsel %vm1978_vm6, %v4381_v30, 0.0 }
 0x601   : > { %vm5060_vm3 = vcmp.gt.f32.partialorder %v5028_v11, 0.0  ;;  %v5092_v32 = vmul.f32 0.2, %v5028_v11  ;;  %v4927_v29 = vadd.f32 %v4926_v7, %v4925_v3 }
 0x603   : > { %v5124_v38 = vsel %vm5060_vm3, %v5028_v11, %v5092_v32  ;;  %v4963_v61 = vadd.f32 %v10342_v43, %v4927_v29 }
 0x604   : > { %5156 = vst.msk [vmem:[%s9915_s21 + $0xf0] sm:$0xff] %vm1978_vm6, %v5124_v38 }
 0x605   : > { %v4997_v4 = vmul.f32 %v9894_v60, %v4963_v61 }
 0x607   : > { %v5029_v20 = vadd.f32 %v4997_v4, %v2774_v48 }
 0x609   : > { %vm5061_vm15 = vcmp.gt.f32.partialorder %v5029_v20, 0.0  ;;  %v5093_v42 = vmul.f32 0.2, %v5029_v20 }
 0x60b   : > { %v5125_v12 = vsel %vm5061_vm15, %v5029_v20, %v5093_v42 }
 0x60c   : > { %5157 = vst.msk [vmem:[%s9915_s21 + $0xf8] sm:$0xff] %vm1978_vm6, %v5125_v12 }
 0x60d PF: > { %s19_s29 = sadd.s32 1, %s5904_s29  }
 0x60e   : > { %p16_p4 = scmp.ge.s32.totalorder %s19_s29, 4  }
 0x610   :  { %18 = sbr.rel (!%p16_p4) target bundleno = 2 (0x2), region = 86 }

</bundles_post_ra>
